<compile_context>
chip_gen: v7x
topology: tpu7x:2x2x1
jax: 0.10.0
libtpu: 0.0.40
codegen_flags: <defaults>
</compile_context>

<pallas_src>
import jax
import jax.numpy as jnp
from jax.experimental import pallas as pl
from jax.experimental.pallas import tpu as pltpu

_K = 4        # conv kernel size
_EPS = 1e-5   # BatchNorm eps


# ----------------------------------------------------------------------------
# in-kernel helpers
# ----------------------------------------------------------------------------
def _zero_border(p_ref):
    """Zero only the 1-pixel spatial border of a padded staging buffer."""
    Bp, Hp, Wp, C = p_ref.shape
    zr = jnp.zeros((Bp, 1, Wp, C), p_ref.dtype)
    p_ref[:, 0:1, :, :] = zr
    p_ref[:, Hp - 1:Hp, :, :] = zr
    zc = jnp.zeros((Bp, Hp, 1, C), p_ref.dtype)
    p_ref[:, :, 0:1, :] = zc
    p_ref[:, :, Wp - 1:Wp, :] = zc


def _bn_scale_shift(s1, s2, count, g_ref, bt_ref):
    """Fold train-mode BatchNorm into one per-channel scale/shift."""
    inv_n = 1.0 / float(count)
    mu = s1 * inv_n
    var = jnp.maximum(s2 * inv_n - mu * mu, 0.0)          # biased batch variance
    scale = g_ref[...] * jax.lax.rsqrt(var + _EPS)
    shift = bt_ref[...] - mu * scale
    return scale, shift


def _enc_layer(xp_ref, w_ref, g_ref, bt_ref, out_ref):
    """Conv2d(k=4, s=2, p=1) + BN + ReLU.

    xp_ref : (B, H+2, W+2, Cin) zero-padded input.
    out_ref: (B, H/2+2, W/2+2, Cout) padded staging buffer for the next layer;
             only the interior is written (border was zeroed once).
    """
    B, Hp, Wp, Cin = xp_ref.shape
    Ho, Wo = (Hp - 2) // 2, (Wp - 2) // 2
    n = B * Ho * Wo
    Cout = w_ref.shape[-1]

    # im2col: 16 stride-2 tap loads merged lane-dense with one concatenate.
    taps = [xp_ref[:, pl.ds(kh, Ho, stride=2), pl.ds(kw, Wo, stride=2), :]
            for kh in range(_K) for kw in range(_K)]
    patches = jnp.concatenate(taps, axis=-1)              # (B, Ho, Wo, 16*Cin)
    patches = patches.reshape(n, _K * _K * Cin).astype(jnp.bfloat16)
    y = jnp.dot(patches, w_ref[...], preferred_element_type=jnp.float32)

    # one sweep for BN statistics, then a single fused scale/shift + ReLU
    s1 = jnp.sum(y, axis=0, keepdims=True)
    s2 = jnp.sum(y * y, axis=0, keepdims=True)
    scale, shift = _bn_scale_shift(s1, s2, n, g_ref, bt_ref)
    a = jnp.maximum(y * scale + shift, 0.0)

    out_ref[:, 1:Ho + 1, 1:Wo + 1, :] = (
        a.reshape(B, Ho, Wo, Cout).astype(out_ref.dtype))


def _dec_layer(xp_ref, w_ref, g_ref, bt_ref, out_ref, *, last):
    """ConvTranspose2d(k=4, s=2, p=1) + BN + (ReLU | Sigmoid).

    Sub-pixel / output-phase decomposition: output phase (ph, pw) is a 2x2
    stride-1 conv over the 1-padded (un-dilated) input; phase results are
    interleaved into the output with stride-2 stores.
    """
    B, Hp, Wp, Cin = xp_ref.shape
    H, W = Hp - 2, Wp - 2
    n = B * H * W
    Cout = w_ref.shape[-1]

    ys = []
    s1 = jnp.zeros((1, Cout), jnp.float32)
    s2 = jnp.zeros((1, Cout), jnp.float32)
    for ph in range(2):
        for pw in range(2):
            taps = [xp_ref[:, ph + dh:ph + dh + H, pw + dw:pw + dw + W, :]
                    for dh in range(2) for dw in range(2)]
            patches = jnp.concatenate(taps, axis=-1)       # (B, H, W, 4*Cin)
            patches = patches.reshape(n, 4 * Cin).astype(jnp.bfloat16)
            y = jnp.dot(patches, w_ref[2 * ph + pw],
                        preferred_element_type=jnp.float32)
            s1 = s1 + jnp.sum(y, axis=0, keepdims=True)
            s2 = s2 + jnp.sum(y * y, axis=0, keepdims=True)
            ys.append(y)

    # BN statistics over all 4 phases (= the whole output feature map)
    scale, shift = _bn_scale_shift(s1, s2, 4 * n, g_ref, bt_ref)

    off = 0 if last else 1            # o_ref is unpadded; staging bufs are padded
    for idx, (ph, pw) in enumerate(((0, 0), (0, 1), (1, 0), (1, 1))):
        a = ys[idx] * scale + shift
        if last:
            a = 1.0 / (1.0 + jnp.exp(-a))                 # sigmoid (exp -> EUP)
        else:
            a = jnp.maximum(a, 0.0)                        # ReLU
        a = a.reshape(B, H, W, Cout).astype(out_ref.dtype)
        out_ref[:, pl.ds(off + ph, H, stride=2),
                   pl.ds(off + pw, W, stride=2), :] = a


# ----------------------------------------------------------------------------
# fused kernel
# ----------------------------------------------------------------------------
def _conv_ae_kernel(x_ref,
                    w1, g1, t1, w2, g2, t2, w3, g3, t3,
                    w4, g4, t4, w5, g5, t5, w6, g6, t6,
                    o_ref, pa, pb, pc):
    # zero the borders of the 3 reusable padded staging buffers once
    _zero_border(pa)
    _zero_border(pb)
    _zero_border(pc)

    # encoder
    _enc_layer(x_ref, w1, g1, t1, pa)     # (H,W,3)      -> (H/2,W/2,12)
    _enc_layer(pa,    w2, g2, t2, pb)     # (H/2,W/2,12) -> (H/4,W/4,24)
    _enc_layer(pb,    w3, g3, t3, pc)     # (H/4,W/4,24) -> (H/8,W/8,48)

    # decoder (buffers pb, pa are dead by now and are reused as targets)
    _dec_layer(pc, w4, g4, t4, pb, last=False)   # -> (H/4,W/4,24)
    _dec_layer(pb, w5, g5, t5, pa, last=False)   # -> (H/2,W/2,12)
    _dec_layer(pa, w6, g6, t6, o_ref, last=True)  # -> (H,W,3)


# ----------------------------------------------------------------------------
# wrapper
# ----------------------------------------------------------------------------
def _tile_bytes(shape, itemsize):
    """Approximate Mosaic VMEM footprint (sublane->8, lane->128 padding)."""
    lead = 1
    for d in shape[:-2]:
        lead *= d
    sub = ((shape[-2] + 7) // 8) * 8
    lane = ((shape[-1] + 127) // 128) * 128
    return lead * sub * lane * itemsize


def _vmem_budget_bytes(B, H, W):
    static = (_tile_bytes((B, H + 2, W + 2, 3), 4) +            # padded input
              _tile_bytes((B, H, W, 3), 4) +                    # output
              _tile_bytes((B, H // 2 + 2, W // 2 + 2, 12), 4) +
              _tile_bytes((B, H // 4 + 2, W // 4 + 2, 24), 4) +
              _tile_bytes((B, H // 8 + 2, W // 8 + 2, 48), 4))
    # headroom for transient im2col patch values of the largest layer
    transient = 4 * _tile_bytes((B * (H // 2) * (W // 2), 16 * 3), 2)
    budget = static + transient + (16 << 20)
    # cap below v5e/v6e physical (128 MiB); on v7x (64 MiB) large shapes should
    # additionally be row-banded — see TODO(synk) in the kernel header.
    return int(min(max(budget, 32 << 20), 96 << 20))


def conv_ae_forward(x_nchw, params):
    """Forward pass of Conv_AE.  x_nchw: (B, 3, H, W); H, W multiples of 8."""
    B, C, H, W = x_nchw.shape
    assert C == 3 and H % 8 == 0 and W % 8 == 0
    x = jnp.transpose(x_nchw, (0, 2, 3, 1)).astype(jnp.float32)   # NCHW -> NHWC
    xp = jnp.pad(x, ((0, 0), (1, 1), (1, 1), (0, 0)))             # layer-1 padding

    scratch = [
        pltpu.VMEM((B, H // 2 + 2, W // 2 + 2, 12), jnp.float32),  # enc1 out / dec3 in
        pltpu.VMEM((B, H // 4 + 2, W // 4 + 2, 24), jnp.float32),  # enc2 out / dec2 in
        pltpu.VMEM((B, H // 8 + 2, W // 8 + 2, 48), jnp.float32),  # enc3 out / dec1 in
    ]

    flat = []
    for i in range(1, 7):
        flat += [params[f"w{i}"], params[f"g{i}"], params[f"beta{i}"]]
        # params[f"b{i}"] (conv bias) is not applied: it cancels under
        # train-mode BatchNorm mean subtraction.

    out_nhwc = pl.pallas_call(
        _conv_ae_kernel,
        out_shape=jax.ShapeDtypeStruct((B, H, W, 3), jnp.float32),
        scratch_shapes=scratch,
        compiler_params=pltpu.CompilerParams(
            vmem_limit_bytes=_vmem_budget_bytes(B, H, W)),
    )(xp, *flat)
    return jnp.transpose(out_nhwc, (0, 3, 1, 2))                   # NHWC -> NCHW


# ----------------------------------------------------------------------------
# parameter packing (PyTorch layout -> kernel layout)
# ----------------------------------------------------------------------------
def _pack_conv_w(w_pt):
    """(Cout, Cin, 4, 4) PyTorch Conv2d weight -> (16*Cin, Cout) bf16."""
    co, ci, kh, kw = w_pt.shape
    return jnp.transpose(w_pt, (2, 3, 1, 0)).reshape(kh * kw * ci, co).astype(
        jnp.bfloat16)


def _pack_deconv_w(w_pt):
    """(Cin, Cout, 4, 4) PyTorch ConvTranspose2d weight -> (4, 4*Cin, Cout) bf16,
    one 2x2 sub-kernel per output phase (ph, pw)."""
    mats = []
    for ph in range(2):
        for pw in range(2):
            taps = [w_pt[:, :, 3 - ph - 2 * dh, 3 - pw - 2 * dw]
                    for dh in range(2) for dw in range(2)]   # each (Cin, Cout)
            mats.append(jnp.concatenate(taps, axis=0))       # (4*Cin, Cout)
    return jnp.stack(mats, axis=0).astype(jnp.bfloat16)


def init_params(key):
    """Deterministic params generated in PyTorch layout, packed for the kernel."""
    enc_io = [(3, 12), (12, 24), (24, 48)]
    dec_io = [(48, 24), (24, 12), (12, 3)]
    params = {}
    keys = jax.random.split(key, 12)
    ki = 0
    for li, (cin, cout) in enumerate(enc_io, start=1):
        bound = 1.0 / float(cin * _K * _K) ** 0.5
        w_pt = jax.random.uniform(keys[ki], (cout, cin, _K, _K),
                                  jnp.float32, -bound, bound); ki += 1
        params[f"w{li}"] = _pack_conv_w(w_pt)
        params[f"b{li}"] = jax.random.uniform(keys[ki], (cout,),
                                              jnp.float32, -bound, bound); ki += 1
        params[f"g{li}"] = jnp.ones((1, cout), jnp.float32)      # BN weight
        params[f"beta{li}"] = jnp.zeros((1, cout), jnp.float32)  # BN bias
    for lj, (cin, cout) in enumerate(dec_io, start=4):
        bound = 1.0 / float(cout * _K * _K) ** 0.5
        w_pt = jax.random.uniform(keys[ki], (cin, cout, _K, _K),
                                  jnp.float32, -bound, bound); ki += 1
        params[f"w{lj}"] = _pack_deconv_w(w_pt)
        params[f"b{lj}"] = jax.random.uniform(keys[ki], (cout,),
                                              jnp.float32, -bound, bound); ki += 1
        params[f"g{lj}"] = jnp.ones((1, cout), jnp.float32)
        params[f"beta{lj}"] = jnp.zeros((1, cout), jnp.float32)
    return params


if __name__ == "__main__":
    key = jax.random.PRNGKey(0)
    k_params, k_x = jax.random.split(key)

    B, H, W = 2, 16, 16
    params = init_params(k_params)
    x = jax.random.normal(k_x, (B, 3, H, W), jnp.float32)

    y = jax.jit(conv_ae_forward)(x, params)
    y = jax.block_until_ready(y)

    assert y.shape == (B, 3, H, W)
    assert bool(jnp.all(jnp.isfinite(y)))
    assert bool(jnp.all((y >= 0.0) & (y <= 1.0)))   # sigmoid output range
    print("KERNEL_OK")
</pallas_src>

<mosaic_0001>
module attributes {stable_mosaic.version = 11 : i64} {
  func.func @_conv_ae_kernel(%arg0: memref<2x18x18x3xf32, #tpu.memory_space<vmem>>, %arg1: memref<48x12xbf16, #tpu.memory_space<vmem>>, %arg2: memref<1x12xf32, #tpu.memory_space<vmem>>, %arg3: memref<1x12xf32, #tpu.memory_space<vmem>>, %arg4: memref<192x24xbf16, #tpu.memory_space<vmem>>, %arg5: memref<1x24xf32, #tpu.memory_space<vmem>>, %arg6: memref<1x24xf32, #tpu.memory_space<vmem>>, %arg7: memref<384x48xbf16, #tpu.memory_space<vmem>>, %arg8: memref<1x48xf32, #tpu.memory_space<vmem>>, %arg9: memref<1x48xf32, #tpu.memory_space<vmem>>, %arg10: memref<4x192x24xbf16, #tpu.memory_space<vmem>>, %arg11: memref<1x24xf32, #tpu.memory_space<vmem>>, %arg12: memref<1x24xf32, #tpu.memory_space<vmem>>, %arg13: memref<4x96x12xbf16, #tpu.memory_space<vmem>>, %arg14: memref<1x12xf32, #tpu.memory_space<vmem>>, %arg15: memref<1x12xf32, #tpu.memory_space<vmem>>, %arg16: memref<4x48x3xbf16, #tpu.memory_space<vmem>>, %arg17: memref<1x3xf32, #tpu.memory_space<vmem>>, %arg18: memref<1x3xf32, #tpu.memory_space<vmem>>, %arg19: memref<2x16x16x3xf32, #tpu.memory_space<vmem>>, %arg20: memref<2x10x10x12xf32, #tpu.memory_space<vmem>>, %arg21: memref<2x6x6x24xf32, #tpu.memory_space<vmem>>, %arg22: memref<2x4x4x48xf32, #tpu.memory_space<vmem>>) attributes {dimension_semantics = [], scalar_prefetch = 0 : i64, scratch_operands = 3 : i64, tpu.core_type = #tpu.core_type<tc>} {
    %cst = arith.constant 0.000000e+00 : f32
    %0 = vector.broadcast %cst : f32 to vector<2x1x10x12xf32>
    %c0 = arith.constant 0 : index
    %c0_0 = arith.constant 0 : index
    %c0_1 = arith.constant 0 : index
    %c0_2 = arith.constant 0 : index
    %1 = vector.load %arg20[%c0, %c0_0, %c0_1, %c0_2] : memref<2x10x10x12xf32, #tpu.memory_space<vmem>>, vector<2x1x10x12xf32>
    tpu.vector_store %arg20[%c0, %c0_0, %c0_1, %c0_2], %0 {strides = array<i32>} : memref<2x10x10x12xf32, #tpu.memory_space<vmem>>, vector<2x1x10x12xf32>,
    %c0_3 = arith.constant 0 : index
    %c9 = arith.constant 9 : index
    %c0_4 = arith.constant 0 : index
    %c0_5 = arith.constant 0 : index
    %2 = vector.load %arg20[%c0_3, %c9, %c0_4, %c0_5] : memref<2x10x10x12xf32, #tpu.memory_space<vmem>>, vector<2x1x10x12xf32>
    tpu.vector_store %arg20[%c0_3, %c9, %c0_4, %c0_5], %0 {strides = array<i32>} : memref<2x10x10x12xf32, #tpu.memory_space<vmem>>, vector<2x1x10x12xf32>,
    %cst_6 = arith.constant 0.000000e+00 : f32
    %3 = vector.broadcast %cst_6 : f32 to vector<2x10x1x12xf32>
    %c0_7 = arith.constant 0 : index
    %c0_8 = arith.constant 0 : index
    %c0_9 = arith.constant 0 : index
    %c0_10 = arith.constant 0 : index
    %4 = vector.load %arg20[%c0_7, %c0_8, %c0_9, %c0_10] : memref<2x10x10x12xf32, #tpu.memory_space<vmem>>, vector<2x10x1x12xf32>
    tpu.vector_store %arg20[%c0_7, %c0_8, %c0_9, %c0_10], %3 {strides = array<i32>} : memref<2x10x10x12xf32, #tpu.memory_space<vmem>>, vector<2x10x1x12xf32>,
    %c0_11 = arith.constant 0 : index
    %c0_12 = arith.constant 0 : index
    %c9_13 = arith.constant 9 : index
    %c0_14 = arith.constant 0 : index
    %5 = vector.load %arg20[%c0_11, %c0_12, %c9_13, %c0_14] : memref<2x10x10x12xf32, #tpu.memory_space<vmem>>, vector<2x10x1x12xf32>
    tpu.vector_store %arg20[%c0_11, %c0_12, %c9_13, %c0_14], %3 {strides = array<i32>} : memref<2x10x10x12xf32, #tpu.memory_space<vmem>>, vector<2x10x1x12xf32>,
    %cst_15 = arith.constant 0.000000e+00 : f32
    %6 = vector.broadcast %cst_15 : f32 to vector<2x1x6x24xf32>
    %c0_16 = arith.constant 0 : index
    %c0_17 = arith.constant 0 : index
    %c0_18 = arith.constant 0 : index
    %c0_19 = arith.constant 0 : index
    %7 = vector.load %arg21[%c0_16, %c0_17, %c0_18, %c0_19] : memref<2x6x6x24xf32, #tpu.memory_space<vmem>>, vector<2x1x6x24xf32>
    tpu.vector_store %arg21[%c0_16, %c0_17, %c0_18, %c0_19], %6 {strides = array<i32>} : memref<2x6x6x24xf32, #tpu.memory_space<vmem>>, vector<2x1x6x24xf32>,
    %c0_20 = arith.constant 0 : index
    %c5 = arith.constant 5 : index
    %c0_21 = arith.constant 0 : index
    %c0_22 = arith.constant 0 : index
    %8 = vector.load %arg21[%c0_20, %c5, %c0_21, %c0_22] : memref<2x6x6x24xf32, #tpu.memory_space<vmem>>, vector<2x1x6x24xf32>
    tpu.vector_store %arg21[%c0_20, %c5, %c0_21, %c0_22], %6 {strides = array<i32>} : memref<2x6x6x24xf32, #tpu.memory_space<vmem>>, vector<2x1x6x24xf32>,
    %cst_23 = arith.constant 0.000000e+00 : f32
    %9 = vector.broadcast %cst_23 : f32 to vector<2x6x1x24xf32>
    %c0_24 = arith.constant 0 : index
    %c0_25 = arith.constant 0 : index
    %c0_26 = arith.constant 0 : index
    %c0_27 = arith.constant 0 : index
    %10 = vector.load %arg21[%c0_24, %c0_25, %c0_26, %c0_27] : memref<2x6x6x24xf32, #tpu.memory_space<vmem>>, vector<2x6x1x24xf32>
    tpu.vector_store %arg21[%c0_24, %c0_25, %c0_26, %c0_27], %9 {strides = array<i32>} : memref<2x6x6x24xf32, #tpu.memory_space<vmem>>, vector<2x6x1x24xf32>,
    %c0_28 = arith.constant 0 : index
    %c0_29 = arith.constant 0 : index
    %c5_30 = arith.constant 5 : index
    %c0_31 = arith.constant 0 : index
    %11 = vector.load %arg21[%c0_28, %c0_29, %c5_30, %c0_31] : memref<2x6x6x24xf32, #tpu.memory_space<vmem>>, vector<2x6x1x24xf32>
    tpu.vector_store %arg21[%c0_28, %c0_29, %c5_30, %c0_31], %9 {strides = array<i32>} : memref<2x6x6x24xf32, #tpu.memory_space<vmem>>, vector<2x6x1x24xf32>,
    %cst_32 = arith.constant 0.000000e+00 : f32
    %12 = vector.broadcast %cst_32 : f32 to vector<2x1x4x48xf32>
    %c0_33 = arith.constant 0 : index
    %c0_34 = arith.constant 0 : index
    %c0_35 = arith.constant 0 : index
    %c0_36 = arith.constant 0 : index
    %13 = vector.load %arg22[%c0_33, %c0_34, %c0_35, %c0_36] : memref<2x4x4x48xf32, #tpu.memory_space<vmem>>, vector<2x1x4x48xf32>
    tpu.vector_store %arg22[%c0_33, %c0_34, %c0_35, %c0_36], %12 {strides = array<i32>} : memref<2x4x4x48xf32, #tpu.memory_space<vmem>>, vector<2x1x4x48xf32>,
    %c0_37 = arith.constant 0 : index
    %c3 = arith.constant 3 : index
    %c0_38 = arith.constant 0 : index
    %c0_39 = arith.constant 0 : index
    %14 = vector.load %arg22[%c0_37, %c3, %c0_38, %c0_39] : memref<2x4x4x48xf32, #tpu.memory_space<vmem>>, vector<2x1x4x48xf32>
    tpu.vector_store %arg22[%c0_37, %c3, %c0_38, %c0_39], %12 {strides = array<i32>} : memref<2x4x4x48xf32, #tpu.memory_space<vmem>>, vector<2x1x4x48xf32>,
    %cst_40 = arith.constant 0.000000e+00 : f32
    %15 = vector.broadcast %cst_40 : f32 to vector<2x4x1x48xf32>
    %c0_41 = arith.constant 0 : index
    %c0_42 = arith.constant 0 : index
    %c0_43 = arith.constant 0 : index
    %c0_44 = arith.constant 0 : index
    %16 = vector.load %arg22[%c0_41, %c0_42, %c0_43, %c0_44] : memref<2x4x4x48xf32, #tpu.memory_space<vmem>>, vector<2x4x1x48xf32>
    tpu.vector_store %arg22[%c0_41, %c0_42, %c0_43, %c0_44], %15 {strides = array<i32>} : memref<2x4x4x48xf32, #tpu.memory_space<vmem>>, vector<2x4x1x48xf32>,
    %c0_45 = arith.constant 0 : index
    %c0_46 = arith.constant 0 : index
    %c3_47 = arith.constant 3 : index
    %c0_48 = arith.constant 0 : index
    %17 = vector.load %arg22[%c0_45, %c0_46, %c3_47, %c0_48] : memref<2x4x4x48xf32, #tpu.memory_space<vmem>>, vector<2x4x1x48xf32>
    tpu.vector_store %arg22[%c0_45, %c0_46, %c3_47, %c0_48], %15 {strides = array<i32>} : memref<2x4x4x48xf32, #tpu.memory_space<vmem>>, vector<2x4x1x48xf32>,
    %c0_49 = arith.constant 0 : index
    %c0_50 = arith.constant 0 : index
    %c0_51 = arith.constant 0 : index
    %c0_52 = arith.constant 0 : index
    %18 = tpu.strided_load %arg0[%c0_49, %c0_50, %c0_51, %c0_52] {strides = array<i32: 1, 2, 2, 1>} : memref<2x18x18x3xf32, #tpu.memory_space<vmem>>, vector<2x8x8x3xf32>
    %c0_53 = arith.constant 0 : index
    %c0_54 = arith.constant 0 : index
    %c1 = arith.constant 1 : index
    %c0_55 = arith.constant 0 : index
    %19 = tpu.strided_load %arg0[%c0_53, %c0_54, %c1, %c0_55] {strides = array<i32: 1, 2, 2, 1>} : memref<2x18x18x3xf32, #tpu.memory_space<vmem>>, vector<2x8x8x3xf32>
    %c0_56 = arith.constant 0 : index
    %c0_57 = arith.constant 0 : index
    %c2 = arith.constant 2 : index
    %c0_58 = arith.constant 0 : index
    %20 = tpu.strided_load %arg0[%c0_56, %c0_57, %c2, %c0_58] {strides = array<i32: 1, 2, 2, 1>} : memref<2x18x18x3xf32, #tpu.memory_space<vmem>>, vector<2x8x8x3xf32>
    %c0_59 = arith.constant 0 : index
    %c0_60 = arith.constant 0 : index
    %c3_61 = arith.constant 3 : index
    %c0_62 = arith.constant 0 : index
    %21 = tpu.strided_load %arg0[%c0_59, %c0_60, %c3_61, %c0_62] {strides = array<i32: 1, 2, 2, 1>} : memref<2x18x18x3xf32, #tpu.memory_space<vmem>>, vector<2x8x8x3xf32>
    %c0_63 = arith.constant 0 : index
    %c1_64 = arith.constant 1 : index
    %c0_65 = arith.constant 0 : index
    %c0_66 = arith.constant 0 : index
    %22 = tpu.strided_load %arg0[%c0_63, %c1_64, %c0_65, %c0_66] {strides = array<i32: 1, 2, 2, 1>} : memref<2x18x18x3xf32, #tpu.memory_space<vmem>>, vector<2x8x8x3xf32>
    %c0_67 = arith.constant 0 : index
    %c1_68 = arith.constant 1 : index
    %c1_69 = arith.constant 1 : index
    %c0_70 = arith.constant 0 : index
    %23 = tpu.strided_load %arg0[%c0_67, %c1_68, %c1_69, %c0_70] {strides = array<i32: 1, 2, 2, 1>} : memref<2x18x18x3xf32, #tpu.memory_space<vmem>>, vector<2x8x8x3xf32>
    %c0_71 = arith.constant 0 : index
    %c1_72 = arith.constant 1 : index
    %c2_73 = arith.constant 2 : index
    %c0_74 = arith.constant 0 : index
    %24 = tpu.strided_load %arg0[%c0_71, %c1_72, %c2_73, %c0_74] {strides = array<i32: 1, 2, 2, 1>} : memref<2x18x18x3xf32, #tpu.memory_space<vmem>>, vector<2x8x8x3xf32>
    %c0_75 = arith.constant 0 : index
    %c1_76 = arith.constant 1 : index
    %c3_77 = arith.constant 3 : index
    %c0_78 = arith.constant 0 : index
    %25 = tpu.strided_load %arg0[%c0_75, %c1_76, %c3_77, %c0_78] {strides = array<i32: 1, 2, 2, 1>} : memref<2x18x18x3xf32, #tpu.memory_space<vmem>>, vector<2x8x8x3xf32>
    %c0_79 = arith.constant 0 : index
    %c2_80 = arith.constant 2 : index
    %c0_81 = arith.constant 0 : index
    %c0_82 = arith.constant 0 : index
    %26 = tpu.strided_load %arg0[%c0_79, %c2_80, %c0_81, %c0_82] {strides = array<i32: 1, 2, 2, 1>} : memref<2x18x18x3xf32, #tpu.memory_space<vmem>>, vector<2x8x8x3xf32>
    %c0_83 = arith.constant 0 : index
    %c2_84 = arith.constant 2 : index
    %c1_85 = arith.constant 1 : index
    %c0_86 = arith.constant 0 : index
    %27 = tpu.strided_load %arg0[%c0_83, %c2_84, %c1_85, %c0_86] {strides = array<i32: 1, 2, 2, 1>} : memref<2x18x18x3xf32, #tpu.memory_space<vmem>>, vector<2x8x8x3xf32>
    %c0_87 = arith.constant 0 : index
    %c2_88 = arith.constant 2 : index
    %c2_89 = arith.constant 2 : index
    %c0_90 = arith.constant 0 : index
    %28 = tpu.strided_load %arg0[%c0_87, %c2_88, %c2_89, %c0_90] {strides = array<i32: 1, 2, 2, 1>} : memref<2x18x18x3xf32, #tpu.memory_space<vmem>>, vector<2x8x8x3xf32>
    %c0_91 = arith.constant 0 : index
    %c2_92 = arith.constant 2 : index
    %c3_93 = arith.constant 3 : index
    %c0_94 = arith.constant 0 : index
    %29 = tpu.strided_load %arg0[%c0_91, %c2_92, %c3_93, %c0_94] {strides = array<i32: 1, 2, 2, 1>} : memref<2x18x18x3xf32, #tpu.memory_space<vmem>>, vector<2x8x8x3xf32>
    %c0_95 = arith.constant 0 : index
    %c3_96 = arith.constant 3 : index
    %c0_97 = arith.constant 0 : index
    %c0_98 = arith.constant 0 : index
    %30 = tpu.strided_load %arg0[%c0_95, %c3_96, %c0_97, %c0_98] {strides = array<i32: 1, 2, 2, 1>} : memref<2x18x18x3xf32, #tpu.memory_space<vmem>>, vector<2x8x8x3xf32>
    %c0_99 = arith.constant 0 : index
    %c3_100 = arith.constant 3 : index
    %c1_101 = arith.constant 1 : index
    %c0_102 = arith.constant 0 : index
    %31 = tpu.strided_load %arg0[%c0_99, %c3_100, %c1_101, %c0_102] {strides = array<i32: 1, 2, 2, 1>} : memref<2x18x18x3xf32, #tpu.memory_space<vmem>>, vector<2x8x8x3xf32>
    %c0_103 = arith.constant 0 : index
    %c3_104 = arith.constant 3 : index
    %c2_105 = arith.constant 2 : index
    %c0_106 = arith.constant 0 : index
    %32 = tpu.strided_load %arg0[%c0_103, %c3_104, %c2_105, %c0_106] {strides = array<i32: 1, 2, 2, 1>} : memref<2x18x18x3xf32, #tpu.memory_space<vmem>>, vector<2x8x8x3xf32>
    %c0_107 = arith.constant 0 : index
    %c3_108 = arith.constant 3 : index
    %c3_109 = arith.constant 3 : index
    %c0_110 = arith.constant 0 : index
    %33 = tpu.strided_load %arg0[%c0_107, %c3_108, %c3_109, %c0_110] {strides = array<i32: 1, 2, 2, 1>} : memref<2x18x18x3xf32, #tpu.memory_space<vmem>>, vector<2x8x8x3xf32>
    %34 = tpu.concatenate %18, %19, %20, %21, %22, %23, %24, %25, %26, %27, %28, %29, %30, %31, %32, %33 in 3 : vector<2x8x8x3xf32>, vector<2x8x8x3xf32>, vector<2x8x8x3xf32>, vector<2x8x8x3xf32>, vector<2x8x8x3xf32>, vector<2x8x8x3xf32>, vector<2x8x8x3xf32>, vector<2x8x8x3xf32>, vector<2x8x8x3xf32>, vector<2x8x8x3xf32>, vector<2x8x8x3xf32>, vector<2x8x8x3xf32>, vector<2x8x8x3xf32>, vector<2x8x8x3xf32>, vector<2x8x8x3xf32>, vector<2x8x8x3xf32> -> vector<2x8x8x48xf32>
    %35 = vector.shape_cast %34 : vector<2x8x8x48xf32> to vector<128x48xf32>
    %36 = arith.truncf %35 : vector<128x48xf32> to vector<128x48xbf16>
    %c0_111 = arith.constant 0 : index
    %c0_112 = arith.constant 0 : index
    %37 = vector.load %arg1[%c0_111, %c0_112] : memref<48x12xbf16, #tpu.memory_space<vmem>>, vector<48x12xbf16>
    %cst_113 = arith.constant dense<0.000000e+00> : vector<128x12xf32>
    %38 = tpu.matmul %36, %37, %cst_113 {dimension_numbers = #tpu.dot_dimension_numbers<[1], [0], [0], [1], [0, 0, 1, 1], [], []>} : vector<128x48xbf16>, vector<48x12xbf16>, vector<128x12xf32> -> vector<128x12xf32>
    %cst_114 = arith.constant dense<0.000000e+00> : vector<12xf32>
    %39 = vector.multi_reduction <add>, %38, %cst_114 [0] : vector<128x12xf32> to vector<12xf32>
    %40 = vector.shape_cast %39 : vector<12xf32> to vector<1x12xf32>
    %41 = arith.mulf %38, %38 : vector<128x12xf32>
    %cst_115 = arith.constant dense<0.000000e+00> : vector<12xf32>
    %42 = vector.multi_reduction <add>, %41, %cst_115 [0] : vector<128x12xf32> to vector<12xf32>
    %43 = vector.shape_cast %42 : vector<12xf32> to vector<1x12xf32>
    %cst_116 = arith.constant 7.812500e-03 : f32
    %44 = vector.broadcast %cst_116 : f32 to vector<1x12xf32>
    %45 = arith.mulf %40, %44 : vector<1x12xf32>
    %cst_117 = arith.constant 7.812500e-03 : f32
    %46 = vector.broadcast %cst_117 : f32 to vector<1x12xf32>
    %47 = arith.mulf %43, %46 : vector<1x12xf32>
    %48 = arith.mulf %45, %45 : vector<1x12xf32>
    %49 = arith.subf %47, %48 : vector<1x12xf32>
    %cst_118 = arith.constant 0.000000e+00 : f32
    %50 = vector.broadcast %cst_118 : f32 to vector<1x12xf32>
    %51 = arith.maximumf %49, %50 : vector<1x12xf32>
    %c0_119 = arith.constant 0 : index
    %c0_120 = arith.constant 0 : index
    %52 = vector.load %arg2[%c0_119, %c0_120] : memref<1x12xf32, #tpu.memory_space<vmem>>, vector<1x12xf32>
    %cst_121 = arith.constant 9.99999974E-6 : f32
    %53 = vector.broadcast %cst_121 : f32 to vector<1x12xf32>
    %54 = arith.addf %51, %53 : vector<1x12xf32>
    %55 = math.rsqrt %54 : vector<1x12xf32>
    %56 = arith.mulf %52, %55 : vector<1x12xf32>
    %c0_122 = arith.constant 0 : index
    %c0_123 = arith.constant 0 : index
    %57 = vector.load %arg3[%c0_122, %c0_123] : memref<1x12xf32, #tpu.memory_space<vmem>>, vector<1x12xf32>
    %58 = arith.mulf %45, %56 : vector<1x12xf32>
    %59 = arith.subf %57, %58 : vector<1x12xf32>
    %60 = vector.broadcast %56 : vector<1x12xf32> to vector<128x12xf32>
    %61 = arith.mulf %38, %60 : vector<128x12xf32>
    %62 = vector.broadcast %59 : vector<1x12xf32> to vector<128x12xf32>
    %63 = arith.addf %61, %62 : vector<128x12xf32>
    %cst_124 = arith.constant 0.000000e+00 : f32
    %64 = vector.broadcast %cst_124 : f32 to vector<128x12xf32>
    %65 = arith.maximumf %63, %64 : vector<128x12xf32>
    %66 = vector.shape_cast %65 : vector<128x12xf32> to vector<2x8x8x12xf32>
    %c0_125 = arith.constant 0 : index
    %c1_126 = arith.constant 1 : index
    %c1_127 = arith.constant 1 : index
    %c0_128 = arith.constant 0 : index
    %67 = vector.load %arg20[%c0_125, %c1_126, %c1_127, %c0_128] : memref<2x10x10x12xf32, #tpu.memory_space<vmem>>, vector<2x8x8x12xf32>
    tpu.vector_store %arg20[%c0_125, %c1_126, %c1_127, %c0_128], %66 {strides = array<i32>} : memref<2x10x10x12xf32, #tpu.memory_space<vmem>>, vector<2x8x8x12xf32>,
    %c0_129 = arith.constant 0 : index
    %c0_130 = arith.constant 0 : index
    %c0_131 = arith.constant 0 : index
    %c0_132 = arith.constant 0 : index
    %68 = tpu.strided_load %arg20[%c0_129, %c0_130, %c0_131, %c0_132] {strides = array<i32: 1, 2, 2, 1>} : memref<2x10x10x12xf32, #tpu.memory_space<vmem>>, vector<2x4x4x12xf32>
    %c0_133 = arith.constant 0 : index
    %c0_134 = arith.constant 0 : index
    %c1_135 = arith.constant 1 : index
    %c0_136 = arith.constant 0 : index
    %69 = tpu.strided_load %arg20[%c0_133, %c0_134, %c1_135, %c0_136] {strides = array<i32: 1, 2, 2, 1>} : memref<2x10x10x12xf32, #tpu.memory_space<vmem>>, vector<2x4x4x12xf32>
    %c0_137 = arith.constant 0 : index
    %c0_138 = arith.constant 0 : index
    %c2_139 = arith.constant 2 : index
    %c0_140 = arith.constant 0 : index
    %70 = tpu.strided_load %arg20[%c0_137, %c0_138, %c2_139, %c0_140] {strides = array<i32: 1, 2, 2, 1>} : memref<2x10x10x12xf32, #tpu.memory_space<vmem>>, vector<2x4x4x12xf32>
    %c0_141 = arith.constant 0 : index
    %c0_142 = arith.constant 0 : index
    %c3_143 = arith.constant 3 : index
    %c0_144 = arith.constant 0 : index
    %71 = tpu.strided_load %arg20[%c0_141, %c0_142, %c3_143, %c0_144] {strides = array<i32: 1, 2, 2, 1>} : memref<2x10x10x12xf32, #tpu.memory_space<vmem>>, vector<2x4x4x12xf32>
    %c0_145 = arith.constant 0 : index
    %c1_146 = arith.constant 1 : index
    %c0_147 = arith.constant 0 : index
    %c0_148 = arith.constant 0 : index
    %72 = tpu.strided_load %arg20[%c0_145, %c1_146, %c0_147, %c0_148] {strides = array<i32: 1, 2, 2, 1>} : memref<2x10x10x12xf32, #tpu.memory_space<vmem>>, vector<2x4x4x12xf32>
    %c0_149 = arith.constant 0 : index
    %c1_150 = arith.constant 1 : index
    %c1_151 = arith.constant 1 : index
    %c0_152 = arith.constant 0 : index
    %73 = tpu.strided_load %arg20[%c0_149, %c1_150, %c1_151, %c0_152] {strides = array<i32: 1, 2, 2, 1>} : memref<2x10x10x12xf32, #tpu.memory_space<vmem>>, vector<2x4x4x12xf32>
    %c0_153 = arith.constant 0 : index
    %c1_154 = arith.constant 1 : index
    %c2_155 = arith.constant 2 : index
    %c0_156 = arith.constant 0 : index
    %74 = tpu.strided_load %arg20[%c0_153, %c1_154, %c2_155, %c0_156] {strides = array<i32: 1, 2, 2, 1>} : memref<2x10x10x12xf32, #tpu.memory_space<vmem>>, vector<2x4x4x12xf32>
    %c0_157 = arith.constant 0 : index
    %c1_158 = arith.constant 1 : index
    %c3_159 = arith.constant 3 : index
    %c0_160 = arith.constant 0 : index
    %75 = tpu.strided_load %arg20[%c0_157, %c1_158, %c3_159, %c0_160] {strides = array<i32: 1, 2, 2, 1>} : memref<2x10x10x12xf32, #tpu.memory_space<vmem>>, vector<2x4x4x12xf32>
    %c0_161 = arith.constant 0 : index
    %c2_162 = arith.constant 2 : index
    %c0_163 = arith.constant 0 : index
    %c0_164 = arith.constant 0 : index
    %76 = tpu.strided_load %arg20[%c0_161, %c2_162, %c0_163, %c0_164] {strides = array<i32: 1, 2, 2, 1>} : memref<2x10x10x12xf32, #tpu.memory_space<vmem>>, vector<2x4x4x12xf32>
    %c0_165 = arith.constant 0 : index
    %c2_166 = arith.constant 2 : index
    %c1_167 = arith.constant 1 : index
    %c0_168 = arith.constant 0 : index
    %77 = tpu.strided_load %arg20[%c0_165, %c2_166, %c1_167, %c0_168] {strides = array<i32: 1, 2, 2, 1>} : memref<2x10x10x12xf32, #tpu.memory_space<vmem>>, vector<2x4x4x12xf32>
    %c0_169 = arith.constant 0 : index
    %c2_170 = arith.constant 2 : index
    %c2_171 = arith.constant 2 : index
    %c0_172 = arith.constant 0 : index
    %78 = tpu.strided_load %arg20[%c0_169, %c2_170, %c2_171, %c0_172] {strides = array<i32: 1, 2, 2, 1>} : memref<2x10x10x12xf32, #tpu.memory_space<vmem>>, vector<2x4x4x12xf32>
    %c0_173 = arith.constant 0 : index
    %c2_174 = arith.constant 2 : index
    %c3_175 = arith.constant 3 : index
    %c0_176 = arith.constant 0 : index
    %79 = tpu.strided_load %arg20[%c0_173, %c2_174, %c3_175, %c0_176] {strides = array<i32: 1, 2, 2, 1>} : memref<2x10x10x12xf32, #tpu.memory_space<vmem>>, vector<2x4x4x12xf32>
    %c0_177 = arith.constant 0 : index
    %c3_178 = arith.constant 3 : index
    %c0_179 = arith.constant 0 : index
    %c0_180 = arith.constant 0 : index
    %80 = tpu.strided_load %arg20[%c0_177, %c3_178, %c0_179, %c0_180] {strides = array<i32: 1, 2, 2, 1>} : memref<2x10x10x12xf32, #tpu.memory_space<vmem>>, vector<2x4x4x12xf32>
    %c0_181 = arith.constant 0 : index
    %c3_182 = arith.constant 3 : index
    %c1_183 = arith.constant 1 : index
    %c0_184 = arith.constant 0 : index
    %81 = tpu.strided_load %arg20[%c0_181, %c3_182, %c1_183, %c0_184] {strides = array<i32: 1, 2, 2, 1>} : memref<2x10x10x12xf32, #tpu.memory_space<vmem>>, vector<2x4x4x12xf32>
    %c0_185 = arith.constant 0 : index
    %c3_186 = arith.constant 3 : index
    %c2_187 = arith.constant 2 : index
    %c0_188 = arith.constant 0 : index
    %82 = tpu.strided_load %arg20[%c0_185, %c3_186, %c2_187, %c0_188] {strides = array<i32: 1, 2, 2, 1>} : memref<2x10x10x12xf32, #tpu.memory_space<vmem>>, vector<2x4x4x12xf32>
    %c0_189 = arith.constant 0 : index
    %c3_190 = arith.constant 3 : index
    %c3_191 = arith.constant 3 : index
    %c0_192 = arith.constant 0 : index
    %83 = tpu.strided_load %arg20[%c0_189, %c3_190, %c3_191, %c0_192] {strides = array<i32: 1, 2, 2, 1>} : memref<2x10x10x12xf32, #tpu.memory_space<vmem>>, vector<2x4x4x12xf32>
    %84 = tpu.concatenate %68, %69, %70, %71, %72, %73, %74, %75, %76, %77, %78, %79, %80, %81, %82, %83 in 3 : vector<2x4x4x12xf32>, vector<2x4x4x12xf32>, vector<2x4x4x12xf32>, vector<2x4x4x12xf32>, vector<2x4x4x12xf32>, vector<2x4x4x12xf32>, vector<2x4x4x12xf32>, vector<2x4x4x12xf32>, vector<2x4x4x12xf32>, vector<2x4x4x12xf32>, vector<2x4x4x12xf32>, vector<2x4x4x12xf32>, vector<2x4x4x12xf32>, vector<2x4x4x12xf32>, vector<2x4x4x12xf32>, vector<2x4x4x12xf32> -> vector<2x4x4x192xf32>
    %85 = vector.shape_cast %84 : vector<2x4x4x192xf32> to vector<32x192xf32>
    %86 = arith.truncf %85 : vector<32x192xf32> to vector<32x192xbf16>
    %c0_193 = arith.constant 0 : index
    %c0_194 = arith.constant 0 : index
    %87 = vector.load %arg4[%c0_193, %c0_194] : memref<192x24xbf16, #tpu.memory_space<vmem>>, vector<192x24xbf16>
    %cst_195 = arith.constant dense<0.000000e+00> : vector<32x24xf32>
    %88 = tpu.matmul %86, %87, %cst_195 {dimension_numbers = #tpu.dot_dimension_numbers<[1], [0], [0], [1], [0, 0, 1, 1], [], []>} : vector<32x192xbf16>, vector<192x24xbf16>, vector<32x24xf32> -> vector<32x24xf32>
    %cst_196 = arith.constant dense<0.000000e+00> : vector<24xf32>
    %89 = vector.multi_reduction <add>, %88, %cst_196 [0] : vector<32x24xf32> to vector<24xf32>
    %90 = vector.shape_cast %89 : vector<24xf32> to vector<1x24xf32>
    %91 = arith.mulf %88, %88 : vector<32x24xf32>
    %cst_197 = arith.constant dense<0.000000e+00> : vector<24xf32>
    %92 = vector.multi_reduction <add>, %91, %cst_197 [0] : vector<32x24xf32> to vector<24xf32>
    %93 = vector.shape_cast %92 : vector<24xf32> to vector<1x24xf32>
    %cst_198 = arith.constant 3.125000e-02 : f32
    %94 = vector.broadcast %cst_198 : f32 to vector<1x24xf32>
    %95 = arith.mulf %90, %94 : vector<1x24xf32>
    %cst_199 = arith.constant 3.125000e-02 : f32
    %96 = vector.broadcast %cst_199 : f32 to vector<1x24xf32>
    %97 = arith.mulf %93, %96 : vector<1x24xf32>
    %98 = arith.mulf %95, %95 : vector<1x24xf32>
    %99 = arith.subf %97, %98 : vector<1x24xf32>
    %cst_200 = arith.constant 0.000000e+00 : f32
    %100 = vector.broadcast %cst_200 : f32 to vector<1x24xf32>
    %101 = arith.maximumf %99, %100 : vector<1x24xf32>
    %c0_201 = arith.constant 0 : index
    %c0_202 = arith.constant 0 : index
    %102 = vector.load %arg5[%c0_201, %c0_202] : memref<1x24xf32, #tpu.memory_space<vmem>>, vector<1x24xf32>
    %cst_203 = arith.constant 9.99999974E-6 : f32
    %103 = vector.broadcast %cst_203 : f32 to vector<1x24xf32>
    %104 = arith.addf %101, %103 : vector<1x24xf32>
    %105 = math.rsqrt %104 : vector<1x24xf32>
    %106 = arith.mulf %102, %105 : vector<1x24xf32>
    %c0_204 = arith.constant 0 : index
    %c0_205 = arith.constant 0 : index
    %107 = vector.load %arg6[%c0_204, %c0_205] : memref<1x24xf32, #tpu.memory_space<vmem>>, vector<1x24xf32>
    %108 = arith.mulf %95, %106 : vector<1x24xf32>
    %109 = arith.subf %107, %108 : vector<1x24xf32>
    %110 = vector.broadcast %106 : vector<1x24xf32> to vector<32x24xf32>
    %111 = arith.mulf %88, %110 : vector<32x24xf32>
    %112 = vector.broadcast %109 : vector<1x24xf32> to vector<32x24xf32>
    %113 = arith.addf %111, %112 : vector<32x24xf32>
    %cst_206 = arith.constant 0.000000e+00 : f32
    %114 = vector.broadcast %cst_206 : f32 to vector<32x24xf32>
    %115 = arith.maximumf %113, %114 : vector<32x24xf32>
    %116 = vector.shape_cast %115 : vector<32x24xf32> to vector<2x4x4x24xf32>
    %c0_207 = arith.constant 0 : index
    %c1_208 = arith.constant 1 : index
    %c1_209 = arith.constant 1 : index
    %c0_210 = arith.constant 0 : index
    %117 = vector.load %arg21[%c0_207, %c1_208, %c1_209, %c0_210] : memref<2x6x6x24xf32, #tpu.memory_space<vmem>>, vector<2x4x4x24xf32>
    tpu.vector_store %arg21[%c0_207, %c1_208, %c1_209, %c0_210], %116 {strides = array<i32>} : memref<2x6x6x24xf32, #tpu.memory_space<vmem>>, vector<2x4x4x24xf32>,
    %c0_211 = arith.constant 0 : index
    %c0_212 = arith.constant 0 : index
    %c0_213 = arith.constant 0 : index
    %c0_214 = arith.constant 0 : index
    %118 = tpu.strided_load %arg21[%c0_211, %c0_212, %c0_213, %c0_214] {strides = array<i32: 1, 2, 2, 1>} : memref<2x6x6x24xf32, #tpu.memory_space<vmem>>, vector<2x2x2x24xf32>
    %c0_215 = arith.constant 0 : index
    %c0_216 = arith.constant 0 : index
    %c1_217 = arith.constant 1 : index
    %c0_218 = arith.constant 0 : index
    %119 = tpu.strided_load %arg21[%c0_215, %c0_216, %c1_217, %c0_218] {strides = array<i32: 1, 2, 2, 1>} : memref<2x6x6x24xf32, #tpu.memory_space<vmem>>, vector<2x2x2x24xf32>
    %c0_219 = arith.constant 0 : index
    %c0_220 = arith.constant 0 : index
    %c2_221 = arith.constant 2 : index
    %c0_222 = arith.constant 0 : index
    %120 = tpu.strided_load %arg21[%c0_219, %c0_220, %c2_221, %c0_222] {strides = array<i32: 1, 2, 2, 1>} : memref<2x6x6x24xf32, #tpu.memory_space<vmem>>, vector<2x2x2x24xf32>
    %c0_223 = arith.constant 0 : index
    %c0_224 = arith.constant 0 : index
    %c3_225 = arith.constant 3 : index
    %c0_226 = arith.constant 0 : index
    %121 = tpu.strided_load %arg21[%c0_223, %c0_224, %c3_225, %c0_226] {strides = array<i32: 1, 2, 2, 1>} : memref<2x6x6x24xf32, #tpu.memory_space<vmem>>, vector<2x2x2x24xf32>
    %c0_227 = arith.constant 0 : index
    %c1_228 = arith.constant 1 : index
    %c0_229 = arith.constant 0 : index
    %c0_230 = arith.constant 0 : index
    %122 = tpu.strided_load %arg21[%c0_227, %c1_228, %c0_229, %c0_230] {strides = array<i32: 1, 2, 2, 1>} : memref<2x6x6x24xf32, #tpu.memory_space<vmem>>, vector<2x2x2x24xf32>
    %c0_231 = arith.constant 0 : index
    %c1_232 = arith.constant 1 : index
    %c1_233 = arith.constant 1 : index
    %c0_234 = arith.constant 0 : index
    %123 = tpu.strided_load %arg21[%c0_231, %c1_232, %c1_233, %c0_234] {strides = array<i32: 1, 2, 2, 1>} : memref<2x6x6x24xf32, #tpu.memory_space<vmem>>, vector<2x2x2x24xf32>
    %c0_235 = arith.constant 0 : index
    %c1_236 = arith.constant 1 : index
    %c2_237 = arith.constant 2 : index
    %c0_238 = arith.constant 0 : index
    %124 = tpu.strided_load %arg21[%c0_235, %c1_236, %c2_237, %c0_238] {strides = array<i32: 1, 2, 2, 1>} : memref<2x6x6x24xf32, #tpu.memory_space<vmem>>, vector<2x2x2x24xf32>
    %c0_239 = arith.constant 0 : index
    %c1_240 = arith.constant 1 : index
    %c3_241 = arith.constant 3 : index
    %c0_242 = arith.constant 0 : index
    %125 = tpu.strided_load %arg21[%c0_239, %c1_240, %c3_241, %c0_242] {strides = array<i32: 1, 2, 2, 1>} : memref<2x6x6x24xf32, #tpu.memory_space<vmem>>, vector<2x2x2x24xf32>
    %c0_243 = arith.constant 0 : index
    %c2_244 = arith.constant 2 : index
    %c0_245 = arith.constant 0 : index
    %c0_246 = arith.constant 0 : index
    %126 = tpu.strided_load %arg21[%c0_243, %c2_244, %c0_245, %c0_246] {strides = array<i32: 1, 2, 2, 1>} : memref<2x6x6x24xf32, #tpu.memory_space<vmem>>, vector<2x2x2x24xf32>
    %c0_247 = arith.constant 0 : index
    %c2_248 = arith.constant 2 : index
    %c1_249 = arith.constant 1 : index
    %c0_250 = arith.constant 0 : index
    %127 = tpu.strided_load %arg21[%c0_247, %c2_248, %c1_249, %c0_250] {strides = array<i32: 1, 2, 2, 1>} : memref<2x6x6x24xf32, #tpu.memory_space<vmem>>, vector<2x2x2x24xf32>
    %c0_251 = arith.constant 0 : index
    %c2_252 = arith.constant 2 : index
    %c2_253 = arith.constant 2 : index
    %c0_254 = arith.constant 0 : index
    %128 = tpu.strided_load %arg21[%c0_251, %c2_252, %c2_253, %c0_254] {strides = array<i32: 1, 2, 2, 1>} : memref<2x6x6x24xf32, #tpu.memory_space<vmem>>, vector<2x2x2x24xf32>
    %c0_255 = arith.constant 0 : index
    %c2_256 = arith.constant 2 : index
    %c3_257 = arith.constant 3 : index
    %c0_258 = arith.constant 0 : index
    %129 = tpu.strided_load %arg21[%c0_255, %c2_256, %c3_257, %c0_258] {strides = array<i32: 1, 2, 2, 1>} : memref<2x6x6x24xf32, #tpu.memory_space<vmem>>, vector<2x2x2x24xf32>
    %c0_259 = arith.constant 0 : index
    %c3_260 = arith.constant 3 : index
    %c0_261 = arith.constant 0 : index
    %c0_262 = arith.constant 0 : index
    %130 = tpu.strided_load %arg21[%c0_259, %c3_260, %c0_261, %c0_262] {strides = array<i32: 1, 2, 2, 1>} : memref<2x6x6x24xf32, #tpu.memory_space<vmem>>, vector<2x2x2x24xf32>
    %c0_263 = arith.constant 0 : index
    %c3_264 = arith.constant 3 : index
    %c1_265 = arith.constant 1 : index
    %c0_266 = arith.constant 0 : index
    %131 = tpu.strided_load %arg21[%c0_263, %c3_264, %c1_265, %c0_266] {strides = array<i32: 1, 2, 2, 1>} : memref<2x6x6x24xf32, #tpu.memory_space<vmem>>, vector<2x2x2x24xf32>
    %c0_267 = arith.constant 0 : index
    %c3_268 = arith.constant 3 : index
    %c2_269 = arith.constant 2 : index
    %c0_270 = arith.constant 0 : index
    %132 = tpu.strided_load %arg21[%c0_267, %c3_268, %c2_269, %c0_270] {strides = array<i32: 1, 2, 2, 1>} : memref<2x6x6x24xf32, #tpu.memory_space<vmem>>, vector<2x2x2x24xf32>
    %c0_271 = arith.constant 0 : index
    %c3_272 = arith.constant 3 : index
    %c3_273 = arith.constant 3 : index
    %c0_274 = arith.constant 0 : index
    %133 = tpu.strided_load %arg21[%c0_271, %c3_272, %c3_273, %c0_274] {strides = array<i32: 1, 2, 2, 1>} : memref<2x6x6x24xf32, #tpu.memory_space<vmem>>, vector<2x2x2x24xf32>
    %134 = tpu.concatenate %118, %119, %120, %121, %122, %123, %124, %125, %126, %127, %128, %129, %130, %131, %132, %133 in 3 : vector<2x2x2x24xf32>, vector<2x2x2x24xf32>, vector<2x2x2x24xf32>, vector<2x2x2x24xf32>, vector<2x2x2x24xf32>, vector<2x2x2x24xf32>, vector<2x2x2x24xf32>, vector<2x2x2x24xf32>, vector<2x2x2x24xf32>, vector<2x2x2x24xf32>, vector<2x2x2x24xf32>, vector<2x2x2x24xf32>, vector<2x2x2x24xf32>, vector<2x2x2x24xf32>, vector<2x2x2x24xf32>, vector<2x2x2x24xf32> -> vector<2x2x2x384xf32>
    %135 = vector.shape_cast %134 : vector<2x2x2x384xf32> to vector<8x384xf32>
    %136 = arith.truncf %135 : vector<8x384xf32> to vector<8x384xbf16>
    %c0_275 = arith.constant 0 : index
    %c0_276 = arith.constant 0 : index
    %137 = vector.load %arg7[%c0_275, %c0_276] : memref<384x48xbf16, #tpu.memory_space<vmem>>, vector<384x48xbf16>
    %cst_277 = arith.constant dense<0.000000e+00> : vector<8x48xf32>
    %138 = tpu.matmul %136, %137, %cst_277 {dimension_numbers = #tpu.dot_dimension_numbers<[1], [0], [0], [1], [0, 0, 1, 1], [], []>} : vector<8x384xbf16>, vector<384x48xbf16>, vector<8x48xf32> -> vector<8x48xf32>
    %cst_278 = arith.constant dense<0.000000e+00> : vector<48xf32>
    %139 = vector.multi_reduction <add>, %138, %cst_278 [0] : vector<8x48xf32> to vector<48xf32>
    %140 = vector.shape_cast %139 : vector<48xf32> to vector<1x48xf32>
    %141 = arith.mulf %138, %138 : vector<8x48xf32>
    %cst_279 = arith.constant dense<0.000000e+00> : vector<48xf32>
    %142 = vector.multi_reduction <add>, %141, %cst_279 [0] : vector<8x48xf32> to vector<48xf32>
    %143 = vector.shape_cast %142 : vector<48xf32> to vector<1x48xf32>
    %cst_280 = arith.constant 1.250000e-01 : f32
    %144 = vector.broadcast %cst_280 : f32 to vector<1x48xf32>
    %145 = arith.mulf %140, %144 : vector<1x48xf32>
    %cst_281 = arith.constant 1.250000e-01 : f32
    %146 = vector.broadcast %cst_281 : f32 to vector<1x48xf32>
    %147 = arith.mulf %143, %146 : vector<1x48xf32>
    %148 = arith.mulf %145, %145 : vector<1x48xf32>
    %149 = arith.subf %147, %148 : vector<1x48xf32>
    %cst_282 = arith.constant 0.000000e+00 : f32
    %150 = vector.broadcast %cst_282 : f32 to vector<1x48xf32>
    %151 = arith.maximumf %149, %150 : vector<1x48xf32>
    %c0_283 = arith.constant 0 : index
    %c0_284 = arith.constant 0 : index
    %152 = vector.load %arg8[%c0_283, %c0_284] : memref<1x48xf32, #tpu.memory_space<vmem>>, vector<1x48xf32>
    %cst_285 = arith.constant 9.99999974E-6 : f32
    %153 = vector.broadcast %cst_285 : f32 to vector<1x48xf32>
    %154 = arith.addf %151, %153 : vector<1x48xf32>
    %155 = math.rsqrt %154 : vector<1x48xf32>
    %156 = arith.mulf %152, %155 : vector<1x48xf32>
    %c0_286 = arith.constant 0 : index
    %c0_287 = arith.constant 0 : index
    %157 = vector.load %arg9[%c0_286, %c0_287] : memref<1x48xf32, #tpu.memory_space<vmem>>, vector<1x48xf32>
    %158 = arith.mulf %145, %156 : vector<1x48xf32>
    %159 = arith.subf %157, %158 : vector<1x48xf32>
    %160 = vector.broadcast %156 : vector<1x48xf32> to vector<8x48xf32>
    %161 = arith.mulf %138, %160 : vector<8x48xf32>
    %162 = vector.broadcast %159 : vector<1x48xf32> to vector<8x48xf32>
    %163 = arith.addf %161, %162 : vector<8x48xf32>
    %cst_288 = arith.constant 0.000000e+00 : f32
    %164 = vector.broadcast %cst_288 : f32 to vector<8x48xf32>
    %165 = arith.maximumf %163, %164 : vector<8x48xf32>
    %166 = vector.shape_cast %165 : vector<8x48xf32> to vector<2x2x2x48xf32>
    %c0_289 = arith.constant 0 : index
    %c1_290 = arith.constant 1 : index
    %c1_291 = arith.constant 1 : index
    %c0_292 = arith.constant 0 : index
    %167 = vector.load %arg22[%c0_289, %c1_290, %c1_291, %c0_292] : memref<2x4x4x48xf32, #tpu.memory_space<vmem>>, vector<2x2x2x48xf32>
    tpu.vector_store %arg22[%c0_289, %c1_290, %c1_291, %c0_292], %166 {strides = array<i32>} : memref<2x4x4x48xf32, #tpu.memory_space<vmem>>, vector<2x2x2x48xf32>,
    %cst_293 = arith.constant 0.000000e+00 : f32
    %168 = vector.broadcast %cst_293 : f32 to vector<1x24xf32>
    %cst_294 = arith.constant 0.000000e+00 : f32
    %169 = vector.broadcast %cst_294 : f32 to vector<1x24xf32>
    %c0_295 = arith.constant 0 : index
    %c0_296 = arith.constant 0 : index
    %c0_297 = arith.constant 0 : index
    %c0_298 = arith.constant 0 : index
    %170 = vector.load %arg22[%c0_295, %c0_296, %c0_297, %c0_298] : memref<2x4x4x48xf32, #tpu.memory_space<vmem>>, vector<2x2x2x48xf32>
    %c0_299 = arith.constant 0 : index
    %c0_300 = arith.constant 0 : index
    %c1_301 = arith.constant 1 : index
    %c0_302 = arith.constant 0 : index
    %171 = vector.load %arg22[%c0_299, %c0_300, %c1_301, %c0_302] : memref<2x4x4x48xf32, #tpu.memory_space<vmem>>, vector<2x2x2x48xf32>
    %c0_303 = arith.constant 0 : index
    %c1_304 = arith.constant 1 : index
    %c0_305 = arith.constant 0 : index
    %c0_306 = arith.constant 0 : index
    %172 = vector.load %arg22[%c0_303, %c1_304, %c0_305, %c0_306] : memref<2x4x4x48xf32, #tpu.memory_space<vmem>>, vector<2x2x2x48xf32>
    %c0_307 = arith.constant 0 : index
    %c1_308 = arith.constant 1 : index
    %c1_309 = arith.constant 1 : index
    %c0_310 = arith.constant 0 : index
    %173 = vector.load %arg22[%c0_307, %c1_308, %c1_309, %c0_310] : memref<2x4x4x48xf32, #tpu.memory_space<vmem>>, vector<2x2x2x48xf32>
    %174 = tpu.concatenate %170, %171, %172, %173 in 3 : vector<2x2x2x48xf32>, vector<2x2x2x48xf32>, vector<2x2x2x48xf32>, vector<2x2x2x48xf32> -> vector<2x2x2x192xf32>
    %175 = vector.shape_cast %174 : vector<2x2x2x192xf32> to vector<8x192xf32>
    %176 = arith.truncf %175 : vector<8x192xf32> to vector<8x192xbf16>
    %c0_311 = arith.constant 0 : index
    %c0_312 = arith.constant 0 : index
    %c0_313 = arith.constant 0 : index
    %177 = vector.load %arg10[%c0_311, %c0_312, %c0_313] : memref<4x192x24xbf16, #tpu.memory_space<vmem>>, vector<1x192x24xbf16>
    %178 = vector.shape_cast %177 : vector<1x192x24xbf16> to vector<192x24xbf16>
    %cst_314 = arith.constant dense<0.000000e+00> : vector<8x24xf32>
    %179 = tpu.matmul %176, %178, %cst_314 {dimension_numbers = #tpu.dot_dimension_numbers<[1], [0], [0], [1], [0, 0, 1, 1], [], []>} : vector<8x192xbf16>, vector<192x24xbf16>, vector<8x24xf32> -> vector<8x24xf32>
    %cst_315 = arith.constant dense<0.000000e+00> : vector<24xf32>
    %180 = vector.multi_reduction <add>, %179, %cst_315 [0] : vector<8x24xf32> to vector<24xf32>
    %181 = vector.shape_cast %180 : vector<24xf32> to vector<1x24xf32>
    %182 = arith.addf %168, %181 : vector<1x24xf32>
    %183 = arith.mulf %179, %179 : vector<8x24xf32>
    %cst_316 = arith.constant dense<0.000000e+00> : vector<24xf32>
    %184 = vector.multi_reduction <add>, %183, %cst_316 [0] : vector<8x24xf32> to vector<24xf32>
    %185 = vector.shape_cast %184 : vector<24xf32> to vector<1x24xf32>
    %186 = arith.addf %169, %185 : vector<1x24xf32>
    %c0_317 = arith.constant 0 : index
    %c0_318 = arith.constant 0 : index
    %c1_319 = arith.constant 1 : index
    %c0_320 = arith.constant 0 : index
    %187 = vector.load %arg22[%c0_317, %c0_318, %c1_319, %c0_320] : memref<2x4x4x48xf32, #tpu.memory_space<vmem>>, vector<2x2x2x48xf32>
    %c0_321 = arith.constant 0 : index
    %c0_322 = arith.constant 0 : index
    %c2_323 = arith.constant 2 : index
    %c0_324 = arith.constant 0 : index
    %188 = vector.load %arg22[%c0_321, %c0_322, %c2_323, %c0_324] : memref<2x4x4x48xf32, #tpu.memory_space<vmem>>, vector<2x2x2x48xf32>
    %c0_325 = arith.constant 0 : index
    %c1_326 = arith.constant 1 : index
    %c1_327 = arith.constant 1 : index
    %c0_328 = arith.constant 0 : index
    %189 = vector.load %arg22[%c0_325, %c1_326, %c1_327, %c0_328] : memref<2x4x4x48xf32, #tpu.memory_space<vmem>>, vector<2x2x2x48xf32>
    %c0_329 = arith.constant 0 : index
    %c1_330 = arith.constant 1 : index
    %c2_331 = arith.constant 2 : index
    %c0_332 = arith.constant 0 : index
    %190 = vector.load %arg22[%c0_329, %c1_330, %c2_331, %c0_332] : memref<2x4x4x48xf32, #tpu.memory_space<vmem>>, vector<2x2x2x48xf32>
    %191 = tpu.concatenate %187, %188, %189, %190 in 3 : vector<2x2x2x48xf32>, vector<2x2x2x48xf32>, vector<2x2x2x48xf32>, vector<2x2x2x48xf32> -> vector<2x2x2x192xf32>
    %192 = vector.shape_cast %191 : vector<2x2x2x192xf32> to vector<8x192xf32>
    %193 = arith.truncf %192 : vector<8x192xf32> to vector<8x192xbf16>
    %c1_333 = arith.constant 1 : index
    %c0_334 = arith.constant 0 : index
    %c0_335 = arith.constant 0 : index
    %194 = vector.load %arg10[%c1_333, %c0_334, %c0_335] : memref<4x192x24xbf16, #tpu.memory_space<vmem>>, vector<1x192x24xbf16>
    %195 = vector.shape_cast %194 : vector<1x192x24xbf16> to vector<192x24xbf16>
    %cst_336 = arith.constant dense<0.000000e+00> : vector<8x24xf32>
    %196 = tpu.matmul %193, %195, %cst_336 {dimension_numbers = #tpu.dot_dimension_numbers<[1], [0], [0], [1], [0, 0, 1, 1], [], []>} : vector<8x192xbf16>, vector<192x24xbf16>, vector<8x24xf32> -> vector<8x24xf32>
    %cst_337 = arith.constant dense<0.000000e+00> : vector<24xf32>
    %197 = vector.multi_reduction <add>, %196, %cst_337 [0] : vector<8x24xf32> to vector<24xf32>
    %198 = vector.shape_cast %197 : vector<24xf32> to vector<1x24xf32>
    %199 = arith.addf %182, %198 : vector<1x24xf32>
    %200 = arith.mulf %196, %196 : vector<8x24xf32>
    %cst_338 = arith.constant dense<0.000000e+00> : vector<24xf32>
    %201 = vector.multi_reduction <add>, %200, %cst_338 [0] : vector<8x24xf32> to vector<24xf32>
    %202 = vector.shape_cast %201 : vector<24xf32> to vector<1x24xf32>
    %203 = arith.addf %186, %202 : vector<1x24xf32>
    %c0_339 = arith.constant 0 : index
    %c1_340 = arith.constant 1 : index
    %c0_341 = arith.constant 0 : index
    %c0_342 = arith.constant 0 : index
    %204 = vector.load %arg22[%c0_339, %c1_340, %c0_341, %c0_342] : memref<2x4x4x48xf32, #tpu.memory_space<vmem>>, vector<2x2x2x48xf32>
    %c0_343 = arith.constant 0 : index
    %c1_344 = arith.constant 1 : index
    %c1_345 = arith.constant 1 : index
    %c0_346 = arith.constant 0 : index
    %205 = vector.load %arg22[%c0_343, %c1_344, %c1_345, %c0_346] : memref<2x4x4x48xf32, #tpu.memory_space<vmem>>, vector<2x2x2x48xf32>
    %c0_347 = arith.constant 0 : index
    %c2_348 = arith.constant 2 : index
    %c0_349 = arith.constant 0 : index
    %c0_350 = arith.constant 0 : index
    %206 = vector.load %arg22[%c0_347, %c2_348, %c0_349, %c0_350] : memref<2x4x4x48xf32, #tpu.memory_space<vmem>>, vector<2x2x2x48xf32>
    %c0_351 = arith.constant 0 : index
    %c2_352 = arith.constant 2 : index
    %c1_353 = arith.constant 1 : index
    %c0_354 = arith.constant 0 : index
    %207 = vector.load %arg22[%c0_351, %c2_352, %c1_353, %c0_354] : memref<2x4x4x48xf32, #tpu.memory_space<vmem>>, vector<2x2x2x48xf32>
    %208 = tpu.concatenate %204, %205, %206, %207 in 3 : vector<2x2x2x48xf32>, vector<2x2x2x48xf32>, vector<2x2x2x48xf32>, vector<2x2x2x48xf32> -> vector<2x2x2x192xf32>
    %209 = vector.shape_cast %208 : vector<2x2x2x192xf32> to vector<8x192xf32>
    %210 = arith.truncf %209 : vector<8x192xf32> to vector<8x192xbf16>
    %c2_355 = arith.constant 2 : index
    %c0_356 = arith.constant 0 : index
    %c0_357 = arith.constant 0 : index
    %211 = vector.load %arg10[%c2_355, %c0_356, %c0_357] : memref<4x192x24xbf16, #tpu.memory_space<vmem>>, vector<1x192x24xbf16>
    %212 = vector.shape_cast %211 : vector<1x192x24xbf16> to vector<192x24xbf16>
    %cst_358 = arith.constant dense<0.000000e+00> : vector<8x24xf32>
    %213 = tpu.matmul %210, %212, %cst_358 {dimension_numbers = #tpu.dot_dimension_numbers<[1], [0], [0], [1], [0, 0, 1, 1], [], []>} : vector<8x192xbf16>, vector<192x24xbf16>, vector<8x24xf32> -> vector<8x24xf32>
    %cst_359 = arith.constant dense<0.000000e+00> : vector<24xf32>
    %214 = vector.multi_reduction <add>, %213, %cst_359 [0] : vector<8x24xf32> to vector<24xf32>
    %215 = vector.shape_cast %214 : vector<24xf32> to vector<1x24xf32>
    %216 = arith.addf %199, %215 : vector<1x24xf32>
    %217 = arith.mulf %213, %213 : vector<8x24xf32>
    %cst_360 = arith.constant dense<0.000000e+00> : vector<24xf32>
    %218 = vector.multi_reduction <add>, %217, %cst_360 [0] : vector<8x24xf32> to vector<24xf32>
    %219 = vector.shape_cast %218 : vector<24xf32> to vector<1x24xf32>
    %220 = arith.addf %203, %219 : vector<1x24xf32>
    %c0_361 = arith.constant 0 : index
    %c1_362 = arith.constant 1 : index
    %c1_363 = arith.constant 1 : index
    %c0_364 = arith.constant 0 : index
    %221 = vector.load %arg22[%c0_361, %c1_362, %c1_363, %c0_364] : memref<2x4x4x48xf32, #tpu.memory_space<vmem>>, vector<2x2x2x48xf32>
    %c0_365 = arith.constant 0 : index
    %c1_366 = arith.constant 1 : index
    %c2_367 = arith.constant 2 : index
    %c0_368 = arith.constant 0 : index
    %222 = vector.load %arg22[%c0_365, %c1_366, %c2_367, %c0_368] : memref<2x4x4x48xf32, #tpu.memory_space<vmem>>, vector<2x2x2x48xf32>
    %c0_369 = arith.constant 0 : index
    %c2_370 = arith.constant 2 : index
    %c1_371 = arith.constant 1 : index
    %c0_372 = arith.constant 0 : index
    %223 = vector.load %arg22[%c0_369, %c2_370, %c1_371, %c0_372] : memref<2x4x4x48xf32, #tpu.memory_space<vmem>>, vector<2x2x2x48xf32>
    %c0_373 = arith.constant 0 : index
    %c2_374 = arith.constant 2 : index
    %c2_375 = arith.constant 2 : index
    %c0_376 = arith.constant 0 : index
    %224 = vector.load %arg22[%c0_373, %c2_374, %c2_375, %c0_376] : memref<2x4x4x48xf32, #tpu.memory_space<vmem>>, vector<2x2x2x48xf32>
    %225 = tpu.concatenate %221, %222, %223, %224 in 3 : vector<2x2x2x48xf32>, vector<2x2x2x48xf32>, vector<2x2x2x48xf32>, vector<2x2x2x48xf32> -> vector<2x2x2x192xf32>
    %226 = vector.shape_cast %225 : vector<2x2x2x192xf32> to vector<8x192xf32>
    %227 = arith.truncf %226 : vector<8x192xf32> to vector<8x192xbf16>
    %c3_377 = arith.constant 3 : index
    %c0_378 = arith.constant 0 : index
    %c0_379 = arith.constant 0 : index
    %228 = vector.load %arg10[%c3_377, %c0_378, %c0_379] : memref<4x192x24xbf16, #tpu.memory_space<vmem>>, vector<1x192x24xbf16>
    %229 = vector.shape_cast %228 : vector<1x192x24xbf16> to vector<192x24xbf16>
    %cst_380 = arith.constant dense<0.000000e+00> : vector<8x24xf32>
    %230 = tpu.matmul %227, %229, %cst_380 {dimension_numbers = #tpu.dot_dimension_numbers<[1], [0], [0], [1], [0, 0, 1, 1], [], []>} : vector<8x192xbf16>, vector<192x24xbf16>, vector<8x24xf32> -> vector<8x24xf32>
    %cst_381 = arith.constant dense<0.000000e+00> : vector<24xf32>
    %231 = vector.multi_reduction <add>, %230, %cst_381 [0] : vector<8x24xf32> to vector<24xf32>
    %232 = vector.shape_cast %231 : vector<24xf32> to vector<1x24xf32>
    %233 = arith.addf %216, %232 : vector<1x24xf32>
    %234 = arith.mulf %230, %230 : vector<8x24xf32>
    %cst_382 = arith.constant dense<0.000000e+00> : vector<24xf32>
    %235 = vector.multi_reduction <add>, %234, %cst_382 [0] : vector<8x24xf32> to vector<24xf32>
    %236 = vector.shape_cast %235 : vector<24xf32> to vector<1x24xf32>
    %237 = arith.addf %220, %236 : vector<1x24xf32>
    %cst_383 = arith.constant 3.125000e-02 : f32
    %238 = vector.broadcast %cst_383 : f32 to vector<1x24xf32>
    %239 = arith.mulf %233, %238 : vector<1x24xf32>
    %cst_384 = arith.constant 3.125000e-02 : f32
    %240 = vector.broadcast %cst_384 : f32 to vector<1x24xf32>
    %241 = arith.mulf %237, %240 : vector<1x24xf32>
    %242 = arith.mulf %239, %239 : vector<1x24xf32>
    %243 = arith.subf %241, %242 : vector<1x24xf32>
    %cst_385 = arith.constant 0.000000e+00 : f32
    %244 = vector.broadcast %cst_385 : f32 to vector<1x24xf32>
    %245 = arith.maximumf %243, %244 : vector<1x24xf32>
    %c0_386 = arith.constant 0 : index
    %c0_387 = arith.constant 0 : index
    %246 = vector.load %arg11[%c0_386, %c0_387] : memref<1x24xf32, #tpu.memory_space<vmem>>, vector<1x24xf32>
    %cst_388 = arith.constant 9.99999974E-6 : f32
    %247 = vector.broadcast %cst_388 : f32 to vector<1x24xf32>
    %248 = arith.addf %245, %247 : vector<1x24xf32>
    %249 = math.rsqrt %248 : vector<1x24xf32>
    %250 = arith.mulf %246, %249 : vector<1x24xf32>
    %c0_389 = arith.constant 0 : index
    %c0_390 = arith.constant 0 : index
    %251 = vector.load %arg12[%c0_389, %c0_390] : memref<1x24xf32, #tpu.memory_space<vmem>>, vector<1x24xf32>
    %252 = arith.mulf %239, %250 : vector<1x24xf32>
    %253 = arith.subf %251, %252 : vector<1x24xf32>
    %254 = vector.broadcast %250 : vector<1x24xf32> to vector<8x24xf32>
    %255 = arith.mulf %179, %254 : vector<8x24xf32>
    %256 = vector.broadcast %253 : vector<1x24xf32> to vector<8x24xf32>
    %257 = arith.addf %255, %256 : vector<8x24xf32>
    %cst_391 = arith.constant 0.000000e+00 : f32
    %258 = vector.broadcast %cst_391 : f32 to vector<8x24xf32>
    %259 = arith.maximumf %257, %258 : vector<8x24xf32>
    %260 = vector.shape_cast %259 : vector<8x24xf32> to vector<2x2x2x24xf32>
    %c0_392 = arith.constant 0 : index
    %c1_393 = arith.constant 1 : index
    %c1_394 = arith.constant 1 : index
    %c0_395 = arith.constant 0 : index
    %261 = tpu.strided_load %arg21[%c0_392, %c1_393, %c1_394, %c0_395] {strides = array<i32: 1, 2, 2, 1>} : memref<2x6x6x24xf32, #tpu.memory_space<vmem>>, vector<2x2x2x24xf32>
    tpu.strided_store %arg21[%c0_392, %c1_393, %c1_394, %c0_395], %260 {strides = array<i32: 1, 2, 2, 1>} : memref<2x6x6x24xf32, #tpu.memory_space<vmem>>, vector<2x2x2x24xf32>
    %262 = vector.broadcast %250 : vector<1x24xf32> to vector<8x24xf32>
    %263 = arith.mulf %196, %262 : vector<8x24xf32>
    %264 = vector.broadcast %253 : vector<1x24xf32> to vector<8x24xf32>
    %265 = arith.addf %263, %264 : vector<8x24xf32>
    %cst_396 = arith.constant 0.000000e+00 : f32
    %266 = vector.broadcast %cst_396 : f32 to vector<8x24xf32>
    %267 = arith.maximumf %265, %266 : vector<8x24xf32>
    %268 = vector.shape_cast %267 : vector<8x24xf32> to vector<2x2x2x24xf32>
    %c0_397 = arith.constant 0 : index
    %c1_398 = arith.constant 1 : index
    %c2_399 = arith.constant 2 : index
    %c0_400 = arith.constant 0 : index
    %269 = tpu.strided_load %arg21[%c0_397, %c1_398, %c2_399, %c0_400] {strides = array<i32: 1, 2, 2, 1>} : memref<2x6x6x24xf32, #tpu.memory_space<vmem>>, vector<2x2x2x24xf32>
    tpu.strided_store %arg21[%c0_397, %c1_398, %c2_399, %c0_400], %268 {strides = array<i32: 1, 2, 2, 1>} : memref<2x6x6x24xf32, #tpu.memory_space<vmem>>, vector<2x2x2x24xf32>
    %270 = vector.broadcast %250 : vector<1x24xf32> to vector<8x24xf32>
    %271 = arith.mulf %213, %270 : vector<8x24xf32>
    %272 = vector.broadcast %253 : vector<1x24xf32> to vector<8x24xf32>
    %273 = arith.addf %271, %272 : vector<8x24xf32>
    %cst_401 = arith.constant 0.000000e+00 : f32
    %274 = vector.broadcast %cst_401 : f32 to vector<8x24xf32>
    %275 = arith.maximumf %273, %274 : vector<8x24xf32>
    %276 = vector.shape_cast %275 : vector<8x24xf32> to vector<2x2x2x24xf32>
    %c0_402 = arith.constant 0 : index
    %c2_403 = arith.constant 2 : index
    %c1_404 = arith.constant 1 : index
    %c0_405 = arith.constant 0 : index
    %277 = tpu.strided_load %arg21[%c0_402, %c2_403, %c1_404, %c0_405] {strides = array<i32: 1, 2, 2, 1>} : memref<2x6x6x24xf32, #tpu.memory_space<vmem>>, vector<2x2x2x24xf32>
    tpu.strided_store %arg21[%c0_402, %c2_403, %c1_404, %c0_405], %276 {strides = array<i32: 1, 2, 2, 1>} : memref<2x6x6x24xf32, #tpu.memory_space<vmem>>, vector<2x2x2x24xf32>
    %278 = vector.broadcast %250 : vector<1x24xf32> to vector<8x24xf32>
    %279 = arith.mulf %230, %278 : vector<8x24xf32>
    %280 = vector.broadcast %253 : vector<1x24xf32> to vector<8x24xf32>
    %281 = arith.addf %279, %280 : vector<8x24xf32>
    %cst_406 = arith.constant 0.000000e+00 : f32
    %282 = vector.broadcast %cst_406 : f32 to vector<8x24xf32>
    %283 = arith.maximumf %281, %282 : vector<8x24xf32>
    %284 = vector.shape_cast %283 : vector<8x24xf32> to vector<2x2x2x24xf32>
    %c0_407 = arith.constant 0 : index
    %c2_408 = arith.constant 2 : index
    %c2_409 = arith.constant 2 : index
    %c0_410 = arith.constant 0 : index
    %285 = tpu.strided_load %arg21[%c0_407, %c2_408, %c2_409, %c0_410] {strides = array<i32: 1, 2, 2, 1>} : memref<2x6x6x24xf32, #tpu.memory_space<vmem>>, vector<2x2x2x24xf32>
    tpu.strided_store %arg21[%c0_407, %c2_408, %c2_409, %c0_410], %284 {strides = array<i32: 1, 2, 2, 1>} : memref<2x6x6x24xf32, #tpu.memory_space<vmem>>, vector<2x2x2x24xf32>
    %cst_411 = arith.constant 0.000000e+00 : f32
    %286 = vector.broadcast %cst_411 : f32 to vector<1x12xf32>
    %cst_412 = arith.constant 0.000000e+00 : f32
    %287 = vector.broadcast %cst_412 : f32 to vector<1x12xf32>
    %c0_413 = arith.constant 0 : index
    %c0_414 = arith.constant 0 : index
    %c0_415 = arith.constant 0 : index
    %c0_416 = arith.constant 0 : index
    %288 = vector.load %arg21[%c0_413, %c0_414, %c0_415, %c0_416] : memref<2x6x6x24xf32, #tpu.memory_space<vmem>>, vector<2x4x4x24xf32>
    %c0_417 = arith.constant 0 : index
    %c0_418 = arith.constant 0 : index
    %c1_419 = arith.constant 1 : index
    %c0_420 = arith.constant 0 : index
    %289 = vector.load %arg21[%c0_417, %c0_418, %c1_419, %c0_420] : memref<2x6x6x24xf32, #tpu.memory_space<vmem>>, vector<2x4x4x24xf32>
    %c0_421 = arith.constant 0 : index
    %c1_422 = arith.constant 1 : index
    %c0_423 = arith.constant 0 : index
    %c0_424 = arith.constant 0 : index
    %290 = vector.load %arg21[%c0_421, %c1_422, %c0_423, %c0_424] : memref<2x6x6x24xf32, #tpu.memory_space<vmem>>, vector<2x4x4x24xf32>
    %c0_425 = arith.constant 0 : index
    %c1_426 = arith.constant 1 : index
    %c1_427 = arith.constant 1 : index
    %c0_428 = arith.constant 0 : index
    %291 = vector.load %arg21[%c0_425, %c1_426, %c1_427, %c0_428] : memref<2x6x6x24xf32, #tpu.memory_space<vmem>>, vector<2x4x4x24xf32>
    %292 = tpu.concatenate %288, %289, %290, %291 in 3 : vector<2x4x4x24xf32>, vector<2x4x4x24xf32>, vector<2x4x4x24xf32>, vector<2x4x4x24xf32> -> vector<2x4x4x96xf32>
    %293 = vector.shape_cast %292 : vector<2x4x4x96xf32> to vector<32x96xf32>
    %294 = arith.truncf %293 : vector<32x96xf32> to vector<32x96xbf16>
    %c0_429 = arith.constant 0 : index
    %c0_430 = arith.constant 0 : index
    %c0_431 = arith.constant 0 : index
    %295 = vector.load %arg13[%c0_429, %c0_430, %c0_431] : memref<4x96x12xbf16, #tpu.memory_space<vmem>>, vector<1x96x12xbf16>
    %296 = vector.shape_cast %295 : vector<1x96x12xbf16> to vector<96x12xbf16>
    %cst_432 = arith.constant dense<0.000000e+00> : vector<32x12xf32>
    %297 = tpu.matmul %294, %296, %cst_432 {dimension_numbers = #tpu.dot_dimension_numbers<[1], [0], [0], [1], [0, 0, 1, 1], [], []>} : vector<32x96xbf16>, vector<96x12xbf16>, vector<32x12xf32> -> vector<32x12xf32>
    %cst_433 = arith.constant dense<0.000000e+00> : vector<12xf32>
    %298 = vector.multi_reduction <add>, %297, %cst_433 [0] : vector<32x12xf32> to vector<12xf32>
    %299 = vector.shape_cast %298 : vector<12xf32> to vector<1x12xf32>
    %300 = arith.addf %286, %299 : vector<1x12xf32>
    %301 = arith.mulf %297, %297 : vector<32x12xf32>
    %cst_434 = arith.constant dense<0.000000e+00> : vector<12xf32>
    %302 = vector.multi_reduction <add>, %301, %cst_434 [0] : vector<32x12xf32> to vector<12xf32>
    %303 = vector.shape_cast %302 : vector<12xf32> to vector<1x12xf32>
    %304 = arith.addf %287, %303 : vector<1x12xf32>
    %c0_435 = arith.constant 0 : index
    %c0_436 = arith.constant 0 : index
    %c1_437 = arith.constant 1 : index
    %c0_438 = arith.constant 0 : index
    %305 = vector.load %arg21[%c0_435, %c0_436, %c1_437, %c0_438] : memref<2x6x6x24xf32, #tpu.memory_space<vmem>>, vector<2x4x4x24xf32>
    %c0_439 = arith.constant 0 : index
    %c0_440 = arith.constant 0 : index
    %c2_441 = arith.constant 2 : index
    %c0_442 = arith.constant 0 : index
    %306 = vector.load %arg21[%c0_439, %c0_440, %c2_441, %c0_442] : memref<2x6x6x24xf32, #tpu.memory_space<vmem>>, vector<2x4x4x24xf32>
    %c0_443 = arith.constant 0 : index
    %c1_444 = arith.constant 1 : index
    %c1_445 = arith.constant 1 : index
    %c0_446 = arith.constant 0 : index
    %307 = vector.load %arg21[%c0_443, %c1_444, %c1_445, %c0_446] : memref<2x6x6x24xf32, #tpu.memory_space<vmem>>, vector<2x4x4x24xf32>
    %c0_447 = arith.constant 0 : index
    %c1_448 = arith.constant 1 : index
    %c2_449 = arith.constant 2 : index
    %c0_450 = arith.constant 0 : index
    %308 = vector.load %arg21[%c0_447, %c1_448, %c2_449, %c0_450] : memref<2x6x6x24xf32, #tpu.memory_space<vmem>>, vector<2x4x4x24xf32>
    %309 = tpu.concatenate %305, %306, %307, %308 in 3 : vector<2x4x4x24xf32>, vector<2x4x4x24xf32>, vector<2x4x4x24xf32>, vector<2x4x4x24xf32> -> vector<2x4x4x96xf32>
    %310 = vector.shape_cast %309 : vector<2x4x4x96xf32> to vector<32x96xf32>
    %311 = arith.truncf %310 : vector<32x96xf32> to vector<32x96xbf16>
    %c1_451 = arith.constant 1 : index
    %c0_452 = arith.constant 0 : index
    %c0_453 = arith.constant 0 : index
    %312 = vector.load %arg13[%c1_451, %c0_452, %c0_453] : memref<4x96x12xbf16, #tpu.memory_space<vmem>>, vector<1x96x12xbf16>
    %313 = vector.shape_cast %312 : vector<1x96x12xbf16> to vector<96x12xbf16>
    %cst_454 = arith.constant dense<0.000000e+00> : vector<32x12xf32>
    %314 = tpu.matmul %311, %313, %cst_454 {dimension_numbers = #tpu.dot_dimension_numbers<[1], [0], [0], [1], [0, 0, 1, 1], [], []>} : vector<32x96xbf16>, vector<96x12xbf16>, vector<32x12xf32> -> vector<32x12xf32>
    %cst_455 = arith.constant dense<0.000000e+00> : vector<12xf32>
    %315 = vector.multi_reduction <add>, %314, %cst_455 [0] : vector<32x12xf32> to vector<12xf32>
    %316 = vector.shape_cast %315 : vector<12xf32> to vector<1x12xf32>
    %317 = arith.addf %300, %316 : vector<1x12xf32>
    %318 = arith.mulf %314, %314 : vector<32x12xf32>
    %cst_456 = arith.constant dense<0.000000e+00> : vector<12xf32>
    %319 = vector.multi_reduction <add>, %318, %cst_456 [0] : vector<32x12xf32> to vector<12xf32>
    %320 = vector.shape_cast %319 : vector<12xf32> to vector<1x12xf32>
    %321 = arith.addf %304, %320 : vector<1x12xf32>
    %c0_457 = arith.constant 0 : index
    %c1_458 = arith.constant 1 : index
    %c0_459 = arith.constant 0 : index
    %c0_460 = arith.constant 0 : index
    %322 = vector.load %arg21[%c0_457, %c1_458, %c0_459, %c0_460] : memref<2x6x6x24xf32, #tpu.memory_space<vmem>>, vector<2x4x4x24xf32>
    %c0_461 = arith.constant 0 : index
    %c1_462 = arith.constant 1 : index
    %c1_463 = arith.constant 1 : index
    %c0_464 = arith.constant 0 : index
    %323 = vector.load %arg21[%c0_461, %c1_462, %c1_463, %c0_464] : memref<2x6x6x24xf32, #tpu.memory_space<vmem>>, vector<2x4x4x24xf32>
    %c0_465 = arith.constant 0 : index
    %c2_466 = arith.constant 2 : index
    %c0_467 = arith.constant 0 : index
    %c0_468 = arith.constant 0 : index
    %324 = vector.load %arg21[%c0_465, %c2_466, %c0_467, %c0_468] : memref<2x6x6x24xf32, #tpu.memory_space<vmem>>, vector<2x4x4x24xf32>
    %c0_469 = arith.constant 0 : index
    %c2_470 = arith.constant 2 : index
    %c1_471 = arith.constant 1 : index
    %c0_472 = arith.constant 0 : index
    %325 = vector.load %arg21[%c0_469, %c2_470, %c1_471, %c0_472] : memref<2x6x6x24xf32, #tpu.memory_space<vmem>>, vector<2x4x4x24xf32>
    %326 = tpu.concatenate %322, %323, %324, %325 in 3 : vector<2x4x4x24xf32>, vector<2x4x4x24xf32>, vector<2x4x4x24xf32>, vector<2x4x4x24xf32> -> vector<2x4x4x96xf32>
    %327 = vector.shape_cast %326 : vector<2x4x4x96xf32> to vector<32x96xf32>
    %328 = arith.truncf %327 : vector<32x96xf32> to vector<32x96xbf16>
    %c2_473 = arith.constant 2 : index
    %c0_474 = arith.constant 0 : index
    %c0_475 = arith.constant 0 : index
    %329 = vector.load %arg13[%c2_473, %c0_474, %c0_475] : memref<4x96x12xbf16, #tpu.memory_space<vmem>>, vector<1x96x12xbf16>
    %330 = vector.shape_cast %329 : vector<1x96x12xbf16> to vector<96x12xbf16>
    %cst_476 = arith.constant dense<0.000000e+00> : vector<32x12xf32>
    %331 = tpu.matmul %328, %330, %cst_476 {dimension_numbers = #tpu.dot_dimension_numbers<[1], [0], [0], [1], [0, 0, 1, 1], [], []>} : vector<32x96xbf16>, vector<96x12xbf16>, vector<32x12xf32> -> vector<32x12xf32>
    %cst_477 = arith.constant dense<0.000000e+00> : vector<12xf32>
    %332 = vector.multi_reduction <add>, %331, %cst_477 [0] : vector<32x12xf32> to vector<12xf32>
    %333 = vector.shape_cast %332 : vector<12xf32> to vector<1x12xf32>
    %334 = arith.addf %317, %333 : vector<1x12xf32>
    %335 = arith.mulf %331, %331 : vector<32x12xf32>
    %cst_478 = arith.constant dense<0.000000e+00> : vector<12xf32>
    %336 = vector.multi_reduction <add>, %335, %cst_478 [0] : vector<32x12xf32> to vector<12xf32>
    %337 = vector.shape_cast %336 : vector<12xf32> to vector<1x12xf32>
    %338 = arith.addf %321, %337 : vector<1x12xf32>
    %c0_479 = arith.constant 0 : index
    %c1_480 = arith.constant 1 : index
    %c1_481 = arith.constant 1 : index
    %c0_482 = arith.constant 0 : index
    %339 = vector.load %arg21[%c0_479, %c1_480, %c1_481, %c0_482] : memref<2x6x6x24xf32, #tpu.memory_space<vmem>>, vector<2x4x4x24xf32>
    %c0_483 = arith.constant 0 : index
    %c1_484 = arith.constant 1 : index
    %c2_485 = arith.constant 2 : index
    %c0_486 = arith.constant 0 : index
    %340 = vector.load %arg21[%c0_483, %c1_484, %c2_485, %c0_486] : memref<2x6x6x24xf32, #tpu.memory_space<vmem>>, vector<2x4x4x24xf32>
    %c0_487 = arith.constant 0 : index
    %c2_488 = arith.constant 2 : index
    %c1_489 = arith.constant 1 : index
    %c0_490 = arith.constant 0 : index
    %341 = vector.load %arg21[%c0_487, %c2_488, %c1_489, %c0_490] : memref<2x6x6x24xf32, #tpu.memory_space<vmem>>, vector<2x4x4x24xf32>
    %c0_491 = arith.constant 0 : index
    %c2_492 = arith.constant 2 : index
    %c2_493 = arith.constant 2 : index
    %c0_494 = arith.constant 0 : index
    %342 = vector.load %arg21[%c0_491, %c2_492, %c2_493, %c0_494] : memref<2x6x6x24xf32, #tpu.memory_space<vmem>>, vector<2x4x4x24xf32>
    %343 = tpu.concatenate %339, %340, %341, %342 in 3 : vector<2x4x4x24xf32>, vector<2x4x4x24xf32>, vector<2x4x4x24xf32>, vector<2x4x4x24xf32> -> vector<2x4x4x96xf32>
    %344 = vector.shape_cast %343 : vector<2x4x4x96xf32> to vector<32x96xf32>
    %345 = arith.truncf %344 : vector<32x96xf32> to vector<32x96xbf16>
    %c3_495 = arith.constant 3 : index
    %c0_496 = arith.constant 0 : index
    %c0_497 = arith.constant 0 : index
    %346 = vector.load %arg13[%c3_495, %c0_496, %c0_497] : memref<4x96x12xbf16, #tpu.memory_space<vmem>>, vector<1x96x12xbf16>
    %347 = vector.shape_cast %346 : vector<1x96x12xbf16> to vector<96x12xbf16>
    %cst_498 = arith.constant dense<0.000000e+00> : vector<32x12xf32>
    %348 = tpu.matmul %345, %347, %cst_498 {dimension_numbers = #tpu.dot_dimension_numbers<[1], [0], [0], [1], [0, 0, 1, 1], [], []>} : vector<32x96xbf16>, vector<96x12xbf16>, vector<32x12xf32> -> vector<32x12xf32>
    %cst_499 = arith.constant dense<0.000000e+00> : vector<12xf32>
    %349 = vector.multi_reduction <add>, %348, %cst_499 [0] : vector<32x12xf32> to vector<12xf32>
    %350 = vector.shape_cast %349 : vector<12xf32> to vector<1x12xf32>
    %351 = arith.addf %334, %350 : vector<1x12xf32>
    %352 = arith.mulf %348, %348 : vector<32x12xf32>
    %cst_500 = arith.constant dense<0.000000e+00> : vector<12xf32>
    %353 = vector.multi_reduction <add>, %352, %cst_500 [0] : vector<32x12xf32> to vector<12xf32>
    %354 = vector.shape_cast %353 : vector<12xf32> to vector<1x12xf32>
    %355 = arith.addf %338, %354 : vector<1x12xf32>
    %cst_501 = arith.constant 7.812500e-03 : f32
    %356 = vector.broadcast %cst_501 : f32 to vector<1x12xf32>
    %357 = arith.mulf %351, %356 : vector<1x12xf32>
    %cst_502 = arith.constant 7.812500e-03 : f32
    %358 = vector.broadcast %cst_502 : f32 to vector<1x12xf32>
    %359 = arith.mulf %355, %358 : vector<1x12xf32>
    %360 = arith.mulf %357, %357 : vector<1x12xf32>
    %361 = arith.subf %359, %360 : vector<1x12xf32>
    %cst_503 = arith.constant 0.000000e+00 : f32
    %362 = vector.broadcast %cst_503 : f32 to vector<1x12xf32>
    %363 = arith.maximumf %361, %362 : vector<1x12xf32>
    %c0_504 = arith.constant 0 : index
    %c0_505 = arith.constant 0 : index
    %364 = vector.load %arg14[%c0_504, %c0_505] : memref<1x12xf32, #tpu.memory_space<vmem>>, vector<1x12xf32>
    %cst_506 = arith.constant 9.99999974E-6 : f32
    %365 = vector.broadcast %cst_506 : f32 to vector<1x12xf32>
    %366 = arith.addf %363, %365 : vector<1x12xf32>
    %367 = math.rsqrt %366 : vector<1x12xf32>
    %368 = arith.mulf %364, %367 : vector<1x12xf32>
    %c0_507 = arith.constant 0 : index
    %c0_508 = arith.constant 0 : index
    %369 = vector.load %arg15[%c0_507, %c0_508] : memref<1x12xf32, #tpu.memory_space<vmem>>, vector<1x12xf32>
    %370 = arith.mulf %357, %368 : vector<1x12xf32>
    %371 = arith.subf %369, %370 : vector<1x12xf32>
    %372 = vector.broadcast %368 : vector<1x12xf32> to vector<32x12xf32>
    %373 = arith.mulf %297, %372 : vector<32x12xf32>
    %374 = vector.broadcast %371 : vector<1x12xf32> to vector<32x12xf32>
    %375 = arith.addf %373, %374 : vector<32x12xf32>
    %cst_509 = arith.constant 0.000000e+00 : f32
    %376 = vector.broadcast %cst_509 : f32 to vector<32x12xf32>
    %377 = arith.maximumf %375, %376 : vector<32x12xf32>
    %378 = vector.shape_cast %377 : vector<32x12xf32> to vector<2x4x4x12xf32>
    %c0_510 = arith.constant 0 : index
    %c1_511 = arith.constant 1 : index
    %c1_512 = arith.constant 1 : index
    %c0_513 = arith.constant 0 : index
    %379 = tpu.strided_load %arg20[%c0_510, %c1_511, %c1_512, %c0_513] {strides = array<i32: 1, 2, 2, 1>} : memref<2x10x10x12xf32, #tpu.memory_space<vmem>>, vector<2x4x4x12xf32>
    tpu.strided_store %arg20[%c0_510, %c1_511, %c1_512, %c0_513], %378 {strides = array<i32: 1, 2, 2, 1>} : memref<2x10x10x12xf32, #tpu.memory_space<vmem>>, vector<2x4x4x12xf32>
    %380 = vector.broadcast %368 : vector<1x12xf32> to vector<32x12xf32>
    %381 = arith.mulf %314, %380 : vector<32x12xf32>
    %382 = vector.broadcast %371 : vector<1x12xf32> to vector<32x12xf32>
    %383 = arith.addf %381, %382 : vector<32x12xf32>
    %cst_514 = arith.constant 0.000000e+00 : f32
    %384 = vector.broadcast %cst_514 : f32 to vector<32x12xf32>
    %385 = arith.maximumf %383, %384 : vector<32x12xf32>
    %386 = vector.shape_cast %385 : vector<32x12xf32> to vector<2x4x4x12xf32>
    %c0_515 = arith.constant 0 : index
    %c1_516 = arith.constant 1 : index
    %c2_517 = arith.constant 2 : index
    %c0_518 = arith.constant 0 : index
    %387 = tpu.strided_load %arg20[%c0_515, %c1_516, %c2_517, %c0_518] {strides = array<i32: 1, 2, 2, 1>} : memref<2x10x10x12xf32, #tpu.memory_space<vmem>>, vector<2x4x4x12xf32>
    tpu.strided_store %arg20[%c0_515, %c1_516, %c2_517, %c0_518], %386 {strides = array<i32: 1, 2, 2, 1>} : memref<2x10x10x12xf32, #tpu.memory_space<vmem>>, vector<2x4x4x12xf32>
    %388 = vector.broadcast %368 : vector<1x12xf32> to vector<32x12xf32>
    %389 = arith.mulf %331, %388 : vector<32x12xf32>
    %390 = vector.broadcast %371 : vector<1x12xf32> to vector<32x12xf32>
    %391 = arith.addf %389, %390 : vector<32x12xf32>
    %cst_519 = arith.constant 0.000000e+00 : f32
    %392 = vector.broadcast %cst_519 : f32 to vector<32x12xf32>
    %393 = arith.maximumf %391, %392 : vector<32x12xf32>
    %394 = vector.shape_cast %393 : vector<32x12xf32> to vector<2x4x4x12xf32>
    %c0_520 = arith.constant 0 : index
    %c2_521 = arith.constant 2 : index
    %c1_522 = arith.constant 1 : index
    %c0_523 = arith.constant 0 : index
    %395 = tpu.strided_load %arg20[%c0_520, %c2_521, %c1_522, %c0_523] {strides = array<i32: 1, 2, 2, 1>} : memref<2x10x10x12xf32, #tpu.memory_space<vmem>>, vector<2x4x4x12xf32>
    tpu.strided_store %arg20[%c0_520, %c2_521, %c1_522, %c0_523], %394 {strides = array<i32: 1, 2, 2, 1>} : memref<2x10x10x12xf32, #tpu.memory_space<vmem>>, vector<2x4x4x12xf32>
    %396 = vector.broadcast %368 : vector<1x12xf32> to vector<32x12xf32>
    %397 = arith.mulf %348, %396 : vector<32x12xf32>
    %398 = vector.broadcast %371 : vector<1x12xf32> to vector<32x12xf32>
    %399 = arith.addf %397, %398 : vector<32x12xf32>
    %cst_524 = arith.constant 0.000000e+00 : f32
    %400 = vector.broadcast %cst_524 : f32 to vector<32x12xf32>
    %401 = arith.maximumf %399, %400 : vector<32x12xf32>
    %402 = vector.shape_cast %401 : vector<32x12xf32> to vector<2x4x4x12xf32>
    %c0_525 = arith.constant 0 : index
    %c2_526 = arith.constant 2 : index
    %c2_527 = arith.constant 2 : index
    %c0_528 = arith.constant 0 : index
    %403 = tpu.strided_load %arg20[%c0_525, %c2_526, %c2_527, %c0_528] {strides = array<i32: 1, 2, 2, 1>} : memref<2x10x10x12xf32, #tpu.memory_space<vmem>>, vector<2x4x4x12xf32>
    tpu.strided_store %arg20[%c0_525, %c2_526, %c2_527, %c0_528], %402 {strides = array<i32: 1, 2, 2, 1>} : memref<2x10x10x12xf32, #tpu.memory_space<vmem>>, vector<2x4x4x12xf32>
    %cst_529 = arith.constant 0.000000e+00 : f32
    %404 = vector.broadcast %cst_529 : f32 to vector<1x3xf32>
    %cst_530 = arith.constant 0.000000e+00 : f32
    %405 = vector.broadcast %cst_530 : f32 to vector<1x3xf32>
    %c0_531 = arith.constant 0 : index
    %c0_532 = arith.constant 0 : index
    %c0_533 = arith.constant 0 : index
    %c0_534 = arith.constant 0 : index
    %406 = vector.load %arg20[%c0_531, %c0_532, %c0_533, %c0_534] : memref<2x10x10x12xf32, #tpu.memory_space<vmem>>, vector<2x8x8x12xf32>
    %c0_535 = arith.constant 0 : index
    %c0_536 = arith.constant 0 : index
    %c1_537 = arith.constant 1 : index
    %c0_538 = arith.constant 0 : index
    %407 = vector.load %arg20[%c0_535, %c0_536, %c1_537, %c0_538] : memref<2x10x10x12xf32, #tpu.memory_space<vmem>>, vector<2x8x8x12xf32>
    %c0_539 = arith.constant 0 : index
    %c1_540 = arith.constant 1 : index
    %c0_541 = arith.constant 0 : index
    %c0_542 = arith.constant 0 : index
    %408 = vector.load %arg20[%c0_539, %c1_540, %c0_541, %c0_542] : memref<2x10x10x12xf32, #tpu.memory_space<vmem>>, vector<2x8x8x12xf32>
    %c0_543 = arith.constant 0 : index
    %c1_544 = arith.constant 1 : index
    %c1_545 = arith.constant 1 : index
    %c0_546 = arith.constant 0 : index
    %409 = vector.load %arg20[%c0_543, %c1_544, %c1_545, %c0_546] : memref<2x10x10x12xf32, #tpu.memory_space<vmem>>, vector<2x8x8x12xf32>
    %410 = tpu.concatenate %406, %407, %408, %409 in 3 : vector<2x8x8x12xf32>, vector<2x8x8x12xf32>, vector<2x8x8x12xf32>, vector<2x8x8x12xf32> -> vector<2x8x8x48xf32>
    %411 = vector.shape_cast %410 : vector<2x8x8x48xf32> to vector<128x48xf32>
    %412 = arith.truncf %411 : vector<128x48xf32> to vector<128x48xbf16>
    %c0_547 = arith.constant 0 : index
    %c0_548 = arith.constant 0 : index
    %c0_549 = arith.constant 0 : index
    %413 = vector.load %arg16[%c0_547, %c0_548, %c0_549] : memref<4x48x3xbf16, #tpu.memory_space<vmem>>, vector<1x48x3xbf16>
    %414 = vector.shape_cast %413 : vector<1x48x3xbf16> to vector<48x3xbf16>
    %cst_550 = arith.constant dense<0.000000e+00> : vector<128x3xf32>
    %415 = tpu.matmul %412, %414, %cst_550 {dimension_numbers = #tpu.dot_dimension_numbers<[1], [0], [0], [1], [0, 0, 1, 1], [], []>} : vector<128x48xbf16>, vector<48x3xbf16>, vector<128x3xf32> -> vector<128x3xf32>
    %cst_551 = arith.constant dense<0.000000e+00> : vector<3xf32>
    %416 = vector.multi_reduction <add>, %415, %cst_551 [0] : vector<128x3xf32> to vector<3xf32>
    %417 = vector.shape_cast %416 : vector<3xf32> to vector<1x3xf32>
    %418 = arith.addf %404, %417 : vector<1x3xf32>
    %419 = arith.mulf %415, %415 : vector<128x3xf32>
    %cst_552 = arith.constant dense<0.000000e+00> : vector<3xf32>
    %420 = vector.multi_reduction <add>, %419, %cst_552 [0] : vector<128x3xf32> to vector<3xf32>
    %421 = vector.shape_cast %420 : vector<3xf32> to vector<1x3xf32>
    %422 = arith.addf %405, %421 : vector<1x3xf32>
    %c0_553 = arith.constant 0 : index
    %c0_554 = arith.constant 0 : index
    %c1_555 = arith.constant 1 : index
    %c0_556 = arith.constant 0 : index
    %423 = vector.load %arg20[%c0_553, %c0_554, %c1_555, %c0_556] : memref<2x10x10x12xf32, #tpu.memory_space<vmem>>, vector<2x8x8x12xf32>
    %c0_557 = arith.constant 0 : index
    %c0_558 = arith.constant 0 : index
    %c2_559 = arith.constant 2 : index
    %c0_560 = arith.constant 0 : index
    %424 = vector.load %arg20[%c0_557, %c0_558, %c2_559, %c0_560] : memref<2x10x10x12xf32, #tpu.memory_space<vmem>>, vector<2x8x8x12xf32>
    %c0_561 = arith.constant 0 : index
    %c1_562 = arith.constant 1 : index
    %c1_563 = arith.constant 1 : index
    %c0_564 = arith.constant 0 : index
    %425 = vector.load %arg20[%c0_561, %c1_562, %c1_563, %c0_564] : memref<2x10x10x12xf32, #tpu.memory_space<vmem>>, vector<2x8x8x12xf32>
    %c0_565 = arith.constant 0 : index
    %c1_566 = arith.constant 1 : index
    %c2_567 = arith.constant 2 : index
    %c0_568 = arith.constant 0 : index
    %426 = vector.load %arg20[%c0_565, %c1_566, %c2_567, %c0_568] : memref<2x10x10x12xf32, #tpu.memory_space<vmem>>, vector<2x8x8x12xf32>
    %427 = tpu.concatenate %423, %424, %425, %426 in 3 : vector<2x8x8x12xf32>, vector<2x8x8x12xf32>, vector<2x8x8x12xf32>, vector<2x8x8x12xf32> -> vector<2x8x8x48xf32>
    %428 = vector.shape_cast %427 : vector<2x8x8x48xf32> to vector<128x48xf32>
    %429 = arith.truncf %428 : vector<128x48xf32> to vector<128x48xbf16>
    %c1_569 = arith.constant 1 : index
    %c0_570 = arith.constant 0 : index
    %c0_571 = arith.constant 0 : index
    %430 = vector.load %arg16[%c1_569, %c0_570, %c0_571] : memref<4x48x3xbf16, #tpu.memory_space<vmem>>, vector<1x48x3xbf16>
    %431 = vector.shape_cast %430 : vector<1x48x3xbf16> to vector<48x3xbf16>
    %cst_572 = arith.constant dense<0.000000e+00> : vector<128x3xf32>
    %432 = tpu.matmul %429, %431, %cst_572 {dimension_numbers = #tpu.dot_dimension_numbers<[1], [0], [0], [1], [0, 0, 1, 1], [], []>} : vector<128x48xbf16>, vector<48x3xbf16>, vector<128x3xf32> -> vector<128x3xf32>
    %cst_573 = arith.constant dense<0.000000e+00> : vector<3xf32>
    %433 = vector.multi_reduction <add>, %432, %cst_573 [0] : vector<128x3xf32> to vector<3xf32>
    %434 = vector.shape_cast %433 : vector<3xf32> to vector<1x3xf32>
    %435 = arith.addf %418, %434 : vector<1x3xf32>
    %436 = arith.mulf %432, %432 : vector<128x3xf32>
    %cst_574 = arith.constant dense<0.000000e+00> : vector<3xf32>
    %437 = vector.multi_reduction <add>, %436, %cst_574 [0] : vector<128x3xf32> to vector<3xf32>
    %438 = vector.shape_cast %437 : vector<3xf32> to vector<1x3xf32>
    %439 = arith.addf %422, %438 : vector<1x3xf32>
    %c0_575 = arith.constant 0 : index
    %c1_576 = arith.constant 1 : index
    %c0_577 = arith.constant 0 : index
    %c0_578 = arith.constant 0 : index
    %440 = vector.load %arg20[%c0_575, %c1_576, %c0_577, %c0_578] : memref<2x10x10x12xf32, #tpu.memory_space<vmem>>, vector<2x8x8x12xf32>
    %c0_579 = arith.constant 0 : index
    %c1_580 = arith.constant 1 : index
    %c1_581 = arith.constant 1 : index
    %c0_582 = arith.constant 0 : index
    %441 = vector.load %arg20[%c0_579, %c1_580, %c1_581, %c0_582] : memref<2x10x10x12xf32, #tpu.memory_space<vmem>>, vector<2x8x8x12xf32>
    %c0_583 = arith.constant 0 : index
    %c2_584 = arith.constant 2 : index
    %c0_585 = arith.constant 0 : index
    %c0_586 = arith.constant 0 : index
    %442 = vector.load %arg20[%c0_583, %c2_584, %c0_585, %c0_586] : memref<2x10x10x12xf32, #tpu.memory_space<vmem>>, vector<2x8x8x12xf32>
    %c0_587 = arith.constant 0 : index
    %c2_588 = arith.constant 2 : index
    %c1_589 = arith.constant 1 : index
    %c0_590 = arith.constant 0 : index
    %443 = vector.load %arg20[%c0_587, %c2_588, %c1_589, %c0_590] : memref<2x10x10x12xf32, #tpu.memory_space<vmem>>, vector<2x8x8x12xf32>
    %444 = tpu.concatenate %440, %441, %442, %443 in 3 : vector<2x8x8x12xf32>, vector<2x8x8x12xf32>, vector<2x8x8x12xf32>, vector<2x8x8x12xf32> -> vector<2x8x8x48xf32>
    %445 = vector.shape_cast %444 : vector<2x8x8x48xf32> to vector<128x48xf32>
    %446 = arith.truncf %445 : vector<128x48xf32> to vector<128x48xbf16>
    %c2_591 = arith.constant 2 : index
    %c0_592 = arith.constant 0 : index
    %c0_593 = arith.constant 0 : index
    %447 = vector.load %arg16[%c2_591, %c0_592, %c0_593] : memref<4x48x3xbf16, #tpu.memory_space<vmem>>, vector<1x48x3xbf16>
    %448 = vector.shape_cast %447 : vector<1x48x3xbf16> to vector<48x3xbf16>
    %cst_594 = arith.constant dense<0.000000e+00> : vector<128x3xf32>
    %449 = tpu.matmul %446, %448, %cst_594 {dimension_numbers = #tpu.dot_dimension_numbers<[1], [0], [0], [1], [0, 0, 1, 1], [], []>} : vector<128x48xbf16>, vector<48x3xbf16>, vector<128x3xf32> -> vector<128x3xf32>
    %cst_595 = arith.constant dense<0.000000e+00> : vector<3xf32>
    %450 = vector.multi_reduction <add>, %449, %cst_595 [0] : vector<128x3xf32> to vector<3xf32>
    %451 = vector.shape_cast %450 : vector<3xf32> to vector<1x3xf32>
    %452 = arith.addf %435, %451 : vector<1x3xf32>
    %453 = arith.mulf %449, %449 : vector<128x3xf32>
    %cst_596 = arith.constant dense<0.000000e+00> : vector<3xf32>
    %454 = vector.multi_reduction <add>, %453, %cst_596 [0] : vector<128x3xf32> to vector<3xf32>
    %455 = vector.shape_cast %454 : vector<3xf32> to vector<1x3xf32>
    %456 = arith.addf %439, %455 : vector<1x3xf32>
    %c0_597 = arith.constant 0 : index
    %c1_598 = arith.constant 1 : index
    %c1_599 = arith.constant 1 : index
    %c0_600 = arith.constant 0 : index
    %457 = vector.load %arg20[%c0_597, %c1_598, %c1_599, %c0_600] : memref<2x10x10x12xf32, #tpu.memory_space<vmem>>, vector<2x8x8x12xf32>
    %c0_601 = arith.constant 0 : index
    %c1_602 = arith.constant 1 : index
    %c2_603 = arith.constant 2 : index
    %c0_604 = arith.constant 0 : index
    %458 = vector.load %arg20[%c0_601, %c1_602, %c2_603, %c0_604] : memref<2x10x10x12xf32, #tpu.memory_space<vmem>>, vector<2x8x8x12xf32>
    %c0_605 = arith.constant 0 : index
    %c2_606 = arith.constant 2 : index
    %c1_607 = arith.constant 1 : index
    %c0_608 = arith.constant 0 : index
    %459 = vector.load %arg20[%c0_605, %c2_606, %c1_607, %c0_608] : memref<2x10x10x12xf32, #tpu.memory_space<vmem>>, vector<2x8x8x12xf32>
    %c0_609 = arith.constant 0 : index
    %c2_610 = arith.constant 2 : index
    %c2_611 = arith.constant 2 : index
    %c0_612 = arith.constant 0 : index
    %460 = vector.load %arg20[%c0_609, %c2_610, %c2_611, %c0_612] : memref<2x10x10x12xf32, #tpu.memory_space<vmem>>, vector<2x8x8x12xf32>
    %461 = tpu.concatenate %457, %458, %459, %460 in 3 : vector<2x8x8x12xf32>, vector<2x8x8x12xf32>, vector<2x8x8x12xf32>, vector<2x8x8x12xf32> -> vector<2x8x8x48xf32>
    %462 = vector.shape_cast %461 : vector<2x8x8x48xf32> to vector<128x48xf32>
    %463 = arith.truncf %462 : vector<128x48xf32> to vector<128x48xbf16>
    %c3_613 = arith.constant 3 : index
    %c0_614 = arith.constant 0 : index
    %c0_615 = arith.constant 0 : index
    %464 = vector.load %arg16[%c3_613, %c0_614, %c0_615] : memref<4x48x3xbf16, #tpu.memory_space<vmem>>, vector<1x48x3xbf16>
    %465 = vector.shape_cast %464 : vector<1x48x3xbf16> to vector<48x3xbf16>
    %cst_616 = arith.constant dense<0.000000e+00> : vector<128x3xf32>
    %466 = tpu.matmul %463, %465, %cst_616 {dimension_numbers = #tpu.dot_dimension_numbers<[1], [0], [0], [1], [0, 0, 1, 1], [], []>} : vector<128x48xbf16>, vector<48x3xbf16>, vector<128x3xf32> -> vector<128x3xf32>
    %cst_617 = arith.constant dense<0.000000e+00> : vector<3xf32>
    %467 = vector.multi_reduction <add>, %466, %cst_617 [0] : vector<128x3xf32> to vector<3xf32>
    %468 = vector.shape_cast %467 : vector<3xf32> to vector<1x3xf32>
    %469 = arith.addf %452, %468 : vector<1x3xf32>
    %470 = arith.mulf %466, %466 : vector<128x3xf32>
    %cst_618 = arith.constant dense<0.000000e+00> : vector<3xf32>
    %471 = vector.multi_reduction <add>, %470, %cst_618 [0] : vector<128x3xf32> to vector<3xf32>
    %472 = vector.shape_cast %471 : vector<3xf32> to vector<1x3xf32>
    %473 = arith.addf %456, %472 : vector<1x3xf32>
    %cst_619 = arith.constant 0.001953125 : f32
    %474 = vector.broadcast %cst_619 : f32 to vector<1x3xf32>
    %475 = arith.mulf %469, %474 : vector<1x3xf32>
    %cst_620 = arith.constant 0.001953125 : f32
    %476 = vector.broadcast %cst_620 : f32 to vector<1x3xf32>
    %477 = arith.mulf %473, %476 : vector<1x3xf32>
    %478 = arith.mulf %475, %475 : vector<1x3xf32>
    %479 = arith.subf %477, %478 : vector<1x3xf32>
    %cst_621 = arith.constant 0.000000e+00 : f32
    %480 = vector.broadcast %cst_621 : f32 to vector<1x3xf32>
    %481 = arith.maximumf %479, %480 : vector<1x3xf32>
    %c0_622 = arith.constant 0 : index
    %c0_623 = arith.constant 0 : index
    %482 = vector.load %arg17[%c0_622, %c0_623] : memref<1x3xf32, #tpu.memory_space<vmem>>, vector<1x3xf32>
    %cst_624 = arith.constant 9.99999974E-6 : f32
    %483 = vector.broadcast %cst_624 : f32 to vector<1x3xf32>
    %484 = arith.addf %481, %483 : vector<1x3xf32>
    %485 = math.rsqrt %484 : vector<1x3xf32>
    %486 = arith.mulf %482, %485 : vector<1x3xf32>
    %c0_625 = arith.constant 0 : index
    %c0_626 = arith.constant 0 : index
    %487 = vector.load %arg18[%c0_625, %c0_626] : memref<1x3xf32, #tpu.memory_space<vmem>>, vector<1x3xf32>
    %488 = arith.mulf %475, %486 : vector<1x3xf32>
    %489 = arith.subf %487, %488 : vector<1x3xf32>
    %490 = vector.broadcast %486 : vector<1x3xf32> to vector<128x3xf32>
    %491 = arith.mulf %415, %490 : vector<128x3xf32>
    %492 = vector.broadcast %489 : vector<1x3xf32> to vector<128x3xf32>
    %493 = arith.addf %491, %492 : vector<128x3xf32>
    %cst_627 = arith.constant 0.000000e+00 : f32
    %494 = vector.broadcast %cst_627 : f32 to vector<128x3xf32>
    %495 = arith.subf %494, %493 : vector<128x3xf32>
    %496 = math.exp %495 : vector<128x3xf32>
    %cst_628 = arith.constant 1.000000e+00 : f32
    %497 = vector.broadcast %cst_628 : f32 to vector<128x3xf32>
    %498 = arith.addf %497, %496 : vector<128x3xf32>
    %cst_629 = arith.constant 1.000000e+00 : f32
    %499 = vector.broadcast %cst_629 : f32 to vector<128x3xf32>
    %500 = arith.divf %499, %498 : vector<128x3xf32>
    %501 = vector.shape_cast %500 : vector<128x3xf32> to vector<2x8x8x3xf32>
    %c0_630 = arith.constant 0 : index
    %c0_631 = arith.constant 0 : index
    %c0_632 = arith.constant 0 : index
    %c0_633 = arith.constant 0 : index
    %502 = tpu.strided_load %arg19[%c0_630, %c0_631, %c0_632, %c0_633] {strides = array<i32: 1, 2, 2, 1>} : memref<2x16x16x3xf32, #tpu.memory_space<vmem>>, vector<2x8x8x3xf32>
    tpu.strided_store %arg19[%c0_630, %c0_631, %c0_632, %c0_633], %501 {strides = array<i32: 1, 2, 2, 1>} : memref<2x16x16x3xf32, #tpu.memory_space<vmem>>, vector<2x8x8x3xf32>
    %503 = vector.broadcast %486 : vector<1x3xf32> to vector<128x3xf32>
    %504 = arith.mulf %432, %503 : vector<128x3xf32>
    %505 = vector.broadcast %489 : vector<1x3xf32> to vector<128x3xf32>
    %506 = arith.addf %504, %505 : vector<128x3xf32>
    %cst_634 = arith.constant 0.000000e+00 : f32
    %507 = vector.broadcast %cst_634 : f32 to vector<128x3xf32>
    %508 = arith.subf %507, %506 : vector<128x3xf32>
    %509 = math.exp %508 : vector<128x3xf32>
    %cst_635 = arith.constant 1.000000e+00 : f32
    %510 = vector.broadcast %cst_635 : f32 to vector<128x3xf32>
    %511 = arith.addf %510, %509 : vector<128x3xf32>
    %cst_636 = arith.constant 1.000000e+00 : f32
    %512 = vector.broadcast %cst_636 : f32 to vector<128x3xf32>
    %513 = arith.divf %512, %511 : vector<128x3xf32>
    %514 = vector.shape_cast %513 : vector<128x3xf32> to vector<2x8x8x3xf32>
    %c0_637 = arith.constant 0 : index
    %c0_638 = arith.constant 0 : index
    %c1_639 = arith.constant 1 : index
    %c0_640 = arith.constant 0 : index
    %515 = tpu.strided_load %arg19[%c0_637, %c0_638, %c1_639, %c0_640] {strides = array<i32: 1, 2, 2, 1>} : memref<2x16x16x3xf32, #tpu.memory_space<vmem>>, vector<2x8x8x3xf32>
    tpu.strided_store %arg19[%c0_637, %c0_638, %c1_639, %c0_640], %514 {strides = array<i32: 1, 2, 2, 1>} : memref<2x16x16x3xf32, #tpu.memory_space<vmem>>, vector<2x8x8x3xf32>
    %516 = vector.broadcast %486 : vector<1x3xf32> to vector<128x3xf32>
    %517 = arith.mulf %449, %516 : vector<128x3xf32>
    %518 = vector.broadcast %489 : vector<1x3xf32> to vector<128x3xf32>
    %519 = arith.addf %517, %518 : vector<128x3xf32>
    %cst_641 = arith.constant 0.000000e+00 : f32
    %520 = vector.broadcast %cst_641 : f32 to vector<128x3xf32>
    %521 = arith.subf %520, %519 : vector<128x3xf32>
    %522 = math.exp %521 : vector<128x3xf32>
    %cst_642 = arith.constant 1.000000e+00 : f32
    %523 = vector.broadcast %cst_642 : f32 to vector<128x3xf32>
    %524 = arith.addf %523, %522 : vector<128x3xf32>
    %cst_643 = arith.constant 1.000000e+00 : f32
    %525 = vector.broadcast %cst_643 : f32 to vector<128x3xf32>
    %526 = arith.divf %525, %524 : vector<128x3xf32>
    %527 = vector.shape_cast %526 : vector<128x3xf32> to vector<2x8x8x3xf32>
    %c0_644 = arith.constant 0 : index
    %c1_645 = arith.constant 1 : index
    %c0_646 = arith.constant 0 : index
    %c0_647 = arith.constant 0 : index
    %528 = tpu.strided_load %arg19[%c0_644, %c1_645, %c0_646, %c0_647] {strides = array<i32: 1, 2, 2, 1>} : memref<2x16x16x3xf32, #tpu.memory_space<vmem>>, vector<2x8x8x3xf32>
    tpu.strided_store %arg19[%c0_644, %c1_645, %c0_646, %c0_647], %527 {strides = array<i32: 1, 2, 2, 1>} : memref<2x16x16x3xf32, #tpu.memory_space<vmem>>, vector<2x8x8x3xf32>
    %529 = vector.broadcast %486 : vector<1x3xf32> to vector<128x3xf32>
    %530 = arith.mulf %466, %529 : vector<128x3xf32>
    %531 = vector.broadcast %489 : vector<1x3xf32> to vector<128x3xf32>
    %532 = arith.addf %530, %531 : vector<128x3xf32>
    %cst_648 = arith.constant 0.000000e+00 : f32
    %533 = vector.broadcast %cst_648 : f32 to vector<128x3xf32>
    %534 = arith.subf %533, %532 : vector<128x3xf32>
    %535 = math.exp %534 : vector<128x3xf32>
    %cst_649 = arith.constant 1.000000e+00 : f32
    %536 = vector.broadcast %cst_649 : f32 to vector<128x3xf32>
    %537 = arith.addf %536, %535 : vector<128x3xf32>
    %cst_650 = arith.constant 1.000000e+00 : f32
    %538 = vector.broadcast %cst_650 : f32 to vector<128x3xf32>
    %539 = arith.divf %538, %537 : vector<128x3xf32>
    %540 = vector.shape_cast %539 : vector<128x3xf32> to vector<2x8x8x3xf32>
    %c0_651 = arith.constant 0 : index
    %c1_652 = arith.constant 1 : index
    %c1_653 = arith.constant 1 : index
    %c0_654 = arith.constant 0 : index
    %541 = tpu.strided_load %arg19[%c0_651, %c1_652, %c1_653, %c0_654] {strides = array<i32: 1, 2, 2, 1>} : memref<2x16x16x3xf32, #tpu.memory_space<vmem>>, vector<2x8x8x3xf32>
    tpu.strided_store %arg19[%c0_651, %c1_652, %c1_653, %c0_654], %540 {strides = array<i32: 1, 2, 2, 1>} : memref<2x16x16x3xf32, #tpu.memory_space<vmem>>, vector<2x8x8x3xf32>
    return
  }
}

</mosaic_0001>

<bundles_post_ra>
// kernel: conv_ae_forward.1
= control target key start
LH: loop header
LB: loop body
LE: loop exit
PB: predicated region body
PF: predicated region fallthrough
CT: control target
= control target key end

     0   :  { %s18233_s21 = smov 6   ;;  %s18225_s25 = smov 9   ;;  %vm18266_vm0 = vcmask 23552   ;;  %vm1657_vm1 = vcmask 48128   ;;  %vm1674_vm2 = vcmask 72704   ;;  %vm63_vm3 = vcmask 97280   ;;  %s18191_s0 = inlined_call_operand.vmem [shape: f32[2,18,18,3], index: 0, kind: input, shape index: {}]   ;;  %s18192_s1 = inlined_call_operand.vmem [shape: bf16[48,12], index: 1, kind: input, shape index: {}]   ;;  %s18193_s2 = inlined_call_operand.vmem [shape: f32[1,12], index: 2, kind: input, shape index: {}]   ;;  %s18194_s3 = inlined_call_operand.vmem [shape: f32[1,12], index: 3, kind: input, shape index: {}]   ;;  %s18195_s4 = inlined_call_operand.vmem [shape: bf16[192,24], index: 4, kind: input, shape index: {}]   ;;  %s18196_s5 = inlined_call_operand.vmem [shape: f32[1,24], index: 5, kind: input, shape index: {}]   ;;  %s18197_s6 = inlined_call_operand.vmem [shape: f32[1,24], index: 6, kind: input, shape index: {}]   ;;  %s18198_s7 = inlined_call_operand.vmem [shape: bf16[384,48], index: 7, kind: input, shape index: {}]   ;;  %s18199_s8 = inlined_call_operand.vmem [shape: f32[1,48], index: 8, kind: input, shape index: {}]   ;;  %s18200_s9 = inlined_call_operand.vmem [shape: f32[1,48], index: 9, kind: input, shape index: {}]   ;;  %s18201_s10 = inlined_call_operand.vmem [shape: bf16[4,192,24], index: 10, kind: input, shape index: {}]   ;;  %s18202_s11 = inlined_call_operand.vmem [shape: f32[1,24], index: 11, kind: input, shape index: {}]   ;;  %s18203_s12 = inlined_call_operand.vmem [shape: f32[1,24], index: 12, kind: input, shape index: {}]   ;;  %s18204_s13 = inlined_call_operand.vmem [shape: bf16[4,96,12], index: 13, kind: input, shape index: {}]   ;;  %s18205_s14 = inlined_call_operand.vmem [shape: f32[1,12], index: 14, kind: input, shape index: {}]   ;;  %s18206_s15 = inlined_call_operand.vmem [shape: f32[1,12], index: 15, kind: input, shape index: {}]   ;;  %s18207_s16 = inlined_call_operand.vmem [shape: bf16[4,48,3], index: 16, kind: input, shape index: {}]   ;;  %s18208_s17 = inlined_call_operand.vmem [shape: f32[1,3], index: 17, kind: input, shape index: {}]   ;;  %s18209_s18 = inlined_call_operand.vmem [shape: f32[1,3], index: 18, kind: input, shape index: {}]   ;;  %s18210_s19 = inlined_call_operand.vmem [shape: f32[2,16,16,3], index: 19, kind: output, shape index: {}]  }
   0x1   :  { %18314 = sst [smem:[#allocation32_spill]] %s18191_s0  ;;  %s18213_s30 = smov 15   ;;  %vm1707_vm4 = vcmask 121856   ;;  %vm1724_vm5 = vcmask 146432   ;;  %vm1741_vm6 = vcmask 171008   ;;  %vm1758_vm7 = vcmask 195584  }
   0x2   :  { %18315 = sst [smem:[#allocation33_spill]] %s18192_s1  ;;  %s18328_s20 = sld [smem:[#allocation32_spill]]  ;;  %vm1775_vm8 = vcmask 220160   ;;  %vm1792_vm9 = vcmask 244736   ;;  %vm1809_vm10 = vcmask 269312   ;;  %vm1826_vm11 = vcmask 293888  }
   0x3   :  { %18316 = sst [smem:[#allocation34_spill]] %s18193_s2  ;;  %s18235_s1 = smov 3   ;;  %vm1843_vm12 = vcmask 318464   ;;  %vm1860_vm13 = vcmask 343040   ;;  %vm1877_vm14 = vcmask 367616   ;;  %vm1926_vm15 = vcmask 392192  }
   0x4   :  { %18317 = sst [smem:[#allocation35_spill]] %s18194_s3  ;;  %s18229_s2 = smov 12  }
   0x5   :  { %18318 = sst [smem:[#allocation36_spill]] %s18201_s10  ;;  %s18217_s0 = smov 18  }
   0x6   :  { %18319 = sst [smem:[#allocation37_spill]] %s18202_s11  ;;  %s18331_s26 = sld [smem:[#allocation33_spill]] }
   0x7   :  { %18320 = sst [smem:[#allocation38_spill]] %s18203_s12  ;;  %s18241_s29 = smov 45  }
   0x8   :  { %18321 = sst [smem:[#allocation39_spill]] %s18204_s13  ;;  %v9910_v0 = vld [vmem:[%s18328_s20 + $0x2] ss:$2 sm:$0xff]  ;;  %v9911_v1 = vld [vmem:[%s18328_s20 + $0x32] ss:$2 sm:$0xff]  ;;  %s18334_s28 = smov 24  }
   0x9   :  { %18322 = sst [smem:[#allocation40_spill]] %s18205_s14  ;;  %v9894_v2 = vld [vmem:[%s18328_s20 + $0x1] ss:$2 sm:$0xff]  ;;  %v10879_v3 = vpack.i.bf16 %v9911_v1, %v9910_v0  ;;  %v9895_v4 = vld [vmem:[%s18328_s20 + $0x31] ss:$2 sm:$0xff]  ;;  %s18341_s14 = smov 33  }
   0xa   :  { %18323 = sst [smem:[#allocation41_spill]] %s18206_s15  ;;  %v9912_v5 = vld [vmem:[%s18328_s20 + $0x62] ss:$2 sm:$0xff]  ;;  %v9913_v6 = vld [vmem:[%s18328_s20 + $0x92] ss:$2 sm:$0xff]  ;;  %v10869_v7 = vpack.i.bf16 %v9895_v4, %v9894_v2  ;;  %s18340_s15 = smov 9  }
   0xb   :  { %18324 = sst [smem:[#allocation42_spill]] %s18207_s16  ;;  %v9896_v8 = vld [vmem:[%s18328_s20 + $0x61] ss:$2 sm:$0xff]  ;;  %v9897_v9 = vld [vmem:[%s18328_s20 + $0x91] ss:$2 sm:$0xff]  ;;  %10880 = vrot.lane.b32.xlu1 %v10879_v3, %s18233_s21  ;;  %v10884_v10 = vpack.i.bf16 %v9913_v6, %v9912_v5  ;;  %s18339_s16 = smov 30  }
   0xc   :  { %18325 = sst [smem:[#allocation43_spill]] %s18208_s17  ;;  %10870 = vrot.lane.b32.xlu0 %v10869_v7, %s18235_s1  ;;  %v10874_v11 = vpack.i.bf16 %v9897_v9, %v9896_v8  ;;  %v9928_v12 = vld [vmem:[%s18328_s20 + $0x63] ss:$2 sm:$0xff]  ;;  %v9929_v13 = vld [vmem:[%s18328_s20 + $0x93] ss:$2 sm:$0xff]  ;;  %s18338_s17 = smov 6  }
   0xd   :  { %18326 = sst [smem:[#allocation44_spill]] %s18209_s18  ;;  %v9926_v14 = vld [vmem:[%s18328_s20 + $0x3] ss:$2 sm:$0xff]  ;;  %v9927_v15 = vld [vmem:[%s18328_s20 + $0x33] ss:$2 sm:$0xff]  ;;  %v10894_v16 = vpack.i.bf16 %v9929_v13, %v9928_v12  ;;  %s18337_s18 = smov 27  }
   0xe   :  { %18327 = sst [smem:[#allocation45_spill]] %s18210_s19  ;;  %v10889_v17 = vpack.i.bf16 %v9927_v15, %v9926_v14  ;;  %v9944_v18 = vld [vmem:[%s18328_s20 + $0x78] ss:$2 sm:$0xff]  ;;  %v9945_v19 = vld [vmem:[%s18328_s20 + $0xa8] ss:$2 sm:$0xff]  ;;  %s18336_s19 = smov 45  }
   0xf   :  { %10885 = vrot.lane.b32.xlu1 %v10884_v10, %s18233_s21  ;;  %v9942_v20 = vld [vmem:[%s18328_s20 + $0x18] ss:$2 sm:$0xff]  ;;  %v9943_v21 = vld [vmem:[%s18328_s20 + $0x48] ss:$2 sm:$0xff]  ;;  %v10904_v22 = vpack.i.bf16 %v9945_v19, %v9944_v18  ;;  %v9960_v24 = vld [vmem:[%s18328_s20 + $0x79] ss:$2 sm:$0xff] }
  0x10   :  { %10875 = vrot.lane.b32.xlu0 %v10874_v11, %s18235_s1  ;;  %v10899_v23 = vpack.i.bf16 %v9943_v21, %v9942_v20  ;;  %v9961_v25 = vld [vmem:[%s18328_s20 + $0xa9] ss:$2 sm:$0xff]  ;;  %v9958_v26 = vld [vmem:[%s18328_s20 + $0x19] ss:$2 sm:$0xff]  ;;  %v9976_v30 = vld [vmem:[%s18328_s20 + $0x7a] ss:$2 sm:$0xff] }
  0x11   :  { %v9959_v27 = vld [vmem:[%s18328_s20 + $0x49] ss:$2 sm:$0xff]  ;;  %v10914_v28 = vpack.i.bf16 %v9961_v25, %v9960_v24  ;;  %v9977_v31 = vld [vmem:[%s18328_s20 + $0xaa] ss:$2 sm:$0xff]  ;;  %v9974_v32 = vld [vmem:[%s18328_s20 + $0x1a] ss:$2 sm:$0xff] }
  0x12   :  { %v10909_v29 = vpack.i.bf16 %v9959_v27, %v9958_v26  ;;  %v9975_v33 = vld [vmem:[%s18328_s20 + $0x4a] ss:$2 sm:$0xff]  ;;  %v10924_v34 = vpack.i.bf16 %v9977_v31, %v9976_v30  ;;  %v9992_v36 = vld [vmem:[%s18328_s20 + $0x7b] ss:$2 sm:$0xff]  ;;  %v9993_v37 = vld [vmem:[%s18328_s20 + $0xab] ss:$2 sm:$0xff] }
  0x13   :  { %10895 = vrot.lane.b32.xlu1 %v10894_v16, %s18225_s25  ;;  %v10919_v35 = vpack.i.bf16 %v9975_v33, %v9974_v32  ;;  %v9990_v38 = vld [vmem:[%s18328_s20 + $0x1b] ss:$2 sm:$0xff]  ;;  %v9991_v39 = vld [vmem:[%s18328_s20 + $0x4b] ss:$2 sm:$0xff]  ;;  %v10934_v40 = vpack.i.bf16 %v9993_v37, %v9992_v36  ;;  %v10006_v44 = vld [vmem:[%s18328_s20 + $0x30] ss:$2 sm:$0xff] }
  0x14   :  { %10890 = vrot.lane.b32.xlu0 %v10889_v17, %s18225_s25  ;;  %v10929_v41 = vpack.i.bf16 %v9991_v39, %v9990_v38  ;;  %v9898_v42 = vld [vmem:[%s18328_s20 + $0xc1] ss:$2 sm:$0xff]  ;;  %v9899_v43 = vld [vmem:[%s18328_s20 + $0xf1] ss:$2 sm:$0xff]  ;;  %v10007_v45 = vld [vmem:[%s18328_s20 + $0x60] ss:$2 sm:$0xff] }
  0x15   :  { %v10944_v46 = vpack.i.bf16 %v9899_v43, %v9898_v42  ;;  %v10939_v47 = vpack.i.bf16 %v10007_v45, %v10006_v44  ;;  %v10022_v48 = vld [vmem:[%s18328_s20 + $0x31] ss:$2 sm:$0xff]  ;;  %v10023_v49 = vld [vmem:[%s18328_s20 + $0x61] ss:$2 sm:$0xff]  ;;  %v10008_v50 = vld [vmem:[%s18328_s20 + $0x90] ss:$2 sm:$0xff] }
  0x16   :  { %v10009_v51 = vld [vmem:[%s18328_s20 + $0xc0] ss:$2 sm:$0xff]  ;;  %v10954_v52 = vpack.i.bf16 %v10023_v49, %v10022_v48  ;;  %v9900_v56 = vld [vmem:[%s18328_s20 + $0x121] ss:$2 sm:$0xff]  ;;  %v9901_v57 = vld [vmem:[%s18328_s20 + $0x151] ss:$2 sm:$0xff] }
  0x17   :  { %10905 = vrot.lane.b32.xlu1 %v10904_v22, %s18229_s2  ;;  %v10949_v53 = vpack.i.bf16 %v10009_v51, %v10008_v50  ;;  %v9914_v54 = vld [vmem:[%s18328_s20 + $0xc2] ss:$2 sm:$0xff]  ;;  %v9915_v55 = vld [vmem:[%s18328_s20 + $0xf2] ss:$2 sm:$0xff]  ;;  %v10959_v59 = vpack.i.bf16 %v9901_v57, %v9900_v56  ;;  %v10024_v62 = vld [vmem:[%s18328_s20 + $0x91] ss:$2 sm:$0xff] }
  0x18   :  { %10900 = vrot.lane.b32.xlu0 %v10899_v23, %s18229_s2  ;;  %v10964_v58 = vpack.i.bf16 %v9915_v55, %v9914_v54  ;;  %v10038_v60 = vld [vmem:[%s18328_s20 + $0x32] ss:$2 sm:$0xff]  ;;  %v10039_v61 = vld [vmem:[%s18328_s20 + $0x62] ss:$2 sm:$0xff]  ;;  %v10025_v63 = vld [vmem:[%s18328_s20 + $0xc1] ss:$2 sm:$0xff] }
  0x19   :  { %v10974_v0 = vpack.i.bf16 %v10039_v61, %v10038_v60  ;;  %v10969_v1 = vpack.i.bf16 %v10025_v63, %v10024_v62  ;;  %v9930_v2 = vld [vmem:[%s18328_s20 + $0xc3] ss:$2 sm:$0xff]  ;;  %v9931_v3 = vld [vmem:[%s18328_s20 + $0xf3] ss:$2 sm:$0xff]  ;;  %v9916_v4 = vld [vmem:[%s18328_s20 + $0x122] ss:$2 sm:$0xff] }
  0x1a   :  { %v9917_v5 = vld [vmem:[%s18328_s20 + $0x152] ss:$2 sm:$0xff]  ;;  %v10984_v6 = vpack.i.bf16 %v9931_v3, %v9930_v2  ;;  %v10054_v8 = vld [vmem:[%s18328_s20 + $0x33] ss:$2 sm:$0xff]  ;;  %v10055_v9 = vld [vmem:[%s18328_s20 + $0x63] ss:$2 sm:$0xff] }
  0x1b   :  { %10915 = vrot.lane.b32.xlu1 %v10914_v28, %s18213_s30  ;;  %v10979_v7 = vpack.i.bf16 %v9917_v5, %v9916_v4  ;;  %v10040_v10 = vld [vmem:[%s18328_s20 + $0x92] ss:$2 sm:$0xff]  ;;  %v10041_v11 = vld [vmem:[%s18328_s20 + $0xc2] ss:$2 sm:$0xff]  ;;  %v10994_v12 = vpack.i.bf16 %v10055_v9, %v10054_v8  ;;  %v9932_v16 = vld [vmem:[%s18328_s20 + $0x123] ss:$2 sm:$0xff] }
  0x1c   :  { %10910 = vrot.lane.b32.xlu0 %v10909_v29, %s18213_s30  ;;  %s18215_s30 = smov 21   ;;  %v10989_v13 = vpack.i.bf16 %v10041_v11, %v10040_v10  ;;  %v9946_v14 = vld [vmem:[%s18328_s20 + $0xd8] ss:$2 sm:$0xff]  ;;  %v9947_v15 = vld [vmem:[%s18328_s20 + $0x108] ss:$2 sm:$0xff]  ;;  %s18342_s13 = smov 12  }
  0x1d   :  { %v9933_v17 = vld [vmem:[%s18328_s20 + $0x153] ss:$2 sm:$0xff]  ;;  %v11004_v18 = vpack.i.bf16 %v9947_v15, %v9946_v14  ;;  %v10070_v20 = vld [vmem:[%s18328_s20 + $0x48] ss:$2 sm:$0xff]  ;;  %v10071_v21 = vld [vmem:[%s18328_s20 + $0x78] ss:$2 sm:$0xff] }
  0x1e   :  { %v10999_v19 = vpack.i.bf16 %v9933_v17, %v9932_v16  ;;  %v10056_v22 = vld [vmem:[%s18328_s20 + $0x93] ss:$2 sm:$0xff]  ;;  %v10057_v23 = vld [vmem:[%s18328_s20 + $0xc3] ss:$2 sm:$0xff]  ;;  %v11014_v24 = vpack.i.bf16 %v10071_v21, %v10070_v20  ;;  %v9948_v28 = vld [vmem:[%s18328_s20 + $0x138] ss:$2 sm:$0xff] }
  0x1f   :  { %10925 = vrot.lane.b32.xlu1 %v10924_v34, %s18217_s0  ;;  %v11009_v25 = vpack.i.bf16 %v10057_v23, %v10056_v22  ;;  %v9962_v26 = vld [vmem:[%s18328_s20 + $0xd9] ss:$2 sm:$0xff]  ;;  %v9963_v27 = vld [vmem:[%s18328_s20 + $0x109] ss:$2 sm:$0xff]  ;;  %v9949_v29 = vld [vmem:[%s18328_s20 + $0x168] ss:$2 sm:$0xff] }
  0x20   :  { %10920 = vrot.lane.b32.xlu0 %v10919_v35, %s18217_s0  ;;  %s18221_s0 = smov 27   ;;  %v11024_v30 = vpack.i.bf16 %v9963_v27, %v9962_v26  ;;  %v11019_v31 = vpack.i.bf16 %v9949_v29, %v9948_v28  ;;  %v10086_v32 = vld [vmem:[%s18328_s20 + $0x49] ss:$2 sm:$0xff]  ;;  %v10087_v33 = vld [vmem:[%s18328_s20 + $0x79] ss:$2 sm:$0xff]  ;;  %s18343_s12 = smov 36  }
  0x21   :  { %v10072_v34 = vld [vmem:[%s18328_s20 + $0xa8] ss:$2 sm:$0xff]  ;;  %v10073_v35 = vld [vmem:[%s18328_s20 + $0xd8] ss:$2 sm:$0xff]  ;;  %v11034_v36 = vpack.i.bf16 %v10087_v33, %v10086_v32  ;;  %v9994_v49 = vld [vmem:[%s18328_s20 + $0xdb] ss:$2 sm:$0xff] }
  0x22   :  { %v11029_v37 = vpack.i.bf16 %v10073_v35, %v10072_v34  ;;  %v9978_v38 = vld [vmem:[%s18328_s20 + $0xda] ss:$2 sm:$0xff]  ;;  %v9979_v39 = vld [vmem:[%s18328_s20 + $0x10a] ss:$2 sm:$0xff]  ;;  %v9995_v50 = vld [vmem:[%s18328_s20 + $0x10b] ss:$2 sm:$0xff] }
  0x23   :  { %10935 = vrot.lane.b32.xlu1 %v10934_v40, %s18215_s30  ;;  %v9964_v40 = vld [vmem:[%s18328_s20 + $0x139] ss:$2 sm:$0xff]  ;;  %v11044_v42 = vpack.i.bf16 %v9979_v39, %v9978_v38  ;;  %v10102_v44 = vld [vmem:[%s18328_s20 + $0x4a] ss:$2 sm:$0xff]  ;;  %v10103_v45 = vld [vmem:[%s18328_s20 + $0x7a] ss:$2 sm:$0xff]  ;;  %v11064_v55 = vpack.i.bf16 %v9995_v50, %v9994_v49 }
  0x24   :  { %10930 = vrot.lane.b32.xlu0 %v10929_v41, %s18215_s30  ;;  %s18219_s30 = smov 24   ;;  %v9965_v41 = vld [vmem:[%s18328_s20 + $0x169] ss:$2 sm:$0xff]  ;;  %v11054_v48 = vpack.i.bf16 %v10103_v45, %v10102_v44  ;;  %v9981_v54 = vld [vmem:[%s18328_s20 + $0x16a] ss:$2 sm:$0xff]  ;;  %s18344_s11 = smov 39  }
  0x25   :  { %v11039_v43 = vpack.i.bf16 %v9965_v41, %v9964_v40  ;;  %v11950_v56 = vld [vmem:[%s18331_s26 + $0x8] sm:$0xff]   ;;  %v11951_v62 = vld [vmem:[%s18331_s26 + $0x10] sm:$0xff]   ;;  %v9951_v44 = vld [vmem:[%s18328_s20 + $0x1f8] ss:$2 sm:$0xff]  ;;  %s18385_s24 = sld [smem:[#allocation35_spill]]  ;;  %s12381_s10 = smov 48  }
  0x26   :  { %v10104_v60 = vld [vmem:[%s18328_s20 + $0xaa] ss:$2 sm:$0xff]  ;;  %v10105_v61 = vld [vmem:[%s18328_s20 + $0xda] ss:$2 sm:$0xff]  ;;  %v9996_v3 = vld [vmem:[%s18328_s20 + $0x13b] ss:$2 sm:$0xff] }
  0x27   :  { %10945 = vrot.lane.b32.xlu1 %v10944_v46, %s18235_s1  ;;  %v10088_v46 = vld [vmem:[%s18328_s20 + $0xa9] ss:$2 sm:$0xff]  ;;  %v10011_v2 = vld [vmem:[%s18328_s20 + $0x120] ss:$2 sm:$0xff]  ;;  %v10012_v15 = vld [vmem:[%s18328_s20 + $0x150] ss:$2 sm:$0xff] }
  0x28   :  { %10940 = vrot.lane.b32.xlu0 %v10939_v47, %s18219_s30  ;;  %v10089_v47 = vld [vmem:[%s18328_s20 + $0xd9] ss:$2 sm:$0xff]  ;;  %v10013_v16 = vld [vmem:[%s18328_s20 + $0x180] ss:$2 sm:$0xff]  ;;  %s12382_s3 = smov 60   ;;  %s12388_s27 = smov 96  }
  0x29   :  { %v11049_v51 = vpack.i.bf16 %v10089_v47, %v10088_v46  ;;  %v9997_v4 = vld [vmem:[%s18328_s20 + $0x16b] ss:$2 sm:$0xff]  ;;  %v10121_v10 = vld [vmem:[%s18328_s20 + $0xdb] ss:$2 sm:$0xff]  ;;  %v9919_v20 = vld [vmem:[%s18328_s20 + $0x1e2] ss:$2 sm:$0xff] }
  0x2a   :  { %v9903_v8 = vld [vmem:[%s18328_s20 + $0x1e1] ss:$2 sm:$0xff]  ;;  %v9904_v21 = vld [vmem:[%s18328_s20 + $0x211] ss:$2 sm:$0xff]  ;;  %v10043_v26 = vld [vmem:[%s18328_s20 + $0x122] ss:$2 sm:$0xff] }
  0x2b   :  { %10955 = vrot.lane.b32.xlu1 %v10954_v52, %s18221_s0  ;;  %v11949_v52 = vld [vmem:[%s18331_s26] sm:$0xff]   ;;  %v10120_v9 = vld [vmem:[%s18328_s20 + $0xab] ss:$2 sm:$0xff]  ;;  %v10074_v49 = vld [vmem:[%s18328_s20 + $0x108] ss:$2 sm:$0xff]  ;;  %s12394_s22 = smov 56  }
  0x2c   :  { %10950 = vrot.lane.b32.xlu0 %v10949_v53, %s18219_s30  ;;  %s18223_s30 = smov 30   ;;  %v9980_v53 = vld [vmem:[%s18328_s20 + $0x13a] ss:$2 sm:$0xff]  ;;  %10630 = vmatprep.subr.bf16.mxu0 %v11949_v52  ;;  %v10027_v14 = vld [vmem:[%s18328_s20 + $0x121] ss:$2 sm:$0xff]  ;;  %s12395_s26 = smov 80  }
  0x2d   :  { %10631 = vmatpush3.bf16.msra.mxu0 %v11949_v52  ;;  %v11059_v57 = vpack.i.bf16 %v9981_v54, %v9980_v53  ;;  %v9905_v22 = vld [vmem:[%s18328_s20 + $0x241] ss:$2 sm:$0xff]  ;;  %v10028_v27 = vld [vmem:[%s18328_s20 + $0x151] ss:$2 sm:$0xff]  ;;  %v9920_v33 = vld [vmem:[%s18328_s20 + $0x212] ss:$2 sm:$0xff] }
  0x2e   :  { %10632 = vmatprep.subr.bf16.mxu0 %v11950_v56  ;;  %v10029_v28 = vld [vmem:[%s18328_s20 + $0x181] ss:$2 sm:$0xff]  ;;  %v9921_v34 = vld [vmem:[%s18328_s20 + $0x242] ss:$2 sm:$0xff]  ;;  %v10044_v39 = vld [vmem:[%s18328_s20 + $0x152] ss:$2 sm:$0xff] }
  0x2f   :  { %10965 = vrot.lane.b32.xlu1 %v10964_v58, %s18233_s21  ;;  %v10118_v58 = vld [vmem:[%s18328_s20 + $0x4b] ss:$2 sm:$0xff]  ;;  %v10045_v40 = vld [vmem:[%s18328_s20 + $0x182] ss:$2 sm:$0xff] }
  0x30   :  { %10960 = vrot.lane.b32.xlu0 %v10959_v59, %s18235_s1  ;;  %v10119_v59 = vld [vmem:[%s18328_s20 + $0x7b] ss:$2 sm:$0xff]  ;;  %v10075_v50 = vld [vmem:[%s18328_s20 + $0x138] ss:$2 sm:$0xff]  ;;  %s12383_s1 = smov 120  }
  0x31   :  { %v11074_v63 = vpack.i.bf16 %v10119_v59, %v10118_v58  ;;  %10633 = vmatpush3.bf16.msra.mxu0 %v11950_v56  ;;  %v9935_v32 = vld [vmem:[%s18328_s20 + $0x1e3] ss:$2 sm:$0xff]  ;;  %v9936_v45 = vld [vmem:[%s18328_s20 + $0x213] ss:$2 sm:$0xff]  ;;  %v11164_v53 = vpack.i.bf16 %v10075_v50, %v10074_v49  ;;  %v9952_v58 = vld [vmem:[%s18328_s20 + $0x228] ss:$2 sm:$0xff] }
  0x32   :  { %10634 = vmatprep.subr.bf16.mxu0 %v11951_v62  ;;  %v10059_v38 = vld [vmem:[%s18328_s20 + $0x123] ss:$2 sm:$0xff]  ;;  %v9953_v59 = vld [vmem:[%s18328_s20 + $0x258] ss:$2 sm:$0xff] }
  0x33   :  { %10975 = vrot.lane.b32.xlu1 %v10974_v0, %s18223_s30  ;;  %v11069_v0 = vpack.i.bf16 %v10105_v61, %v10104_v60  ;;  %v9937_v46 = vld [vmem:[%s18328_s20 + $0x243] ss:$2 sm:$0xff] }
  0x34   :  { %10970 = vrot.lane.b32.xlu0 %v10969_v1, %s18221_s0  ;;  %s18227_s0 = smov 33   ;;  %v10010_v1 = vld [vmem:[%s18328_s20 + $0xf0] ss:$2 sm:$0xff]  ;;  %v10061_v52 = vld [vmem:[%s18328_s20 + $0x183] ss:$2 sm:$0xff] }
  0x35   :  { %v11084_v5 = vpack.i.bf16 %v10011_v2, %v10010_v1  ;;  %10635 = vmatpush3.bf16.msra.mxu0 %v11951_v62  ;;  %v9967_v56 = vld [vmem:[%s18328_s20 + $0x1f9] ss:$2 sm:$0xff]  ;;  %v11169_v62 = vpack.i.bf16 %v9953_v59, %v9952_v58  ;;  %v10076_v2 = vld [vmem:[%s18328_s20 + $0x168] ss:$2 sm:$0xff] }
  0x36   :  { %v10124_v50 = vld [vmem:[%s18328_s20 + $0x16b] ss:$2 sm:$0xff]  ;;  %v10016_v59 = vld [vmem:[%s18328_s20 + $0x240] ss:$2 sm:$0xff] }
  0x37   :  { %10985 = vrot.lane.b32.xlu1 %v10984_v6, %s18225_s25  ;;  %v11079_v6 = vpack.i.bf16 %v9997_v4, %v9996_v3  ;;  %v10077_v3 = vld [vmem:[%s18328_s20 + $0x198] ss:$2 sm:$0xff] }
  0x38   :  { %10980 = vrot.lane.b32.xlu0 %v10979_v7, %s18233_s21  ;;  %s18237_s21 = smov 42   ;;  %v9902_v7 = vld [vmem:[%s18328_s20 + $0x1b1] ss:$2 sm:$0xff] }
  0x39   :  { %v11094_v11 = vpack.i.bf16 %v9903_v8, %v9902_v7  ;;  %v9982_v7 = vld [vmem:[%s18328_s20 + $0x1ca] ss:$2 sm:$0xff]  ;;  %v9983_v8 = vld [vmem:[%s18328_s20 + $0x1fa] ss:$2 sm:$0xff] }
  0x3b   :  { %10995 = vrot.lane.b32.xlu1 %v10994_v12, %s18227_s0  ;;  %v11089_v12 = vpack.i.bf16 %v10121_v10, %v10120_v9  ;;  %v9968_v10 = vld [vmem:[%s18328_s20 + $0x229] ss:$2 sm:$0xff] }
  0x3c   :  { %10990 = vrot.lane.b32.xlu0 %v10989_v13, %s18223_s30  ;;  %s18231_s30 = smov 36   ;;  %v10026_v13 = vld [vmem:[%s18328_s20 + $0xf1] ss:$2 sm:$0xff] }
  0x3d   :  { %v11104_v17 = vpack.i.bf16 %v10027_v14, %v10026_v13  ;;  %v11194_v13 = vpack.i.bf16 %v9983_v8, %v9982_v7  ;;  %v9909_v7 = vld [vmem:[%s18328_s20 + $0x301] ss:$2 sm:$0xff] }
  0x3f   :  { %11005 = vrot.lane.b32.xlu1 %v11004_v18, %s18229_s2  ;;  %v11099_v18 = vpack.i.bf16 %v10013_v16, %v10012_v15  ;;  %v10106_v15 = vld [vmem:[%s18328_s20 + $0x10a] ss:$2 sm:$0xff]  ;;  %v10107_v16 = vld [vmem:[%s18328_s20 + $0x13a] ss:$2 sm:$0xff] }
  0x40   :  { %11000 = vrot.lane.b32.xlu0 %v10999_v19, %s18225_s25  ;;  %s18329_s25 = smov 15   ;;  %v9918_v19 = vld [vmem:[%s18328_s20 + $0x1b2] ss:$2 sm:$0xff] }
  0x41   :  { %v11114_v23 = vpack.i.bf16 %v9919_v20, %v9918_v19  ;;  %v10093_v19 = vld [vmem:[%s18328_s20 + $0x199] ss:$2 sm:$0xff] }
  0x43   :  { %11015 = vrot.lane.b32.xlu1 %v11014_v24, %s18231_s30  ;;  %v11109_v24 = vpack.i.bf16 %v9905_v22, %v9904_v21  ;;  %v11204_v21 = vpack.i.bf16 %v10107_v16, %v10106_v15  ;;  %v10032_v16 = vld [vmem:[%s18328_s20 + $0x241] ss:$2 sm:$0xff] }
  0x44   :  { %11010 = vrot.lane.b32.xlu0 %v11009_v25, %s18227_s0  ;;  %s18239_s0 = smov 39   ;;  %v10042_v25 = vld [vmem:[%s18328_s20 + $0xf2] ss:$2 sm:$0xff] }
  0x45   :  { %v11124_v29 = vpack.i.bf16 %v10043_v26, %v10042_v25  ;;  %v9984_v26 = vld [vmem:[%s18328_s20 + $0x22a] ss:$2 sm:$0xff] }
  0x47   :  { %11025 = vrot.lane.b32.xlu1 %v11024_v30, %s18329_s25  ;;  %v11119_v30 = vpack.i.bf16 %v10029_v28, %v10028_v27  ;;  %v9985_v27 = vld [vmem:[%s18328_s20 + $0x25a] ss:$2 sm:$0xff] }
  0x48   :  { %11020 = vrot.lane.b32.xlu0 %v11019_v31, %s18229_s2  ;;  %s18330_s2 = smov 18   ;;  %v9934_v31 = vld [vmem:[%s18328_s20 + $0x1b3] ss:$2 sm:$0xff] }
  0x49   :  { %v11134_v35 = vpack.i.bf16 %v9935_v32, %v9934_v31  ;;  %v10122_v31 = vld [vmem:[%s18328_s20 + $0x10b] ss:$2 sm:$0xff]  ;;  %v10123_v32 = vld [vmem:[%s18328_s20 + $0x13b] ss:$2 sm:$0xff] }
  0x4b   :  { %11035 = vrot.lane.b32.xlu1 %v11034_v36, %s18239_s0  ;;  %v11129_v36 = vpack.i.bf16 %v9921_v34, %v9920_v33  ;;  %v10108_v34 = vld [vmem:[%s18328_s20 + $0x16a] ss:$2 sm:$0xff] }
  0x4c   :  { %11030 = vrot.lane.b32.xlu0 %v11029_v37, %s18231_s30  ;;  %s18333_s30 = smov 42   ;;  %v10058_v37 = vld [vmem:[%s18328_s20 + $0xf3] ss:$2 sm:$0xff] }
  0x4d   :  { %v11144_v41 = vpack.i.bf16 %v10059_v38, %v10058_v37  ;;  %v11224_v37 = vpack.i.bf16 %v10123_v32, %v10122_v31 }
  0x4f   :  { %11045 = vrot.lane.b32.xlu1 %v11044_v42, %s18330_s2  ;;  %v11139_v42 = vpack.i.bf16 %v10045_v40, %v10044_v39  ;;  %v10014_v39 = vld [vmem:[%s18328_s20 + $0x1e0] ss:$2 sm:$0xff]  ;;  %v10015_v40 = vld [vmem:[%s18328_s20 + $0x210] ss:$2 sm:$0xff] }
  0x50   :  { %11040 = vrot.lane.b32.xlu0 %v11039_v43, %s18329_s25  ;;  %v9950_v43 = vld [vmem:[%s18328_s20 + $0x1c8] ss:$2 sm:$0xff] }
  0x51   :  { %v11154_v47 = vpack.i.bf16 %v9951_v44, %v9950_v43  ;;  %v10001_v43 = vld [vmem:[%s18328_s20 + $0x25b] ss:$2 sm:$0xff] }
  0x53   :  { %11055 = vrot.lane.b32.xlu1 %v11054_v48, %s18237_s21  ;;  %v11149_v48 = vpack.i.bf16 %v9937_v46, %v9936_v45  ;;  %v11234_v45 = vpack.i.bf16 %v10015_v40, %v10014_v39  ;;  %v10049_v39 = vld [vmem:[%s18328_s20 + $0x272] ss:$2 sm:$0xff]  ;;  %s12385_s21 = smov 72  }
  0x54   :  { %11050 = vrot.lane.b32.xlu0 %v11049_v51, %s18239_s0  ;;  %s18332_s0 = smov 21   ;;  %v10060_v51 = vld [vmem:[%s18328_s20 + $0x153] ss:$2 sm:$0xff] }
  0x55   :  { %v11159_v54 = vpack.i.bf16 %v10061_v52, %v10060_v51  ;;  %v10125_v51 = vld [vmem:[%s18328_s20 + $0x19b] ss:$2 sm:$0xff] }
  0x57   :  { %11065 = vrot.lane.b32.xlu1 %v11064_v55, %s18332_s0  ;;  %v9966_v55 = vld [vmem:[%s18328_s20 + $0x1c9] ss:$2 sm:$0xff] }
  0x58   :  { %11060 = vrot.lane.b32.xlu0 %v11059_v57, %s18330_s2  ;;  %v11174_v61 = vpack.i.bf16 %v9967_v56, %v9966_v55  ;;  %v10030_v55 = vld [vmem:[%s18328_s20 + $0x1e1] ss:$2 sm:$0xff]  ;;  %v10031_v56 = vld [vmem:[%s18328_s20 + $0x211] ss:$2 sm:$0xff] }
  0x5b   :  { %11075 = vrot.lane.b32.xlu1 %v11074_v63, %s18241_s29  ;;  %s18335_s29 = smov 3   ;;  %v10090_v63 = vld [vmem:[%s18328_s20 + $0x109] ss:$2 sm:$0xff] }
  0x5c   :  { %11070 = vrot.lane.b32.xlu0 %v11069_v0, %s18333_s30  ;;  %v10091_v0 = vld [vmem:[%s18328_s20 + $0x139] ss:$2 sm:$0xff] }
  0x5f   :  { %11085 = vrot.lane.b32.xlu1 %v11084_v5, %s18334_s28  ;;  %v11184_v5 = vpack.i.bf16 %v10091_v0, %v10090_v63  ;;  %v11254_v63 = vpack.i.bf16 %v10031_v56, %v10030_v55  ;;  %v13193_v55 = vld [vmem:[%s18328_s20 + $0x273] ss:$2 sm:$0xff] }
  0x60   :  { %11080 = vrot.lane.b32.xlu0 %v11079_v6, %s18332_s0  ;;  %v11179_v6 = vpack.i.bf16 %v10077_v3, %v10076_v2  ;;  %v9922_v2 = vld [vmem:[%s18328_s20 + $0x272] ss:$2 sm:$0xff]  ;;  %v9923_v3 = vld [vmem:[%s18328_s20 + $0x2a2] ss:$2 sm:$0xff]  ;;  %v13198_v56 = vld [vmem:[%s18328_s20 + $0x289] ss:$2 sm:$0xff] }
  0x63   :  { %11095 = vrot.lane.b32.xlu1 %v11094_v11, %s18335_s29  ;;  %v9969_v11 = vld [vmem:[%s18328_s20 + $0x259] ss:$2 sm:$0xff] }
  0x64   :  { %11090 = vrot.lane.b32.xlu0 %v11089_v12, %s18336_s19  ;;  %v11189_v14 = vpack.i.bf16 %v9969_v11, %v9968_v10  ;;  %v11264_v10 = vpack.i.bf16 %v9923_v3, %v9922_v2  ;;  %v13220_v2 = vld [vmem:[%s18328_s20 + $0x1f9] ss:$2 sm:$0xff]  ;;  %v13225_v3 = vld [vmem:[%s18328_s20 + $0x229] ss:$2 sm:$0xff] }
  0x67   :  { %11105 = vrot.lane.b32.xlu1 %v11104_v17, %s18337_s18 }
  0x68   :  { %11100 = vrot.lane.b32.xlu0 %v11099_v18, %s18334_s28  ;;  %v10092_v18 = vld [vmem:[%s18328_s20 + $0x169] ss:$2 sm:$0xff] }
  0x69   :  { %v11199_v22 = vpack.i.bf16 %v10093_v19, %v10092_v18  ;;  %v10033_v18 = vld [vmem:[%s18328_s20 + $0x271] ss:$2 sm:$0xff] }
  0x6b   :  { %11115 = vrot.lane.b32.xlu1 %v11114_v23, %s18338_s17  ;;  %v9998_v23 = vld [vmem:[%s18328_s20 + $0x1cb] ss:$2 sm:$0xff] }
  0x6c   :  { %11110 = vrot.lane.b32.xlu0 %v11109_v24, %s18335_s29  ;;  %v9999_v24 = vld [vmem:[%s18328_s20 + $0x1fb] ss:$2 sm:$0xff] }
  0x6f   :  { %11125 = vrot.lane.b32.xlu1 %v11124_v29, %s18339_s16  ;;  %v11214_v29 = vpack.i.bf16 %v9999_v24, %v9998_v23  ;;  %v9938_v23 = vld [vmem:[%s18328_s20 + $0x273] ss:$2 sm:$0xff]  ;;  %v9939_v24 = vld [vmem:[%s18328_s20 + $0x2a3] ss:$2 sm:$0xff] }
  0x70   :  { %11120 = vrot.lane.b32.xlu0 %v11119_v30, %s18337_s18  ;;  %v11209_v30 = vpack.i.bf16 %v9985_v27, %v9984_v26  ;;  %v9924_v27 = vld [vmem:[%s18328_s20 + $0x2d2] ss:$2 sm:$0xff]  ;;  %v11284_v31 = vpack.i.bf16 %v9939_v24, %v9938_v23 }
  0x71   :  { %v169_v23 = vld [vmem:[%s18328_s20] ss:$2 sm:$0xff] }
  0x73   :  { %11135 = vrot.lane.b32.xlu1 %v11134_v35, %s18340_s15  ;;  %v10109_v35 = vld [vmem:[%s18328_s20 + $0x19a] ss:$2 sm:$0xff] }
  0x74   :  { %11130 = vrot.lane.b32.xlu0 %v11129_v36, %s18338_s17  ;;  %v11219_v38 = vpack.i.bf16 %v10109_v35, %v10108_v34  ;;  %v10062_v34 = vld [vmem:[%s18328_s20 + $0x1e3] ss:$2 sm:$0xff]  ;;  %v10063_v35 = vld [vmem:[%s18328_s20 + $0x213] ss:$2 sm:$0xff] }
  0x77   :  { %11145 = vrot.lane.b32.xlu1 %v11144_v41, %s18341_s14 }
  0x78   :  { %11140 = vrot.lane.b32.xlu0 %v11139_v42, %s18339_s16  ;;  %v10000_v42 = vld [vmem:[%s18328_s20 + $0x22b] ss:$2 sm:$0xff] }
  0x79   :  { %v11229_v46 = vpack.i.bf16 %v10001_v43, %v10000_v42  ;;  %v11294_v42 = vpack.i.bf16 %v10063_v35, %v10062_v34  ;;  %v9954_v43 = vld [vmem:[%s18328_s20 + $0x288] ss:$2 sm:$0xff] }
  0x7b   :  { %11155 = vrot.lane.b32.xlu1 %v11154_v47, %s18342_s13  ;;  %v9906_v47 = vld [vmem:[%s18328_s20 + $0x271] ss:$2 sm:$0xff] }
  0x7c   :  { %11150 = vrot.lane.b32.xlu0 %v11149_v48, %s18340_s15  ;;  %v9907_v48 = vld [vmem:[%s18328_s20 + $0x2a1] ss:$2 sm:$0xff] }
  0x7d   :  { %v12933_v57 = vpop.permute.xlu1 %10880 }
  0x7e   :  { %v12941_v60 = vpop.permute.xlu0 %10870 }
  0x7f   :  { %11165 = vrot.lane.b32.xlu1 %v11164_v53, %s18343_s12  ;;  %v11244_v53 = vpack.i.bf16 %v9907_v48, %v9906_v47  ;;  %v9941_v48 = vld [vmem:[%s18328_s20 + $0x303] ss:$2 sm:$0xff]  ;;  %v10872_v34 = vunpack.i.l.bf16 %v12941_v60 }
  0x80   :  { %11160 = vrot.lane.b32.xlu0 %v11159_v54, %s18341_s14  ;;  %v11239_v54 = vpack.i.bf16 %v10125_v51, %v10124_v50  ;;  %v13176_v50 = vld [vmem:[%s18328_s20 + $0x1f8] ss:$2 sm:$0xff]  ;;  %v13181_v51 = vld [vmem:[%s18328_s20 + $0x228] ss:$2 sm:$0xff] }
  0x81   :  { %v12951_v1 = vpop.permute.xlu1 %10885 }
  0x82   :  { %v12959_v4 = vpop.permute.xlu0 %10875 }
  0x83   :  { %11175 = vrot.lane.b32.xlu1 %v11174_v61, %s18329_s25  ;;  %v10017_v61 = vld [vmem:[%s18328_s20 + $0x270] ss:$2 sm:$0xff] }
  0x84   :  { %11170 = vrot.lane.b32.xlu0 %v11169_v62, %s18342_s13  ;;  %v11249_v0 = vpack.i.bf16 %v10017_v61, %v10016_v59  ;;  %v13203_v59 = vld [vmem:[%s18328_s20 + $0x2b9] ss:$2 sm:$0xff]  ;;  %v13208_v61 = vld [vmem:[%s18328_s20 + $0x2e8] ss:$2 sm:$0xff] }
  0x85   :  { %v12969_v9 = vpop.permute.xlu1 %10895 }
  0x86   :  { %v12977_v12 = vpop.permute.xlu0 %10890 }
  0x87   :  { %11185 = vrot.lane.b32.xlu1 %v11184_v5, %s18344_s11 }
  0x88   :  { %11180 = vrot.lane.b32.xlu0 %v11179_v6, %s18343_s12  ;;  %v9908_v6 = vld [vmem:[%s18328_s20 + $0x2d1] ss:$2 sm:$0xff] }
  0x89   :  { %v12987_v17 = vpop.permute.xlu1 %10905  ;;  %v11259_v11 = vpack.i.bf16 %v9909_v7, %v9908_v6  ;;  %v13230_v6 = vld [vmem:[%s18328_s20 + $0x258] ss:$2 sm:$0xff]  ;;  %v13235_v7 = vld [vmem:[%s18328_s20 + $0x288] ss:$2 sm:$0xff] }
  0x8a   :  { %v12995_v20 = vpop.permute.xlu0 %10900 }
  0x8b   :  { %11195 = vrot.lane.b32.xlu1 %v11194_v13, %s18330_s2  ;;  %v10046_v13 = vld [vmem:[%s18328_s20 + $0x1e2] ss:$2 sm:$0xff] }
  0x8c   :  { %11190 = vrot.lane.b32.xlu0 %v11189_v14, %s18329_s25  ;;  %v10047_v14 = vld [vmem:[%s18328_s20 + $0x212] ss:$2 sm:$0xff] }
  0x8d   :  { %v13005_v25 = vpop.permute.xlu1 %10915 }
  0x8e   :  { %v13013_v28 = vpop.permute.xlu0 %10910 }
  0x8f   :  { %11205 = vrot.lane.b32.xlu1 %v11204_v21, %s18333_s30  ;;  %v11274_v21 = vpack.i.bf16 %v10047_v14, %v10046_v13  ;;  %v13246_v13 = vld [vmem:[%s18328_s20 + $0x2ba] ss:$2 sm:$0xff]  ;;  %v13251_v14 = vld [vmem:[%s18328_s20 + $0x2e9] ss:$2 sm:$0xff] }
  0x90   :  { %11200 = vrot.lane.b32.xlu0 %v11199_v22, %s18344_s11  ;;  %v11269_v22 = vpack.i.bf16 %v10033_v18, %v10032_v16  ;;  %v13257_v18 = vld [vmem:[%s18328_s20 + $0x319] ss:$2 sm:$0xff] }
  0x91   :  { %v13023_v33 = vpop.permute.xlu1 %10925 }
  0x92   :  { %v13031_v36 = vpop.permute.xlu0 %10920 }
  0x93   :  { %11215 = vrot.lane.b32.xlu1 %v11214_v29, %s18332_s0  ;;  %v9925_v29 = vld [vmem:[%s18328_s20 + $0x302] ss:$2 sm:$0xff] }
  0x94   :  { %11210 = vrot.lane.b32.xlu0 %v11209_v30, %s18330_s2  ;;  %v11279_v32 = vpack.i.bf16 %v9925_v29, %v9924_v27  ;;  %v11314_v27 = vpack.i.bf16 %v13181_v51, %v13176_v50  ;;  %v13279_v29 = vld [vmem:[%s18328_s20 + $0x259] ss:$2 sm:$0xff]  ;;  %v10877_v50 = vunpack.i.l.bf16 %v12959_v4 }
  0x95   :  { %v13041_v41 = vpop.permute.xlu1 %10935 }
  0x96   :  { %v13049_v44 = vpop.permute.xlu0 %10930 }
  0x97   :  { %11225 = vrot.lane.b32.xlu1 %v11224_v37, %s18336_s19 }
  0x98   :  { %11220 = vrot.lane.b32.xlu0 %v11219_v38, %s18333_s30  ;;  %v10048_v38 = vld [vmem:[%s18328_s20 + $0x242] ss:$2 sm:$0xff] }
  0x99   :  { %v13059_v49 = vpop.permute.xlu1 %10945  ;;  %v11289_v47 = vpack.i.bf16 %v10049_v39, %v10048_v38  ;;  %v1641_v39 = vsel %vm18266_vm0, %v169_v23, %v10872_v34  ;;  %v10888_v23 = vunpack.i.h.bf16 %v12951_v1 }
  0x9a   :  { %18345 = vst [vmem:[#allocation5_spill] sm:$0xff] %v13059_v49  ;;  %v13067_v52 = vpop.permute.xlu0 %10940  ;;  %v13388_v49 = vld [vmem:[%s18328_s20 + $0x2eb] ss:$2 sm:$0xff] }
  0x9b   :  { %11235 = vrot.lane.b32.xlu1 %v11234_v45, %s18334_s28  ;;  %v9955_v45 = vld [vmem:[%s18328_s20 + $0x2b8] ss:$2 sm:$0xff] }
  0x9c   :  { %11230 = vrot.lane.b32.xlu0 %v11229_v46, %s18332_s0  ;;  %v9940_v46 = vld [vmem:[%s18328_s20 + $0x2d3] ss:$2 sm:$0xff] }
  0x9d   :  { %v13077_v58 = vpop.permute.xlu1 %10955  ;;  %v11299_v16 = vpack.i.bf16 %v9941_v48, %v9940_v46  ;;  %v13313_v46 = vld [vmem:[%s18328_s20 + $0x31a] ss:$2 sm:$0xff] }
  0x9e   :  { %v13085_v62 = vpop.permute.xlu0 %10950  ;;  %v9879_v48 = vld [vmem:[%s18328_s20 + $0x30] ss:$2 sm:$0xff] }
  0x9f   :  { %11245 = vrot.lane.b32.xlu1 %v11244_v53, %s18335_s29 }
  0xa0   :  { %11240 = vrot.lane.b32.xlu0 %v11239_v54, %s18336_s19  ;;  %v13188_v54 = vld [vmem:[%s18328_s20 + $0x243] ss:$2 sm:$0xff] }
  0xa1   :  { %v13095_v5 = vpop.permute.xlu1 %10965  ;;  %v11309_v38 = vpack.i.bf16 %v13193_v55, %v13188_v54  ;;  %v13328_v55 = vld [vmem:[%s18328_s20 + $0x1fb] ss:$2 sm:$0xff]  ;;  %v9881_v54 = vld [vmem:[%s18328_s20 + $0x90] ss:$2 sm:$0xff] }
  0xa2   :  { %18346 = vst [vmem:[#allocation6_spill] sm:$0xff] %v13095_v5  ;;  %v13103_v8 = vpop.permute.xlu0 %10960  ;;  %18353 = vst [vmem:[#allocation13_spill] sm:$0xff] %v13328_v55  ;;  %v10887_v5 = vunpack.i.l.bf16 %v12951_v1  ;;  %v10898_v55 = vunpack.i.h.bf16 %v12969_v9  ;;  %v10893_v1 = vunpack.i.h.bf16 %v12977_v12 }
  0xa3   :  { %18347 = vst [vmem:[#allocation7_spill] sm:$0xff] %v13103_v8  ;;  %11255 = vrot.lane.b32.xlu1 %v11254_v63, %s18337_s18  ;;  %v13213_v63 = vld [vmem:[%s18328_s20 + $0x318] ss:$2 sm:$0xff] }
  0xa4   :  { %11250 = vrot.lane.b32.xlu0 %v11249_v0, %s18334_s28  ;;  %v13376_v8 = vld [vmem:[%s18328_s20 + $0x2d0] ss:$2 sm:$0xff] }
  0xa5   :  { %v13113_v15 = vpop.permute.xlu1 %10975 }
  0xa6   :  { %v13121_v19 = vpop.permute.xlu0 %10970 }
  0xa7   :  { %11265 = vrot.lane.b32.xlu1 %v11264_v10, %s18338_s17  ;;  %v11304_v10 = vpack.i.bf16 %v9955_v45, %v9954_v43  ;;  %v13303_v43 = vld [vmem:[%s18328_s20 + $0x2bb] ss:$2 sm:$0xff]  ;;  %v13308_v45 = vld [vmem:[%s18328_s20 + $0x2ea] ss:$2 sm:$0xff] }
  0xa8   :  { %11260 = vrot.lane.b32.xlu0 %v11259_v11, %s18335_s29  ;;  %v13241_v11 = vld [vmem:[%s18328_s20 + $0x28a] ss:$2 sm:$0xff] }
  0xa9   :  { %v13131_v26 = vpop.permute.xlu1 %10985 }
  0xaa   :  { %18348 = vst [vmem:[#allocation8_spill] sm:$0xff] %v13131_v26  ;;  %v13139_v30 = vpop.permute.xlu0 %10980  ;;  %v13371_v26 = vld [vmem:[%s18328_s20 + $0x2a0] ss:$2 sm:$0xff] }
  0xab   :  { %18349 = vst [vmem:[#allocation9_spill] sm:$0xff] %v13139_v30  ;;  %11275 = vrot.lane.b32.xlu1 %v11274_v21, %s18339_s16  ;;  %v13262_v21 = vld [vmem:[%s18328_s20 + $0x1fa] ss:$2 sm:$0xff]  ;;  %v10917_v30 = vunpack.i.l.bf16 %v13005_v25 }
  0xac   :  { %11270 = vrot.lane.b32.xlu0 %v11269_v22, %s18337_s18  ;;  %v13267_v22 = vld [vmem:[%s18328_s20 + $0x22a] ss:$2 sm:$0xff] }
  0xad   :  { %v13149_v37 = vpop.permute.xlu1 %10995 }
  0xae   :  { %v13157_v40 = vpop.permute.xlu0 %10990 }
  0xaf   :  { %11285 = vrot.lane.b32.xlu1 %v11284_v31, %s18340_s15  ;;  %v13284_v31 = vld [vmem:[%s18328_s20 + $0x289] ss:$2 sm:$0xff] }
  0xb0   :  { %11280 = vrot.lane.b32.xlu0 %v11279_v32, %s18338_s17  ;;  %v13289_v32 = vld [vmem:[%s18328_s20 + $0x28b] ss:$2 sm:$0xff] }
  0xb1   :  { %v13183_v53 = vpop.permute.xlu1 %11005 }
  0xb2   :  { %18350 = vst [vmem:[#allocation10_spill] sm:$0xff] %v13183_v53  ;;  %v13215_v0 = vpop.permute.xlu0 %11000 }
  0xb3   :  { %18351 = vst [vmem:[#allocation11_spill] sm:$0xff] %v13215_v0  ;;  %11295 = vrot.lane.b32.xlu1 %v11294_v42, %s18341_s14  ;;  %v10878_v42 = vunpack.i.h.bf16 %v12959_v4  ;;  %v13349_v4 = vld [vmem:[%s18328_s20 + $0x25a] ss:$2 sm:$0xff]  ;;  %v13354_v0 = vld [vmem:[%s18328_s20 + $0x28a] ss:$2 sm:$0xff] }
  0xb4   :  { %11290 = vrot.lane.b32.xlu0 %v11289_v47, %s18339_s16  ;;  %v10873_v47 = vunpack.i.h.bf16 %v12941_v60  ;;  %v13333_v60 = vld [vmem:[%s18328_s20 + $0x22b] ss:$2 sm:$0xff] }
  0xb5   :  { %v13272_v24 = vpop.permute.xlu1 %11015  ;;  %18354 = vst [vmem:[#allocation14_spill] sm:$0xff] %v13333_v60  ;;  %v10897_v60 = vunpack.i.l.bf16 %v12969_v9 }
  0xb6   :  { %v13292_v35 = vpop.permute.xlu0 %11010 }
  0xb7   :  { %18352 = vst [vmem:[#allocation12_spill] sm:$0xff] %v13292_v35  ;;  %11305 = vrot.lane.b32.xlu1 %v11304_v10, %s18342_s13  ;;  %v9880_v10 = vld [vmem:[%s18328_s20 + $0x60] ss:$2 sm:$0xff]  ;;  %v13393_v35 = vld [vmem:[%s18328_s20 + $0x31b] ss:$2 sm:$0xff] }
  0xb8   :  { %11300 = vrot.lane.b32.xlu0 %v11299_v16, %s18340_s15  ;;  %v10882_v16 = vunpack.i.l.bf16 %v12933_v57  ;;  %v1643_v34 = vsel %vm18266_vm0, %v9880_v10, %v10877_v50  ;;  %v10907_v10 = vunpack.i.l.bf16 %v12987_v17 }
  0xb9   :  { %v13360_v51 = vpop.permute.xlu1 %11025 }
  0xba   :  { %18355 = vst [vmem:[#allocation15_spill] sm:$0xff] %v13360_v51  ;;  %v10883_v51 = vunpack.i.h.bf16 %v12933_v57  ;;  %v13381_v53 = vpop.permute.xlu0 %11020  ;;  %v1642_v57 = vsel %vm18266_vm0, %v9879_v48, %v10873_v47  ;;  %v10892_v48 = vunpack.i.l.bf16 %v12977_v12 }
  0xbb   :  { %18356 = vst [vmem:[#allocation16_spill] sm:$0xff] %v13381_v53  ;;  %11315 = vrot.lane.b32.xlu1 %v11314_v27, %s18343_s12  ;;  %v1644_v53 = vsel %vm18266_vm0, %v9881_v54, %v10878_v42  ;;  %v1658_v27 = vsel %vm1657_vm1, %v1641_v39, %v10882_v16  ;;  %v11379_v42 = vpack.i.bf16 %v13393_v35, %v13388_v49  ;;  %v10903_v39 = vunpack.i.h.bf16 %v12995_v20  ;;  %v10034_v49 = vld [vmem:[%s18328_s20 + $0x2a1] ss:$2 sm:$0xff]  ;;  %v10035_v35 = vld [vmem:[%s18328_s20 + $0x2d1] ss:$2 sm:$0xff] }
  0xbc   :  { %11310 = vrot.lane.b32.xlu0 %v11309_v38, %s18341_s14  ;;  %v1660_v54 = vsel %vm1657_vm1, %v1643_v34, %v10887_v5  ;;  %v1659_v9 = vsel %vm1657_vm1, %v1642_v57, %v10883_v51  ;;  %v10908_v38 = vunpack.i.h.bf16 %v12987_v17  ;;  %v1661_v12 = vsel %vm1657_vm1, %v1644_v53, %v10888_v23 }
  0xbd   :  { %v13410_v50 = vpop.permute.xlu1 %11035  ;;  %v10902_v16 = vunpack.i.l.bf16 %v12995_v20  ;;  %v18357_v5 = vpack.i.bf16 %v13203_v59, %v13198_v56  ;;  %v1677_v51 = vsel %vm1674_vm2, %v1660_v54, %v10897_v60  ;;  %v1678_v17 = vsel %vm1674_vm2, %v1661_v12, %v10898_v55 }
  0xbe   :  { %v13418_v47 = vpop.permute.xlu0 %11030  ;;  %v10918_v57 = vunpack.i.h.bf16 %v13005_v25  ;;  %v10912_v53 = vunpack.i.l.bf16 %v13013_v28  ;;  %v18358_v20 = vpack.i.bf16 %v13213_v63, %v13208_v61  ;;  %v1675_v23 = vsel %vm1674_vm2, %v1658_v27, %v10892_v48 }
  0xbf   :  { %11325 = vrot.lane.b32.xlu1 %v18357_v5, %s18329_s25  ;;  %v1676_v34 = vsel %vm1674_vm2, %v1659_v9, %v10893_v1  ;;  %v10913_v56 = vunpack.i.h.bf16 %v13013_v28  ;;  %v10927_v59 = vunpack.i.l.bf16 %v13023_v33  ;;  %v1693_v25 = vsel %vm63_vm3, %v1677_v51, %v10907_v10 }
  0xc0   :  { %11320 = vrot.lane.b32.xlu0 %v18358_v20, %s18342_s13  ;;  %v1694_v60 = vsel %vm63_vm3, %v1678_v17, %v10908_v38  ;;  %v10928_v54 = vunpack.i.h.bf16 %v13023_v33  ;;  %v10922_v61 = vunpack.i.l.bf16 %v13031_v36  ;;  %v1691_v1 = vsel %vm63_vm3, %v1675_v23, %v10902_v16 }
  0xc1   :  { %v13440_v55 = vpop.permute.xlu1 %11045  ;;  %v1692_v28 = vsel %vm63_vm3, %v1676_v34, %v10903_v39  ;;  %v1710_v48 = vsel %vm1707_vm4, %v1693_v25, %v10917_v30  ;;  %v10923_v27 = vunpack.i.h.bf16 %v13031_v36  ;;  %v18359_v9 = vpack.i.bf16 %v13225_v3, %v13220_v2 }
  0xc2   :  { %v13446_v63 = vpop.permute.xlu0 %11040  ;;  %v1711_v33 = vsel %vm1707_vm4, %v1694_v60, %v10918_v57  ;;  %v1708_v38 = vsel %vm1707_vm4, %v1691_v1, %v10912_v53  ;;  %v10933_v10 = vunpack.i.h.bf16 %v13049_v44  ;;  %v10932_v12 = vunpack.i.l.bf16 %v13049_v44 }
  0xc3   :  { %11335 = vrot.lane.b32.xlu1 %v18359_v9, %s18344_s11  ;;  %v18360_v30 = vpack.i.bf16 %v13235_v7, %v13230_v6  ;;  %v1709_v36 = vsel %vm1707_vm4, %v1692_v28, %v10913_v56  ;;  %v1727_v2 = vsel %vm1724_vm5, %v1710_v48, %v10927_v59  ;;  %v10943_v3 = vunpack.i.h.bf16 %v13067_v52 }
  0xc4   :  { %v10942_v39 = vunpack.i.l.bf16 %v13067_v52  ;;  %v1728_v5 = vsel %vm1724_vm5, %v1711_v33, %v10928_v54  ;;  %v1725_v44 = vsel %vm1724_vm5, %v1708_v38, %v10922_v61  ;;  %v10958_v51 = vunpack.i.h.bf16 %v13077_v58 }
  0xc5   :  { %11330 = vrot.lane.b32.xlu0 %v18360_v30, %s18343_s12  ;;  %v11056_v16 = vpop.permute.xlu1 %11055  ;;  %v10957_v6 = vunpack.i.l.bf16 %v13077_v58  ;;  %v1726_v17 = vsel %vm1724_vm5, %v1709_v36, %v10923_v27  ;;  %v10937_v57 = vunpack.i.l.bf16 %v13041_v41  ;;  %v10978_v53 = vunpack.i.h.bf16 %v13113_v15 }
  0xc6   :  { %v13472_v7 = vpop.permute.xlu0 %11050  ;;  %v10977_v52 = vunpack.i.l.bf16 %v13113_v15  ;;  %v18361_v20 = vpack.i.bf16 %v13246_v13, %v13241_v11  ;;  %v1742_v23 = vsel %vm1741_vm6, %v1725_v44, %v10932_v12  ;;  %v1743_v34 = vsel %vm1741_vm6, %v1726_v17, %v10933_v10 }
  0xc7   :  { %v10998_v58 = vunpack.i.h.bf16 %v13149_v37  ;;  %v10997_v56 = vunpack.i.l.bf16 %v13149_v37  ;;  %v18362_v59 = vpack.i.bf16 %v13257_v18, %v13251_v14  ;;  %v1759_v15 = vsel %vm1758_vm7, %v1742_v23, %v10942_v39 }
  0xc8   :  { %11345 = vrot.lane.b32.xlu1 %v18361_v20, %s18330_s2  ;;  %v1760_v25 = vsel %vm1758_vm7, %v1743_v34, %v10943_v3  ;;  %v11018_v11 = vunpack.i.h.bf16 %v13272_v24  ;;  %v11017_v13 = vunpack.i.l.bf16 %v13272_v24  ;;  %v1776_v54 = vsel %vm1775_vm8, %v1759_v15, %v10957_v6 }
  0xc9   :  { %11340 = vrot.lane.b32.xlu0 %v18362_v59, %s18329_s25  ;;  %v13494_v60 = vpop.permute.xlu1 %11065  ;;  %v1777_v37 = vsel %vm1775_vm8, %v1760_v25, %v10958_v51  ;;  %v11038_v61 = vunpack.i.h.bf16 %v13410_v50  ;;  %v11037_v14 = vunpack.i.l.bf16 %v13410_v50  ;;  %v1793_v1 = vsel %vm1792_vm9, %v1776_v54, %v10977_v52 }
  0xca   :  { %v13500_v18 = vpop.permute.xlu0 %11060  ;;  %v1794_v28 = vsel %vm1792_vm9, %v1777_v37, %v10978_v53  ;;  %v11058_v48 = vunpack.i.h.bf16 %v11056_v16  ;;  %v11057_v27 = vunpack.i.l.bf16 %v11056_v16  ;;  %v18363_v24 = vpack.i.bf16 %v13267_v22, %v13262_v21  ;;  %v10021_v37 = vld [vmem:[%s18328_s20 + $0x330] ss:$2 sm:$0xff] }
  0xcb   :  { %v10938_v9 = vunpack.i.h.bf16 %v13041_v41  ;;  %v1744_v33 = vsel %vm1741_vm6, %v1727_v2, %v10937_v57  ;;  %v1810_v38 = vsel %vm1809_vm10, %v1793_v1, %v10997_v56  ;;  %v1811_v50 = vsel %vm1809_vm10, %v1794_v28, %v10998_v58 }
  0xcc   :  { %11355 = vrot.lane.b32.xlu1 %v18363_v24, %s18333_s30  ;;  %v18364_v10 = vpack.i.bf16 %v13284_v31, %v13279_v29  ;;  %v10953_v12 = vunpack.i.h.bf16 %v13085_v62  ;;  %v10952_v30 = vunpack.i.l.bf16 %v13085_v62  ;;  %v1827_v21 = vsel %vm1826_vm11, %v1810_v38, %v11017_v13  ;;  %v18369_v13 = vld [vmem:[#allocation13_spill] sm:$0xff] }
  0xcd   :  { %v1828_v22 = vsel %vm1826_vm11, %v1811_v50, %v11018_v11  ;;  %v11076_v41 = vpop.permute.xlu1 %11075  ;;  %v1844_v39 = vsel %vm1843_vm12, %v1827_v21, %v11037_v14  ;;  %v10973_v44 = vunpack.i.h.bf16 %v13121_v19  ;;  %v10972_v29 = vunpack.i.l.bf16 %v13121_v19  ;;  %v18368_v11 = vld [vmem:[#allocation14_spill] sm:$0xff] }
  0xce   :  { %11350 = vrot.lane.b32.xlu0 %v18364_v10, %s18344_s11  ;;  %v11078_v36 = vunpack.i.h.bf16 %v11076_v41  ;;  %v11077_v2 = vunpack.i.l.bf16 %v11076_v41  ;;  %v11071_v3 = vpop.permute.xlu0 %11070  ;;  %v1845_v16 = vsel %vm1843_vm12, %v1828_v22, %v11038_v61  ;;  %v18365_v62 = vpack.i.bf16 %v13303_v43, %v13289_v32  ;;  %v18367_v43 = vld [vmem:[#allocation12_spill] sm:$0xff] }
  0xcf   :  { %v1861_v31 = vsel %vm1860_vm13, %v1844_v39, %v11057_v27  ;;  %v1862_v51 = vsel %vm1860_vm13, %v1845_v16, %v11058_v48  ;;  %v10993_v6 = vunpack.i.h.bf16 %v13157_v40  ;;  %v10992_v17 = vunpack.i.l.bf16 %v13157_v40  ;;  %v10037_v39 = vld [vmem:[%s18328_s20 + $0x331] ss:$2 sm:$0xff] }
  0xd0   :  { %11365 = vrot.lane.b32.xlu1 %v18365_v62, %s18332_s0  ;;  %v18366_v57 = vpack.i.bf16 %v13313_v46, %v13308_v45  ;;  %v1878_v19 = vsel %vm1877_vm14, %v1861_v31, %v11077_v2  ;;  %v1879_v53 = vsel %vm1877_vm14, %v1862_v51, %v11078_v36  ;;  %v1745_v32 = vsel %vm1741_vm6, %v1728_v5, %v10938_v9  ;;  %v10128_v9 = vld [vmem:[%s18328_s20 + $0x25b] ss:$2 sm:$0xff]  ;;  %v10052_v31 = vld [vmem:[%s18328_s20 + $0x302] ss:$2 sm:$0xff]  ;;  %v10053_v51 = vld [vmem:[%s18328_s20 + $0x332] ss:$2 sm:$0xff] }
  0xd1   :  { %v11013_v52 = vunpack.i.h.bf16 %v18367_v43  ;;  %v11012_v20 = vunpack.i.l.bf16 %v18367_v43  ;;  %v13541_v23 = vpop.permute.xlu1 %11085  ;;  %v1894_v34 = vpack.c.bf16 %v1879_v53, %v1878_v19  ;;  %v1761_v40 = vsel %vm1758_vm7, %v1744_v33, %v10952_v30  ;;  %v10129_v33 = vld [vmem:[%s18328_s20 + $0x28b] ss:$2 sm:$0xff] }
  0xd2   :  { %11360 = vrot.lane.b32.xlu0 %v18366_v57, %s18330_s2  ;;  %v1762_v58 = vsel %vm1758_vm7, %v1745_v32, %v10953_v12  ;;  %v11033_v45 = vunpack.i.h.bf16 %v13418_v47  ;;  %v11032_v46 = vunpack.i.l.bf16 %v13418_v47  ;;  %v13547_v56 = vpop.permute.xlu0 %11080  ;;  %v1778_v59 = vsel %vm1775_vm8, %v1761_v40, %v10972_v29  ;;  %v10020_v47 = vld [vmem:[%s18328_s20 + $0x300] ss:$2 sm:$0xff]  ;;  %v10068_v43 = vld [vmem:[%s18328_s20 + $0x303] ss:$2 sm:$0xff]  ;;  %v10067_v40 = vld [vmem:[%s18328_s20 + $0x2d3] ss:$2 sm:$0xff] }
  0xd3   :  { %v1779_v5 = vsel %vm1775_vm8, %v1762_v58, %v10973_v44  ;;  %v11053_v15 = vunpack.i.h.bf16 %v13472_v7  ;;  %v11052_v25 = vunpack.i.l.bf16 %v13472_v7  ;;  %v18370_v54 = vpack.i.bf16 %v18368_v11, %v18369_v13  ;;  %10636 = vmatprep.mubr.msk.bf16.mxu0 %vm1926_vm15, %v1894_v34  ;;  %v10051_v57 = vld [vmem:[%s18328_s20 + $0x2d2] ss:$2 sm:$0xff]  ;;  %v10066_v34 = vld [vmem:[%s18328_s20 + $0x2a3] ss:$2 sm:$0xff]  ;;  %s12379_s2 = smov 40  }
  0xd4   :  { %v1795_v61 = vsel %vm1792_vm9, %v1778_v59, %v10992_v17  ;;  %v1796_v14 = vsel %vm1792_vm9, %v1779_v5, %v10993_v6  ;;  %v11073_v7 = vunpack.i.h.bf16 %v11071_v3  ;;  %v11072_v1 = vunpack.i.l.bf16 %v11071_v3  ;;  %v10036_v3 = vld [vmem:[%s18328_s20 + $0x301] ss:$2 sm:$0xff]  ;;  %v10050_v17 = vld [vmem:[%s18328_s20 + $0x2a2] ss:$2 sm:$0xff] }
  0xd5   :  { %11375 = vrot.lane.b32.xlu1 %v18370_v54, %s18336_s19  ;;  %v18371_v28 = vpack.i.bf16 %v13354_v0, %v13349_v4  ;;  %v1812_v48 = vsel %vm1809_vm10, %v1795_v61, %v11012_v20  ;;  %v1813_v27 = vsel %vm1809_vm10, %v1796_v14, %v11013_v52  ;;  %v13572_v24 = vpop.permute.xlu1 %11095  ;;  %v11394_v4 = vpack.i.bf16 %v10021_v37, %v10020_v47  ;;  %v10069_v52 = vld [vmem:[%s18328_s20 + $0x333] ss:$2 sm:$0xff]  ;;  %v10084_v59 = vld [vmem:[%s18328_s20 + $0x318] ss:$2 sm:$0xff]  ;;  %v10085_v5 = vld [vmem:[%s18328_s20 + $0x348] ss:$2 sm:$0xff] }
  0xd6   :  { %v1829_v38 = vsel %vm1826_vm11, %v1812_v48, %v11032_v46  ;;  %v1830_v50 = vsel %vm1826_vm11, %v1813_v27, %v11033_v45  ;;  %v11091_v0 = vpop.permute.xlu0 %11090  ;;  %v18372_v22 = vpack.i.bf16 %v13376_v8, %v13371_v26  ;;  %v11389_v2 = vpack.i.bf16 %v10129_v33, %v10128_v9  ;;  %v10083_v11 = vld [vmem:[%s18328_s20 + $0x2e8] ss:$2 sm:$0xff]  ;;  %v10100_v37 = vld [vmem:[%s18328_s20 + $0x319] ss:$2 sm:$0xff]  ;;  %v10101_v61 = vld [vmem:[%s18328_s20 + $0x349] ss:$2 sm:$0xff] }
  0xd7   :  { %11370 = vrot.lane.b32.xlu0 %v18371_v28, %s18333_s30  ;;  %v1846_v10 = vsel %vm1843_vm12, %v1829_v38, %v11052_v25  ;;  %v1847_v12 = vsel %vm1843_vm12, %v1830_v50, %v11053_v15  ;;  %v11093_v30 = vunpack.i.h.bf16 %v11091_v0  ;;  %v11092_v21 = vunpack.i.l.bf16 %v11091_v0  ;;  %v10082_v25 = vld [vmem:[%s18328_s20 + $0x2b8] ss:$2 sm:$0xff] }
  0xd8   :  { %v1863_v41 = vsel %vm1860_vm13, %v1846_v10, %v11072_v1  ;;  %v1864_v36 = vsel %vm1860_vm13, %v1847_v12, %v11073_v7  ;;  %v11404_v29 = vpack.i.bf16 %v10037_v39, %v10036_v3  ;;  %v11399_v62 = vpack.i.bf16 %v10035_v35, %v10034_v49  ;;  %v10098_v7 = vld [vmem:[%s18328_s20 + $0x2b9] ss:$2 sm:$0xff]  ;;  %v10099_v1 = vld [vmem:[%s18328_s20 + $0x2e9] ss:$2 sm:$0xff]  ;;  %v10116_v9 = vld [vmem:[%s18328_s20 + $0x31a] ss:$2 sm:$0xff] }
  0xd9   :  { %11385 = vrot.lane.b32.xlu1 %v18372_v22, %s18334_s28  ;;  %v1880_v8 = vsel %vm1877_vm14, %v1863_v41, %v11092_v21  ;;  %v1881_v26 = vsel %vm1877_vm14, %v1864_v36, %v11093_v30  ;;  %v13602_v16 = vpop.permute.xlu1 %11105  ;;  %v11414_v53 = vpack.i.bf16 %v10053_v51, %v10052_v31  ;;  %v11409_v32 = vpack.i.bf16 %v10051_v57, %v10050_v17  ;;  %v10117_v33 = vld [vmem:[%s18328_s20 + $0x34a] ss:$2 sm:$0xff]  ;;  %v10114_v50 = vld [vmem:[%s18328_s20 + $0x2ba] ss:$2 sm:$0xff]  ;;  %v10132_v30 = vld [vmem:[%s18328_s20 + $0x31b] ss:$2 sm:$0xff] }
  0xda   :  { %v1895_v44 = vpack.c.bf16 %v1881_v26, %v1880_v8  ;;  %v11424_v45 = vpack.i.bf16 %v10069_v52, %v10068_v43  ;;  %v11419_v46 = vpack.i.bf16 %v10067_v40, %v10066_v34  ;;  %v11434_v54 = vpack.i.bf16 %v10085_v5, %v10084_v59  ;;  %v10115_v0 = vld [vmem:[%s18328_s20 + $0x2ea] ss:$2 sm:$0xff]  ;;  %v10133_v21 = vld [vmem:[%s18328_s20 + $0x34b] ss:$2 sm:$0xff]  ;;  %v10130_v41 = vld [vmem:[%s18328_s20 + $0x2bb] ss:$2 sm:$0xff] }
  0xdb   :  { %11380 = vrot.lane.b32.xlu0 %v11379_v42, %s18332_s0  ;;  %v13610_v42 = vpop.permute.xlu0 %11100  ;;  %v11429_v47 = vpack.i.bf16 %v10083_v11, %v10082_v25  ;;  %v11444_v48 = vpack.i.bf16 %v10101_v61, %v10100_v37  ;;  %v11439_v27 = vpack.i.bf16 %v10099_v1, %v10098_v7  ;;  %v11454_v10 = vpack.i.bf16 %v10117_v33, %v10116_v9  ;;  %v10131_v36 = vld [vmem:[%s18328_s20 + $0x2eb] ss:$2 sm:$0xff]  ;;  %v18373_v3 = vld [vmem:[#allocation5_spill] sm:$0xff] }
  0xdc   :  { %10637 = vmatmul.mubr.msk.bf16.vlgmr.msra.gmra.mrb[0].mxu0 %vm1926_vm15, %v1895_v44  ;;  %v11449_v12 = vpack.i.bf16 %v10115_v0, %v10114_v50  ;;  %v10947_v39 = vunpack.i.l.bf16 %v18373_v3  ;;  %v11464_v8 = vpack.i.bf16 %v10133_v21, %v10132_v30  ;;  %v10948_v26 = vunpack.i.h.bf16 %v18373_v3  ;;  %v9882_v49 = vld [vmem:[%s18328_s20 + $0xc0] ss:$2 sm:$0xff]  ;;  %v18375_v51 = vld [vmem:[#allocation7_spill] sm:$0xff]  ;;  %v18376_v43 = vld [vmem:[#allocation8_spill] sm:$0xff] }
  0xdd   :  { %11395 = vrot.lane.b32.xlu1 %v11394_v4, %s18334_s28  ;;  %v13621_v6 = vpop.permute.xlu1 %11115  ;;  %v18374_v35 = vld [vmem:[#allocation6_spill] sm:$0xff]  ;;  %v10962_v17 = vunpack.i.l.bf16 %v18375_v51  ;;  %v10987_v52 = vunpack.i.l.bf16 %v18376_v43  ;;  %v18377_v59 = vld [vmem:[#allocation9_spill] sm:$0xff]  ;;  %v18379_v33 = vld [vmem:[#allocation11_spill] sm:$0xff] }
  0xde   :  { %v10967_v44 = vunpack.i.l.bf16 %v18374_v35  ;;  %v10968_v31 = vunpack.i.h.bf16 %v18374_v35  ;;  %v1645_v40 = vsel %vm18266_vm0, %v9882_v49, %v10947_v39  ;;  %v10982_v5 = vunpack.i.l.bf16 %v18377_v59  ;;  %v18378_v61 = vld [vmem:[#allocation10_spill] sm:$0xff]  ;;  %v18380_v21 = vld [vmem:[#allocation15_spill] sm:$0xff]  ;;  %v18381_v39 = vld [vmem:[#allocation16_spill] sm:$0xff] }
  0xdf   :  { %11390 = vrot.lane.b32.xlu0 %v11389_v2, %s18336_s19  ;;  %v13629_v19 = vpop.permute.xlu0 %11110  ;;  %v11008_v7 = vunpack.i.h.bf16 %v18378_v61  ;;  %v11007_v1 = vunpack.i.l.bf16 %v18378_v61  ;;  %v11003_v50 = vunpack.i.h.bf16 %v18379_v33  ;;  %v11002_v0 = vunpack.i.l.bf16 %v18379_v33 }
  0xe0   :  { %v1662_v11 = vsel %vm1657_vm1, %v1645_v40, %v10967_v44  ;;  %v11047_v49 = vunpack.i.l.bf16 %v13440_v55 }
  0xe1   :  { %11405 = vrot.lane.b32.xlu1 %v11404_v29, %s18337_s18  ;;  %v13639_v20 = vpop.permute.xlu1 %11125  ;;  %v11459_v29 = vpack.i.bf16 %v10131_v36, %v10130_v41  ;;  %v1679_v9 = vsel %vm1674_vm2, %v1662_v11, %v10987_v52  ;;  %v11028_v41 = vunpack.i.h.bf16 %v18380_v21  ;;  %v11027_v36 = vunpack.i.l.bf16 %v18380_v21 }
  0xe2   :  { %v1695_v35 = vsel %vm63_vm3, %v1679_v9, %v11007_v1  ;;  %v11107_v1 = vunpack.i.l.bf16 %v13602_v16  ;;  %v11128_v33 = vunpack.i.h.bf16 %v13639_v20 }
  0xe3   :  { %11400 = vrot.lane.b32.xlu0 %v11399_v62, %s18337_s18  ;;  %v13647_v58 = vpop.permute.xlu0 %11120  ;;  %v9883_v62 = vld [vmem:[%s18328_s20 + $0xf0] ss:$2 sm:$0xff]  ;;  %v1712_v52 = vsel %vm1707_vm4, %v1695_v35, %v11027_v36  ;;  %s12380_s18 = smov 52  }
  0xe4   :  { %v1646_v25 = vsel %vm18266_vm0, %v9883_v62, %v10948_v26  ;;  %v11022_v26 = vunpack.i.l.bf16 %v18381_v39  ;;  %v11042_v62 = vunpack.i.l.bf16 %v13446_v63 }
  0xe5   :  { %11415 = vrot.lane.b32.xlu1 %v11414_v53, %s18339_s16  ;;  %v13657_v15 = vpop.permute.xlu1 %11135  ;;  %v10963_v53 = vunpack.i.h.bf16 %v18375_v51 }
  0xe7   :  { %11410 = vrot.lane.b32.xlu0 %v11409_v32, %s18339_s16  ;;  %v13665_v13 = vpop.permute.xlu0 %11130  ;;  %v9884_v32 = vld [vmem:[%s18328_s20 + $0x120] ss:$2 sm:$0xff]  ;;  %s12384_s16 = smov 4  }
  0xe8   :  { %v1647_v37 = vsel %vm18266_vm0, %v9884_v32, %v10962_v17  ;;  %v11067_v32 = vunpack.i.l.bf16 %v13494_v60 }
  0xe9   :  { %11425 = vrot.lane.b32.xlu1 %v11424_v45, %s18341_s14  ;;  %v13675_v14 = vpop.permute.xlu1 %11145  ;;  %v9885_v45 = vld [vmem:[%s18328_s20 + $0x150] ss:$2 sm:$0xff]  ;;  %v1664_v30 = vsel %vm1657_vm1, %v1647_v37, %v10982_v5  ;;  %v1729_v5 = vsel %vm1724_vm5, %v1712_v52, %v11047_v49 }
  0xea   :  { %v1681_v51 = vsel %vm1674_vm2, %v1664_v30, %v11002_v0  ;;  %v1746_v61 = vsel %vm1741_vm6, %v1729_v5, %v11067_v32  ;;  %v11082_v0 = vunpack.i.l.bf16 %v13547_v56  ;;  %v11147_v30 = vunpack.i.l.bf16 %v13675_v14 }
  0xeb   :  { %11420 = vrot.lane.b32.xlu0 %v11419_v46, %s18341_s14  ;;  %v13683_v28 = vpop.permute.xlu0 %11140  ;;  %v10988_v46 = vunpack.i.h.bf16 %v18376_v43  ;;  %v11123_v5 = vunpack.i.h.bf16 %v13647_v58  ;;  %s12378_s14 = smov 28  }
  0xed   :  { %11435 = vrot.lane.b32.xlu1 %v11434_v54, %s18343_s12  ;;  %v13693_v38 = vpop.permute.xlu1 %11155  ;;  %v10983_v54 = vunpack.i.h.bf16 %v18377_v59 }
  0xef   :  { %11430 = vrot.lane.b32.xlu0 %v11429_v47, %s18343_s12  ;;  %v13701_v4 = vpop.permute.xlu0 %11150  ;;  %v1663_v47 = vsel %vm1657_vm1, %v1646_v25, %v10968_v31 }
  0xf1   :  { %11445 = vrot.lane.b32.xlu1 %v11444_v48, %s18344_s11  ;;  %v13711_v22 = vpop.permute.xlu1 %11165 }
  0xf2   :  { %v11167_v36 = vunpack.i.l.bf16 %v13711_v22 }
  0xf3   :  { %11440 = vrot.lane.b32.xlu0 %v11439_v27, %s18344_s11  ;;  %v13719_v2 = vpop.permute.xlu0 %11160  ;;  %v1648_v27 = vsel %vm18266_vm0, %v9885_v45, %v10963_v53  ;;  %v11043_v53 = vunpack.i.h.bf16 %v13446_v63  ;;  %v11062_v45 = vunpack.i.l.bf16 %v13500_v18  ;;  %v11063_v63 = vunpack.i.h.bf16 %v13500_v18  ;;  %s12387_s11 = smov 84  }
  0xf4   :  { %v1665_v3 = vsel %vm1657_vm1, %v1648_v27, %v10983_v54  ;;  %v11088_v54 = vunpack.i.h.bf16 %v13541_v23 }
  0xf5   :  { %11455 = vrot.lane.b32.xlu1 %v11454_v10, %s18333_s30  ;;  %v13734_v57 = vpop.permute.xlu1 %11175  ;;  %v1682_v17 = vsel %vm1674_vm2, %v1665_v3, %v11003_v50  ;;  %v11127_v50 = vunpack.i.l.bf16 %v13639_v20 }
  0xf7   :  { %11450 = vrot.lane.b32.xlu0 %v11449_v12, %s18333_s30  ;;  %v13741_v34 = vpop.permute.xlu0 %11170  ;;  %v1680_v12 = vsel %vm1674_vm2, %v1663_v47, %v10988_v46  ;;  %v1697_v46 = vsel %vm63_vm3, %v1681_v51, %v11022_v26  ;;  %v11087_v47 = vunpack.i.l.bf16 %v13541_v23 }
  0xf8   :  { %v1696_v44 = vsel %vm63_vm3, %v1680_v12, %v11008_v7  ;;  %v1714_v11 = vsel %vm1707_vm4, %v1697_v46, %v11042_v62  ;;  %v11108_v7 = vunpack.i.h.bf16 %v13602_v16  ;;  %v11148_v12 = vunpack.i.h.bf16 %v13675_v14 }
  0xf9   :  { %11465 = vrot.lane.b32.xlu1 %v11464_v8, %s18336_s19  ;;  %v13758_v48 = vpop.permute.xlu1 %11185  ;;  %v11023_v8 = vunpack.i.h.bf16 %v18381_v39  ;;  %v1713_v40 = vsel %vm1707_vm4, %v1696_v44, %v11028_v41  ;;  %v1731_v9 = vsel %vm1724_vm5, %v1714_v11, %v11062_v45  ;;  %v1763_v16 = vsel %vm1758_vm7, %v1746_v61, %v11087_v47 }
  0xfa   :  { %v11168_v41 = vunpack.i.h.bf16 %v13711_v22  ;;  %v1780_v20 = vsel %vm1775_vm8, %v1763_v16, %v11107_v1  ;;  %v11187_v26 = vunpack.i.l.bf16 %v13758_v48  ;;  %v11083_v22 = vunpack.i.h.bf16 %v13547_v56 }
  0xfb   :  { %11460 = vrot.lane.b32.xlu0 %v11459_v29, %s18336_s19  ;;  %v13764_v10 = vpop.permute.xlu0 %11180  ;;  %v11048_v29 = vunpack.i.h.bf16 %v13440_v55  ;;  %v11068_v55 = vunpack.i.h.bf16 %v13494_v60  ;;  %v1698_v59 = vsel %vm63_vm3, %v1682_v17, %v11023_v8  ;;  %v11188_v8 = vunpack.i.h.bf16 %v13758_v48  ;;  %s18383_s19 = sld [smem:[#allocation34_spill]] }
  0xfc   :  { %v1715_v60 = vsel %vm1707_vm4, %v1698_v59, %v11043_v53  ;;  %v1797_v14 = vsel %vm1792_vm9, %v1780_v20, %v11127_v50  ;;  %v1748_v62 = vsel %vm1741_vm6, %v1731_v9, %v11082_v0  ;;  %v11103_v53 = vunpack.i.h.bf16 %v13610_v42 }
  0xfd   :  { %v13778_v31 = vpop.permute.xlu1 %11195  ;;  %v1730_v25 = vsel %vm1724_vm5, %v1713_v40, %v11048_v29  ;;  %v1732_v23 = vsel %vm1724_vm5, %v1715_v60, %v11063_v63  ;;  %v1814_v51 = vsel %vm1809_vm10, %v1797_v14, %v11147_v30  ;;  %v11102_v48 = vunpack.i.l.bf16 %v13610_v42 }
  0xfe   :  { %v1747_v18 = vsel %vm1741_vm6, %v1730_v25, %v11068_v55  ;;  %v1831_v32 = vsel %vm1826_vm11, %v1814_v51, %v11167_v36  ;;  %v11122_v63 = vunpack.i.l.bf16 %v13647_v58  ;;  %v11143_v11 = vunpack.i.h.bf16 %v13683_v28 }
  0xff   :  { %v13784_v43 = vpop.permute.xlu0 %11190  ;;  %v1764_v21 = vsel %vm1758_vm7, %v1747_v18, %v11088_v54  ;;  %v1848_v55 = vsel %vm1843_vm12, %v1831_v32, %v11187_v26  ;;  %v11142_v54 = vunpack.i.l.bf16 %v13683_v28  ;;  %v1749_v60 = vsel %vm1741_vm6, %v1732_v23, %v11083_v22 }
 0x100   :  { %v1781_v39 = vsel %vm1775_vm8, %v1764_v21, %v11108_v7  ;;  %v11163_v61 = vunpack.i.h.bf16 %v13719_v2  ;;  %v11162_v7 = vunpack.i.l.bf16 %v13719_v2  ;;  %v1765_v18 = vsel %vm1758_vm7, %v1748_v62, %v11102_v48 }
 0x101   :  { %v11206_v37 = vpop.permute.xlu1 %11205  ;;  %v1798_v35 = vsel %vm1792_vm9, %v1781_v39, %v11128_v33  ;;  %v1766_v9 = vsel %vm1758_vm7, %v1749_v60, %v11103_v53  ;;  %v11183_v33 = vunpack.i.h.bf16 %v13764_v10  ;;  %v11182_v28 = vunpack.i.l.bf16 %v13764_v10 }
 0x102   :  { %v11208_v44 = vunpack.i.h.bf16 %v11206_v37  ;;  %v11207_v29 = vunpack.i.l.bf16 %v11206_v37  ;;  %v1815_v17 = vsel %vm1809_vm10, %v1798_v35, %v11148_v12  ;;  %v1782_v0 = vsel %vm1775_vm8, %v1765_v18, %v11122_v63 }
 0x103   :  { %v13802_v27 = vpop.permute.xlu0 %11200  ;;  %v1832_v52 = vsel %vm1826_vm11, %v1815_v17, %v11168_v41  ;;  %v1783_v23 = vsel %vm1775_vm8, %v1766_v9, %v11123_v5  ;;  %v1799_v30 = vsel %vm1792_vm9, %v1782_v0, %v11142_v54  ;;  %v11097_v54 = vunpack.i.l.bf16 %v13572_v24  ;;  %v9889_v9 = vld [vmem:[%s18328_s20 + $0x240] ss:$2 sm:$0xff] }
 0x104   :  { %v1849_v45 = vsel %vm1843_vm12, %v1832_v52, %v11188_v8  ;;  %v1865_v25 = vsel %vm1860_vm13, %v1848_v55, %v11207_v29  ;;  %v11203_v12 = vunpack.i.h.bf16 %v13802_v27  ;;  %v11202_v2 = vunpack.i.l.bf16 %v13802_v27 }
 0x105   :  { %v13816_v3 = vpop.permute.xlu1 %11215  ;;  %v1866_v42 = vsel %vm1860_vm13, %v1849_v45, %v11208_v44  ;;  %v1800_v16 = vsel %vm1792_vm9, %v1783_v23, %v11143_v11  ;;  %v1816_v10 = vsel %vm1809_vm10, %v1799_v30, %v11162_v7  ;;  %v11098_v11 = vunpack.i.h.bf16 %v13572_v24  ;;  %v9888_v24 = vld [vmem:[%s18328_s20 + $0x210] ss:$2 sm:$0xff] }
 0x106   :  { %v1817_v36 = vsel %vm1809_vm10, %v1800_v16, %v11163_v61  ;;  %v1833_v39 = vsel %vm1826_vm11, %v1816_v10, %v11182_v28  ;;  %v11118_v60 = vunpack.i.h.bf16 %v13621_v6  ;;  %v11117_v61 = vunpack.i.l.bf16 %v13621_v6 }
 0x107   :  { %v13822_v49 = vpop.permute.xlu0 %11210  ;;  %v1834_v8 = vsel %vm1826_vm11, %v1817_v36, %v11183_v33  ;;  %v1850_v27 = vsel %vm1843_vm12, %v1833_v39, %v11202_v2  ;;  %v11113_v7 = vunpack.i.h.bf16 %v13629_v19  ;;  %v11138_v33 = vunpack.i.h.bf16 %v13657_v15 }
 0x108   :  { %v1851_v14 = vsel %vm1843_vm12, %v1834_v8, %v11203_v12  ;;  %v11137_v28 = vunpack.i.l.bf16 %v13657_v15  ;;  %v11133_v23 = vunpack.i.h.bf16 %v13665_v13  ;;  %v11132_v12 = vunpack.i.l.bf16 %v13665_v13 }
 0x109   :  { %v11226_v40 = vpop.permute.xlu1 %11225  ;;  %v11158_v16 = vunpack.i.h.bf16 %v13693_v38  ;;  %v11153_v10 = vunpack.i.h.bf16 %v13701_v4  ;;  %v11152_v36 = vunpack.i.l.bf16 %v13701_v4  ;;  %v11172_v4 = vunpack.i.l.bf16 %v13741_v34 }
 0x10a   :  { %v11228_v56 = vunpack.i.h.bf16 %v11226_v40  ;;  %v11227_v46 = vunpack.i.l.bf16 %v11226_v40 }
 0x10b   :  { %v11221_v59 = vpop.permute.xlu0 %11220 }
 0x10c   :  { %v1882_v47 = vsel %vm1877_vm14, %v1865_v25, %v11227_v46  ;;  %v1883_v37 = vsel %vm1877_vm14, %v1866_v42, %v11228_v56  ;;  %v11223_v21 = vunpack.i.h.bf16 %v11221_v59  ;;  %v11222_v41 = vunpack.i.l.bf16 %v11221_v59 }
 0x10d   :  { %v13847_v1 = vpop.permute.xlu1 %11235  ;;  %v1896_v58 = vpack.c.bf16 %v1883_v37, %v1882_v47  ;;  %v9886_v47 = vld [vmem:[%s18328_s20 + $0x1b0] ss:$2 sm:$0xff]  ;;  %v9887_v37 = vld [vmem:[%s18328_s20 + $0x1e0] ss:$2 sm:$0xff] }
 0x10e   :  { %v1867_v29 = vsel %vm1860_vm13, %v1850_v27, %v11222_v41  ;;  %v1868_v22 = vsel %vm1860_vm13, %v1851_v14, %v11223_v21  ;;  %v1649_v6 = vsel %vm18266_vm0, %v9886_v47, %v11097_v54  ;;  %v11157_v21 = vunpack.i.l.bf16 %v13693_v38 }
 0x10f   :  { %v13853_v50 = vpop.permute.xlu0 %11230  ;;  %10640 = vmatprep.mubr.msk.bf16.mxu0 %vm1926_vm15, %v1896_v58  ;;  %v11112_v58 = vunpack.i.l.bf16 %v13629_v19  ;;  %v1650_v19 = vsel %vm18266_vm0, %v9887_v37, %v11098_v11  ;;  %v1666_v2 = vsel %vm1657_vm1, %v1649_v6, %v11117_v61  ;;  %v1652_v41 = vsel %vm18266_vm0, %v9889_v9, %v11113_v7 }
 0x110   :  { %v1667_v30 = vsel %vm1657_vm1, %v1650_v19, %v11118_v60  ;;  %v1683_v13 = vsel %vm1674_vm2, %v1666_v2, %v11137_v28  ;;  %v11177_v27 = vunpack.i.l.bf16 %v13734_v57  ;;  %v11193_v11 = vunpack.i.h.bf16 %v13784_v43 }
 0x111   :  { %v13864_v20 = vpop.permute.xlu1 %11245  ;;  %v1651_v15 = vsel %vm18266_vm0, %v9888_v24, %v11112_v58  ;;  %v1684_v8 = vsel %vm1674_vm2, %v1667_v30, %v11138_v33  ;;  %v11192_v54 = vunpack.i.l.bf16 %v13784_v43  ;;  %v11218_v60 = vunpack.i.h.bf16 %v13816_v3 }
 0x112   :  { %v1668_v38 = vsel %vm1657_vm1, %v1651_v15, %v11132_v12  ;;  %v11217_v61 = vunpack.i.l.bf16 %v13816_v3  ;;  %v11213_v24 = vunpack.i.h.bf16 %v13822_v49  ;;  %v11212_v43 = vunpack.i.l.bf16 %v13822_v49 }
 0x113   :  { %v11241_v26 = vpop.permute.xlu0 %11240  ;;  %v11238_v28 = vunpack.i.h.bf16 %v13847_v1  ;;  %v11237_v6 = vunpack.i.l.bf16 %v13847_v1  ;;  %v11232_v12 = vunpack.i.l.bf16 %v13853_v50 }
 0x114   :  { %v11243_v35 = vunpack.i.h.bf16 %v11241_v26  ;;  %v11242_v44 = vunpack.i.l.bf16 %v11241_v26  ;;  %v11178_v26 = vunpack.i.h.bf16 %v13734_v57  ;;  %v1685_v57 = vsel %vm1674_vm2, %v1668_v38, %v11152_v36 }
 0x115   :  { %v13874_v17 = vpop.permute.xlu1 %11255 }
 0x116   :  { %v1884_v62 = vsel %vm1877_vm14, %v1867_v29, %v11242_v44  ;;  %v1885_v51 = vsel %vm1877_vm14, %v1868_v22, %v11243_v35  ;;  %v1669_v35 = vsel %vm1657_vm1, %v1652_v41, %v11133_v23  ;;  %v11173_v44 = vunpack.i.h.bf16 %v13741_v34 }
 0x117   :  { %v13876_v53 = vpop.permute.xlu0 %11250  ;;  %v1897_v48 = vpack.c.bf16 %v1885_v51, %v1884_v62  ;;  %v1699_v29 = vsel %vm63_vm3, %v1683_v13, %v11157_v21  ;;  %v1700_v22 = vsel %vm63_vm3, %v1684_v8, %v11158_v16  ;;  %v11198_v62 = vunpack.i.h.bf16 %v13778_v31 }
 0x118   :  { %v11197_v51 = vunpack.i.l.bf16 %v13778_v31  ;;  %v1716_v34 = vsel %vm1707_vm4, %v1699_v29, %v11177_v27  ;;  %v1717_v37 = vsel %vm1707_vm4, %v1700_v22, %v11178_v26  ;;  %v1701_v31 = vsel %vm63_vm3, %v1685_v57, %v11172_v4 }
 0x119   :  { %10641 = vmatmul.mubr.msk.bf16.gmra.mrb[4].mxu0 %vm1926_vm15, %v1897_v48  ;;  %v13879_v32 = vpop.permute.xlu1 %11265  ;;  %v1686_v48 = vsel %vm1674_vm2, %v1669_v35, %v11153_v10  ;;  %v1734_v33 = vsel %vm1724_vm5, %v1717_v37, %v11198_v62  ;;  %v1718_v3 = vsel %vm1707_vm4, %v1701_v31, %v11192_v54  ;;  %v11233_v23 = vunpack.i.h.bf16 %v13853_v50 }
 0x11a   :  { %v1702_v58 = vsel %vm63_vm3, %v1686_v48, %v11173_v44  ;;  %v1733_v9 = vsel %vm1724_vm5, %v1716_v34, %v11197_v51  ;;  %v1751_v49 = vsel %vm1741_vm6, %v1734_v33, %v11218_v60  ;;  %v11258_v16 = vunpack.i.h.bf16 %v13874_v17 }
 0x11b   :  { %v13881_v52 = vpop.permute.xlu0 %11260  ;;  %v1719_v19 = vsel %vm1707_vm4, %v1702_v58, %v11193_v11  ;;  %v1750_v30 = vsel %vm1741_vm6, %v1733_v9, %v11217_v61  ;;  %v11257_v21 = vunpack.i.l.bf16 %v13874_v17  ;;  %v1735_v1 = vsel %vm1724_vm5, %v1718_v3, %v11212_v43  ;;  %v9890_v58 = vld [vmem:[%s18328_s20 + $0x270] ss:$2 sm:$0xff] }
 0x11c   :  { %v1736_v41 = vsel %vm1724_vm5, %v1719_v19, %v11213_v24  ;;  %v1767_v50 = vsel %vm1758_vm7, %v1750_v30, %v11237_v6  ;;  %v1768_v13 = vsel %vm1758_vm7, %v1751_v49, %v11238_v28  ;;  %v1752_v17 = vsel %vm1741_vm6, %v1735_v1, %v11232_v12 }
 0x11d   :  { %v13883_v40 = vpop.permute.xlu1 %11275  ;;  %v1753_v27 = vsel %vm1741_vm6, %v1736_v41, %v11233_v23  ;;  %v1785_v4 = vsel %vm1775_vm8, %v1768_v13, %v11258_v16  ;;  %v11247_v11 = vunpack.i.l.bf16 %v13864_v20  ;;  %v11253_v37 = vunpack.i.h.bf16 %v13876_v53 }
 0x11e   :  { %v11278_v10 = vunpack.i.h.bf16 %v13883_v40  ;;  %v11277_v36 = vunpack.i.l.bf16 %v13883_v40  ;;  %v1784_v40 = vsel %vm1775_vm8, %v1767_v50, %v11257_v21 }
 0x11f   :  { %v13885_v55 = vpop.permute.xlu0 %11270  ;;  %v1653_v49 = vsel %vm18266_vm0, %v9890_v58, %v11247_v11 }
 0x120   :  { %v1802_v51 = vsel %vm1792_vm9, %v1785_v4, %v11278_v10  ;;  %v11273_v6 = vunpack.i.h.bf16 %v13885_v55  ;;  %v1770_v10 = vsel %vm1758_vm7, %v1753_v27, %v11253_v37 }
 0x121   :  { %v13887_v45 = vpop.permute.xlu1 %11285 }
 0x123   :  { %v13889_v56 = vpop.permute.xlu0 %11280 }
 0x125   :  { %v13891_v46 = vpop.permute.xlu1 %11295 }
 0x126   :  { %v11298_v8 = vunpack.i.h.bf16 %v13891_v46  ;;  %v11297_v26 = vunpack.i.l.bf16 %v13891_v46  ;;  %v1801_v46 = vsel %vm1792_vm9, %v1784_v40, %v11277_v36  ;;  %v11267_v40 = vunpack.i.l.bf16 %v13879_v32 }
 0x127   :  { %v13893_v59 = vpop.permute.xlu0 %11290 }
 0x128   :  { %v1818_v54 = vsel %vm1809_vm10, %v1801_v46, %v11297_v26  ;;  %v1819_v34 = vsel %vm1809_vm10, %v1802_v51, %v11298_v8  ;;  %v11293_v23 = vunpack.i.h.bf16 %v13893_v59  ;;  %v11292_v12 = vunpack.i.l.bf16 %v13893_v59 }
 0x129   :  { %v13895_v5 = vpop.permute.xlu1 %11305  ;;  %v1787_v8 = vsel %vm1775_vm8, %v1770_v10, %v11273_v6  ;;  %v11263_v46 = vunpack.i.h.bf16 %v13881_v52  ;;  %v11262_v51 = vunpack.i.l.bf16 %v13881_v52  ;;  %v11288_v52 = vunpack.i.h.bf16 %v13887_v45 }
 0x12a   :  { %v1804_v27 = vsel %vm1792_vm9, %v1787_v8, %v11293_v23  ;;  %v11308_v23 = vunpack.i.h.bf16 %v13895_v5 }
 0x12b   :  { %v13897_v63 = vpop.permute.xlu0 %11300 }
 0x12d   :  { %v13899_v25 = vpop.permute.xlu1 %11315 }
 0x12e   :  { %v11318_v38 = vunpack.i.h.bf16 %v13899_v25  ;;  %v11317_v35 = vunpack.i.l.bf16 %v13899_v25  ;;  %v11248_v25 = vunpack.i.h.bf16 %v13864_v20 }
 0x12f   :  { %v13901_v42 = vpop.permute.xlu0 %11310 }
 0x130   :  { %v1835_v60 = vsel %vm1826_vm11, %v1818_v54, %v11317_v35  ;;  %v1836_v61 = vsel %vm1826_vm11, %v1819_v34, %v11318_v38  ;;  %v11313_v16 = vunpack.i.h.bf16 %v13901_v42  ;;  %v11312_v21 = vunpack.i.l.bf16 %v13901_v42 }
 0x131   :  { %v13915_v18 = vpop.permute.xlu1 %11325 }
 0x133   :  { %v13925_v0 = vpop.permute.xlu0 %11320 }
 0x135   :  { %v13939_v39 = vpop.permute.xlu1 %11335 }
 0x136   :  { %v11338_v29 = vunpack.i.h.bf16 %v13939_v39  ;;  %v11337_v22 = vunpack.i.l.bf16 %v13939_v39  ;;  %v11252_v39 = vunpack.i.l.bf16 %v13876_v53  ;;  %v11272_v53 = vunpack.i.l.bf16 %v13885_v55 }
 0x137   :  { %v13945_v14 = vpop.permute.xlu0 %11330 }
 0x138   :  { %v1852_v24 = vsel %vm1843_vm12, %v1835_v60, %v11337_v22  ;;  %v1853_v43 = vsel %vm1843_vm12, %v1836_v61, %v11338_v29  ;;  %v1769_v41 = vsel %vm1758_vm7, %v1752_v17, %v11252_v39  ;;  %v11333_v36 = vunpack.i.h.bf16 %v13945_v14  ;;  %v9892_v39 = vld [vmem:[%s18328_s20 + $0x2d0] ss:$2 sm:$0xff]  ;;  %v9893_v60 = vld [vmem:[%s18328_s20 + $0x300] ss:$2 sm:$0xff] }
 0x139   :  { %v11332_v59 = vunpack.i.l.bf16 %v13945_v14  ;;  %v1786_v13 = vsel %vm1775_vm8, %v1769_v41, %v11272_v53  ;;  %v11268_v14 = vunpack.i.h.bf16 %v13879_v32  ;;  %v1821_v29 = vsel %vm1809_vm10, %v1804_v27, %v11313_v16 }
 0x13a   :  { %v13959_v47 = vpop.permute.xlu1 %11345  ;;  %v1803_v17 = vsel %vm1792_vm9, %v1786_v13, %v11292_v12  ;;  %v11287_v61 = vunpack.i.l.bf16 %v13887_v45  ;;  %v11283_v45 = vunpack.i.h.bf16 %v13889_v56  ;;  %v11282_v53 = vunpack.i.l.bf16 %v13889_v56 }
 0x13b   :  { %v13965_v7 = vpop.permute.xlu0 %11340  ;;  %v1820_v4 = vsel %vm1809_vm10, %v1803_v17, %v11312_v21  ;;  %v1655_v20 = vsel %vm18266_vm0, %v9892_v39, %v11262_v51  ;;  %v11307_v12 = vunpack.i.l.bf16 %v13895_v5  ;;  %v11302_v16 = vunpack.i.l.bf16 %v13897_v63 }
 0x13c   :  { %v11328_v56 = vunpack.i.h.bf16 %v13915_v18  ;;  %v11327_v21 = vunpack.i.l.bf16 %v13915_v18  ;;  %v11322_v41 = vunpack.i.l.bf16 %v13925_v0  ;;  %v1672_v5 = vsel %vm1657_vm1, %v1655_v20, %v11282_v53 }
 0x13d   :  { %v11343_v18 = vunpack.i.h.bf16 %v13965_v7 }
 0x13e   :  { %v11356_v2 = vpop.permute.xlu1 %11355 }
 0x13f   :  { %v11358_v57 = vunpack.i.h.bf16 %v11356_v2  ;;  %v11357_v48 = vunpack.i.l.bf16 %v11356_v2 }
 0x140   :  { %v13983_v15 = vpop.permute.xlu0 %11350 }
 0x141   :  { %v1869_v3 = vsel %vm1860_vm13, %v1852_v24, %v11357_v48  ;;  %v1870_v19 = vsel %vm1860_vm13, %v1853_v43, %v11358_v57  ;;  %v11353_v26 = vunpack.i.h.bf16 %v13983_v15  ;;  %v11352_v42 = vunpack.i.l.bf16 %v13983_v15  ;;  %v9891_v15 = vld [vmem:[%s18328_s20 + $0x2a0] ss:$2 sm:$0xff]  ;;  %s12377_s20 = smov 16  }
 0x142   :  { %v13997_v44 = vpop.permute.xlu1 %11365  ;;  %v1837_v57 = vsel %vm1826_vm11, %v1820_v4, %v11332_v59  ;;  %v1838_v48 = vsel %vm1826_vm11, %v1821_v29, %v11333_v36  ;;  %v1654_v24 = vsel %vm18266_vm0, %v9891_v15, %v11248_v25  ;;  %v1670_v43 = vsel %vm1657_vm1, %v1653_v49, %v11267_v40 }
 0x143   :  { %v1854_v32 = vsel %vm1843_vm12, %v1837_v57, %v11352_v42  ;;  %v1855_v54 = vsel %vm1843_vm12, %v1838_v48, %v11353_v26  ;;  %v1671_v6 = vsel %vm1657_vm1, %v1654_v24, %v11268_v14  ;;  %v1656_v25 = vsel %vm18266_vm0, %v9893_v60, %v11263_v46 }
 0x144   :  { %v14003_v62 = vpop.permute.xlu0 %11360  ;;  %v11303_v49 = vunpack.i.h.bf16 %v13897_v63  ;;  %v1673_v36 = vsel %vm1657_vm1, %v1656_v25, %v11283_v45  ;;  %v11348_v59 = vunpack.i.h.bf16 %v13959_v47  ;;  %v11347_v63 = vunpack.i.l.bf16 %v13959_v47 }
 0x145   :  { %v11342_v42 = vunpack.i.l.bf16 %v13965_v7  ;;  %v11368_v27 = vunpack.i.h.bf16 %v13997_v44  ;;  %v11363_v15 = vunpack.i.h.bf16 %v14003_v62  ;;  %v11362_v46 = vunpack.i.l.bf16 %v14003_v62 }
 0x146   :  { %v1690_v17 = vsel %vm1674_vm2, %v1673_v36, %v11303_v49  ;;  %vm65_vm1 = vcmask 91136   ;;  %vm3232_vm0 = vcmask 523264  }
 0x147   :  { %v11376_v31 = vpop.permute.xlu1 %11375 }
 0x148   :  { %v11378_v9 = vunpack.i.h.bf16 %v11376_v31  ;;  %v11377_v33 = vunpack.i.l.bf16 %v11376_v31 }
 0x149   :  { %v11371_v28 = vpop.permute.xlu0 %11370 }
 0x14a   :  { %v1886_v2 = vsel %vm1877_vm14, %v1869_v3, %v11377_v33  ;;  %v1887_v30 = vsel %vm1877_vm14, %v1870_v19, %v11378_v9  ;;  %v11373_v38 = vunpack.i.h.bf16 %v11371_v28  ;;  %v11372_v35 = vunpack.i.l.bf16 %v11371_v28 }
 0x14b   :  { %v14031_v1 = vpop.permute.xlu1 %11385  ;;  %v1898_v55 = vpack.c.bf16 %v1887_v30, %v1886_v2  ;;  %v1687_v2 = vsel %vm1674_vm2, %v1670_v43, %v11287_v61  ;;  %v1688_v30 = vsel %vm1674_vm2, %v1671_v6, %v11288_v52 }
 0x14c   :  { %v1871_v31 = vsel %vm1860_vm13, %v1854_v32, %v11372_v35  ;;  %v1872_v58 = vsel %vm1860_vm13, %v1855_v54, %v11373_v38  ;;  %v1703_v8 = vsel %vm63_vm3, %v1687_v2, %v11307_v12  ;;  %v1704_v26 = vsel %vm63_vm3, %v1688_v30, %v11308_v23 }
 0x14d   :  { %v14037_v50 = vpop.permute.xlu0 %11380  ;;  %10644 = vmatprep.mubr.msk.bf16.mxu0 %vm1926_vm15, %v1898_v55  ;;  %v11323_v55 = vunpack.i.h.bf16 %v13925_v0  ;;  %v1689_v0 = vsel %vm1674_vm2, %v1672_v5, %v11302_v16  ;;  %v11367_v38 = vunpack.i.l.bf16 %v13997_v44  ;;  %v1720_v35 = vsel %vm1707_vm4, %v1703_v8, %v11327_v21 }
 0x14e   :  { %v1721_v47 = vsel %vm1707_vm4, %v1704_v26, %v11328_v56  ;;  %v1705_v14 = vsel %vm63_vm3, %v1689_v0, %v11322_v41  ;;  %v1737_v29 = vsel %vm1724_vm5, %v1720_v35, %v11347_v63  ;;  %v11383_v48 = vunpack.i.h.bf16 %v14037_v50 }
 0x14f   :  { %v14050_v22 = vpop.permute.xlu1 %11395  ;;  %v1706_v40 = vsel %vm63_vm3, %v1690_v17, %v11323_v55  ;;  %v1738_v7 = vsel %vm1724_vm5, %v1721_v47, %v11348_v59  ;;  %v1722_v44 = vsel %vm1707_vm4, %v1705_v14, %v11342_v42  ;;  %v1754_v32 = vsel %vm1741_vm6, %v1737_v29, %v11367_v38 }
 0x150   :  { %v1723_v57 = vsel %vm1707_vm4, %v1706_v40, %v11343_v18  ;;  %v1755_v54 = vsel %vm1741_vm6, %v1738_v7, %v11368_v27  ;;  %v11388_v39 = vunpack.i.h.bf16 %v14031_v1  ;;  %v11387_v62 = vunpack.i.l.bf16 %v14031_v1 }
 0x151   :  { %v11391_v11 = vpop.permute.xlu0 %11390  ;;  %vm74_vm2 = vcmask 90112   ;;  %vm3047_vm4 = vcmask 31744  }
 0x152   :  { %v11393_v34 = vunpack.i.h.bf16 %v11391_v11  ;;  %v11392_v37 = vunpack.i.l.bf16 %v11391_v11  ;;  %v11382_v11 = vunpack.i.l.bf16 %v14037_v50  ;;  %v1740_v50 = vsel %vm1724_vm5, %v1723_v57, %v11363_v15 }
 0x153   :  { %v14077_v28 = vpop.permute.xlu1 %11405  ;;  %v1772_v20 = vsel %vm1758_vm7, %v1755_v54, %v11388_v39 }
 0x154   :  { %v1888_v9 = vsel %vm1877_vm14, %v1871_v31, %v11392_v37  ;;  %v1889_v33 = vsel %vm1877_vm14, %v1872_v58, %v11393_v34  ;;  %v11398_v34 = vunpack.i.h.bf16 %v14050_v22  ;;  %v11397_v37 = vunpack.i.l.bf16 %v14050_v22 }
 0x155   :  { %v14082_v3 = vpop.permute.xlu0 %11400  ;;  %v1899_v19 = vpack.c.bf16 %v1889_v33, %v1888_v9  ;;  %v11408_v60 = vunpack.i.h.bf16 %v14077_v28  ;;  %v11407_v52 = vunpack.i.l.bf16 %v14077_v28  ;;  %v1739_v31 = vsel %vm1724_vm5, %v1722_v44, %v11362_v46 }
 0x156   :  { %v11403_v58 = vunpack.i.h.bf16 %v14082_v3  ;;  %v11402_v24 = vunpack.i.l.bf16 %v14082_v3  ;;  %v1756_v22 = vsel %vm1741_vm6, %v1739_v31, %v11382_v11  ;;  %v1757_v9 = vsel %vm1741_vm6, %v1740_v50, %v11383_v48 }
 0x157   :  { %10645 = vmatmul.mubr.msk.bf16.gmra.mrb[8].mxu0 %vm1926_vm15, %v1899_v19  ;;  %v14097_v10 = vpop.permute.xlu1 %11415  ;;  %v1773_v28 = vsel %vm1758_vm7, %v1756_v22, %v11397_v37  ;;  %v1774_v6 = vsel %vm1758_vm7, %v1757_v9, %v11398_v34  ;;  %v1771_v19 = vsel %vm1758_vm7, %v1754_v32, %v11387_v62  ;;  %vm3056_vm5 = vcmask 130048  }
 0x158   :  { %v11418_v1 = vunpack.i.h.bf16 %v14097_v10  ;;  %v11417_v33 = vunpack.i.l.bf16 %v14097_v10  ;;  %v1790_v3 = vsel %vm1775_vm8, %v1773_v28, %v11407_v52  ;;  %v1791_v25 = vsel %vm1775_vm8, %v1774_v6, %v11408_v60 }
 0x159   :  { %v11411_v13 = vpop.permute.xlu0 %11410  ;;  %v1788_v12 = vsel %vm1775_vm8, %v1771_v19, %v11402_v24  ;;  %v1789_v2 = vsel %vm1775_vm8, %v1772_v20, %v11403_v58  ;;  %vm2993_vm6 = vcmask 490496   ;;  %vm3002_vm8 = vcmask 588800  }
 0x15a   :  { %v11413_v45 = vunpack.i.h.bf16 %v11411_v13  ;;  %v11412_v53 = vunpack.i.l.bf16 %v11411_v13  ;;  %v1807_v56 = vsel %vm1792_vm9, %v1790_v3, %v11417_v33  ;;  %v1808_v21 = vsel %vm1792_vm9, %v1791_v25, %v11418_v1 }
 0x15b   :  { %v11426_v4 = vpop.permute.xlu1 %11425 }
 0x15c   :  { %v11428_v30 = vunpack.i.h.bf16 %v11426_v4  ;;  %v11427_v49 = vunpack.i.l.bf16 %v11426_v4  ;;  %v1805_v10 = vsel %vm1792_vm9, %v1788_v12, %v11412_v53  ;;  %v1806_v5 = vsel %vm1792_vm9, %v1789_v2, %v11413_v45 }
 0x15d   :  { %v11421_v51 = vpop.permute.xlu0 %11420  ;;  %vm3065_vm9 = vcmask 228352  }
 0x15e   :  { %v11423_v55 = vunpack.i.h.bf16 %v11421_v51  ;;  %v11422_v41 = vunpack.i.l.bf16 %v11421_v51  ;;  %v1824_v42 = vsel %vm1809_vm10, %v1807_v56, %v11427_v49  ;;  %v1825_v0 = vsel %vm1809_vm10, %v1808_v21, %v11428_v30 }
 0x15f   :  { %v11436_v61 = vpop.permute.xlu1 %11435 }
 0x160   :  { %v11438_v36 = vunpack.i.h.bf16 %v11436_v61  ;;  %v11437_v59 = vunpack.i.l.bf16 %v11436_v61  ;;  %v1822_v35 = vsel %vm1809_vm10, %v1805_v10, %v11422_v41  ;;  %v1823_v47 = vsel %vm1809_vm10, %v1806_v5, %v11423_v55 }
 0x161   :  { %v11431_v43 = vpop.permute.xlu0 %11430  ;;  %vm3011_vm10 = vcmask 687104  }
 0x162   :  { %v11433_v63 = vunpack.i.h.bf16 %v11431_v43  ;;  %v11432_v13 = vunpack.i.l.bf16 %v11431_v43  ;;  %v1841_v4 = vsel %vm1826_vm11, %v1824_v42, %v11437_v59  ;;  %v1842_v29 = vsel %vm1826_vm11, %v1825_v0, %v11438_v36 }
 0x163   :  { %v11446_v23 = vpop.permute.xlu1 %11445  ;;  %v18261_v36 = vmov 0.0  }
 0x164   :  { %v11448_v8 = vunpack.i.h.bf16 %v11446_v23  ;;  %v11447_v26 = vunpack.i.l.bf16 %v11446_v23  ;;  %v1839_v46 = vsel %vm1826_vm11, %v1822_v35, %v11432_v13  ;;  %v1840_v51 = vsel %vm1826_vm11, %v1823_v47, %v11433_v63  ;;  %64 = vst.msk [vmem:[#allocation2] sm:$0xff] %vm63_vm3, %v18261_v36  ;;  %67 = vst.msk [vmem:[#allocation2 + $0xa0] sm:$0xff] %vm63_vm3, %v18261_v36 }
 0x165   :  { %v11441_v16 = vpop.permute.xlu0 %11440  ;;  %70 = vst.msk [vmem:[#allocation2 + $0x90] sm:$0xff] %vm63_vm3, %v18261_v36  ;;  %72 = vst.msk [vmem:[#allocation2 + $0x130] sm:$0xff] %vm63_vm3, %v18261_v36 }
 0x166   :  { %v11443_v17 = vunpack.i.h.bf16 %v11441_v16  ;;  %v11442_v27 = vunpack.i.l.bf16 %v11441_v16  ;;  %v1858_v44 = vsel %vm1843_vm12, %v1841_v4, %v11447_v26  ;;  %v1859_v57 = vsel %vm1843_vm12, %v1842_v29, %v11448_v8  ;;  %66 = vst.msk [vmem:[#allocation2 + $0x8] sm:$0x3] %vm65_vm1, %v18261_v36  ;;  %68 = vst.msk [vmem:[#allocation2 + $0xa8] sm:$0x3] %vm65_vm1, %v18261_v36 }
 0x167   :  { %v11456_v18 = vpop.permute.xlu1 %11455  ;;  %71 = vst.msk [vmem:[#allocation2 + $0x98] sm:$0x3] %vm65_vm1, %v18261_v36  ;;  %73 = vst.msk [vmem:[#allocation2 + $0x138] sm:$0x3] %vm65_vm1, %v18261_v36  ;;  %vm3038_vm1 = vcmask 982016  }
 0x168   :  { %v11458_v14 = vunpack.i.h.bf16 %v11456_v18  ;;  %v11457_v40 = vunpack.i.l.bf16 %v11456_v18  ;;  %v1856_v11 = vsel %vm1843_vm12, %v1839_v46, %v11442_v27  ;;  %v1857_v32 = vsel %vm1843_vm12, %v1840_v51, %v11443_v17  ;;  %84 = vst.msk [vmem:[#allocation2 + $0x90] sm:$0x1] %vm74_vm2, %v18261_v36  ;;  %75 = vst.msk [vmem:[#allocation2] sm:$0x1] %vm74_vm2, %v18261_v36 }
 0x169   :  { %v11451_v38 = vpop.permute.xlu0 %11450  ;;  %76 = vst.msk [vmem:[#allocation2 + $0x10] sm:$0x1] %vm74_vm2, %v18261_v36  ;;  %77 = vst.msk [vmem:[#allocation2 + $0x20] sm:$0x1] %vm74_vm2, %v18261_v36  ;;  %vm3020_vm12 = vcmask 785408  }
 0x16a   :  { %v11453_v7 = vunpack.i.h.bf16 %v11451_v38  ;;  %v11452_v15 = vunpack.i.l.bf16 %v11451_v38  ;;  %v1875_v39 = vsel %vm1860_vm13, %v1858_v44, %v11457_v40  ;;  %v1876_v62 = vsel %vm1860_vm13, %v1859_v57, %v11458_v14  ;;  %78 = vst.msk [vmem:[#allocation2 + $0x30] sm:$0x1] %vm74_vm2, %v18261_v36  ;;  %79 = vst.msk [vmem:[#allocation2 + $0x40] sm:$0x1] %vm74_vm2, %v18261_v36 }
 0x16b   :  { %v11466_v48 = vpop.permute.xlu1 %11465  ;;  %80 = vst.msk [vmem:[#allocation2 + $0x50] sm:$0x1] %vm74_vm2, %v18261_v36  ;;  %81 = vst.msk [vmem:[#allocation2 + $0x60] sm:$0x1] %vm74_vm2, %v18261_v36 }
 0x16c   :  { %v11468_v54 = vunpack.i.h.bf16 %v11466_v48  ;;  %v11467_v34 = vunpack.i.l.bf16 %v11466_v48  ;;  %v1873_v61 = vsel %vm1860_vm13, %v1856_v11, %v11452_v15  ;;  %v1874_v31 = vsel %vm1860_vm13, %v1857_v32, %v11453_v7  ;;  %82 = vst.msk [vmem:[#allocation2 + $0x70] sm:$0x1] %vm74_vm2, %v18261_v36  ;;  %83 = vst.msk [vmem:[#allocation2 + $0x80] sm:$0x1] %vm74_vm2, %v18261_v36 }
 0x16d   :  { %v11461_v37 = vpop.permute.xlu0 %11460  ;;  %85 = vst.msk [vmem:[#allocation2 + $0xa0] sm:$0x1] %vm74_vm2, %v18261_v36  ;;  %86 = vst.msk [vmem:[#allocation2 + $0xb0] sm:$0x1] %vm74_vm2, %v18261_v36  ;;  %vm3074_vm13 = vcmask 326656  }
 0x16e   :  { %v11463_v60 = vunpack.i.h.bf16 %v11461_v37  ;;  %v11462_v52 = vunpack.i.l.bf16 %v11461_v37  ;;  %v1892_v50 = vsel %vm1877_vm14, %v1875_v39, %v11467_v34  ;;  %v1893_v58 = vsel %vm1877_vm14, %v1876_v62, %v11468_v54  ;;  %87 = vst.msk [vmem:[#allocation2 + $0xc0] sm:$0x1] %vm74_vm2, %v18261_v36  ;;  %88 = vst.msk [vmem:[#allocation2 + $0xd0] sm:$0x1] %vm74_vm2, %v18261_v36 }
 0x16f   :  { %v1901_v22 = vpack.c.bf16 %v1893_v58, %v1892_v50  ;;  %89 = vst.msk [vmem:[#allocation2 + $0xe0] sm:$0x1] %vm74_vm2, %v18261_v36  ;;  %90 = vst.msk [vmem:[#allocation2 + $0xf0] sm:$0x1] %vm74_vm2, %v18261_v36 }
 0x170   :  { %v1890_v24 = vsel %vm1877_vm14, %v1873_v61, %v11462_v52  ;;  %v1891_v43 = vsel %vm1877_vm14, %v1874_v31, %v11463_v60  ;;  %91 = vst.msk [vmem:[#allocation2 + $0x100] sm:$0x1] %vm74_vm2, %v18261_v36  ;;  %92 = vst.msk [vmem:[#allocation2 + $0x110] sm:$0x1] %vm74_vm2, %v18261_v36  ;;  %vm3029_vm14 = vcmask 883712  }
 0x171   :  { %v1900_v9 = vpack.c.bf16 %v1891_v43, %v1890_v24  ;;  %93 = vst.msk [vmem:[#allocation2 + $0x120] sm:$0x1] %vm74_vm2, %v18261_v36  ;;  %94 = vst.msk [vmem:[#allocation2 + $0x130] sm:$0x1] %vm74_vm2, %v18261_v36 }
 0x172   :  { %95 = vst.msk [vmem:[#allocation2 + $0x9] sm:$0x1] %vm74_vm2, %v18261_v36  ;;  %96 = vst.msk [vmem:[#allocation2 + $0x19] sm:$0x1] %vm74_vm2, %v18261_v36 }
 0x173   :  { %10648 = vmatprep.mubr.msk.bf16.mxu0 %vm1926_vm15, %v1900_v9  ;;  %97 = vst.msk [vmem:[#allocation2 + $0x29] sm:$0x1] %vm74_vm2, %v18261_v36  ;;  %98 = vst.msk [vmem:[#allocation2 + $0x39] sm:$0x1] %vm74_vm2, %v18261_v36 }
 0x174   :  { %10649 = vmatmul.mubr.msk.bf16.gmra.mrb[12].mxu0 %vm1926_vm15, %v1901_v22  ;;  %99 = vst.msk [vmem:[#allocation2 + $0x49] sm:$0x1] %vm74_vm2, %v18261_v36  ;;  %100 = vst.msk [vmem:[#allocation2 + $0x59] sm:$0x1] %vm74_vm2, %v18261_v36 }
 0x175   :  { %101 = vst.msk [vmem:[#allocation2 + $0x69] sm:$0x1] %vm74_vm2, %v18261_v36  ;;  %102 = vst.msk [vmem:[#allocation2 + $0x79] sm:$0x1] %vm74_vm2, %v18261_v36 }
 0x176   :  { %103 = vst.msk [vmem:[#allocation2 + $0x89] sm:$0x1] %vm74_vm2, %v18261_v36  ;;  %104 = vst.msk [vmem:[#allocation2 + $0x99] sm:$0x1] %vm74_vm2, %v18261_v36 }
 0x177   :  { %105 = vst.msk [vmem:[#allocation2 + $0xa9] sm:$0x1] %vm74_vm2, %v18261_v36  ;;  %106 = vst.msk [vmem:[#allocation2 + $0xb9] sm:$0x1] %vm74_vm2, %v18261_v36 }
 0x178   :  { %107 = vst.msk [vmem:[#allocation2 + $0xc9] sm:$0x1] %vm74_vm2, %v18261_v36  ;;  %108 = vst.msk [vmem:[#allocation2 + $0xd9] sm:$0x1] %vm74_vm2, %v18261_v36 }
 0x179   :  { %109 = vst.msk [vmem:[#allocation2 + $0xe9] sm:$0x1] %vm74_vm2, %v18261_v36  ;;  %110 = vst.msk [vmem:[#allocation2 + $0xf9] sm:$0x1] %vm74_vm2, %v18261_v36 }
 0x17a   :  { %111 = vst.msk [vmem:[#allocation2 + $0x109] sm:$0x1] %vm74_vm2, %v18261_v36  ;;  %112 = vst.msk [vmem:[#allocation2 + $0x119] sm:$0x1] %vm74_vm2, %v18261_v36 }
 0x17b   :  { %113 = vst.msk [vmem:[#allocation2 + $0x129] sm:$0x1] %vm74_vm2, %v18261_v36  ;;  %114 = vst.msk [vmem:[#allocation2 + $0x139] sm:$0x1] %vm74_vm2, %v18261_v36  ;;  %vm3083_vm2 = vcmask 424960  }
 0x17c   :  { %v2243_v59 = vld [vmem:[#allocation2 + $0x1] ss:$2 sm:$0xf]  ;;  %v2259_v42 = vld [vmem:[#allocation2 + $0x2] ss:$2 sm:$0xf] }
 0x17d   :  { %2489 = vrot.lane.b32.xlu0 %v2243_v59, %s18342_s13  ;;  %v2424_v14 = vld [vmem:[#allocation2 + $0x90] ss:$2 sm:$0xf]  ;;  %v2275_v46 = vld [vmem:[#allocation2 + $0x3] ss:$2 sm:$0xf] }
 0x17e   :  { %2847 = vrot.lane.b32.xlu1 %v2424_v14, %s12377_s20  ;;  %v2440_v11 = vld [vmem:[#allocation2 + $0x91] ss:$2 sm:$0xf]  ;;  %v2251_v37 = vld [vmem:[#allocation2 + $0xa1] ss:$2 sm:$0xf] }
 0x17f   :  { %v2456_v62 = vld [vmem:[#allocation2 + $0x92] ss:$2 sm:$0xf]  ;;  %v2267_v60 = vld [vmem:[#allocation2 + $0xa2] ss:$2 sm:$0xf] }
 0x180   :  { %v2472_v52 = vld [vmem:[#allocation2 + $0x93] ss:$2 sm:$0xf]  ;;  %v2283_v61 = vld [vmem:[#allocation2 + $0xa3] ss:$2 sm:$0xf] }
 0x181   :  { %2521 = vrot.lane.b32.xlu0 %v2259_v42, %s18334_s28  ;;  %v2432_v31 = vld [vmem:[#allocation2 + $0x130] ss:$2 sm:$0xf] }
 0x182   :  { %2879 = vrot.lane.b32.xlu1 %v2440_v11, %s12378_s14 }
 0x185   :  { %2553 = vrot.lane.b32.xlu0 %v2275_v46, %s18343_s12 }
 0x186   :  { %2911 = vrot.lane.b32.xlu1 %v2456_v62, %s12379_s2 }
 0x189   :  { %2497 = vrot.lane.b32.xlu0 %v2251_v37, %s18342_s13 }
 0x18a   :  { %2943 = vrot.lane.b32.xlu1 %v2472_v52, %s12380_s18 }
 0x18d   :  { %2529 = vrot.lane.b32.xlu0 %v2267_v60, %s18334_s28 }
 0x18e   :  { %2855 = vrot.lane.b32.xlu1 %v2432_v31, %s12377_s20 }
 0x191   :  { %2561 = vrot.lane.b32.xlu0 %v2283_v61, %s18343_s12 }
 0x1af   :  { %v14173_v1 = vpop.f32.mrb[0].mxu0 }
 0x1b0   :  { %v14175_v33 = vpop.f32.mrb[1].mxu0  ;;  %v2087_v53 = vmul.f32 %v14173_v1, %v14173_v1  ;;  %v2051_v23 = vsel %vm63_vm3, %v14173_v1, 0.0 }
 0x1b1   :  { %v2085_v28 = vmul.f32 %v14175_v33, %v14175_v33  ;;  %v14179_v6 = vpop.f32.mrb[2].mxu0  ;;  %v2048_v19 = vsel %vm63_vm3, %v14175_v33, 0.0 }
 0x1b2   :  { %v14181_v45 = vpop.f32.mrb[3].mxu0  ;;  %v2088_v2 = vmul.f32 %v14179_v6, %v14179_v6  ;;  %v2104_v56 = vsel %vm63_vm3, %v2087_v53, 0.0  ;;  %v2053_v21 = vsel %vm63_vm3, %v14179_v6, 0.0 }
 0x1b3   :  { %v2049_v20 = vsel %vm63_vm3, %v14181_v45, 0.0  ;;  %v2086_v3 = vmul.f32 %v14181_v45, %v14181_v45  ;;  %v2101_v12 = vsel %vm63_vm3, %v2085_v28, 0.0 }
 0x1b4   :  { %v2050_v25 = vadd.f32 %v2049_v20, %v2048_v19  ;;  %v2106_v10 = vsel %vm63_vm3, %v2088_v2, 0.0 }
 0x1b5   :  { %v2102_v30 = vsel %vm63_vm3, %v2086_v3, 0.0 }
 0x1b6   :  { %v2052_v49 = vadd.f32 %v2051_v23, %v2050_v25  ;;  %v2103_v16 = vadd.f32 %v2102_v30, %v2101_v12 }
 0x1b8   :  { %v2105_v55 = vadd.f32 %v2104_v56, %v2103_v16  ;;  %v2054_v41 = vadd.f32 %v2053_v21, %v2052_v49 }
 0x1ba   :  { %v14201_v5 = vadd.f32 %v2106_v10, %v2105_v55 }
 0x1ec   :  { %v14296_v63 = vpop.f32.mrb[4].mxu0 }
 0x1ed   :  { %v14298_v13 = vpop.f32.mrb[5].mxu0  ;;  %v2091_v27 = vmul.f32 %v14296_v63, %v14296_v63  ;;  %v2059_v29 = vsel %vm63_vm3, %v14296_v63, 0.0 }
 0x1ee   :  { %v2055_v8 = vsel %vm63_vm3, %v14298_v13, 0.0  ;;  %v2089_v26 = vmul.f32 %v14298_v13, %v14298_v13  ;;  %v14304_v18 = vpop.f32.mrb[6].mxu0 }
 0x1ef   :  { %v2056_v0 = vadd.f32 %v2055_v8, %v2054_v41  ;;  %v14306_v17 = vpop.f32.mrb[7].mxu0  ;;  %v2092_v7 = vmul.f32 %v14304_v18, %v14304_v18  ;;  %v2112_v57 = vsel %vm63_vm3, %v2091_v27, 0.0  ;;  %v2061_v48 = vsel %vm63_vm3, %v14304_v18, 0.0 }
 0x1f0   :  { %v2108_v38 = vsel %vm63_vm3, %v2089_v26, 0.0  ;;  %v2057_v35 = vsel %vm63_vm3, %v14306_v17, 0.0  ;;  %v2090_v47 = vmul.f32 %v14306_v17, %v14306_v17 }
 0x1f1   :  { %v2109_v40 = vadd.f32 %v2108_v38, %v14201_v5  ;;  %v2058_v4 = vadd.f32 %v2057_v35, %v2056_v0  ;;  %v2114_v34 = vsel %vm63_vm3, %v2092_v7, 0.0 }
 0x1f2   :  { %v2110_v15 = vsel %vm63_vm3, %v2090_v47, 0.0 }
 0x1f3   :  { %v2060_v51 = vadd.f32 %v2059_v29, %v2058_v4  ;;  %v2111_v44 = vadd.f32 %v2110_v15, %v2109_v40 }
 0x1f5   :  { %v2113_v32 = vadd.f32 %v2112_v57, %v2111_v44  ;;  %v2062_v54 = vadd.f32 %v2061_v48, %v2060_v51 }
 0x1f7   :  { %v2115_v39 = vadd.f32 %v2114_v34, %v2113_v32 }
 0x22a   :  { %v14335_v50 = vpop.f32.mrb[8].mxu0 }
 0x22b   :  { %v14337_v58 = vpop.f32.mrb[9].mxu0  ;;  %v2095_v53 = vmul.f32 %v14335_v50, %v14335_v50  ;;  %v2067_v12 = vsel %vm63_vm3, %v14335_v50, 0.0 }
 0x22c   :  { %v2063_v24 = vsel %vm63_vm3, %v14337_v58, 0.0  ;;  %v2093_v43 = vmul.f32 %v14337_v58, %v14337_v58  ;;  %v14343_v22 = vpop.f32.mrb[10].mxu0 }
 0x22d   :  { %v2064_v9 = vadd.f32 %v2063_v24, %v2062_v54  ;;  %v14345_v28 = vpop.f32.mrb[11].mxu0  ;;  %v2096_v2 = vmul.f32 %v14343_v22, %v14343_v22  ;;  %v2120_v56 = vsel %vm63_vm3, %v2095_v53, 0.0  ;;  %v2069_v21 = vsel %vm63_vm3, %v14343_v22, 0.0 }
 0x22e   :  { %v2116_v19 = vsel %vm63_vm3, %v2093_v43, 0.0  ;;  %v2065_v20 = vsel %vm63_vm3, %v14345_v28, 0.0  ;;  %v2094_v3 = vmul.f32 %v14345_v28, %v14345_v28 }
 0x22f   :  { %v2117_v25 = vadd.f32 %v2116_v19, %v2115_v39  ;;  %v2066_v23 = vadd.f32 %v2065_v20, %v2064_v9  ;;  %v2122_v10 = vsel %vm63_vm3, %v2096_v2, 0.0 }
 0x230   :  { %v2118_v30 = vsel %vm63_vm3, %v2094_v3, 0.0 }
 0x231   :  { %v2068_v49 = vadd.f32 %v2067_v12, %v2066_v23  ;;  %v2119_v16 = vadd.f32 %v2118_v30, %v2117_v25  ;;  %v2151_v30 = vlaneseq }
 0x233   :  { %v2121_v55 = vadd.f32 %v2120_v56, %v2119_v16  ;;  %v2070_v41 = vadd.f32 %v2069_v21, %v2068_v49  ;;  %v14386_v49 = vshrl.u32 %v2151_v30, 7  ;;  %v2143_v16 = vld [vmem:[%s18383_s19] sm:$0x1]  ;;  %s12393_s19 = smov 112  }
 0x235   :  { %v2123_v5 = vadd.f32 %v2122_v10, %v2121_v55  ;;  %18382 = vst [vmem:[#allocation12_spill] sm:$0xff] %v14386_v49  ;;  %v14392_v56 = vsub.s32 0, %v14386_v49 }
 0x237   :  { %18384 = vst [vmem:[#allocation14_spill] sm:$0xff] %v14392_v56 }
 0x247   :  { %v14363_v59 = vpop.f32.mrb[12].mxu0 }
 0x248   :  { %v14365_v8 = vpop.f32.mrb[13].mxu0  ;;  %v2099_v35 = vmul.f32 %v14363_v59, %v14363_v59  ;;  %v2075_v7 = vsel %vm63_vm3, %v14363_v59, 0.0 }
 0x249   :  { %v2071_v26 = vsel %vm63_vm3, %v14365_v8, 0.0  ;;  %v2097_v42 = vmul.f32 %v14365_v8, %v14365_v8  ;;  %v14371_v0 = vpop.f32.mrb[14].mxu0 }
 0x24a   :  { %v2072_v27 = vadd.f32 %v2071_v26, %v2070_v41  ;;  %v2036_v38 = vpop.f32.mrb[15].mxu0  ;;  %v2100_v15 = vmul.f32 %v14371_v0, %v14371_v0  ;;  %v2128_v57 = vsel %vm63_vm3, %v2099_v35, 0.0  ;;  %v2077_v48 = vsel %vm63_vm3, %v14371_v0, 0.0  ;;  %v2147_v41 = vld [vmem:[%s18385_s24] sm:$0x1]  ;;  %s12389_s24 = smov 108  }
 0x24b   :  { %v2124_v47 = vsel %vm63_vm3, %v2097_v42, 0.0  ;;  %v2073_v14 = vsel %vm63_vm3, %v2036_v38, 0.0  ;;  %v2098_v40 = vmul.f32 %v2036_v38, %v2036_v38 }
 0x24c   :  { %v2125_v4 = vadd.f32 %v2124_v47, %v2123_v5  ;;  %v2074_v29 = vadd.f32 %v2073_v14, %v2072_v27  ;;  %v2130_v54 = vsel %vm63_vm3, %v2100_v15, 0.0 }
 0x24d   :  { %v2126_v46 = vsel %vm63_vm3, %v2098_v40, 0.0 }
 0x24e   :  { %v2076_v51 = vadd.f32 %v2075_v7, %v2074_v29  ;;  %v2127_v44 = vadd.f32 %v2126_v46, %v2125_v4 }
 0x250   :  { %v2078_v11 = vadd.f32 %v2077_v48, %v2076_v51  ;;  %v2129_v32 = vadd.f32 %v2128_v57, %v2127_v44 }
 0x252   :  { %v2079_v34 = vrot.slane %v2078_v11, 4  ;;  %v2131_v37 = vadd.f32 %v2130_v54, %v2129_v32 }
 0x254   :  { %v2080_v39 = vadd.f32 %v2079_v34, %v2078_v11  ;;  %v2132_v62 = vrot.slane %v2131_v37, 4 }
 0x256   :  { %v2081_v60 = vrot.slane %v2080_v39, 2  ;;  %v2133_v52 = vadd.f32 %v2132_v62, %v2131_v37 }
 0x258   :  { %v2082_v61 = vadd.f32 %v2081_v60, %v2080_v39  ;;  %v2134_v31 = vrot.slane %v2133_v52, 2 }
 0x25a   :  { %v2083_v24 = vrot.slane %v2082_v61, 1  ;;  %v2135_v43 = vadd.f32 %v2134_v31, %v2133_v52 }
 0x25c   :  { %v2084_v9 = vadd.f32 %v2083_v24, %v2082_v61  ;;  %v2136_v53 = vrot.slane %v2135_v43, 1 }
 0x25e   :  { %v2137_v19 = vadd.f32 %v2136_v53, %v2135_v43  ;;  %v2138_v20 = vmul.f32 0.0078125, %v2084_v9 }
 0x260   :  { %v2139_v3 = vmul.f32 0.0078125, %v2137_v19  ;;  %v2140_v25 = vmul.f32 %v2138_v20, %v2138_v20 }
 0x262   :  { %v2141_v23 = vsub.f32 %v2139_v3, %v2140_v25 }
 0x264   :  { %v2142_v12 = vmax.f32 %v2141_v23, 0.0 }
 0x266   :  { %v2144_v2 = vadd.f32 1e-05, %v2142_v12 }
 0x268   :  { %12072 = vrsqrt.f32 %v2144_v2 }
 0x272   :  { %v12073_v21 = vpop.eup %12072 }
 0x273   :  { %v2146_v55 = vmul.f32 %v12073_v21, %v2143_v16 }
 0x275   :  { %v2148_v10 = vmul.f32 %v2146_v55, %v2138_v20  ;;  %v2154_v5 = vrot.slane %v2146_v55, %v14392_v56 }
 0x277   :  { %v2149_v26 = vsub.f32 %v2147_v41, %v2148_v10  ;;  %v2169_v42 = vmul.f32 %v2154_v5, %v2036_v38  ;;  %v2159_v27 = vmul.f32 %v14179_v6, %v2154_v5  ;;  %v2157_v35 = vmul.f32 %v2154_v5, %v14181_v45 }
 0x278   :  { %v2161_v47 = vmul.f32 %v2154_v5, %v14306_v17  ;;  %v2156_v14 = vmul.f32 %v2154_v5, %v14175_v33  ;;  %v2160_v40 = vmul.f32 %v2154_v5, %v14298_v13  ;;  %v2158_v4 = vmul.f32 %v14173_v1, %v2154_v5 }
 0x279   :  { %v2176_v29 = vrot.slane %v2149_v26, %v14392_v56  ;;  %v2162_v7 = vmul.f32 %v14296_v63, %v2154_v5  ;;  %v2163_v15 = vmul.f32 %v14304_v18, %v2154_v5  ;;  %v2165_v38 = vmul.f32 %v2154_v5, %v14345_v28 }
 0x27a   :  { %v2167_v6 = vmul.f32 %v14343_v22, %v2154_v5  ;;  %v2164_v45 = vmul.f32 %v2154_v5, %v14337_v58  ;;  %v2168_v17 = vmul.f32 %v2154_v5, %v14365_v8  ;;  %v2166_v33 = vmul.f32 %v14335_v50, %v2154_v5 }
 0x27b   :  { %v2191_v46 = vadd.f32 %v2176_v29, %v2169_v42  ;;  %v2181_v13 = vadd.f32 %v2176_v29, %v2159_v27  ;;  %v2179_v51 = vadd.f32 %v2176_v29, %v2157_v35  ;;  %v2183_v1 = vadd.f32 %v2176_v29, %v2161_v47 }
 0x27c   :  { %v2178_v44 = vadd.f32 %v2176_v29, %v2156_v14  ;;  %v2182_v57 = vadd.f32 %v2176_v29, %v2160_v40  ;;  %v2180_v48 = vadd.f32 %v2176_v29, %v2158_v4  ;;  %v2184_v63 = vadd.f32 %v2176_v29, %v2162_v7 }
 0x27d   :  { %v2207_v11 = vmax.f32 %v2191_v46, 0.0  ;;  %v2197_v18 = vmax.f32 %v2181_v13, 0.0  ;;  %v2195_v32 = vmax.f32 %v2179_v51, 0.0  ;;  %v2199_v28 = vmax.f32 %v2183_v1, 0.0  ;;  %v11952_v1 = vld [vmem:[%s18195_s4] sm:$0xff]  }
 0x27e   :  { %v2194_v54 = vmax.f32 %v2178_v44, 0.0  ;;  %v2198_v22 = vmax.f32 %v2182_v57, 0.0  ;;  %v2196_v34 = vmax.f32 %v2180_v48, 0.0  ;;  %v2200_v58 = vmax.f32 %v2184_v63, 0.0  ;;  %v11953_v57 = vld [vmem:[%s18195_s4 + $0x8] sm:$0xff]  }
 0x27f   :  { %2224 = vst.msk [vmem:[#allocation2 + $0x101] sm:$0xff] %vm63_vm3, %v2207_v11  ;;  %2214 = vst.msk [vmem:[#allocation2 + $0x41] sm:$0xff] %vm63_vm3, %v2197_v18  ;;  %v2185_v50 = vadd.f32 %v2176_v29, %v2163_v15  ;;  %v2187_v8 = vadd.f32 %v2176_v29, %v2165_v38  ;;  %v2189_v37 = vadd.f32 %v2176_v29, %v2167_v6  ;;  %v18259_v51 = vmov 0   ;;  %v11954_v11 = vld [vmem:[%s18195_s4 + $0x10] sm:$0xff]  }
 0x280   :  { %2212 = vst.msk [vmem:[#allocation2 + $0x21] sm:$0xff] %vm63_vm3, %v2195_v32  ;;  %2216 = vst.msk [vmem:[#allocation2 + $0x61] sm:$0xff] %vm63_vm3, %v2199_v28  ;;  %v2186_v39 = vadd.f32 %v2176_v29, %v2164_v45  ;;  %v2190_v62 = vadd.f32 %v2176_v29, %v2168_v17  ;;  %v2188_v60 = vadd.f32 %v2176_v29, %v2166_v33  ;;  %3239 = vmatprep.subr.bf16.mxu1 %v18259_v51  ;;  %v11955_v28 = vld [vmem:[%s18195_s4 + $0x18] sm:$0xff]  }
 0x281   :  { %2211 = vst.msk [vmem:[#allocation2 + $0x11] sm:$0xff] %vm63_vm3, %v2194_v54  ;;  %2215 = vst.msk [vmem:[#allocation2 + $0x51] sm:$0xff] %vm63_vm3, %v2198_v22  ;;  %v2170_v52 = vmul.f32 %v14363_v59, %v2154_v5  ;;  %v2171_v61 = vmul.f32 %v14371_v0, %v2154_v5  ;;  %v2201_v31 = vmax.f32 %v2185_v50, 0.0  ;;  %v2203_v24 = vmax.f32 %v2187_v8, 0.0  ;;  %3240 = vmatpush1.bf16.msra.mxu1 %v11952_v1  ;;  %v11957_v8 = vld [vmem:[%s18195_s4 + $0x28] sm:$0xff]  }
 0x282   :  { %2213 = vst.msk [vmem:[#allocation2 + $0x31] sm:$0xff] %vm63_vm3, %v2196_v34  ;;  %2217 = vst.msk [vmem:[#allocation2 + $0x71] sm:$0xff] %vm63_vm3, %v2200_v58  ;;  %v2205_v43 = vmax.f32 %v2189_v37, 0.0  ;;  %v2202_v9 = vmax.f32 %v2186_v39, 0.0  ;;  %v2206_v53 = vmax.f32 %v2190_v62, 0.0  ;;  %v2204_v19 = vmax.f32 %v2188_v60, 0.0  ;;  %3241 = vmatprep.subr.bf16.mxu1 %v18259_v51 }
 0x283   :  { %v2192_v20 = vadd.f32 %v2176_v29, %v2170_v52  ;;  %v2193_v3 = vadd.f32 %v2176_v29, %v2171_v61  ;;  %2218 = vst.msk [vmem:[#allocation2 + $0x81] sm:$0xff] %vm63_vm3, %v2201_v31  ;;  %2220 = vst.msk [vmem:[#allocation2 + $0xc1] sm:$0xff] %vm63_vm3, %v2203_v24  ;;  %v11956_v34 = vld [vmem:[%s18195_s4 + $0x20] sm:$0xff]   ;;  %v11958_v62 = vld [vmem:[%s18195_s4 + $0x30] sm:$0xff]   ;;  %v14500_v61 = vpop.permute.xlu0 %2489 }
 0x284   :  { %2222 = vst.msk [vmem:[#allocation2 + $0xe1] sm:$0xff] %vm63_vm3, %v2205_v43  ;;  %2219 = vst.msk [vmem:[#allocation2 + $0xb1] sm:$0xff] %vm63_vm3, %v2202_v9  ;;  %v11959_v31 = vld [vmem:[%s18195_s4 + $0x38] sm:$0xff]   ;;  %v14508_v9 = vpop.permute.xlu1 %2847 }
 0x285   :  { %2223 = vst.msk [vmem:[#allocation2 + $0xf1] sm:$0xff] %vm63_vm3, %v2206_v53  ;;  %2221 = vst.msk [vmem:[#allocation2 + $0xd1] sm:$0xff] %vm63_vm3, %v2204_v19  ;;  %v2208_v59 = vmax.f32 %v2192_v20, 0.0  ;;  %v2209_v0 = vmax.f32 %v2193_v3, 0.0  ;;  %3242 = vmatpush1.bf16.msra.mxu1 %v11953_v57  ;;  %v11960_v53 = vld [vmem:[%s18195_s4 + $0x40] sm:$0xff]  }
 0x286   :  { %v2247_v25 = vld [vmem:[#allocation2 + $0x41] ss:$2 sm:$0xf]  ;;  %v2263_v12 = vld [vmem:[#allocation2 + $0x42] ss:$2 sm:$0xf]  ;;  %3243 = vmatprep.subr.bf16.mxu1 %v18259_v51 }
 0x287   :  { %v2245_v23 = vld [vmem:[#allocation2 + $0x21] ss:$2 sm:$0xf]  ;;  %2225 = vst.msk [vmem:[#allocation2 + $0x111] sm:$0xff] %vm63_vm3, %v2208_v59  ;;  %2226 = vst.msk [vmem:[#allocation2 + $0x121] sm:$0xff] %vm63_vm3, %v2209_v0  ;;  %2493 = vrot.lane.b32.xlu0 %v2247_v25, %s18342_s13  ;;  %v14514_v19 = vpop.permute.xlu0 %2521  ;;  %v11961_v59 = vld [vmem:[%s18195_s4 + $0x48] sm:$0xff]  }
 0x288   :  { %2491 = vrot.lane.b32.xlu1 %v2245_v23, %s18342_s13  ;;  %v2249_v2 = vld [vmem:[#allocation2 + $0x61] ss:$2 sm:$0xf]  ;;  %v2261_v16 = vld [vmem:[#allocation2 + $0x22] ss:$2 sm:$0xf]  ;;  %v14522_v0 = vpop.permute.xlu1 %2879 }
 0x289   :  { %v2279_v30 = vld [vmem:[#allocation2 + $0x43] ss:$2 sm:$0xf]  ;;  %v2265_v21 = vld [vmem:[#allocation2 + $0x62] ss:$2 sm:$0xf]  ;;  %3244 = vmatpush1.bf16.msra.mxu1 %v11954_v11 }
 0x28a   :  { %v2290_v55 = vld [vmem:[#allocation2 + $0x10] ss:$2 sm:$0xf]  ;;  %v2277_v41 = vld [vmem:[#allocation2 + $0x23] ss:$2 sm:$0xf]  ;;  %3245 = vmatprep.subr.bf16.mxu1 %v18259_v51 }
 0x28b   :  { %2525 = vrot.lane.b32.xlu0 %v2263_v12, %s18334_s28  ;;  %v2294_v10 = vld [vmem:[#allocation2 + $0x50] ss:$2 sm:$0xf]  ;;  %v2281_v5 = vld [vmem:[#allocation2 + $0x63] ss:$2 sm:$0xf]  ;;  %v14526_v12 = vpop.permute.xlu0 %2553 }
 0x28c   :  { %2495 = vrot.lane.b32.xlu1 %v2249_v2, %s18342_s13  ;;  %v2306_v26 = vld [vmem:[#allocation2 + $0x11] ss:$2 sm:$0xf]  ;;  %v2292_v42 = vld [vmem:[#allocation2 + $0x30] ss:$2 sm:$0xf] }
 0x28d   :  { %v2310_v27 = vld [vmem:[#allocation2 + $0x51] ss:$2 sm:$0xf]  ;;  %v2296_v35 = vld [vmem:[#allocation2 + $0x70] ss:$2 sm:$0xf]  ;;  %3246 = vmatpush1.bf16.msra.mxu1 %v11955_v28 }
 0x28e   :  { %v2386_v47 = vld [vmem:[#allocation2 + $0x22] ss:$2 sm:$0xf]  ;;  %v2308_v14 = vld [vmem:[#allocation2 + $0x31] ss:$2 sm:$0xf]  ;;  %3247 = vmatprep.subr.bf16.mxu1 %v18259_v51 }
 0x28f   :  { %2557 = vrot.lane.b32.xlu0 %v2279_v30, %s18343_s12  ;;  %v2390_v40 = vld [vmem:[#allocation2 + $0x62] ss:$2 sm:$0xf]  ;;  %v2312_v4 = vld [vmem:[#allocation2 + $0x71] ss:$2 sm:$0xf] }
 0x290   :  { %2523 = vrot.lane.b32.xlu1 %v2261_v16, %s18334_s28  ;;  %v2402_v29 = vld [vmem:[#allocation2 + $0x23] ss:$2 sm:$0xf]  ;;  %v2388_v7 = vld [vmem:[#allocation2 + $0x42] ss:$2 sm:$0xf] }
 0x291   :  { %v2406_v15 = vld [vmem:[#allocation2 + $0x63] ss:$2 sm:$0xf]  ;;  %v2392_v38 = vld [vmem:[#allocation2 + $0x82] ss:$2 sm:$0xf]  ;;  %3248 = vmatpush1.bf16.msra.mxu1 %v11956_v34 }
 0x292   :  { %v2322_v6 = vld [vmem:[#allocation2 + $0x12] ss:$2 sm:$0xf]  ;;  %v2404_v45 = vld [vmem:[#allocation2 + $0x43] ss:$2 sm:$0xf]  ;;  %3249 = vmatprep.subr.bf16.mxu1 %v18259_v51 }
 0x293   :  { %2585 = vrot.lane.b32.xlu0 %v2290_v55, %s12381_s10  ;;  %v2326_v17 = vld [vmem:[#allocation2 + $0x52] ss:$2 sm:$0xf]  ;;  %v2408_v33 = vld [vmem:[#allocation2 + $0x83] ss:$2 sm:$0xf] }
 0x294   :  { %2527 = vrot.lane.b32.xlu1 %v2265_v21, %s18334_s28  ;;  %v2418_v46 = vld [vmem:[#allocation2 + $0x30] ss:$2 sm:$0xf]  ;;  %v2338_v63 = vld [vmem:[#allocation2 + $0x13] ss:$2 sm:$0xf]  ;;  %v14534_v21 = vpop.permute.xlu1 %2911 }
 0x295   :  { %v2324_v13 = vld [vmem:[#allocation2 + $0x32] ss:$2 sm:$0xf]  ;;  %v2342_v32 = vld [vmem:[#allocation2 + $0x53] ss:$2 sm:$0xf]  ;;  %3250 = vmatpush1.bf16.msra.mxu1 %v11957_v8 }
 0x296   :  { %v2422_v44 = vld [vmem:[#allocation2 + $0x70] ss:$2 sm:$0xf]  ;;  %v2340_v54 = vld [vmem:[#allocation2 + $0x33] ss:$2 sm:$0xf]  ;;  %3251 = vmatprep.subr.bf16.mxu1 %v18259_v51 }
 0x297   :  { %2589 = vrot.lane.b32.xlu0 %v2294_v10, %s12381_s10  ;;  %v2328_v48 = vld [vmem:[#allocation2 + $0x72] ss:$2 sm:$0xf]  ;;  %v2434_v22 = vld [vmem:[#allocation2 + $0x31] ss:$2 sm:$0xf] }
 0x298   :  { %2555 = vrot.lane.b32.xlu1 %v2277_v41, %s18343_s12  ;;  %v2420_v18 = vld [vmem:[#allocation2 + $0x50] ss:$2 sm:$0xf]  ;;  %v2344_v58 = vld [vmem:[#allocation2 + $0x73] ss:$2 sm:$0xf]  ;;  %v14540_v41 = vpop.permute.xlu0 %2497 }
 0x299   :  { %v2438_v50 = vld [vmem:[#allocation2 + $0x71] ss:$2 sm:$0xf]  ;;  %v2354_v39 = vld [vmem:[#allocation2 + $0x20] ss:$2 sm:$0xf]  ;;  %3252 = vmatpush1.bf16.msra.mxu1 %v11958_v62 }
 0x29a   :  { %v2436_v37 = vld [vmem:[#allocation2 + $0x51] ss:$2 sm:$0xf]  ;;  %v2356_v60 = vld [vmem:[#allocation2 + $0x40] ss:$2 sm:$0xf]  ;;  %3253 = vmatprep.subr.bf16.mxu1 %v18259_v51 }
 0x29b   :  { %2617 = vrot.lane.b32.xlu0 %v2306_v26, %s12382_s3  ;;  %v2358_v52 = vld [vmem:[#allocation2 + $0x60] ss:$2 sm:$0xf]  ;;  %v2450_v43 = vld [vmem:[#allocation2 + $0x32] ss:$2 sm:$0xf]  ;;  %v14545_v26 = vpop.permute.xlu1 %2943 }
 0x29c   :  { %2559 = vrot.lane.b32.xlu1 %v2281_v5, %s18343_s12  ;;  %v2360_v24 = vld [vmem:[#allocation2 + $0x80] ss:$2 sm:$0xf]  ;;  %v2452_v20 = vld [vmem:[#allocation2 + $0x52] ss:$2 sm:$0xf] }
 0x29d   :  { %3254 = vmatpush1.bf16.msra.mxu1 %v11959_v31  ;;  %v2454_v3 = vld [vmem:[#allocation2 + $0x72] ss:$2 sm:$0xf]  ;;  %v2253_v25 = vld [vmem:[#allocation2 + $0xc1] ss:$2 sm:$0xf] }
 0x29e   :  { %3255 = vmatprep.subr.bf16.mxu1 %v18259_v51  ;;  %v2255_v23 = vld [vmem:[#allocation2 + $0xe1] ss:$2 sm:$0xf]  ;;  %v11962_v2 = vld [vmem:[%s18195_s4 + $0x50] sm:$0xff]   ;;  %v11963_v55 = vld [vmem:[%s18195_s4 + $0x58] sm:$0xff]   ;;  %s12390_s4 = smov 32  }
 0x29f   :  { %2621 = vrot.lane.b32.xlu0 %v2310_v27, %s12382_s3  ;;  %v2257_v30 = vld [vmem:[#allocation2 + $0x101] ss:$2 sm:$0xf]  ;;  %v2466_v27 = vld [vmem:[#allocation2 + $0x33] ss:$2 sm:$0xf] }
 0x2a0   :  { %2587 = vrot.lane.b32.xlu1 %v2292_v42, %s12381_s10  ;;  %v2370_v16 = vld [vmem:[#allocation2 + $0x21] ss:$2 sm:$0xf]  ;;  %v2318_v34 = vld [vmem:[#allocation2 + $0xf1] ss:$2 sm:$0xf] }
 0x2a1   :  { %3256 = vmatpush1.bf16.msra.mxu1 %v11960_v53  ;;  %v2372_v10 = vld [vmem:[#allocation2 + $0x41] ss:$2 sm:$0xf]  ;;  %v2316_v8 = vld [vmem:[#allocation2 + $0xd1] ss:$2 sm:$0xf] }
 0x2a2   :  { %3257 = vmatprep.subr.bf16.mxu1 %v18259_v51  ;;  %v2374_v5 = vld [vmem:[#allocation2 + $0x61] ss:$2 sm:$0xf] }
 0x2a3   :  { %2777 = vrot.lane.b32.xlu0 %v2386_v47, %s12383_s1  ;;  %v2376_v42 = vld [vmem:[#allocation2 + $0x81] ss:$2 sm:$0xf]  ;;  %v2468_v47 = vld [vmem:[#allocation2 + $0x53] ss:$2 sm:$0xf] }
 0x2a4   :  { %2591 = vrot.lane.b32.xlu1 %v2296_v35, %s12381_s10  ;;  %v14547_v35 = vpop.permute.xlu0 %2529  ;;  %v2289_v57 = vld [vmem:[#allocation2 + $0x103] ss:$2 sm:$0xf] }
 0x2a5   :  { %3258 = vmatpush1.bf16.msra.mxu1 %v11961_v59  ;;  %v2410_v53 = vld [vmem:[#allocation2 + $0xc3] ss:$2 sm:$0xf]  ;;  %v2400_v59 = vld [vmem:[#allocation2 + $0x122] ss:$2 sm:$0xf] }
 0x2a6   :  { %3259 = vmatprep.subr.bf16.mxu1 %v18259_v51  ;;  %v2378_v36 = vld [vmem:[#allocation2 + $0xc1] ss:$2 sm:$0xf] }
 0x2a7   :  { %2781 = vrot.lane.b32.xlu0 %v2390_v40, %s12383_s1  ;;  %v14553_v40 = vpop.permute.xlu1 %2855 }
 0x2a8   :  { %2619 = vrot.lane.b32.xlu1 %v2308_v14, %s12382_s3  ;;  %v2470_v14 = vld [vmem:[#allocation2 + $0x73] ss:$2 sm:$0xf]  ;;  %18386 = vst [vmem:[#allocation13_spill] sm:$0xff] %v14553_v40 }
 0x2a9   :  { %3260 = vmatpush1.bf16.msra.mxu1 %v11962_v2 }
 0x2aa   :  { %3261 = vmatprep.subr.bf16.mxu1 %v18259_v51 }
 0x2ab   :  { %2809 = vrot.lane.b32.xlu0 %v2402_v29, %s12384_s16  ;;  %v2269_v29 = vld [vmem:[#allocation2 + $0xc2] ss:$2 sm:$0xf] }
 0x2ac   :  { %2623 = vrot.lane.b32.xlu1 %v2312_v4, %s12382_s3  ;;  %v14555_v4 = vpop.permute.xlu0 %2561 }
 0x2ad   :  { %3262 = vmatpush1.bf16.msra.mxu1 %v11963_v55  ;;  %18387 = vst [vmem:[#allocation5_spill] sm:$0xff] %v14555_v4  ;;  %v2229_v4 = vld [vmem:[#allocation2 + $0x20] ss:$2 sm:$0xf] }
 0x2ae   :  { %4505 = vmatprep.subr.bf16.mxu1 %v18259_v51 }
 0x2af   :  { %2813 = vrot.lane.b32.xlu0 %v2406_v15, %s12384_s16 }
 0x2b0   :  { %2779 = vrot.lane.b32.xlu1 %v2388_v7, %s12383_s1  ;;  %v2271_v7 = vld [vmem:[#allocation2 + $0xe2] ss:$2 sm:$0xf] }
 0x2b3   :  { %2649 = vrot.lane.b32.xlu0 %v2322_v6, %s12385_s21  ;;  %v2273_v6 = vld [vmem:[#allocation2 + $0x102] ss:$2 sm:$0xf] }
 0x2b4   :  { %2783 = vrot.lane.b32.xlu1 %v2392_v38, %s12383_s1 }
 0x2b7   :  { %2653 = vrot.lane.b32.xlu0 %v2326_v17, %s12385_s21 }
 0x2b8   :  { %2811 = vrot.lane.b32.xlu1 %v2404_v45, %s12384_s16  ;;  %v2287_v45 = vld [vmem:[#allocation2 + $0xe3] ss:$2 sm:$0xf] }
 0x2bb   :  { %2841 = vrot.lane.b32.xlu0 %v2418_v46, %s12377_s20  ;;  %v2285_v46 = vld [vmem:[#allocation2 + $0xc3] ss:$2 sm:$0xf] }
 0x2bc   :  { %2815 = vrot.lane.b32.xlu1 %v2408_v33, %s12384_s16 }
 0x2bf   :  { %2845 = vrot.lane.b32.xlu0 %v2422_v44, %s12377_s20 }
 0x2c0   :  { %2651 = vrot.lane.b32.xlu1 %v2324_v13, %s12385_s21  ;;  %v2298_v13 = vld [vmem:[#allocation2 + $0xb0] ss:$2 sm:$0xf] }
 0x2c3   :  { %2681 = vrot.lane.b32.xlu0 %v2338_v63, %s12387_s11 }
 0x2c4   :  { %2655 = vrot.lane.b32.xlu1 %v2328_v48, %s12385_s21  ;;  %v2302_v48 = vld [vmem:[#allocation2 + $0xf0] ss:$2 sm:$0xf] }
 0x2c7   :  { %2685 = vrot.lane.b32.xlu0 %v2342_v32, %s12387_s11  ;;  %v2314_v32 = vld [vmem:[#allocation2 + $0xb1] ss:$2 sm:$0xf] }
 0x2c8   :  { %2843 = vrot.lane.b32.xlu1 %v2420_v18, %s12377_s20  ;;  %v2300_v18 = vld [vmem:[#allocation2 + $0xd0] ss:$2 sm:$0xf] }
 0x2cb   :  { %2873 = vrot.lane.b32.xlu0 %v2434_v22, %s12378_s14  ;;  %v2304_v22 = vld [vmem:[#allocation2 + $0x110] ss:$2 sm:$0xf] }
 0x2cc   :  { %2683 = vrot.lane.b32.xlu1 %v2340_v54, %s12387_s11 }
 0x2cf   :  { %2877 = vrot.lane.b32.xlu0 %v2438_v50, %s12378_s14 }
 0x2d0   :  { %2687 = vrot.lane.b32.xlu1 %v2344_v58, %s12387_s11 }
 0x2d3   :  { %2713 = vrot.lane.b32.xlu0 %v2354_v39, %s12388_s27 }
 0x2d4   :  { %2875 = vrot.lane.b32.xlu1 %v2436_v37, %s12378_s14  ;;  %v2394_v37 = vld [vmem:[#allocation2 + $0xc2] ss:$2 sm:$0xf] }
 0x2d7   :  { %2717 = vrot.lane.b32.xlu0 %v2358_v52, %s12388_s27  ;;  %v2398_v52 = vld [vmem:[#allocation2 + $0x102] ss:$2 sm:$0xf] }
 0x2d8   :  { %2715 = vrot.lane.b32.xlu1 %v2356_v60, %s12388_s27  ;;  %v2320_v60 = vld [vmem:[#allocation2 + $0x111] ss:$2 sm:$0xf] }
 0x2db   :  { %2905 = vrot.lane.b32.xlu0 %v2450_v43, %s12379_s2  ;;  %v2396_v43 = vld [vmem:[#allocation2 + $0xe2] ss:$2 sm:$0xf] }
 0x2dc   :  { %2719 = vrot.lane.b32.xlu1 %v2360_v24, %s12388_s27 }
 0x2df   :  { %2909 = vrot.lane.b32.xlu0 %v2454_v3, %s12379_s2 }
 0x2e0   :  { %2907 = vrot.lane.b32.xlu1 %v2452_v20, %s12379_s2 }
 0x2e3   :  { %2501 = vrot.lane.b32.xlu0 %v2255_v23, %s18342_s13 }
 0x2e4   :  { %2499 = vrot.lane.b32.xlu1 %v2253_v25, %s18342_s13  ;;  %v2414_v25 = vld [vmem:[#allocation2 + $0x103] ss:$2 sm:$0xf] }
 0x2e7   :  { %2745 = vrot.lane.b32.xlu0 %v2370_v16, %s12389_s24  ;;  %v2330_v16 = vld [vmem:[#allocation2 + $0xb2] ss:$2 sm:$0xf] }
 0x2e8   :  { %2503 = vrot.lane.b32.xlu1 %v2257_v30, %s18342_s13  ;;  %v2412_v30 = vld [vmem:[#allocation2 + $0xe3] ss:$2 sm:$0xf] }
 0x2eb   :  { %2749 = vrot.lane.b32.xlu0 %v2374_v5, %s12389_s24  ;;  %v2416_v5 = vld [vmem:[#allocation2 + $0x123] ss:$2 sm:$0xf] }
 0x2ec   :  { %2747 = vrot.lane.b32.xlu1 %v2372_v10, %s12389_s24 }
 0x2ef   :  { %2937 = vrot.lane.b32.xlu0 %v2466_v27, %s12380_s18 }
 0x2f0   :  { %2751 = vrot.lane.b32.xlu1 %v2376_v42, %s12389_s24  ;;  %v2334_v42 = vld [vmem:[#allocation2 + $0xf2] ss:$2 sm:$0xf] }
 0x2f3   :  { %2941 = vrot.lane.b32.xlu0 %v2470_v14, %s12380_s18  ;;  %v2332_v14 = vld [vmem:[#allocation2 + $0xd2] ss:$2 sm:$0xf] }
 0x2f4   :  { %2939 = vrot.lane.b32.xlu1 %v2468_v47, %s12380_s18 }
 0x2f7   :  { %2533 = vrot.lane.b32.xlu0 %v2271_v7, %s18334_s28 }
 0x2f8   :  { %2531 = vrot.lane.b32.xlu1 %v2269_v29, %s18334_s28  ;;  %v2426_v29 = vld [vmem:[#allocation2 + $0xd0] ss:$2 sm:$0xf] }
 0x2f9   :  { %v14559_v15 = vpop.permute.xlu0 %2493 }
 0x2fa   :  { %v14561_v38 = vpop.permute.xlu1 %2491 }
 0x2fb   :  { %2565 = vrot.lane.b32.xlu0 %v2287_v45, %s18343_s12  ;;  %v2336_v45 = vld [vmem:[#allocation2 + $0x112] ss:$2 sm:$0xf] }
 0x2fc   :  { %2535 = vrot.lane.b32.xlu1 %v2273_v6, %s18334_s28 }
 0x2fd   :  { %v14565_v17 = vpop.permute.xlu0 %2525 }
 0x2fe   :  { %v14567_v33 = vpop.permute.xlu1 %2495 }
 0x2ff   :  { %2593 = vrot.lane.b32.xlu0 %v2298_v13, %s12381_s10 }
 0x300   :  { %2563 = vrot.lane.b32.xlu1 %v2285_v46, %s18343_s12  ;;  %v2430_v46 = vld [vmem:[#allocation2 + $0x110] ss:$2 sm:$0xf] }
 0x301   :  { %v14571_v1 = vpop.permute.xlu0 %2557 }
 0x302   :  { %v14573_v44 = vpop.permute.xlu1 %2523 }
 0x303   :  { %2597 = vrot.lane.b32.xlu0 %v2302_v48, %s12381_s10  ;;  %v2428_v48 = vld [vmem:[#allocation2 + $0xf0] ss:$2 sm:$0xf] }
 0x304   :  { %2567 = vrot.lane.b32.xlu1 %v2289_v57, %s18343_s12 }
 0x305   :  { %v14579_v11 = vpop.permute.xlu0 %2585 }
 0x306   :  { %v14577_v63 = vpop.permute.xlu1 %2527 }
 0x307   :  { %2625 = vrot.lane.b32.xlu0 %v2314_v32, %s12382_s3 }
 0x308   :  { %2595 = vrot.lane.b32.xlu1 %v2300_v18, %s12381_s10  ;;  %v2346_v18 = vld [vmem:[#allocation2 + $0xb3] ss:$2 sm:$0xf] }
 0x309   :  { %v14585_v54 = vpop.permute.xlu0 %2589 }
 0x30a   :  { %v14583_v28 = vpop.permute.xlu1 %2555 }
 0x30b   :  { %2629 = vrot.lane.b32.xlu0 %v2318_v34, %s12382_s3  ;;  %v2348_v34 = vld [vmem:[#allocation2 + $0xd3] ss:$2 sm:$0xf] }
 0x30c   :  { %2599 = vrot.lane.b32.xlu1 %v2304_v22, %s12381_s10 }
 0x30d   :  { %v14591_v50 = vpop.permute.xlu0 %2617 }
 0x30e   :  { %v14589_v58 = vpop.permute.xlu1 %2559 }
 0x30f   :  { %2785 = vrot.lane.b32.xlu0 %v2394_v37, %s12383_s1 }
 0x310   :  { %2627 = vrot.lane.b32.xlu1 %v2316_v8, %s12382_s3  ;;  %v2350_v8 = vld [vmem:[#allocation2 + $0xf3] ss:$2 sm:$0xf] }
 0x311   :  { %v14597_v62 = vpop.permute.xlu0 %2621 }
 0x312   :  { %v14595_v39 = vpop.permute.xlu1 %2587 }
 0x313   :  { %2789 = vrot.lane.b32.xlu0 %v2398_v52, %s12383_s1  ;;  %v2352_v52 = vld [vmem:[#allocation2 + $0x113] ss:$2 sm:$0xf] }
 0x314   :  { %2631 = vrot.lane.b32.xlu1 %v2320_v60, %s12382_s3  ;;  %s12396_s3 = smov 104  }
 0x315   :  { %v14603_v24 = vpop.permute.xlu0 %2777 }
 0x316   :  { %v14601_v31 = vpop.permute.xlu1 %2591 }
 0x317   :  { %2817 = vrot.lane.b32.xlu0 %v2410_v53, %s12384_s16 }
 0x318   :  { %2787 = vrot.lane.b32.xlu1 %v2396_v43, %s12383_s1  ;;  %v2442_v43 = vld [vmem:[#allocation2 + $0xd1] ss:$2 sm:$0xf] }
 0x319   :  { %v14609_v3 = vpop.permute.xlu0 %2781 }
 0x31a   :  { %v14607_v20 = vpop.permute.xlu1 %2619 }
 0x31b   :  { %2821 = vrot.lane.b32.xlu0 %v2414_v25, %s12384_s16  ;;  %v2444_v25 = vld [vmem:[#allocation2 + $0xf1] ss:$2 sm:$0xf] }
 0x31c   :  { %2791 = vrot.lane.b32.xlu1 %v2400_v59, %s12383_s1 }
 0x31d   :  { %v14615_v2 = vpop.permute.xlu0 %2809 }
 0x31e   :  { %v14613_v23 = vpop.permute.xlu1 %2623 }
 0x31f   :  { %2657 = vrot.lane.b32.xlu0 %v2330_v16, %s12385_s21  ;;  %v2448_v16 = vld [vmem:[#allocation2 + $0x131] ss:$2 sm:$0xf] }
 0x320   :  { %2819 = vrot.lane.b32.xlu1 %v2412_v30, %s12384_s16  ;;  %v2446_v30 = vld [vmem:[#allocation2 + $0x111] ss:$2 sm:$0xf] }
 0x321   :  { %v14621_v10 = vpop.permute.xlu0 %2813 }
 0x322   :  { %v14619_v55 = vpop.permute.xlu1 %2779 }
 0x323   :  { %2661 = vrot.lane.b32.xlu0 %v2334_v42, %s12385_s21 }
 0x324   :  { %2823 = vrot.lane.b32.xlu1 %v2416_v5, %s12384_s16  ;;  %s12397_s16 = smov 8  }
 0x325   :  { %v14627_v47 = vpop.permute.xlu0 %2649 }
 0x326   :  { %v14625_v27 = vpop.permute.xlu1 %2783 }
 0x327   :  { %2849 = vrot.lane.b32.xlu0 %v2426_v29, %s12377_s20 }
 0x328   :  { %2659 = vrot.lane.b32.xlu1 %v2332_v14, %s12385_s21  ;;  %v2362_v14 = vld [vmem:[#allocation2 + $0xc0] ss:$2 sm:$0xf] }
 0x329   :  { %v14633_v6 = vpop.permute.xlu0 %2653 }
 0x32a   :  { %v14631_v7 = vpop.permute.xlu1 %2811 }
 0x32b   :  { %2853 = vrot.lane.b32.xlu0 %v2430_v46, %s12377_s20  ;;  %v2364_v46 = vld [vmem:[#allocation2 + $0xe0] ss:$2 sm:$0xf] }
 0x32c   :  { %2663 = vrot.lane.b32.xlu1 %v2336_v45, %s12385_s21 }
 0x32d   :  { %v14639_v57 = vpop.permute.xlu0 %2841 }
 0x32e   :  { %v14637_v13 = vpop.permute.xlu1 %2815 }
 0x32f   :  { %2689 = vrot.lane.b32.xlu0 %v2346_v18, %s12387_s11 }
 0x330   :  { %2851 = vrot.lane.b32.xlu1 %v2428_v48, %s12377_s20  ;;  %v2366_v48 = vld [vmem:[#allocation2 + $0x100] ss:$2 sm:$0xf] }
 0x331   :  { %v14645_v22 = vpop.permute.xlu0 %2845 }
 0x332   :  { %v14643_v32 = vpop.permute.xlu1 %2651 }
 0x333   :  { %2693 = vrot.lane.b32.xlu0 %v2350_v8, %s12387_s11  ;;  %v2368_v8 = vld [vmem:[#allocation2 + $0x120] ss:$2 sm:$0xf] }
 0x334   :  { %2691 = vrot.lane.b32.xlu1 %v2348_v34, %s12387_s11 }
 0x335   :  { %v14651_v60 = vpop.permute.xlu0 %2681 }
 0x336   :  { %v14649_v37 = vpop.permute.xlu1 %2655 }
 0x337   :  { %2881 = vrot.lane.b32.xlu0 %v2442_v43, %s12378_s14 }
 0x338   :  { %2695 = vrot.lane.b32.xlu1 %v2352_v52, %s12387_s11  ;;  %v2458_v52 = vld [vmem:[#allocation2 + $0xd2] ss:$2 sm:$0xf] }
 0x339   :  { %v14657_v59 = vpop.permute.xlu0 %2685 }
 0x33a   :  { %v14655_v53 = vpop.permute.xlu1 %2843 }
 0x33b   :  { %2885 = vrot.lane.b32.xlu0 %v2446_v30, %s12378_s14  ;;  %v2460_v30 = vld [vmem:[#allocation2 + $0xf2] ss:$2 sm:$0xf] }
 0x33c   :  { %2883 = vrot.lane.b32.xlu1 %v2444_v25, %s12378_s14 }
 0x33d   :  { %v14663_v42 = vpop.permute.xlu0 %2873 }
 0x33e   :  { %v14661_v5 = vpop.permute.xlu1 %2683 }
 0x33f   :  { %2721 = vrot.lane.b32.xlu0 %v2362_v14, %s12388_s27  ;;  %v2464_v14 = vld [vmem:[#allocation2 + $0x132] ss:$2 sm:$0xf] }
 0x340   :  { %2887 = vrot.lane.b32.xlu1 %v2448_v16, %s12378_s14  ;;  %v2462_v16 = vld [vmem:[#allocation2 + $0x112] ss:$2 sm:$0xf] }
 0x341   :  { %v14669_v45 = vpop.permute.xlu0 %2877 }
 0x342   :  { %v14667_v29 = vpop.permute.xlu1 %2687 }
 0x343   :  { %2725 = vrot.lane.b32.xlu0 %v2366_v48, %s12388_s27 }
 0x344   :  { %2723 = vrot.lane.b32.xlu1 %v2364_v46, %s12388_s27  ;;  %v2227_v46 = vld [vmem:[#allocation2] ss:$2 sm:$0xf] }
 0x345   :  { %v14675_v34 = vpop.permute.xlu0 %2713 }
 0x346   :  { %v14673_v18 = vpop.permute.xlu1 %2875 }
 0x347   :  { %2913 = vrot.lane.b32.xlu0 %v2458_v52, %s12379_s2 }
 0x348   :  { %2727 = vrot.lane.b32.xlu1 %v2368_v8, %s12388_s27  ;;  %v2961_v8 = vsel %vm63_vm3, %v2227_v46, %v14500_v61 }
 0x349   :  { %v14681_v25 = vpop.permute.xlu0 %2717  ;;  %v2969_v56 = vsel %vm1758_vm7, %v2961_v8, %v14514_v19  ;;  %v2384_v19 = vld [vmem:[#allocation2 + $0x121] ss:$2 sm:$0xf]  ;;  %v2474_v8 = vld [vmem:[#allocation2 + $0xd3] ss:$2 sm:$0xf] }
 0x34a   :  { %v14679_v43 = vpop.permute.xlu1 %2715  ;;  %v2977_v40 = vsel %vm1826_vm11, %v2969_v56, %v14526_v12  ;;  %v2962_v56 = vsel %vm63_vm3, %v2229_v4, %v14561_v38  ;;  %v2476_v38 = vld [vmem:[#allocation2 + $0xf3] ss:$2 sm:$0xf] }
 0x34b   :  { %2917 = vrot.lane.b32.xlu0 %v2462_v16, %s12379_s2  ;;  %v2382_v16 = vld [vmem:[#allocation2 + $0x101] ss:$2 sm:$0xf]  ;;  %v2985_v4 = vsel %vm1926_vm15, %v2977_v40, %v14579_v11 }
 0x34c   :  { %2915 = vrot.lane.b32.xlu1 %v2460_v30, %s12379_s2  ;;  %v2380_v30 = vld [vmem:[#allocation2 + $0xe1] ss:$2 sm:$0xf] }
 0x34d   :  { %v14687_v51 = vpop.permute.xlu0 %2905 }
 0x34e   :  { %v14685_v48 = vpop.permute.xlu1 %2719 }
 0x34f   :  { %2753 = vrot.lane.b32.xlu0 %v2378_v36, %s12389_s24  ;;  %v3051_v36 = vsel %vm3047_vm4, %v14625_v27, %v14637_v13 }
 0x350   :  { %2919 = vrot.lane.b32.xlu1 %v2464_v14, %s12379_s2  ;;  %v2231_v14 = vld [vmem:[#allocation2 + $0x40] ss:$2 sm:$0xf] }
 0x351   :  { %v14695_v49 = vpop.permute.xlu0 %2909  ;;  %v2963_v13 = vsel %vm63_vm3, %v2231_v14, %v14559_v15 }
 0x352   :  { %v14693_v52 = vpop.permute.xlu1 %2907  ;;  %v2971_v12 = vsel %vm1758_vm7, %v2963_v13, %v14565_v17  ;;  %v2478_v17 = vld [vmem:[#allocation2 + $0x113] ss:$2 sm:$0xf] }
 0x353   :  { %2757 = vrot.lane.b32.xlu0 %v2382_v16, %s12389_s24  ;;  %v3060_v16 = vsel %vm3056_vm5, %v3051_v36, %v14508_v9  ;;  %v2979_v15 = vsel %vm1826_vm11, %v2971_v12, %v14571_v1  ;;  %v2970_v9 = vsel %vm1758_vm7, %v2962_v56, %v14573_v44  ;;  %v2994_v44 = vsel %vm2993_vm6, %v2985_v4, %v14591_v50 }
 0x354   :  { %2755 = vrot.lane.b32.xlu1 %v2380_v30, %s12389_s24  ;;  %v2233_v30 = vld [vmem:[#allocation2 + $0x60] ss:$2 sm:$0xf]  ;;  %v3069_v1 = vsel %vm3065_vm9, %v3060_v16, %v14522_v0  ;;  %v2987_v40 = vsel %vm1926_vm15, %v2979_v15, %v14585_v54  ;;  %v3048_v54 = vsel %vm3047_vm4, %v14603_v24, %v14615_v2 }
 0x355   :  { %v14706_v46 = vpop.permute.xlu0 %2501  ;;  %v2996_v0 = vsel %vm2993_vm6, %v2987_v40, %v14597_v62  ;;  %v3049_v62 = vsel %vm3047_vm4, %v14619_v55, %v14631_v7  ;;  %v3057_v2 = vsel %vm3056_vm5, %v3048_v54, %v14639_v57 }
 0x356   :  { %v14704_v61 = vpop.permute.xlu1 %2499  ;;  %18388 = vst [vmem:[#allocation6_spill] sm:$0xff] %v14706_v46 }
 0x357   :  { %2945 = vrot.lane.b32.xlu0 %v2474_v8, %s12380_s18 }
 0x358   :  { %2759 = vrot.lane.b32.xlu1 %v2384_v19, %s12389_s24  ;;  %v2964_v19 = vsel %vm63_vm3, %v2233_v30, %v14567_v33  ;;  %v2978_v33 = vsel %vm1826_vm11, %v2970_v9, %v14583_v28  ;;  %v2480_v28 = vld [vmem:[#allocation2 + $0x133] ss:$2 sm:$0xf] }
 0x359   :  { %v2746_v8 = vpop.permute.xlu0 %2745  ;;  %v2972_v14 = vsel %vm1758_vm7, %v2964_v19, %v14577_v63  ;;  %v2986_v63 = vsel %vm1926_vm15, %v2978_v33, %v14595_v39  ;;  %v3050_v39 = vsel %vm3047_vm4, %v14609_v3, %v14621_v10 }
 0x35a   :  { %v14722_v46 = vpop.permute.xlu1 %2503  ;;  %v2980_v36 = vsel %vm1826_vm11, %v2972_v14, %v14589_v58  ;;  %v2995_v58 = vsel %vm2993_vm6, %v2986_v63, %v14607_v20  ;;  %v3078_v20 = vsel %vm3074_vm13, %v3069_v1, %v14534_v21 }
 0x35b   :  { %2949 = vrot.lane.b32.xlu0 %v2478_v17, %s12380_s18  ;;  %v2988_v11 = vsel %vm1926_vm15, %v2980_v36, %v14601_v31  ;;  %v3003_v31 = vsel %vm3002_vm8, %v2994_v44, %v14627_v47  ;;  %v3004_v16 = vsel %vm3002_vm8, %v2995_v58, %v14643_v32  ;;  %v3059_v47 = vsel %vm3056_vm5, %v3050_v39, %v14645_v22 }
 0x35c   :  { %2947 = vrot.lane.b32.xlu1 %v2476_v38, %s12380_s18  ;;  %v2997_v13 = vsel %vm2993_vm6, %v2988_v11, %v14613_v23  ;;  %v3005_v23 = vsel %vm3002_vm8, %v2996_v0, %v14633_v6  ;;  %v3013_v7 = vsel %vm3011_vm10, %v3004_v16, %v14661_v5  ;;  %v3012_v5 = vsel %vm3011_vm10, %v3003_v31, %v14651_v60 }
 0x35d   :  { %v2750_v30 = vpop.permute.xlu0 %2749  ;;  %v3006_v10 = vsel %vm3002_vm8, %v2997_v13, %v14649_v37  ;;  %v3014_v21 = vsel %vm3011_vm10, %v3005_v23, %v14657_v59  ;;  %v3022_v57 = vsel %vm3020_vm12, %v3013_v7, %v14679_v43  ;;  %v3087_v59 = vsel %vm3083_vm2, %v3078_v20, %v14545_v26 }
 0x35e   :  { %v2748_v50 = vpop.permute.xlu1 %2747  ;;  %v3015_v6 = vsel %vm3011_vm10, %v3006_v10, %v14667_v29  ;;  %v3023_v32 = vsel %vm3020_vm12, %v3014_v21, %v14681_v25  ;;  %v3058_v25 = vsel %vm3056_vm5, %v3049_v62, %v14655_v53  ;;  %v3021_v19 = vsel %vm3020_vm12, %v3012_v5, %v14675_v34 }
 0x35f   :  { %v3024_v37 = vsel %vm3020_vm12, %v3015_v6, %v14685_v48  ;;  %v3031_v12 = vsel %vm3029_vm14, %v3022_v57, %v2748_v50  ;;  %v3032_v29 = vsel %vm3029_vm14, %v3023_v32, %v2750_v30  ;;  %v3066_v48 = vsel %vm3065_vm9, %v3057_v2, %v14663_v42 }
 0x360   :  { %2951 = vrot.lane.b32.xlu1 %v2480_v28, %s12380_s18  ;;  %v3068_v60 = vsel %vm3065_vm9, %v3059_v47, %v14669_v45  ;;  %v3067_v15 = vsel %vm3065_vm9, %v3058_v25, %v14673_v18  ;;  %v3075_v9 = vsel %vm3074_vm13, %v3066_v48, %v14687_v51  ;;  %v3030_v53 = vsel %vm3029_vm14, %v3021_v19, %v2746_v8 }
 0x361   :  { %v2938_v22 = vpop.permute.xlu0 %2937  ;;  %v3076_v42 = vsel %vm3074_vm13, %v3067_v15, %v14693_v52  ;;  %v3077_v34 = vsel %vm3074_vm13, %v3068_v60, %v14695_v49  ;;  %v3041_v45 = vsel %vm3038_vm1, %v3032_v29, %v14609_v3  ;;  %v3039_v52 = vsel %vm3038_vm1, %v3030_v53, %v14603_v24 }
 0x362   :  { %v2752_v56 = vpop.permute.xlu1 %2751  ;;  %v3084_v38 = vsel %vm3083_vm2, %v3075_v9, %v2938_v22  ;;  %v2235_v9 = vld [vmem:[#allocation2 + $0xa0] ss:$2 sm:$0xf] }
 0x363   :  { %v3033_v43 = vsel %vm3029_vm14, %v3024_v37, %v2752_v56 }
 0x364   :  { %v3042_v26 = vsel %vm3038_vm1, %v3033_v43, %v14625_v27  ;;  %v3040_v27 = vsel %vm3038_vm1, %v3031_v12, %v14619_v55 }
 0x365   :  { %v2942_v4 = vpop.permute.xlu0 %2941  ;;  %v10147_v18 = vcombine.low %v3041_v45, %v3042_v26  ;;  %v10145_v33 = vcombine.low %v3039_v52, %v3040_v27 }
 0x366   :  { %v2940_v14 = vpop.permute.xlu1 %2939  ;;  %v3086_v8 = vsel %vm3083_vm2, %v3077_v34, %v2942_v4  ;;  %v2965_v34 = vsel %vm63_vm3, %v2235_v9, %v14540_v41 }
 0x367   :  { %v3085_v51 = vsel %vm3083_vm2, %v3076_v42, %v2940_v14  ;;  %v10148_v49 = vcombine.low %v3086_v8, %v3087_v59  ;;  %v3132_v3 = vpack.c.bf16 %v10147_v18, %v10145_v33  ;;  %v2237_v14 = vld [vmem:[#allocation2 + $0xc0] ss:$2 sm:$0xf]  ;;  %v2973_v4 = vsel %vm1758_vm7, %v2965_v34, %v14547_v35  ;;  %v18389_v8 = vld [vmem:[#allocation6_spill] sm:$0xff] }
 0x368   :  { %v10146_v17 = vcombine.low %v3084_v38, %v3085_v51  ;;  %v2239_v18 = vld [vmem:[#allocation2 + $0xe0] ss:$2 sm:$0xf]  ;;  %v2966_v51 = vsel %vm63_vm3, %v2237_v14, %v14704_v61 }
 0x369   :  { %v2534_v36 = vpop.permute.xlu0 %2533  ;;  %v2241_v38 = vld [vmem:[#allocation2 + $0x100] ss:$2 sm:$0xf]  ;;  %v2967_v52 = vsel %vm63_vm3, %v2239_v18, %v18389_v8 }
 0x36a   :  { %v2532_v55 = vpop.permute.xlu1 %2531  ;;  %v3133_v1 = vpack.c.bf16 %v10148_v49, %v10146_v17  ;;  %v2968_v17 = vsel %vm63_vm3, %v2241_v38, %v14722_v46  ;;  %v2975_v49 = vsel %vm1758_vm7, %v2967_v52, %v2534_v36  ;;  %v18390_v35 = vld [vmem:[#allocation5_spill] sm:$0xff] }
 0x36b   :  { %v2974_v41 = vsel %vm1758_vm7, %v2966_v51, %v2532_v55  ;;  %v2981_v9 = vsel %vm1826_vm11, %v2973_v4, %v18390_v35  ;;  %v18391_v51 = vld [vmem:[#allocation13_spill] sm:$0xff] }
 0x36c   :  { %10165 = vmatprep.mubr.msk.bf16.mxu1 %vm3232_vm0, %v3133_v1 }
 0x36d   :  { %3272 = vmatmul.mubr.bf16.vlgmr.msra.gmra.mrb[0].mxu1 %v3132_v3  ;;  %v2566_v44 = vpop.permute.xlu0 %2565 }
 0x36e   :  { %v2536_v40 = vpop.permute.xlu1 %2535  ;;  %v2983_v34 = vsel %vm1826_vm11, %v2975_v49, %v2566_v44 }
 0x36f   :  { %v2976_v33 = vsel %vm1758_vm7, %v2968_v17, %v2536_v40 }
 0x371   :  { %v2594_v11 = vpop.permute.xlu0 %2593 }
 0x372   :  { %v2564_v63 = vpop.permute.xlu1 %2563  ;;  %v2989_v18 = vsel %vm1926_vm15, %v2981_v9, %v2594_v11 }
 0x373   :  { %v2982_v61 = vsel %vm1826_vm11, %v2974_v41, %v2564_v63 }
 0x375   :  { %v2598_v0 = vpop.permute.xlu0 %2597 }
 0x376   :  { %v2568_v28 = vpop.permute.xlu1 %2567  ;;  %v2991_v46 = vsel %vm1926_vm15, %v2983_v34, %v2598_v0 }
 0x377   :  { %v2984_v14 = vsel %vm1826_vm11, %v2976_v33, %v2568_v28 }
 0x379   :  { %v2626_v13 = vpop.permute.xlu0 %2625 }
 0x37a   :  { %v2596_v58 = vpop.permute.xlu1 %2595  ;;  %v2998_v40 = vsel %vm2993_vm6, %v2989_v18, %v2626_v13 }
 0x37b   :  { %v2990_v55 = vsel %vm1926_vm15, %v2982_v61, %v2596_v58 }
 0x37d   :  { %v2630_v54 = vpop.permute.xlu0 %2629 }
 0x37e   :  { %v2600_v24 = vpop.permute.xlu1 %2599  ;;  %v3000_v38 = vsel %vm2993_vm6, %v2991_v46, %v2630_v54 }
 0x37f   :  { %v2992_v36 = vsel %vm1926_vm15, %v2984_v14, %v2600_v24 }
 0x381   :  { %v14826_v30 = vpop.permute.xlu0 %2785 }
 0x382   :  { %v2628_v50 = vpop.permute.xlu1 %2627 }
 0x383   :  { %v2999_v63 = vsel %vm2993_vm6, %v2990_v55, %v2628_v50 }
 0x385   :  { %v14828_v31 = vpop.permute.xlu0 %2789 }
 0x386   :  { %v2632_v39 = vpop.permute.xlu1 %2631 }
 0x387   :  { %v3001_v4 = vsel %vm2993_vm6, %v2992_v36, %v2632_v39  ;;  %vm121_vm6 = vcmask 188416  }
 0x389   :  { %v2818_v20 = vpop.permute.xlu0 %2817 }
 0x38a   :  { %v14830_v62 = vpop.permute.xlu1 %2787  ;;  %v3052_v11 = vsel %vm3047_vm4, %v14826_v30, %v2818_v20 }
 0x38d   :  { %v2822_v2 = vpop.permute.xlu0 %2821 }
 0x38e   :  { %v14832_v23 = vpop.permute.xlu1 %2791  ;;  %v3054_v28 = vsel %vm3047_vm4, %v14828_v31, %v2822_v2 }
 0x391   :  { %v2658_v10 = vpop.permute.xlu0 %2657 }
 0x392   :  { %v2820_v16 = vpop.permute.xlu1 %2819  ;;  %v3007_v54 = vsel %vm3002_vm8, %v2998_v40, %v2658_v10 }
 0x393   :  { %v3053_v13 = vsel %vm3047_vm4, %v14830_v62, %v2820_v16 }
 0x395   :  { %v2662_v21 = vpop.permute.xlu0 %2661 }
 0x396   :  { %v2824_v47 = vpop.permute.xlu1 %2823  ;;  %v3009_v39 = vsel %vm3002_vm8, %v3000_v38, %v2662_v21 }
 0x397   :  { %v3055_v44 = vsel %vm3047_vm4, %v14832_v23, %v2824_v47  ;;  %vm115_vm4 = vcmask 193536  }
 0x398   :  { %v3064_v2 = vsel %vm3056_vm5, %v3055_v44, %v18391_v51 }
 0x399   :  { %v2850_v6 = vpop.permute.xlu0 %2849 }
 0x39a   :  { %v2660_v7 = vpop.permute.xlu1 %2659  ;;  %v3061_v20 = vsel %vm3056_vm5, %v3052_v11, %v2850_v6 }
 0x39b   :  { %v3008_v50 = vsel %vm3002_vm8, %v2999_v63, %v2660_v7  ;;  %v18392_v63 = vmov 0.0  }
 0x39c   :  { %116 = vst.msk [vmem:[#allocation3] sm:$0x3f] %vm115_vm4, %v18392_v63  ;;  %117 = vst.msk [vmem:[#allocation3 + $0x30] sm:$0x3f] %vm115_vm4, %v18392_v63 }
 0x39d   :  { %v2854_v32 = vpop.permute.xlu0 %2853  ;;  %119 = vst.msk [vmem:[#allocation3 + $0x28] sm:$0x3f] %vm115_vm4, %v18392_v63  ;;  %120 = vst.msk [vmem:[#allocation3 + $0x58] sm:$0x3f] %vm115_vm4, %v18392_v63  ;;  %vm3794_vm4 = vcmask 457728  }
 0x39e   :  { %v2664_v57 = vpop.permute.xlu1 %2663  ;;  %v3063_v8 = vsel %vm3056_vm5, %v3054_v28, %v2854_v32  ;;  %123 = vst.msk [vmem:[#allocation3 + $0x8] sm:$0x1] %vm121_vm6, %v18392_v63  ;;  %124 = vst.msk [vmem:[#allocation3 + $0x10] sm:$0x1] %vm121_vm6, %v18392_v63 }
 0x39f   :  { %v3010_v0 = vsel %vm3002_vm8, %v3001_v4, %v2664_v57  ;;  %125 = vst.msk [vmem:[#allocation3 + $0x18] sm:$0x1] %vm121_vm6, %v18392_v63  ;;  %126 = vst.msk [vmem:[#allocation3 + $0x20] sm:$0x1] %vm121_vm6, %v18392_v63 }
 0x3a0   :  { %129 = vst.msk [vmem:[#allocation3 + $0x38] sm:$0x1] %vm121_vm6, %v18392_v63  ;;  %130 = vst.msk [vmem:[#allocation3 + $0x40] sm:$0x1] %vm121_vm6, %v18392_v63 }
 0x3a1   :  { %v14836_v56 = vpop.permute.xlu0 %2689  ;;  %131 = vst.msk [vmem:[#allocation3 + $0x48] sm:$0x1] %vm121_vm6, %v18392_v63  ;;  %132 = vst.msk [vmem:[#allocation3 + $0x50] sm:$0x1] %vm121_vm6, %v18392_v63 }
 0x3a2   :  { %v14834_v37 = vpop.permute.xlu1 %2851  ;;  %v3016_v7 = vsel %vm3011_vm10, %v3007_v54, %v14836_v56  ;;  %135 = vst.msk [vmem:[#allocation3 + $0xd] sm:$0x1] %vm121_vm6, %v18392_v63  ;;  %136 = vst.msk [vmem:[#allocation3 + $0x15] sm:$0x1] %vm121_vm6, %v18392_v63 }
 0x3a3   :  { %v3062_v21 = vsel %vm3056_vm5, %v3053_v13, %v14834_v37  ;;  %137 = vst.msk [vmem:[#allocation3 + $0x1d] sm:$0x1] %vm121_vm6, %v18392_v63  ;;  %138 = vst.msk [vmem:[#allocation3 + $0x25] sm:$0x1] %vm121_vm6, %v18392_v63 }
 0x3a4   :  { %141 = vst.msk [vmem:[#allocation3 + $0x3d] sm:$0x1] %vm121_vm6, %v18392_v63  ;;  %142 = vst.msk [vmem:[#allocation3 + $0x45] sm:$0x1] %vm121_vm6, %v18392_v63 }
 0x3a5   :  { %v2694_v59 = vpop.permute.xlu0 %2693  ;;  %143 = vst.msk [vmem:[#allocation3 + $0x4d] sm:$0x1] %vm121_vm6, %v18392_v63  ;;  %144 = vst.msk [vmem:[#allocation3 + $0x55] sm:$0x1] %vm121_vm6, %v18392_v63 }
 0x3a6   :  { %v2692_v22 = vpop.permute.xlu1 %2691  ;;  %v3018_v16 = vsel %vm3011_vm10, %v3009_v39, %v2694_v59  ;;  %134 = vst.msk [vmem:[#allocation3 + $0x5] sm:$0x1] %vm121_vm6, %v18392_v63  ;;  %122 = vst.msk [vmem:[#allocation3] sm:$0x1] %vm121_vm6, %v18392_v63 }
 0x3a7   :  { %v3017_v52 = vsel %vm3011_vm10, %v3008_v50, %v2692_v22  ;;  %127 = vst.msk [vmem:[#allocation3 + $0x28] sm:$0x1] %vm121_vm6, %v18392_v63  ;;  %128 = vst.msk [vmem:[#allocation3 + $0x30] sm:$0x1] %vm121_vm6, %v18392_v63 }
 0x3a8   :  { %133 = vst.msk [vmem:[#allocation3 + $0x58] sm:$0x1] %vm121_vm6, %v18392_v63  ;;  %139 = vst.msk [vmem:[#allocation3 + $0x2d] sm:$0x1] %vm121_vm6, %v18392_v63 }
 0x3a9   :  { %v14838_v12 = vpop.permute.xlu0 %2881  ;;  %140 = vst.msk [vmem:[#allocation3 + $0x35] sm:$0x1] %vm121_vm6, %v18392_v63  ;;  %145 = vst.msk [vmem:[#allocation3 + $0x5d] sm:$0x1] %vm121_vm6, %v18392_v63  ;;  %vm3799_vm6 = vcmask 654336  }
 0x3aa   :  { %v2696_v5 = vpop.permute.xlu1 %2695  ;;  %v3070_v32 = vsel %vm3065_vm9, %v3061_v20, %v14838_v12  ;;  %v3384_v11 = vld [vmem:[#allocation3 + $0x1] ss:$2 sm:$0x3]  ;;  %v3388_v28 = vld [vmem:[#allocation3 + $0x31] ss:$2 sm:$0x3] }
 0x3ab   :  { %v3019_v47 = vsel %vm3011_vm10, %v3010_v0, %v2696_v5  ;;  %3506 = vrot.lane.b32.xlu0 %v3384_v11, %s18334_s28  ;;  %vm3774_vm10 = vcmask 719872  }
 0x3ad   :  { %v14842_v43 = vpop.permute.xlu0 %2885  ;;  %v3400_v13 = vld [vmem:[#allocation3 + $0x3] ss:$2 sm:$0x3] }
 0x3ae   :  { %v14840_v29 = vpop.permute.xlu1 %2883  ;;  %v3072_v37 = vsel %vm3065_vm9, %v3063_v8, %v14842_v43  ;;  %v3473_v0 = vld [vmem:[#allocation3 + $0x28] ss:$2 sm:$0x3] }
 0x3af   :  { %v3071_v22 = vsel %vm3065_vm9, %v3062_v21, %v14840_v29  ;;  %3684 = vrot.lane.b32.xlu1 %v3473_v0, %s12390_s4  ;;  %3510 = vrot.lane.b32.xlu0 %v3388_v28, %s18334_s28 }
 0x3b0   :  { %v3404_v54 = vld [vmem:[#allocation3 + $0x33] ss:$2 sm:$0x3] }
 0x3b1   :  { %v14846_v48 = vpop.permute.xlu0 %2721 }
 0x3b2   :  { %v14844_v25 = vpop.permute.xlu1 %2887  ;;  %v3025_v56 = vsel %vm3020_vm12, %v3016_v7, %v14846_v48 }
 0x3b3   :  { %v3073_v12 = vsel %vm3065_vm9, %v3064_v2, %v14844_v25  ;;  %vm3367_vm9 = vcmask 191488  }
 0x3b5   :  { %v2726_v26 = vpop.permute.xlu0 %2725 }
 0x3b6   :  { %v2724_v19 = vpop.permute.xlu1 %2723  ;;  %v3027_v5 = vsel %vm3020_vm12, %v3018_v16, %v2726_v26 }
 0x3b7   :  { %v3026_v6 = vsel %vm3020_vm12, %v3017_v52, %v2724_v19 }
 0x3b9   :  { %v14848_v15 = vpop.permute.xlu0 %2913 }
 0x3ba   :  { %v2728_v60 = vpop.permute.xlu1 %2727  ;;  %v3079_v29 = vsel %vm3074_vm13, %v3070_v32, %v14848_v15 }
 0x3bb   :  { %v3028_v57 = vsel %vm3020_vm12, %v3019_v47, %v2728_v60 }
 0x3bd   :  { %v14850_v42 = vpop.permute.xlu0 %2917 }
 0x3be   :  { %v2916_v53 = vpop.permute.xlu1 %2915  ;;  %v3081_v43 = vsel %vm3074_vm13, %v3072_v37, %v14850_v42 }
 0x3bf   :  { %v3080_v19 = vsel %vm3074_vm13, %v3071_v22, %v2916_v53 }
 0x3c1   :  { %v2754_v45 = vpop.permute.xlu0 %2753 }
 0x3c2   :  { %v14854_v27 = vpop.permute.xlu1 %2919  ;;  %v3034_v49 = vsel %vm3029_vm14, %v3025_v56, %v2754_v45 }
 0x3c3   :  { %v3082_v48 = vsel %vm3074_vm13, %v3073_v12, %v14854_v27  ;;  %v3043_v42 = vsel %vm3038_vm1, %v3034_v49, %v14826_v30 }
 0x3c5   :  { %v2758_v3 = vpop.permute.xlu0 %2757 }
 0x3c6   :  { %v2756_v1 = vpop.permute.xlu1 %2755  ;;  %v3036_v60 = vsel %vm3029_vm14, %v3027_v5, %v2758_v3 }
 0x3c7   :  { %v3035_v59 = vsel %vm3029_vm14, %v3026_v6, %v2756_v1  ;;  %v3045_v53 = vsel %vm3038_vm1, %v3036_v60, %v14828_v31 }
 0x3c9   :  { %v2946_v24 = vpop.permute.xlu0 %2945 }
 0x3ca   :  { %v2760_v58 = vpop.permute.xlu1 %2759  ;;  %v3088_v15 = vsel %vm3083_vm2, %v3079_v29, %v2946_v24  ;;  %v3396_v24 = vld [vmem:[#allocation3 + $0x32] ss:$2 sm:$0x3] }
 0x3cb   :  { %v3037_v10 = vsel %vm3029_vm14, %v3028_v57, %v2760_v58  ;;  %v3392_v58 = vld [vmem:[#allocation3 + $0x2] ss:$2 sm:$0x3]  ;;  %vm3779_vm14 = vcmask 916480  }
 0x3cc   :  { %v3046_v26 = vsel %vm3038_vm1, %v3037_v10, %v14832_v23  ;;  %v3044_v23 = vsel %vm3038_vm1, %v3035_v59, %v14830_v62  ;;  %3522 = vrot.lane.b32.xlu0 %v3392_v58, %s12381_s10 }
 0x3cd   :  { %v2950_v41 = vpop.permute.xlu0 %2949  ;;  %v10151_v1 = vcombine.low %v3045_v53, %v3046_v26  ;;  %v10149_v27 = vcombine.low %v3043_v42, %v3044_v23  ;;  %v3323_v53 = vld [vmem:[%s18196_s5] sm:$0x1]  ;;  %s12391_s5 = smov 64  }
 0x3ce   :  { %v2948_v17 = vpop.permute.xlu1 %2947  ;;  %v3090_v45 = vsel %vm3083_vm2, %v3081_v43, %v2950_v41 }
 0x3cf   :  { %v3089_v33 = vsel %vm3083_vm2, %v3080_v19, %v2948_v17  ;;  %v3134_v61 = vpack.c.bf16 %v10151_v1, %v10149_v27 }
 0x3d0   :  { %v10150_v35 = vcombine.low %v3088_v15, %v3089_v33  ;;  %3526 = vrot.lane.b32.xlu0 %v3396_v24, %s12381_s10  ;;  %v3327_v15 = vld [vmem:[%s18197_s6] sm:$0x1]  ;;  %s12392_s6 = smov 88  }
 0x3d2   :  { %v2952_v25 = vpop.permute.xlu1 %2951 }
 0x3d3   :  { %v3091_v3 = vsel %vm3083_vm2, %v3082_v48, %v2952_v25  ;;  %vm3789_vm2 = vcmask 261120  }
 0x3d4   :  { %v10152_v9 = vcombine.low %v3090_v45, %v3091_v3  ;;  %3538 = vrot.lane.b32.xlu0 %v3400_v13, %s12385_s21  ;;  %v18393_v3 = vld [vmem:[#allocation14_spill] sm:$0xff] }
 0x3d6   :  { %v3135_v34 = vpack.c.bf16 %v10152_v9, %v10150_v35 }
 0x3d8   :  { %10166 = vmatprep.mubr.msk.bf16.mxu1 %vm3232_vm0, %v3135_v34  ;;  %3542 = vrot.lane.b32.xlu0 %v3404_v54, %s12385_s21 }
 0x3d9   :  { %3280 = vmatmul.mubr.bf16.gmra.mrb[4].mxu1 %v3134_v61 }
 0x440   :  { %v14940_v31 = vpop.f32.mrb[0].mxu1 }
 0x441   :  { %v3301_v62 = vmul.f32 %v14940_v31, %v14940_v31  ;;  %v3275_v14 = vpop.f32.mrb[1].mxu1  ;;  %v3288_v46 = vsel %vm1758_vm7, %v14940_v31, 0.0 }
 0x442   :  { %v14944_v18 = vpop.f32.mrb[2].mxu1 }
 0x443   :  { %v3289_v30 = vsel %vm1758_vm7, %v14944_v18, 0.0  ;;  %v3302_v55 = vmul.f32 %v14944_v18, %v14944_v18  ;;  %v3278_v36 = vpop.f32.mrb[3].mxu1  ;;  %v3305_v38 = vsel %vm1758_vm7, %v3301_v62, 0.0 }
 0x444   :  { %v3290_v40 = vadd.f32 %v3289_v30, %v3288_v46 }
 0x445   :  { %v3306_v4 = vsel %vm1758_vm7, %v3302_v55, 0.0 }
 0x446   :  { %v3307_v44 = vadd.f32 %v3306_v4, %v3305_v38 }
 0x4ac   :  { %v3281_v39 = vpop.f32.mrb[4].mxu1 }
 0x4ad   :  { %v3291_v47 = vsel %vm1758_vm7, %v3281_v39, 0.0  ;;  %v3303_v50 = vmul.f32 %v3281_v39, %v3281_v39  ;;  %v3283_v20 = vpop.f32.mrb[5].mxu1 }
 0x4ae   :  { %v3292_v51 = vadd.f32 %v3291_v47, %v3290_v40  ;;  %v3284_v2 = vpop.f32.mrb[6].mxu1 }
 0x4af   :  { %v3308_v57 = vsel %vm1758_vm7, %v3303_v50, 0.0  ;;  %v3293_v8 = vsel %vm1758_vm7, %v3284_v2, 0.0  ;;  %v3304_v52 = vmul.f32 %v3284_v2, %v3284_v2  ;;  %v3286_v16 = vpop.f32.mrb[7].mxu1 }
 0x4b0   :  { %v3309_v10 = vadd.f32 %v3308_v57, %v3307_v44  ;;  %v3294_v21 = vadd.f32 %v3293_v8, %v3292_v51 }
 0x4b1   :  { %v3310_v7 = vsel %vm1758_vm7, %v3304_v52, 0.0 }
 0x4b2   :  { %v3295_v6 = vrot.slane %v3294_v21, 4  ;;  %v3311_v5 = vadd.f32 %v3310_v7, %v3309_v10 }
 0x4b4   :  { %v3296_v17 = vadd.f32 %v3295_v6, %v3294_v21  ;;  %v3312_v32 = vrot.slane %v3311_v5, 4 }
 0x4b6   :  { %v3297_v22 = vrot.slane %v3296_v17, 2  ;;  %v3313_v59 = vadd.f32 %v3312_v32, %v3311_v5 }
 0x4b8   :  { %v3298_v60 = vadd.f32 %v3297_v22, %v3296_v17  ;;  %v3314_v37 = vrot.slane %v3313_v59, 2 }
 0x4ba   :  { %v3299_v56 = vrot.slane %v3298_v60, 1  ;;  %v3315_v19 = vadd.f32 %v3314_v37, %v3313_v59  ;;  %v11964_v37 = vld [vmem:[%s18198_s7 + $0x40] sm:$0xff]  }
 0x4bb   :  { %10523 = vmatprep.subr.bf16.mxu0 %v11964_v37 }
 0x4bc   :  { %v3300_v26 = vadd.f32 %v3299_v56, %v3298_v60  ;;  %v3316_v41 = vrot.slane %v3315_v19, 1 }
 0x4be   :  { %v3317_v12 = vadd.f32 %v3316_v41, %v3315_v19  ;;  %v3318_v29 = vmul.f32 0.03125, %v3300_v26  ;;  %v11965_v26 = vld [vmem:[%s18198_s7] sm:$0xff]   ;;  %v11966_v41 = vld [vmem:[%s18198_s7 + $0x48] sm:$0xff]  }
 0x4bf   :  { %10524 = vmatpush3.bf16.msra.mxu0 %v11965_v26 }
 0x4c0   :  { %v3319_v49 = vmul.f32 0.03125, %v3317_v12  ;;  %v3320_v33 = vmul.f32 %v3318_v29, %v3318_v29  ;;  %v11967_v12 = vld [vmem:[%s18198_s7 + $0x8] sm:$0xff]   ;;  %10525 = vmatprep.subr.bf16.mxu0 %v11966_v41 }
 0x4c2   :  { %v3321_v43 = vsub.f32 %v3319_v49, %v3320_v33  ;;  %v11968_v33 = vld [vmem:[%s18198_s7 + $0x50] sm:$0xff]  }
 0x4c3   :  { %10526 = vmatpush3.bf16.msra.mxu0 %v11967_v12 }
 0x4c4   :  { %v3322_v48 = vmax.f32 %v3321_v43, 0.0  ;;  %v11969_v43 = vld [vmem:[%s18198_s7 + $0x10] sm:$0xff]   ;;  %10527 = vmatprep.subr.bf16.mxu0 %v11968_v33 }
 0x4c6   :  { %v3324_v23 = vadd.f32 1e-05, %v3322_v48  ;;  %v11970_v48 = vld [vmem:[%s18198_s7 + $0x58] sm:$0xff]  }
 0x4c7   :  { %10528 = vmatpush3.bf16.msra.mxu0 %v11969_v43 }
 0x4c8   :  { %12074 = vrsqrt.f32 %v3324_v23  ;;  %10529 = vmatprep.subr.bf16.mxu0 %v11970_v48 }
 0x4d2   :  { %v12075_v25 = vpop.eup %12074 }
 0x4d3   :  { %v3326_v1 = vmul.f32 %v12075_v25, %v3323_v53  ;;  %v11971_v25 = vld [vmem:[%s18198_s7 + $0x18] sm:$0xff]  }
 0x4d4   :  { %10530 = vmatpush3.bf16.msra.mxu0 %v11971_v25 }
 0x4d5   :  { %v3328_v45 = vmul.f32 %v3326_v1, %v3318_v29  ;;  %v3334_v42 = vrot.slane %v3326_v1, %v18393_v3 }
 0x4d7   :  { %v3329_v35 = vsub.f32 %v3327_v15, %v3328_v45  ;;  %v3336_v9 = vmul.f32 %v3334_v42, %v14940_v31  ;;  %v3337_v27 = vmul.f32 %v3334_v42, %v14944_v18  ;;  %v3338_v34 = vmul.f32 %v3334_v42, %v3281_v39  ;;  %v11972_v45 = vld [vmem:[%s18198_s7 + $0x60] sm:$0xff]  }
 0x4d8   :  { %v3339_v61 = vmul.f32 %v3334_v42, %v3284_v2  ;;  %v11973_v42 = vld [vmem:[%s18198_s7 + $0x20] sm:$0xff]   ;;  %10531 = vmatprep.subr.bf16.mxu0 %v11972_v45 }
 0x4d9   :  { %v3344_v62 = vrot.slane %v3329_v35, %v18393_v3  ;;  %10532 = vmatpush3.bf16.msra.mxu0 %v11973_v42 }
 0x4db   :  { %v3346_v14 = vadd.f32 %v3344_v62, %v3336_v9  ;;  %v3347_v46 = vadd.f32 %v3344_v62, %v3337_v27  ;;  %v3348_v30 = vadd.f32 %v3344_v62, %v3338_v34  ;;  %v3349_v55 = vadd.f32 %v3344_v62, %v3339_v61  ;;  %v11974_v27 = vld [vmem:[%s18198_s7 + $0x68] sm:$0xff]   ;;  %v11976_v61 = vld [vmem:[%s18198_s7 + $0x70] sm:$0xff]  }
 0x4dc   :  { %v11975_v34 = vld [vmem:[%s18198_s7 + $0x28] sm:$0xff]   ;;  %10533 = vmatprep.subr.bf16.mxu0 %v11974_v27 }
 0x4dd   :  { %v3350_v36 = vmax.f32 %v3346_v14, 0.0  ;;  %v3351_v40 = vmax.f32 %v3347_v46, 0.0  ;;  %v3352_v38 = vmax.f32 %v3348_v30, 0.0  ;;  %v3353_v4 = vmax.f32 %v3349_v55, 0.0  ;;  %10534 = vmatpush3.bf16.msra.mxu0 %v11975_v34  ;;  %v11977_v46 = vld [vmem:[%s18198_s7 + $0x30] sm:$0xff]   ;;  %v11978_v30 = vld [vmem:[%s18198_s7 + $0x78] sm:$0xff]  }
 0x4de   :  { %10535 = vmatprep.subr.bf16.mxu0 %v11976_v61  ;;  %v3380_v34 = vld [vmem:[#allocation3 + $0x30] ss:$2 sm:$0x3] }
 0x4df   :  { %v3358_v44 = vcombine.high %v3350_v36, %v3350_v36  ;;  %v3359_v11 = vcombine.high %v3351_v40, %v3351_v40  ;;  %v3360_v28 = vcombine.high %v3352_v38, %v3352_v38  ;;  %v3361_v0 = vcombine.high %v3353_v4, %v3353_v4  ;;  %3368 = vst.msk [vmem:[#allocation3 + $0x9] sm:$0xf] %vm3367_vm9, %v3350_v36 }
 0x4e0   :  { %3370 = vst.msk [vmem:[#allocation3 + $0x19] sm:$0xf] %vm3367_vm9, %v3351_v40  ;;  %3372 = vst.msk [vmem:[#allocation3 + $0x39] sm:$0xf] %vm3367_vm9, %v3352_v38  ;;  %v11979_v40 = vld [vmem:[%s18198_s7 + $0x38] sm:$0xff]  }
 0x4e1   :  { %3374 = vst.msk [vmem:[#allocation3 + $0x49] sm:$0xf] %vm3367_vm9, %v3353_v4  ;;  %3369 = vst.msk [vmem:[#allocation3 + $0x11] sm:$0xf] %vm3367_vm9, %v3358_v44  ;;  %10536 = vmatpush3.bf16.msra.mxu0 %v11977_v46  ;;  %v15123_v4 = vpop.permute.xlu0 %3506 }
 0x4e2   :  { %3371 = vst.msk [vmem:[#allocation3 + $0x21] sm:$0xf] %vm3367_vm9, %v3359_v11  ;;  %3373 = vst.msk [vmem:[#allocation3 + $0x41] sm:$0xf] %vm3367_vm9, %v3360_v28  ;;  %10537 = vmatprep.subr.bf16.mxu0 %v11978_v30 }
 0x4e3   :  { %3375 = vst.msk [vmem:[#allocation3 + $0x51] sm:$0xf] %vm3367_vm9, %v3361_v0  ;;  %v3477_v38 = vld [vmem:[#allocation3 + $0x58] ss:$2 sm:$0x3]  ;;  %vm3804_vm9 = vcmask 850944  }
 0x4e4   :  { %v3481_v11 = vld [vmem:[#allocation3 + $0x29] ss:$2 sm:$0x3] }
 0x4e5   :  { %10538 = vmatpush3.bf16.msra.mxu0 %v11979_v40  ;;  %v3511_v0 = vpop.permute.xlu0 %3510 }
 0x4e6   :  { %v3415_v18 = vld [vmem:[#allocation3 + $0x9] ss:$2 sm:$0x3]  ;;  %v3423_v54 = vld [vmem:[#allocation3 + $0xa] ss:$2 sm:$0x3]  ;;  %10652 = vmatprep.subr.bf16.mxu0 %v18392_v63  ;;  %v3744_v46 = vsel %vm1758_vm7, %v3380_v34, %v3511_v0 }
 0x4e7   :  { %v3417_v31 = vld [vmem:[#allocation3 + $0x19] ss:$2 sm:$0x3]  ;;  %3570 = vrot.lane.b32.xlu0 %v3415_v18, %s12383_s1  ;;  %v3425_v13 = vld [vmem:[#allocation3 + $0x1a] ss:$2 sm:$0x3] }
 0x4e8   :  { %3572 = vrot.lane.b32.xlu1 %v3417_v31, %s12383_s1  ;;  %v3421_v58 = vld [vmem:[#allocation3 + $0x49] ss:$2 sm:$0x3]  ;;  %v3419_v24 = vld [vmem:[#allocation3 + $0x39] ss:$2 sm:$0x3] }
 0x4e9   :  { %v3429_v39 = vld [vmem:[#allocation3 + $0x4a] ss:$2 sm:$0x3]  ;;  %v3427_v47 = vld [vmem:[#allocation3 + $0x3a] ss:$2 sm:$0x3] }
 0x4ea   :  { %v3433_v50 = vld [vmem:[#allocation3 + $0x1b] ss:$2 sm:$0x3]  ;;  %v3431_v20 = vld [vmem:[#allocation3 + $0xb] ss:$2 sm:$0x3] }
 0x4eb   :  { %3574 = vrot.lane.b32.xlu0 %v3419_v24, %s12383_s1  ;;  %v3437_v51 = vld [vmem:[#allocation3 + $0x4b] ss:$2 sm:$0x3]  ;;  %v3435_v2 = vld [vmem:[#allocation3 + $0x3b] ss:$2 sm:$0x3]  ;;  %v3523_v24 = vpop.permute.xlu0 %3522 }
 0x4ec   :  { %3576 = vrot.lane.b32.xlu1 %v3421_v58, %s12383_s1  ;;  %v3409_v57 = vld [vmem:[#allocation3 + $0x18] ss:$2 sm:$0x3]  ;;  %v3407_v8 = vld [vmem:[#allocation3 + $0x8] ss:$2 sm:$0x3] }
 0x4ed   :  { %v3413_v52 = vld [vmem:[#allocation3 + $0x48] ss:$2 sm:$0x3]  ;;  %v3411_v16 = vld [vmem:[#allocation3 + $0x38] ss:$2 sm:$0x3] }
 0x4ee   :  { %v3471_v10 = vld [vmem:[#allocation3 + $0x18] ss:$2 sm:$0x3]  ;;  %v3386_v21 = vld [vmem:[#allocation3 + $0x11] ss:$2 sm:$0x3] }
 0x4ef   :  { %3586 = vrot.lane.b32.xlu0 %v3423_v54, %s12377_s20  ;;  %v3439_v7 = vld [vmem:[#allocation3 + $0x10] ss:$2 sm:$0x3]  ;;  %v3390_v6 = vld [vmem:[#allocation3 + $0x41] ss:$2 sm:$0x3] }
 0x4f0   :  { %3588 = vrot.lane.b32.xlu1 %v3425_v13, %s12377_s20  ;;  %v3443_v5 = vld [vmem:[#allocation3 + $0x40] ss:$2 sm:$0x3]  ;;  %v3394_v17 = vld [vmem:[#allocation3 + $0x12] ss:$2 sm:$0x3] }
 0x4f1   :  { %v3447_v32 = vld [vmem:[#allocation3 + $0x11] ss:$2 sm:$0x3]  ;;  %v3398_v22 = vld [vmem:[#allocation3 + $0x42] ss:$2 sm:$0x3] }
 0x4f2   :  { %v3451_v59 = vld [vmem:[#allocation3 + $0x41] ss:$2 sm:$0x3]  ;;  %v3402_v60 = vld [vmem:[#allocation3 + $0x13] ss:$2 sm:$0x3] }
 0x4f3   :  { %3590 = vrot.lane.b32.xlu0 %v3427_v47, %s12377_s20  ;;  %v3455_v56 = vld [vmem:[#allocation3 + $0x12] ss:$2 sm:$0x3]  ;;  %v3406_v19 = vld [vmem:[#allocation3 + $0x43] ss:$2 sm:$0x3] }
 0x4f4   :  { %3592 = vrot.lane.b32.xlu1 %v3429_v39, %s12377_s20  ;;  %v3459_v29 = vld [vmem:[#allocation3 + $0x42] ss:$2 sm:$0x3]  ;;  %v3475_v23 = vld [vmem:[#allocation3 + $0x48] ss:$2 sm:$0x3]  ;;  %v3527_v39 = vpop.permute.xlu0 %3526 }
 0x4f5   :  { %v3441_v49 = vld [vmem:[#allocation3 + $0x20] ss:$2 sm:$0x3]  ;;  %v3445_v53 = vld [vmem:[#allocation3 + $0x50] ss:$2 sm:$0x3] }
 0x4f6   :  { %v3479_v1 = vld [vmem:[#allocation3 + $0x19] ss:$2 sm:$0x3]  ;;  %v3449_v15 = vld [vmem:[#allocation3 + $0x21] ss:$2 sm:$0x3] }
 0x4f7   :  { %3602 = vrot.lane.b32.xlu0 %v3431_v20, %s12379_s2  ;;  %v3483_v35 = vld [vmem:[#allocation3 + $0x49] ss:$2 sm:$0x3]  ;;  %v3453_v9 = vld [vmem:[#allocation3 + $0x51] ss:$2 sm:$0x3] }
 0x4f8   :  { %3604 = vrot.lane.b32.xlu1 %v3433_v50, %s12379_s2  ;;  %v3487_v62 = vld [vmem:[#allocation3 + $0x1a] ss:$2 sm:$0x3]  ;;  %v3457_v14 = vld [vmem:[#allocation3 + $0x22] ss:$2 sm:$0x3]  ;;  %v3539_v50 = vpop.permute.xlu0 %3538 }
 0x4f9   :  { %v3491_v55 = vld [vmem:[#allocation3 + $0x4a] ss:$2 sm:$0x3]  ;;  %v3461_v36 = vld [vmem:[#allocation3 + $0x52] ss:$2 sm:$0x3] }
 0x4fa   :  { %v3495_v44 = vld [vmem:[#allocation3 + $0x1b] ss:$2 sm:$0x3]  ;;  %v3463_v28 = vld [vmem:[#allocation3 + $0x13] ss:$2 sm:$0x3] }
 0x4fb   :  { %3606 = vrot.lane.b32.xlu0 %v3435_v2, %s12379_s2  ;;  %v3485_v31 = vld [vmem:[#allocation3 + $0x59] ss:$2 sm:$0x3]  ;;  %v3467_v18 = vld [vmem:[#allocation3 + $0x43] ss:$2 sm:$0x3]  ;;  %v15134_v2 = vpop.permute.xlu1 %3684 }
 0x4fc   :  { %3608 = vrot.lane.b32.xlu1 %v3437_v51, %s12379_s2  ;;  %v3489_v58 = vld [vmem:[#allocation3 + $0x2a] ss:$2 sm:$0x3]  ;;  %v3499_v13 = vld [vmem:[#allocation3 + $0x4b] ss:$2 sm:$0x3] }
 0x4fd   :  { %v3493_v54 = vld [vmem:[#allocation3 + $0x5a] ss:$2 sm:$0x3]  ;;  %v3497_v47 = vld [vmem:[#allocation3 + $0x2b] ss:$2 sm:$0x3] }
 0x4fe   :  { %v3465_v20 = vld [vmem:[#allocation3 + $0x23] ss:$2 sm:$0x3]  ;;  %v3469_v51 = vld [vmem:[#allocation3 + $0x53] ss:$2 sm:$0x3] }
 0x4ff   :  { %3554 = vrot.lane.b32.xlu0 %v3407_v8, %s12388_s27  ;;  %v3501_v8 = vld [vmem:[#allocation3 + $0x5b] ss:$2 sm:$0x3]  ;;  %v3378_v40 = vld [vmem:[#allocation3 + $0x10] ss:$2 sm:$0x3] }
 0x500   :  { %3556 = vrot.lane.b32.xlu1 %v3409_v57, %s12388_s27  ;;  %v3543_v57 = vpop.permute.xlu0 %3542  ;;  %s18404_s2 = sld [smem:[#allocation39_spill]] }
 0x503   :  { %3558 = vrot.lane.b32.xlu0 %v3411_v16, %s12388_s27 }
 0x504   :  { %3560 = vrot.lane.b32.xlu1 %v3413_v52, %s12388_s27 }
 0x507   :  { %3682 = vrot.lane.b32.xlu0 %v3471_v10, %s12390_s4 }
 0x508   :  { %3508 = vrot.lane.b32.xlu1 %v3386_v21, %s18334_s28 }
 0x50b   :  { %3618 = vrot.lane.b32.xlu0 %v3439_v7, %s12391_s5 }
 0x50c   :  { %3512 = vrot.lane.b32.xlu1 %v3390_v6, %s18334_s28 }
 0x50f   :  { %3622 = vrot.lane.b32.xlu0 %v3443_v5, %s12391_s5 }
 0x510   :  { %3524 = vrot.lane.b32.xlu1 %v3394_v17, %s12381_s10 }
 0x513   :  { %3634 = vrot.lane.b32.xlu0 %v3447_v32, %s12392_s6 }
 0x514   :  { %3528 = vrot.lane.b32.xlu1 %v3398_v22, %s12381_s10 }
 0x517   :  { %3638 = vrot.lane.b32.xlu0 %v3451_v59, %s12392_s6 }
 0x518   :  { %3540 = vrot.lane.b32.xlu1 %v3402_v60, %s12385_s21 }
 0x51b   :  { %3650 = vrot.lane.b32.xlu0 %v3455_v56, %s12393_s19 }
 0x51c   :  { %3544 = vrot.lane.b32.xlu1 %v3406_v19, %s12385_s21 }
 0x51f   :  { %3654 = vrot.lane.b32.xlu0 %v3459_v29, %s12393_s19 }
 0x520   :  { %3620 = vrot.lane.b32.xlu1 %v3441_v49, %s12391_s5 }
 0x523   :  { %3686 = vrot.lane.b32.xlu0 %v3475_v23, %s12390_s4 }
 0x524   :  { %3624 = vrot.lane.b32.xlu1 %v3445_v53, %s12391_s5 }
 0x527   :  { %3698 = vrot.lane.b32.xlu0 %v3479_v1, %s12394_s22 }
 0x528   :  { %3636 = vrot.lane.b32.xlu1 %v3449_v15, %s12392_s6 }
 0x52b   :  { %3702 = vrot.lane.b32.xlu0 %v3483_v35, %s12394_s22  ;;  %v3376_v35 = vld [vmem:[#allocation3] ss:$2 sm:$0x3] }
 0x52c   :  { %3640 = vrot.lane.b32.xlu1 %v3453_v9, %s12392_s6  ;;  %v12398_v9 = vmov 1983009808   ;;  %v3742_v61 = vsel %vm1758_vm7, %v3376_v35, %v15123_v4 }
 0x52d   :  { %v3823_v27 = vunpack.c.l.s4 %v12398_v9 }
 0x52f   :  { %3714 = vrot.lane.b32.xlu0 %v3487_v62, %s12395_s26  ;;  %v3824_v30 = vunpack.c.0.s8 %v3823_v27 }
 0x530   :  { %3652 = vrot.lane.b32.xlu1 %v3457_v14, %s12393_s19 }
 0x533   :  { %3718 = vrot.lane.b32.xlu0 %v3491_v55, %s12395_s26  ;;  %v3746_v55 = vsel %vm1926_vm15, %v3742_v61, %v3523_v24 }
 0x534   :  { %3656 = vrot.lane.b32.xlu1 %v3461_v36, %s12393_s19  ;;  %v3748_v36 = vsel %vm1926_vm15, %v3744_v46, %v3527_v39  ;;  %v3750_v4 = vsel %vm3002_vm8, %v3746_v55, %v3539_v50  ;;  %s18431_s19 = sld [smem:[#allocation42_spill]] }
 0x535   :  { %v3752_v0 = vsel %vm3002_vm8, %v3748_v36, %v3543_v57 }
 0x537   :  { %3730 = vrot.lane.b32.xlu0 %v3495_v44, %s12396_s3 }
 0x538   :  { %3688 = vrot.lane.b32.xlu1 %v3477_v38, %s12390_s4  ;;  %s18396_s4 = sld [smem:[#allocation36_spill]] }
 0x53b   :  { %3666 = vrot.lane.b32.xlu0 %v3463_v28, %s12397_s16  ;;  %v18394_v28 = vld [vmem:[#allocation12_spill] sm:$0xff] }
 0x53c   :  { %3700 = vrot.lane.b32.xlu1 %v3481_v11, %s12394_s22 }
 0x53f   :  { %3670 = vrot.lane.b32.xlu0 %v3467_v18, %s12397_s16 }
 0x540   :  { %3704 = vrot.lane.b32.xlu1 %v3485_v31, %s12394_s22  ;;  %v15168_v31 = vsub.s32 %v3824_v30, %v18394_v28 }
 0x543   :  { %3734 = vrot.lane.b32.xlu0 %v3499_v13, %s12396_s3 }
 0x544   :  { %3716 = vrot.lane.b32.xlu1 %v3489_v58, %s12395_s26 }
 0x548   :  { %3720 = vrot.lane.b32.xlu1 %v3493_v54, %s12395_s26 }
 0x54c   :  { %3732 = vrot.lane.b32.xlu1 %v3497_v47, %s12396_s3  ;;  %v3382_v47 = vld [vmem:[#allocation3 + $0x40] ss:$2 sm:$0x3] }
 0x550   :  { %3668 = vrot.lane.b32.xlu1 %v3465_v20, %s12397_s16 }
 0x554   :  { %3672 = vrot.lane.b32.xlu1 %v3469_v51, %s12397_s16  ;;  %s18397_s16 = sld [smem:[#allocation37_spill]] }
 0x558   :  { %3736 = vrot.lane.b32.xlu1 %v3501_v8, %s12396_s3 }
 0x559   :  { %v15139_v16 = vpop.permute.xlu0 %3570 }
 0x55a   :  { %v15137_v52 = vpop.permute.xlu1 %3572 }
 0x55d   :  { %v15143_v21 = vpop.permute.xlu0 %3574 }
 0x55e   :  { %v15141_v10 = vpop.permute.xlu1 %3576 }
 0x561   :  { %v3587_v6 = vpop.permute.xlu0 %3586 }
 0x562   :  { %v3589_v7 = vpop.permute.xlu1 %3588  ;;  %v3762_v58 = vsel %vm3056_vm5, %v15139_v16, %v3587_v6 }
 0x563   :  { %v3763_v13 = vsel %vm3056_vm5, %v15137_v52, %v3589_v7 }
 0x565   :  { %v3591_v17 = vpop.permute.xlu0 %3590 }
 0x566   :  { %v15145_v5 = vpop.permute.xlu1 %3592  ;;  %v3764_v54 = vsel %vm3056_vm5, %v15143_v21, %v3591_v17 }
 0x569   :  { %v3603_v22 = vpop.permute.xlu0 %3602 }
 0x56a   :  { %v3605_v32 = vpop.permute.xlu1 %3604  ;;  %v3766_v39 = vsel %vm3074_vm13, %v3762_v58, %v3603_v22 }
 0x56b   :  { %v3767_v51 = vsel %vm3074_vm13, %v3763_v13, %v3605_v32 }
 0x56d   :  { %v3607_v60 = vpop.permute.xlu0 %3606 }
 0x56e   :  { %v15147_v59 = vpop.permute.xlu1 %3608  ;;  %v3768_v57 = vsel %vm3074_vm13, %v3764_v54, %v3607_v60 }
 0x571   :  { %v3555_v56 = vpop.permute.xlu0 %3554 }
 0x572   :  { %v3557_v37 = vpop.permute.xlu1 %3556  ;;  %v3754_v7 = vsel %vm3020_vm12, %v3750_v4, %v3555_v56 }
 0x575   :  { %v3559_v26 = vpop.permute.xlu0 %3558 }
 0x576   :  { %v15149_v19 = vpop.permute.xlu1 %3560  ;;  %v3756_v56 = vsel %vm3020_vm12, %v3752_v0, %v3559_v26 }
 0x579   :  { %v15151_v12 = vpop.permute.xlu0 %3682 }
 0x57a   :  { %v3509_v41 = vpop.permute.xlu1 %3508 }
 0x57b   :  { %v3743_v11 = vsel %vm1758_vm7, %v3378_v40, %v3509_v41 }
 0x57d   :  { %v3619_v49 = vpop.permute.xlu0 %3618 }
 0x57e   :  { %v3513_v29 = vpop.permute.xlu1 %3512  ;;  %v3770_v6 = vsel %vm3232_vm0, %v3766_v39, %v3619_v49  ;;  %v11980_v39 = vld [vmem:[%s18198_s7 + $0x80] sm:$0xff]  }
 0x57f   :  { %v3745_v8 = vsel %vm1758_vm7, %v3382_v47, %v3513_v29  ;;  %v3765_v29 = vsel %vm3056_vm5, %v15141_v10, %v15145_v5 }
 0x580   :  { %v3769_v26 = vsel %vm3074_vm13, %v3765_v29, %v15147_v59  ;;  %vm12399_vm13 = vmmov 0  }
 0x581   :  { %v3623_v43 = vpop.permute.xlu0 %3622 }
 0x582   :  { %v3525_v33 = vpop.permute.xlu1 %3524 }
 0x583   :  { %v3747_v18 = vsel %vm1926_vm15, %v3743_v11, %v3525_v33  ;;  %v3772_v33 = vsel %vm3232_vm0, %v3768_v57, %v3623_v43 }
 0x585   :  { %v3635_v23 = vpop.permute.xlu0 %3634 }
 0x586   :  { %v3529_v48 = vpop.permute.xlu1 %3528  ;;  %v3775_v17 = vsel %vm3774_vm10, %v3770_v6, %v3635_v23  ;;  %v3758_v23 = vsel %vm3038_vm1, %v3754_v7, %v15139_v16  ;;  %v3760_v16 = vsel %vm3038_vm1, %v3756_v56, %v15143_v21  ;;  %v11982_v6 = vld [vmem:[%s18198_s7 + $0x90] sm:$0xff]  }
 0x587   :  { %v3749_v41 = vsel %vm1926_vm15, %v3745_v8, %v3529_v48 }
 0x589   :  { %v3639_v25 = vpop.permute.xlu0 %3638 }
 0x58a   :  { %v3541_v53 = vpop.permute.xlu1 %3540  ;;  %v3777_v49 = vsel %vm3774_vm10, %v3772_v33, %v3639_v25  ;;  %v11983_v33 = vld [vmem:[%s18198_s7 + $0x98] sm:$0xff]  }
 0x58b   :  { %v3751_v24 = vsel %vm3002_vm8, %v3747_v18, %v3541_v53 }
 0x58c   :  { %v3755_v22 = vsel %vm3020_vm12, %v3751_v24, %v3557_v37 }
 0x58d   :  { %v15153_v15 = vpop.permute.xlu0 %3650 }
 0x58e   :  { %v3545_v1 = vpop.permute.xlu1 %3544  ;;  %v3780_v32 = vsel %vm3779_vm14, %v3775_v17, %v15153_v15 }
 0x58f   :  { %v3753_v53 = vsel %vm3002_vm8, %v3749_v41, %v3545_v1  ;;  %v3821_v35 = vcombine.low %v3758_v23, %v3780_v32 }
 0x590   :  { %v3757_v25 = vsel %vm3020_vm12, %v3753_v53, %v15149_v19 }
 0x591   :  { %v15155_v42 = vpop.permute.xlu0 %3654  ;;  %v3761_v59 = vsel %vm3038_vm1, %v3757_v25, %v15141_v10  ;;  %v3828_v30 = vrot.slane %v3821_v35, %v15168_v31 }
 0x592   :  { %v3621_v45 = vpop.permute.xlu1 %3620  ;;  %v3782_v1 = vsel %vm3779_vm14, %v3777_v49, %v15155_v42 }
 0x593   :  { %v3771_v60 = vsel %vm3232_vm0, %v3767_v51, %v3621_v45  ;;  %v3759_v45 = vsel %vm3038_vm1, %v3755_v22, %v15137_v52  ;;  %v3853_v34 = vcombine.low %v3760_v16, %v3782_v1  ;;  %v11981_v51 = vld [vmem:[%s18198_s7 + $0x88] sm:$0xff]   ;;  %vm3784_vm1 = vcmask 64512   ;;  %v11986_v16 = vld [vmem:[%s18198_s7 + $0xb0] sm:$0xff]  }
 0x595   :  { %v15159_v14 = vpop.permute.xlu0 %3686  ;;  %v3860_v21 = vrot.slane %v3853_v34, %v15168_v31 }
 0x596   :  { %v3625_v62 = vpop.permute.xlu1 %3624 }
 0x597   :  { %v3773_v27 = vsel %vm3232_vm0, %v3769_v26, %v3625_v62 }
 0x599   :  { %v15164_v44 = vpop.permute.xlu0 %3698 }
 0x59a   :  { %v3637_v38 = vpop.permute.xlu1 %3636 }
 0x59b   :  { %v3776_v48 = vsel %vm3774_vm10, %v3771_v60, %v3637_v38 }
 0x59d   :  { %v15181_v20 = vpop.permute.xlu0 %3702 }
 0x59e   :  { %v3641_v50 = vpop.permute.xlu1 %3640 }
 0x59f   :  { %v3778_v61 = vsel %vm3774_vm10, %v3773_v27, %v3641_v50  ;;  %vm146_vm10 = vcmask 388096  }
 0x5a0   :  { %147 = vst.msk [vmem:[#allocation4] sm:$0xf] %vm146_vm10, %v18392_v63  ;;  %148 = vst.msk [vmem:[#allocation4 + $0x10] sm:$0xf] %vm146_vm10, %v18392_v63 }
 0x5a1   :  { %v15204_v43 = vpop.permute.xlu0 %3714  ;;  %150 = vst.msk [vmem:[#allocation4 + $0xc] sm:$0xf] %vm146_vm10, %v18392_v63  ;;  %151 = vst.msk [vmem:[#allocation4 + $0x1c] sm:$0xf] %vm146_vm10, %v18392_v63 }
 0x5a2   :  { %v15202_v37 = vpop.permute.xlu1 %3652 }
 0x5a3   :  { %v3781_v5 = vsel %vm3779_vm14, %v3776_v48, %v15202_v37 }
 0x5a4   :  { %v3837_v9 = vcombine.low %v3759_v45, %v3781_v5 }
 0x5a5   :  { %v3719_v36 = vpop.permute.xlu0 %3718 }
 0x5a6   :  { %v3844_v52 = vrot.slane %v3837_v9, %v15168_v31  ;;  %v15223_v46 = vpop.permute.xlu1 %3656 }
 0x5a7   :  { %v3783_v19 = vsel %vm3779_vm14, %v3778_v61, %v15223_v46  ;;  %vm152_vm14 = vcmask 385024  }
 0x5a8   :  { %v3869_v55 = vcombine.low %v3761_v59, %v3783_v19  ;;  %v10167_v38 = vcombine.low %v3828_v30, %v3844_v52  ;;  %v11987_v59 = vld [vmem:[%s18198_s7 + $0xb8] sm:$0xff]   ;;  %154 = vst.msk [vmem:[#allocation4 + $0x4] sm:$0x1] %vm152_vm14, %v18392_v63  ;;  %155 = vst.msk [vmem:[#allocation4 + $0x8] sm:$0x1] %vm152_vm14, %v18392_v63 }
 0x5a9   :  { %v3731_v28 = vpop.permute.xlu0 %3730  ;;  %158 = vst.msk [vmem:[#allocation4 + $0x14] sm:$0x1] %vm152_vm14, %v18392_v63  ;;  %159 = vst.msk [vmem:[#allocation4 + $0x18] sm:$0x1] %vm152_vm14, %v18392_v63 }
 0x5aa   :  { %v3876_v62 = vrot.slane %v3869_v55, %v15168_v31  ;;  %v3689_v40 = vpop.permute.xlu1 %3688  ;;  %v3895_v18 = vrot.slane %v10167_v38, %v15168_v31  ;;  %162 = vst.msk [vmem:[#allocation4 + $0x7] sm:$0x1] %vm152_vm14, %v18392_v63  ;;  %163 = vst.msk [vmem:[#allocation4 + $0xb] sm:$0x1] %vm152_vm14, %v18392_v63 }
 0x5ab   :  { %166 = vst.msk [vmem:[#allocation4 + $0x17] sm:$0x1] %vm152_vm14, %v18392_v63  ;;  %167 = vst.msk [vmem:[#allocation4 + $0x1b] sm:$0x1] %vm152_vm14, %v18392_v63 }
 0x5ac   :  { %v10169_v11 = vcombine.low %v3860_v21, %v3876_v62  ;;  %161 = vst.msk [vmem:[#allocation4 + $0x3] sm:$0x1] %vm152_vm14, %v18392_v63  ;;  %153 = vst.msk [vmem:[#allocation4] sm:$0x1] %vm152_vm14, %v18392_v63  ;;  %v15339_v62 = vld [vmem:[#allocation4 + $0x1] sm:$0x3] }
 0x5ad   :  { %v3667_v47 = vpop.permute.xlu0 %3666  ;;  %156 = vst.msk [vmem:[#allocation4 + $0xc] sm:$0x1] %vm152_vm14, %v18392_v63  ;;  %157 = vst.msk [vmem:[#allocation4 + $0x10] sm:$0x1] %vm152_vm14, %v18392_v63  ;;  %4288 = vrot.lane.b32.xlu0 %v15339_v62, %s12381_s10 }
 0x5ae   :  { %v3701_v4 = vpop.permute.xlu1 %3700  ;;  %v3909_v10 = vrot.slane %v10169_v11, %v15168_v31  ;;  %v3785_v7 = vsel %vm3784_vm1, %v15153_v15, %v3667_v47  ;;  %160 = vst.msk [vmem:[#allocation4 + $0x1c] sm:$0x1] %vm152_vm14, %v18392_v63  ;;  %164 = vst.msk [vmem:[#allocation4 + $0xf] sm:$0x1] %vm152_vm14, %v18392_v63 }
 0x5af   :  { %v3790_v17 = vsel %vm3789_vm2, %v3785_v7, %v15151_v12  ;;  %v11984_v12 = vld [vmem:[%s18198_s7 + $0xa0] sm:$0xff]   ;;  %165 = vst.msk [vmem:[#allocation4 + $0x13] sm:$0x1] %vm152_vm14, %v18392_v63  ;;  %168 = vst.msk [vmem:[#allocation4 + $0x1f] sm:$0x1] %vm152_vm14, %v18392_v63 }
 0x5b0   :  { %v3917_v0 = vcombine.low %v3895_v18, %v3909_v10  ;;  %v3918_v58 = vcombine.high %v3895_v18, %v3909_v10  ;;  %v3795_v53 = vsel %vm3794_vm4, %v3790_v17, %v15164_v44 }
 0x5b1   :  { %v3671_v57 = vpop.permute.xlu0 %3670 }
 0x5b2   :  { %v3705_v24 = vpop.permute.xlu1 %3704  ;;  %v3923_v13 = vpack.c.bf16 %v3917_v0, %v3917_v0  ;;  %v3924_v54 = vpack.c.bf16 %v3918_v58, %v3918_v58  ;;  %v3787_v41 = vsel %vm3784_vm1, %v15155_v42, %v3671_v57 }
 0x5b3   :  { %v3792_v15 = vsel %vm3789_vm2, %v3787_v41, %v15159_v14  ;;  %v3800_v14 = vsel %vm3799_vm6, %v3795_v53, %v15204_v43  ;;  %v4562_v38 = vld [vmem:[#allocation4 + $0x2] sm:$0x3] }
 0x5b4   :  { %4150 = vmatprep.mubr.bf16.mxu0 %v3924_v54  ;;  %v3797_v32 = vsel %vm3794_vm4, %v3792_v15, %v15181_v20  ;;  %v3805_v23 = vsel %vm3804_vm9, %v3800_v14, %v3731_v28 }
 0x5b5   :  { %4151 = vmatmul.mubr.bf16.vlgmr.msra.gmra.mrb[16].mxu0 %v3923_v13  ;;  %v3802_v56 = vsel %vm3799_vm6, %v3797_v32, %v3719_v36  ;;  %v3735_v49 = vpop.permute.xlu0 %3734  ;;  %v3835_v25 = vrot.slane %v3805_v23, %v15168_v31  ;;  %v18395_v36 = vmov 0  }
 0x5b6   :  { %v3717_v50 = vpop.permute.xlu1 %3716  ;;  %10653 = vmatpush3.bf16.msra.mxu0 %v11980_v39  ;;  %10668 = vmatprep.mubr.msk.bf16.mxu0 %vm12399_vm13, %v18392_v63  ;;  %v3807_v5 = vsel %vm3804_vm9, %v3802_v56, %v3735_v49  ;;  %v4564_v11 = vld [vmem:[#allocation4 + $0x12] sm:$0x3]  ;;  %v4218_v56 = vld [vmem:[%s18199_s8] sm:$0x1]  ;;  %vm4263_vm13 = vcmask 386048   ;;  %s18398_s8 = sld [smem:[#allocation38_spill]] }
 0x5b7   :  { %10654 = vmatprep.subr.bf16.mxu0 %v18392_v63  ;;  %v3867_v34 = vrot.slane %v3807_v5, %v15168_v31 }
 0x5ba   :  { %v3721_v8 = vpop.permute.xlu1 %3720  ;;  %10655 = vmatpush3.bf16.msra.mxu0 %v11981_v51 }
 0x5bb   :  { %10656 = vmatprep.subr.bf16.mxu0 %v18392_v63 }
 0x5be   :  { %v3733_v22 = vpop.permute.xlu1 %3732  ;;  %10657 = vmatpush3.bf16.msra.mxu0 %v11982_v6 }
 0x5bf   :  { %10658 = vmatprep.subr.bf16.mxu0 %v18392_v63 }
 0x5c2   :  { %v3669_v42 = vpop.permute.xlu1 %3668  ;;  %10659 = vmatpush3.bf16.msra.mxu0 %v11983_v33 }
 0x5c3   :  { %v3786_v60 = vsel %vm3784_vm1, %v15202_v37, %v3669_v42  ;;  %10660 = vmatprep.subr.bf16.mxu0 %v18392_v63  ;;  %v11985_v37 = vld [vmem:[%s18198_s7 + $0xa8] sm:$0xff]  }
 0x5c4   :  { %v3791_v44 = vsel %vm3789_vm2, %v3786_v60, %v15134_v2 }
 0x5c5   :  { %v3796_v29 = vsel %vm3794_vm4, %v3791_v44, %v3701_v4 }
 0x5c6   :  { %v3801_v48 = vsel %vm3799_vm6, %v3796_v29, %v3717_v50  ;;  %v3673_v20 = vpop.permute.xlu1 %3672  ;;  %10661 = vmatpush3.bf16.msra.mxu0 %v11984_v12 }
 0x5c7   :  { %v3806_v43 = vsel %vm3804_vm9, %v3801_v48, %v3733_v22  ;;  %v3788_v2 = vsel %vm3784_vm1, %v15223_v46, %v3673_v20  ;;  %10662 = vmatprep.subr.bf16.mxu0 %v18392_v63  ;;  %v4222_v20 = vld [vmem:[%s18200_s9] sm:$0x1]  ;;  %s18429_s9 = sld [smem:[#allocation41_spill]] }
 0x5c8   :  { %v3851_v1 = vrot.slane %v3806_v43, %v15168_v31  ;;  %v3793_v45 = vsel %vm3789_vm2, %v3788_v2, %v3689_v40  ;;  %v15343_v40 = vld [vmem:[#allocation4 + $0x11] sm:$0x3] }
 0x5c9   :  { %v3798_v26 = vsel %vm3794_vm4, %v3793_v45, %v3705_v24  ;;  %4292 = vrot.lane.b32.xlu0 %v15343_v40, %s12381_s10 }
 0x5ca   :  { %v3803_v35 = vsel %vm3799_vm6, %v3798_v26, %v3721_v8  ;;  %v3737_v9 = vpop.permute.xlu1 %3736  ;;  %10663 = vmatpush3.bf16.msra.mxu0 %v11985_v37  ;;  %v10168_v52 = vcombine.low %v3835_v25, %v3851_v1  ;;  %v11988_v26 = vld [vmem:[%s18396_s4] sm:$0xff]  }
 0x5cb   :  { %v3808_v27 = vsel %vm3804_vm9, %v3803_v35, %v3737_v9  ;;  %10664 = vmatprep.subr.bf16.mxu0 %v18392_v63  ;;  %4506 = vmatpush1.bf16.msra.mxu1 %v11988_v26 }
 0x5cc   :  { %v3883_v61 = vrot.slane %v3808_v27, %v15168_v31  ;;  %v3902_v30 = vrot.slane %v10168_v52, %v15168_v31  ;;  %4507 = vmatprep.subr.bf16.mxu1 %v18395_v36  ;;  %v11991_v52 = vld [vmem:[%s18396_s4 + $0x60] sm:$0xff]  }
 0x5cd   :  { %4574 = vrot.lane.b32.xlu0 %v4562_v38, %s12381_s10  ;;  %v11993_v38 = vld [vmem:[%s18396_s4 + $0x68] sm:$0xff]  }
 0x5ce   :  { %v10170_v46 = vcombine.low %v3867_v34, %v3883_v61  ;;  %10665 = vmatpush3.bf16.msra.mxu0 %v11986_v16  ;;  %v11989_v34 = vld [vmem:[%s18396_s4 + $0x8] sm:$0xff]   ;;  %v11990_v61 = vld [vmem:[%s18396_s4 + $0x10] sm:$0xff]  }
 0x5cf   :  { %10666 = vmatprep.subr.bf16.mxu0 %v18392_v63  ;;  %4508 = vmatpush1.bf16.msra.mxu1 %v11989_v34 }
 0x5d0   :  { %v3916_v19 = vrot.slane %v10170_v46, %v15168_v31  ;;  %4509 = vmatprep.subr.bf16.mxu1 %v18395_v36 }
 0x5d1   :  { %4578 = vrot.lane.b32.xlu0 %v4564_v11, %s12381_s10 }
 0x5d2   :  { %10667 = vmatpush3.bf16.msra.mxu0 %v11987_v59  ;;  %v3919_v55 = vcombine.low %v3902_v30, %v3916_v19 }
 0x5d3   :  { %4788 = vmatprep.subr.bf16.mxu0 %v18395_v36  ;;  %4510 = vmatpush1.bf16.msra.mxu1 %v11990_v61 }
 0x5d4   :  { %v3925_v21 = vpack.c.bf16 %v3919_v55, %v3919_v55  ;;  %4511 = vmatprep.subr.bf16.mxu1 %v18395_v36 }
 0x5d6   :  { %10669 = vmatmul.mubr.bf16.vlgmr.msra.gmra.mrb[20].mxu0 %v3925_v21  ;;  %v11992_v21 = vld [vmem:[%s18396_s4 + $0x18] sm:$0xff]  }
 0x5d7   :  { %4789 = vmatpush1.bf16.msra.mxu0 %v11991_v52  ;;  %4512 = vmatpush1.bf16.msra.mxu1 %v11992_v21 }
 0x5d8   :  { %4790 = vmatprep.subr.bf16.mxu0 %v18395_v36  ;;  %4513 = vmatprep.subr.bf16.mxu1 %v18395_v36 }
 0x5db   :  { %4791 = vmatpush1.bf16.msra.mxu0 %v11993_v38 }
 0x5dc   :  { %4792 = vmatprep.subr.bf16.mxu0 %v18395_v36 }
 0x688   :  { %v10539_v28 = vpop.f32.mrb[16].mxu0 }
 0x689   :  { %v10540_v4 = vpop.f32.mrb[17].mxu0 }
 0x68a   :  { %v10541_v18 = vadd.f32 %v10540_v4, %v10539_v28  ;;  %v10542_v63 = vpop.f32.mrb[18].mxu0  ;;  %v11994_v28 = vld [vmem:[%s18396_s4 + $0x20] sm:$0xff]   ;;  %v11995_v4 = vld [vmem:[%s18396_s4 + $0x70] sm:$0xff]  }
 0x68b   :  { %v10543_v10 = vpop.f32.mrb[19].mxu0  ;;  %v11996_v63 = vld [vmem:[%s18396_s4 + $0x28] sm:$0xff]   ;;  %4514 = vmatpush1.bf16.msra.mxu1 %v11994_v28  ;;  %4793 = vmatpush1.bf16.msra.mxu0 %v11995_v4 }
 0x68c   :  { %v11997_v10 = vld [vmem:[%s18396_s4 + $0x78] sm:$0xff]   ;;  %4515 = vmatprep.subr.bf16.mxu1 %v18395_v36  ;;  %4794 = vmatprep.subr.bf16.mxu0 %v18395_v36 }
 0x68f   :  { %4516 = vmatpush1.bf16.msra.mxu1 %v11996_v63  ;;  %4795 = vmatpush1.bf16.msra.mxu0 %v11997_v10  ;;  %v4268_v10 = vld [vmem:[#allocation4] sm:$0x3] }
 0x690   :  { %4517 = vmatprep.subr.bf16.mxu1 %v18395_v36  ;;  %4796 = vmatprep.subr.bf16.mxu0 %v18395_v36 }
 0x6a9   :  { %v4192_v0 = vpop.f32.mrb[20].mxu0 }
 0x6aa   :  { %v4193_v58 = vadd.f32 %v10541_v18, %v4192_v0  ;;  %v10670_v24 = vpop.f32.mrb[21].mxu0 }
 0x6ab   :  { %v4195_v13 = vpop.f32.mrb[22].mxu0  ;;  %v11998_v24 = vld [vmem:[%s18396_s4 + $0x30] sm:$0xff]  }
 0x6ac   :  { %v4198_v54 = vsel %vm1926_vm15, %v4193_v58, 0.0  ;;  %v4205_v39 = vmul.f32 %v4193_v58, %v4193_v58  ;;  %v10671_v47 = vpop.f32.mrb[23].mxu0  ;;  %v11999_v13 = vld [vmem:[%s18396_s4 + $0x80] sm:$0xff]   ;;  %4518 = vmatpush1.bf16.msra.mxu1 %v11998_v24 }
 0x6ad   :  { %v4199_v50 = vrot.slane %v4198_v54, 4  ;;  %4797 = vmatpush1.bf16.msra.mxu0 %v11999_v13  ;;  %4519 = vmatprep.subr.bf16.mxu1 %v18395_v36  ;;  %v12000_v47 = vld [vmem:[%s18396_s4 + $0x38] sm:$0xff]  }
 0x6ae   :  { %v4206_v51 = vsel %vm1926_vm15, %v4205_v39, 0.0  ;;  %4798 = vmatprep.subr.bf16.mxu0 %v18395_v36 }
 0x6af   :  { %v4200_v57 = vadd.f32 %v4199_v50, %v4198_v54  ;;  %v4207_v8 = vrot.slane %v4206_v51, 4  ;;  %v12001_v50 = vld [vmem:[%s18396_s4 + $0x88] sm:$0xff]  }
 0x6b0   :  { %4520 = vmatpush1.bf16.msra.mxu1 %v12000_v47 }
 0x6b1   :  { %v4201_v6 = vrot.slane %v4200_v57, 2  ;;  %v4208_v7 = vadd.f32 %v4207_v8, %v4206_v51  ;;  %v12002_v51 = vld [vmem:[%s18396_s4 + $0x40] sm:$0xff]   ;;  %4799 = vmatpush1.bf16.msra.mxu0 %v12001_v50  ;;  %4521 = vmatprep.subr.bf16.mxu1 %v18395_v36 }
 0x6b2   :  { %4800 = vmatprep.subr.bf16.mxu0 %v18395_v36 }
 0x6b3   :  { %v4202_v41 = vadd.f32 %v4201_v6, %v4200_v57  ;;  %v4209_v17 = vrot.slane %v4208_v7, 2  ;;  %v12003_v57 = vld [vmem:[%s18396_s4 + $0x90] sm:$0xff]  }
 0x6b4   :  { %4522 = vmatpush1.bf16.msra.mxu1 %v12002_v51 }
 0x6b5   :  { %v4203_v22 = vrot.slane %v4202_v41, 1  ;;  %v4210_v33 = vadd.f32 %v4209_v17, %v4208_v7  ;;  %4801 = vmatpush1.bf16.msra.mxu0 %v12003_v57  ;;  %4523 = vmatprep.subr.bf16.mxu1 %v18395_v36  ;;  %v12005_v17 = vld [vmem:[%s18396_s4 + $0x98] sm:$0xff]  }
 0x6b6   :  { %4802 = vmatprep.subr.bf16.mxu0 %v18395_v36 }
 0x6b7   :  { %v4204_v15 = vadd.f32 %v4203_v22, %v4202_v41  ;;  %v4211_v53 = vrot.slane %v4210_v33, 1  ;;  %v12004_v41 = vld [vmem:[%s18396_s4 + $0x48] sm:$0xff]  }
 0x6b8   :  { %4524 = vmatpush1.bf16.msra.mxu1 %v12004_v41 }
 0x6b9   :  { %v4212_v42 = vadd.f32 %v4211_v53, %v4210_v33  ;;  %v4213_v12 = vmul.f32 0.125, %v4204_v15  ;;  %4803 = vmatpush1.bf16.msra.mxu0 %v12005_v17  ;;  %v12006_v33 = vld [vmem:[%s18396_s4 + $0x50] sm:$0xff]   ;;  %v12007_v15 = vld [vmem:[%s18396_s4 + $0xa0] sm:$0xff]   ;;  %4525 = vmatprep.subr.bf16.mxu1 %v18395_v36 }
 0x6ba   :  { %4804 = vmatprep.subr.bf16.mxu0 %v18395_v36 }
 0x6bb   :  { %v4214_v32 = vmul.f32 0.125, %v4212_v42  ;;  %v4215_v60 = vmul.f32 %v4213_v12, %v4213_v12  ;;  %v12008_v42 = vld [vmem:[%s18396_s4 + $0x58] sm:$0xff]  }
 0x6bc   :  { %4526 = vmatpush1.bf16.msra.mxu1 %v12006_v33 }
 0x6bd   :  { %v4216_v14 = vsub.f32 %v4214_v32, %v4215_v60  ;;  %4805 = vmatpush1.bf16.msra.mxu0 %v12007_v15  ;;  %4527 = vmatprep.subr.bf16.mxu1 %v18395_v36 }
 0x6be   :  { %4806 = vmatprep.subr.bf16.mxu0 %v18395_v36 }
 0x6bf   :  { %v4217_v44 = vmax.f32 %v4216_v14, 0.0  ;;  %v12010_v14 = vld [vmem:[%s18396_s4 + $0xb0] sm:$0xff]  }
 0x6c0   :  { %4528 = vmatpush1.bf16.msra.mxu1 %v12008_v42 }
 0x6c1   :  { %v4219_v29 = vadd.f32 1e-05, %v4217_v44  ;;  %5072 = vmatprep.subr.bf16.mxu1 %v18395_v36  ;;  %v4847_v44 = vld [vmem:[#allocation4 + $0xc] sm:$0x3] }
 0x6c3   :  { %12076 = vrsqrt.f32 %v4219_v29  ;;  %v12012_v29 = vld [vmem:[%s18396_s4 + $0xb8] sm:$0xff]  }
 0x6cd   :  { %v12077_v49 = vpop.eup %12076 }
 0x6ce   :  { %v4221_v48 = vmul.f32 %v12077_v49, %v4218_v56  ;;  %v4849_v56 = vld [vmem:[#allocation4 + $0x1c] sm:$0x3]  ;;  %v4851_v49 = vld [vmem:[#allocation4 + $0xd] sm:$0x3] }
 0x6d0   :  { %v4223_v37 = vmul.f32 %v4221_v48, %v4213_v12  ;;  %v4229_v23 = vrot.slane %v4221_v48, %v18393_v3  ;;  %v12009_v12 = vld [vmem:[%s18396_s4 + $0xa8] sm:$0xff]  }
 0x6d1   :  { %4807 = vmatpush1.bf16.msra.mxu0 %v12009_v12 }
 0x6d2   :  { %v4224_v43 = vsub.f32 %v4222_v20, %v4223_v37  ;;  %v4231_v2 = vmul.f32 %v4229_v23, %v4193_v58  ;;  %4808 = vmatprep.subr.bf16.mxu0 %v18395_v36  ;;  %v4853_v20 = vld [vmem:[#allocation4 + $0x1d] sm:$0x3] }
 0x6d4   :  { %v4236_v1 = vrot.slane %v4224_v43, %v18393_v3 }
 0x6d5   :  { %4809 = vmatpush1.bf16.msra.mxu0 %v12010_v14 }
 0x6d6   :  { %v4238_v45 = vadd.f32 %v4236_v1, %v4231_v2  ;;  %4810 = vmatprep.subr.bf16.mxu0 %v18395_v36  ;;  %v5130_v2 = vld [vmem:[#allocation4 + $0xe] sm:$0x3]  ;;  %v5132_v1 = vld [vmem:[#allocation4 + $0x1e] sm:$0x3] }
 0x6d8   :  { %v4239_v5 = vmax.f32 %v4238_v45, 0.0  ;;  %v4289_v45 = vpop.permute.xlu0 %4288 }
 0x6d9   :  { %4811 = vmatpush1.bf16.msra.mxu0 %v12012_v29  ;;  %v4332_v50 = vsel %vm1926_vm15, %v4268_v10, %v4289_v45 }
 0x6da   :  { %v4241_v25 = vcombine.high %v4239_v5, %v4239_v5  ;;  %v4248_v35 = vrot.slane %v4239_v5, %v15168_v31  ;;  %5347 = vmatprep.subr.bf16.mxu0 %v18395_v36 }
 0x6dc   :  { %v4255_v9 = vrot.slane %v4241_v25, %v15168_v31  ;;  %v4256_v16 = vcombine.high %v4248_v35, %v4248_v35  ;;  %4264 = vst.msk [vmem:[#allocation4 + $0x5] sm:$0x3] %vm4263_vm13, %v4248_v35  ;;  %v4293_v5 = vpop.permute.xlu0 %4292 }
 0x6de   :  { %v4257_v27 = vcombine.high %v4255_v9, %v4255_v9  ;;  %4265 = vst.msk [vmem:[#allocation4 + $0x9] sm:$0x3] %vm4263_vm13, %v4256_v16  ;;  %4266 = vst.msk [vmem:[#allocation4 + $0x15] sm:$0x3] %vm4263_vm13, %v4255_v9 }
 0x6e0   :  { %4267 = vst.msk [vmem:[#allocation4 + $0x19] sm:$0x3] %vm4263_vm13, %v4257_v27  ;;  %v4575_v26 = vpop.permute.xlu0 %4574 }
 0x6e3   :  { %v15380_v46 = vld [vmem:[#allocation4 + $0x4] sm:$0x3]  ;;  %v4563_v30 = vld [vmem:[#allocation4 + $0x6] sm:$0x3] }
 0x6e4   :  { %v15382_v59 = vld [vmem:[#allocation4 + $0x5] sm:$0x3]  ;;  %4304 = vrot.lane.b32.xlu0 %v15380_v46, %s12388_s27  ;;  %v4579_v25 = vpop.permute.xlu0 %4578 }
 0x6e5   :  { %4290 = vrot.lane.b32.xlu1 %v15382_v59, %s12381_s10  ;;  %v15389_v19 = vld [vmem:[#allocation4 + $0x5] sm:$0x3]  ;;  %v15394_v55 = vld [vmem:[#allocation4 + $0x15] sm:$0x3]  ;;  %v15416_v18 = vld [vmem:[#allocation4 + $0x8] sm:$0x3] }
 0x6e6   :  { %v15406_v11 = vld [vmem:[#allocation4 + $0x6] sm:$0x3]  ;;  %v15428_v0 = vld [vmem:[#allocation4 + $0x14] sm:$0x3]  ;;  %v15430_v58 = vld [vmem:[#allocation4 + $0x9] sm:$0x3] }
 0x6e7   :  { %v15444_v54 = vld [vmem:[#allocation4 + $0x15] sm:$0x3]  ;;  %v15469_v6 = vld [vmem:[#allocation4 + $0xa] sm:$0x3]  ;;  %v15476_v7 = vld [vmem:[#allocation4 + $0x18] sm:$0x3] }
 0x6e8   :  { %4320 = vrot.lane.b32.xlu0 %v15389_v19, %s12377_s20  ;;  %v4565_v39 = vld [vmem:[#allocation4 + $0x16] sm:$0x3]  ;;  %v15490_v22 = vld [vmem:[#allocation4 + $0x19] sm:$0x3]  ;;  %v4846_v53 = vld [vmem:[#allocation4 + $0x8] sm:$0x3] }
 0x6e9   :  { %4576 = vrot.lane.b32.xlu1 %v4563_v30, %s12381_s10  ;;  %v4568_v8 = vld [vmem:[#allocation4 + $0x16] sm:$0x3]  ;;  %v4850_v32 = vld [vmem:[#allocation4 + $0x9] sm:$0x3]  ;;  %v4569_v60 = vld [vmem:[#allocation4 + $0x1a] sm:$0x3] }
 0x6ea   :  { %v5129_v48 = vld [vmem:[#allocation4 + $0xa] sm:$0x3]  ;;  %v4848_v37 = vld [vmem:[#allocation4 + $0x18] sm:$0x3]  ;;  %v5131_v43 = vld [vmem:[#allocation4 + $0x1a] sm:$0x3] }
 0x6eb   :  { %v4852_v23 = vld [vmem:[#allocation4 + $0x19] sm:$0x3]  ;;  %v4269_v24 = vld [vmem:[#allocation4 + $0x4] sm:$0x3] }
 0x6ec   :  { %4586 = vrot.lane.b32.xlu0 %v15389_v19, %s12388_s27 }
 0x6ed   :  { %4294 = vrot.lane.b32.xlu1 %v15394_v55, %s12381_s10 }
 0x6f0   :  { %4602 = vrot.lane.b32.xlu0 %v15406_v11, %s12377_s20 }
 0x6f1   :  { %4306 = vrot.lane.b32.xlu1 %v15416_v18, %s12388_s27 }
 0x6f4   :  { %4308 = vrot.lane.b32.xlu0 %v15428_v0, %s12388_s27 }
 0x6f5   :  { %4322 = vrot.lane.b32.xlu1 %v15430_v58, %s12377_s20 }
 0x6f8   :  { %4324 = vrot.lane.b32.xlu0 %v15444_v54, %s12377_s20 }
 0x6f9   :  { %4580 = vrot.lane.b32.xlu1 %v4565_v39, %s12381_s10 }
 0x6fc   :  { %4590 = vrot.lane.b32.xlu0 %v15444_v54, %s12388_s27 }
 0x6fd   :  { %4588 = vrot.lane.b32.xlu1 %v15430_v58, %s12388_s27 }
 0x700   :  { %4606 = vrot.lane.b32.xlu0 %v4568_v8, %s12377_s20 }
 0x701   :  { %4604 = vrot.lane.b32.xlu1 %v15469_v6, %s12377_s20 }
 0x704   :  { %4854 = vrot.lane.b32.xlu0 %v15389_v19, %s12381_s10 }
 0x705   :  { %4310 = vrot.lane.b32.xlu1 %v15476_v7, %s12388_s27 }
 0x708   :  { %4858 = vrot.lane.b32.xlu0 %v15444_v54, %s12381_s10 }
 0x709   :  { %4326 = vrot.lane.b32.xlu1 %v15490_v22, %s12377_s20 }
 0x70c   :  { %4870 = vrot.lane.b32.xlu0 %v4846_v53, %s12388_s27 }
 0x70d   :  { %4592 = vrot.lane.b32.xlu1 %v15490_v22, %s12388_s27 }
 0x710   :  { %4886 = vrot.lane.b32.xlu0 %v4850_v32, %s12377_s20 }
 0x711   :  { %4608 = vrot.lane.b32.xlu1 %v4569_v60, %s12377_s20 }
 0x714   :  { %5133 = vrot.lane.b32.xlu0 %v15406_v11, %s12381_s10 }
 0x715   :  { %4856 = vrot.lane.b32.xlu1 %v15430_v58, %s12381_s10 }
 0x718   :  { %5137 = vrot.lane.b32.xlu0 %v4568_v8, %s12381_s10 }
 0x719   :  { %4872 = vrot.lane.b32.xlu1 %v4847_v44, %s12388_s27 }
 0x71c   :  { %5145 = vrot.lane.b32.xlu0 %v4850_v32, %s12388_s27  ;;  %v4271_v32 = vld [vmem:[#allocation4 + $0x14] sm:$0x3] }
 0x71d   :  { %4876 = vrot.lane.b32.xlu1 %v4849_v56, %s12388_s27 }
 0x720   :  { %5161 = vrot.lane.b32.xlu0 %v5129_v48, %s12377_s20 }
 0x721   :  { %4888 = vrot.lane.b32.xlu1 %v4851_v49, %s12377_s20 }
 0x724   :  { %4874 = vrot.lane.b32.xlu0 %v4848_v37, %s12388_s27 }
 0x725   :  { %4892 = vrot.lane.b32.xlu1 %v4853_v20, %s12377_s20 }
 0x728   :  { %4890 = vrot.lane.b32.xlu0 %v4852_v23, %s12377_s20 }
 0x729   :  { %5135 = vrot.lane.b32.xlu1 %v15469_v6, %s12381_s10  ;;  %v4270_v6 = vld [vmem:[#allocation4 + $0x10] sm:$0x3] }
 0x72a   :  { %v4334_v12 = vsel %vm1926_vm15, %v4270_v6, %v4293_v5 }
 0x72c   :  { %5149 = vrot.lane.b32.xlu0 %v4852_v23, %s12388_s27 }
 0x72d   :  { %5147 = vrot.lane.b32.xlu1 %v4851_v49, %s12388_s27 }
 0x730   :  { %5165 = vrot.lane.b32.xlu0 %v5131_v43, %s12377_s20  ;;  %v4614_v43 = vsel %vm1926_vm15, %v15339_v62, %v4575_v26  ;;  %v4616_v62 = vsel %vm1926_vm15, %v15343_v40, %v4579_v25 }
 0x731   :  { %5151 = vrot.lane.b32.xlu1 %v4853_v20, %s12388_s27 }
 0x735   :  { %5163 = vrot.lane.b32.xlu1 %v5130_v2, %s12377_s20 }
 0x739   :  { %4860 = vrot.lane.b32.xlu1 %v15490_v22, %s12381_s10 }
 0x73d   :  { %5139 = vrot.lane.b32.xlu1 %v4569_v60, %s12381_s10 }
 0x741   :  { %5167 = vrot.lane.b32.xlu1 %v5132_v1, %s12377_s20  ;;  %s18428_s20 = sld [smem:[#allocation40_spill]] }
 0x756   :  { %v4305_v9 = vpop.permute.xlu0 %4304 }
 0x757   :  { %v4291_v35 = vpop.permute.xlu1 %4290  ;;  %v4336_v17 = vsel %vm3020_vm12, %v4332_v50, %v4305_v9 }
 0x758   :  { %v4333_v51 = vsel %vm1926_vm15, %v4269_v24, %v4291_v35 }
 0x75a   :  { %v4321_v27 = vpop.permute.xlu0 %4320 }
 0x75b   :  { %v4577_v16 = vpop.permute.xlu1 %4576  ;;  %v4340_v57 = vsel %vm3056_vm5, %v4305_v9, %v4321_v27 }
 0x75c   :  { %v4352_v53 = vcombine.low %v4336_v17, %v4340_v57  ;;  %v4615_v2 = vsel %vm1926_vm15, %v15382_v59, %v4577_v16 }
 0x75e   :  { %v4587_v61 = vpop.permute.xlu0 %4586  ;;  %v4359_v48 = vrot.slane %v4352_v53, %v15168_v31 }
 0x75f   :  { %v4295_v34 = vpop.permute.xlu1 %4294  ;;  %v4618_v59 = vsel %vm3020_vm12, %v4614_v43, %v4587_v61  ;;  %v12015_v43 = vld [vmem:[%s18396_s4 + $0xd0] sm:$0xff]  }
 0x760   :  { %v4335_v44 = vsel %vm1926_vm15, %v4271_v32, %v4295_v34 }
 0x762   :  { %v4603_v30 = vpop.permute.xlu0 %4602 }
 0x763   :  { %v4307_v52 = vpop.permute.xlu1 %4306  ;;  %v4622_v45 = vsel %vm3056_vm5, %v4587_v61, %v4603_v30 }
 0x764   :  { %v4337_v8 = vsel %vm3020_vm12, %v4333_v51, %v4307_v52  ;;  %v4634_v26 = vcombine.low %v4618_v59, %v4622_v45  ;;  %v12017_v45 = vld [vmem:[%s18396_s4 + $0xd8] sm:$0xff]  }
 0x766   :  { %v4309_v38 = vpop.permute.xlu0 %4308  ;;  %v4641_v61 = vrot.slane %v4634_v26, %v15168_v31  ;;  %v12022_v26 = vld [vmem:[%s18396_s4 + $0x140] sm:$0xff]  }
 0x767   :  { %v4323_v21 = vpop.permute.xlu1 %4322  ;;  %v4338_v14 = vsel %vm3020_vm12, %v4334_v12, %v4309_v38 }
 0x768   :  { %v4341_v13 = vsel %vm3056_vm5, %v4307_v52, %v4323_v21 }
 0x769   :  { %v4360_v41 = vcombine.low %v4337_v8, %v4341_v13 }
 0x76a   :  { %v4325_v28 = vpop.permute.xlu0 %4324 }
 0x76b   :  { %v4581_v11 = vpop.permute.xlu1 %4580  ;;  %v4342_v42 = vsel %vm3056_vm5, %v4309_v38, %v4325_v28  ;;  %v4367_v60 = vrot.slane %v4360_v41, %v15168_v31 }
 0x76c   :  { %v4368_v29 = vcombine.low %v4338_v14, %v4342_v42  ;;  %v4617_v10 = vsel %vm1926_vm15, %v15394_v55, %v4581_v11  ;;  %v12013_v14 = vld [vmem:[%s18396_s4 + $0xc8] sm:$0xff]  }
 0x76d   :  { %v4384_v5 = vcombine.low %v4359_v48, %v4367_v60 }
 0x76e   :  { %v4591_v63 = vpop.permute.xlu0 %4590  ;;  %v4375_v9 = vrot.slane %v4368_v29, %v15168_v31 }
 0x76f   :  { %v4589_v4 = vpop.permute.xlu1 %4588  ;;  %v4620_v16 = vsel %vm3020_vm12, %v4616_v62, %v4591_v63  ;;  %v12021_v62 = vld [vmem:[%s18396_s4 + $0xe8] sm:$0xff]  }
 0x770   :  { %v4619_v35 = vsel %vm3020_vm12, %v4615_v2, %v4589_v4 }
 0x772   :  { %v4607_v47 = vpop.permute.xlu0 %4606 }
 0x773   :  { %v4605_v39 = vpop.permute.xlu1 %4604  ;;  %v4624_v34 = vsel %vm3056_vm5, %v4591_v63, %v4607_v47 }
 0x774   :  { %v4623_v20 = vsel %vm3056_vm5, %v4589_v4, %v4605_v39  ;;  %v4650_v28 = vcombine.low %v4620_v16, %v4624_v34  ;;  %v4392_v4 = vrot.slane %v4384_v5, %v15168_v31  ;;  %v12023_v16 = vld [vmem:[%s18396_s4 + $0xf0] sm:$0xff]  }
 0x775   :  { %v4642_v27 = vcombine.low %v4619_v35, %v4623_v20 }
 0x776   :  { %v15557_v15 = vpop.permute.xlu0 %4854  ;;  %v4657_v57 = vrot.slane %v4650_v28, %v15168_v31 }
 0x777   :  { %v4311_v33 = vpop.permute.xlu1 %4310  ;;  %v4649_v24 = vrot.slane %v4642_v27, %v15168_v31  ;;  %v12019_v27 = vld [vmem:[%s18396_s4 + $0xe0] sm:$0xff]  }
 0x778   :  { %v4339_v37 = vsel %vm3020_vm12, %v4335_v44, %v4311_v33 }
 0x779   :  { %v4666_v8 = vcombine.low %v4641_v61, %v4649_v24 }
 0x77a   :  { %v15564_v49 = vpop.permute.xlu0 %4858 }
 0x77b   :  { %v4327_v56 = vpop.permute.xlu1 %4326  ;;  %v4674_v42 = vrot.slane %v4666_v8, %v15168_v31 }
 0x77c   :  { %v4343_v23 = vsel %vm3056_vm5, %v4311_v33, %v4327_v56  ;;  %v12011_v33 = vld [vmem:[%s18396_s4 + $0xc0] sm:$0xff]  }
 0x77d   :  { %v4376_v1 = vcombine.low %v4339_v37, %v4343_v23  ;;  %v12014_v23 = vld [vmem:[%s18396_s4 + $0x120] sm:$0xff]  }
 0x77e   :  { %v15579_v38 = vpop.permute.xlu0 %4870 }
 0x77f   :  { %v4383_v52 = vrot.slane %v4376_v1, %v15168_v31  ;;  %v4593_v21 = vpop.permute.xlu1 %4592  ;;  %v12016_v1 = vld [vmem:[%s18396_s4 + $0x128] sm:$0xff]  }
 0x780   :  { %v4621_v40 = vsel %vm3020_vm12, %v4617_v10, %v4593_v21  ;;  %v12025_v10 = vld [vmem:[%s18396_s4 + $0xf8] sm:$0xff]  }
 0x781   :  { %v4385_v30 = vcombine.low %v4375_v9, %v4383_v52  ;;  %v12018_v9 = vld [vmem:[%s18396_s4 + $0x130] sm:$0xff]  }
 0x782   :  { %v15590_v47 = vpop.permute.xlu0 %4886 }
 0x783   :  { %v4399_v13 = vrot.slane %v4385_v30, %v15168_v31  ;;  %v4609_v39 = vpop.permute.xlu1 %4608 }
 0x784   :  { %v4625_v25 = vsel %vm3056_vm5, %v4593_v21, %v4609_v39  ;;  %v12020_v21 = vld [vmem:[%s18396_s4 + $0x138] sm:$0xff]   ;;  %v4906_v39 = vsel %vm3056_vm5, %v15579_v38, %v15590_v47 }
 0x785   :  { %v4400_v63 = vcombine.low %v4392_v4, %v4399_v13  ;;  %v4658_v50 = vcombine.low %v4621_v40, %v4625_v25  ;;  %v4401_v51 = vcombine.high %v4392_v4, %v4399_v13  ;;  %v12024_v4 = vld [vmem:[%s18396_s4 + $0x148] sm:$0xff]   ;;  %v4898_v25 = vsel %vm1926_vm15, %v15380_v46, %v15557_v15 }
 0x786   :  { %v15599_v41 = vpop.permute.xlu0 %5133  ;;  %v4902_v47 = vsel %vm3020_vm12, %v4898_v25, %v15579_v38  ;;  %v12028_v38 = vld [vmem:[%s18396_s4 + $0x158] sm:$0xff]  }
 0x787   :  { %v4404_v55 = vpack.c.bf16 %v4400_v63, %v4400_v63  ;;  %v4665_v11 = vrot.slane %v4658_v50, %v15168_v31  ;;  %v15597_v6 = vpop.permute.xlu1 %4856  ;;  %v4405_v17 = vpack.c.bf16 %v4401_v51, %v4401_v51  ;;  %v12026_v51 = vld [vmem:[%s18396_s4 + $0x150] sm:$0xff]   ;;  %v4918_v46 = vcombine.low %v4902_v47, %v4906_v39 }
 0x788   :  { %v4899_v13 = vsel %vm1926_vm15, %v15416_v18, %v15597_v6  ;;  %v12027_v18 = vld [vmem:[%s18396_s4 + $0x100] sm:$0xff]   ;;  %v12029_v6 = vld [vmem:[%s18396_s4 + $0x108] sm:$0xff]  }
 0x789   :  { %v4667_v53 = vcombine.low %v4657_v57, %v4665_v11  ;;  %10207 = vmatprep.mubr.msk.bf16.mxu1 %vm3232_vm0, %v4405_v17  ;;  %v4900_v57 = vsel %vm1926_vm15, %v15428_v0, %v15564_v49  ;;  %v4925_v49 = vrot.slane %v4918_v46, %v15168_v31  ;;  %v6134_v46 = vld [vmem:[#allocation3 + $0x28] sm:$0xf] }
 0x78a   :  { %4538 = vmatmul.mubr.bf16.vlgmr.msra.gmra.mrb[8].mxu1 %v4404_v55  ;;  %v15607_v60 = vpop.permute.xlu0 %5137  ;;  %6185 = vrot.lane.b32.xlu1 %v6134_v46, %s12381_s10 }
 0x78b   :  { %v4681_v12 = vrot.slane %v4667_v53, %v15168_v31  ;;  %v4873_v32 = vpop.permute.xlu1 %4872  ;;  %5073 = vmatpush1.bf16.msra.mxu1 %v12011_v33 }
 0x78c   :  { %5074 = vmatprep.subr.bf16.mxu1 %v18395_v36  ;;  %v4903_v40 = vsel %vm3020_vm12, %v4899_v13, %v4873_v32 }
 0x78d   :  { %v4683_v44 = vcombine.high %v4674_v42, %v4681_v12  ;;  %v4682_v29 = vcombine.low %v4674_v42, %v4681_v12 }
 0x78e   :  { %v15615_v48 = vpop.permute.xlu0 %5145 }
 0x78f   :  { %v15613_v56 = vpop.permute.xlu1 %4876  ;;  %5075 = vmatpush1.bf16.msra.mxu1 %v12013_v14  ;;  %v4687_v20 = vpack.c.bf16 %v4683_v44, %v4683_v44  ;;  %v4686_v37 = vpack.c.bf16 %v4682_v29, %v4682_v29 }
 0x790   :  { %5076 = vmatprep.subr.bf16.mxu1 %v18395_v36 }
 0x791   :  { %10244 = vmatprep.mubr.msk.bf16.mxu0 %vm3232_vm0, %v4687_v20 }
 0x792   :  { %4821 = vmatmul.mubr.bf16.vlgmr.msra.gmra.mrb[24].mxu0 %v4686_v37  ;;  %v15633_v5 = vpop.permute.xlu0 %5161 }
 0x793   :  { %v4889_v2 = vpop.permute.xlu1 %4888  ;;  %5348 = vmatpush1.bf16.msra.mxu0 %v12014_v23  ;;  %5077 = vmatpush1.bf16.msra.mxu1 %v12015_v43  ;;  %v5181_v14 = vsel %vm3056_vm5, %v15615_v48, %v15633_v5 }
 0x794   :  { %5349 = vmatprep.subr.bf16.mxu0 %v18395_v36  ;;  %5078 = vmatprep.subr.bf16.mxu1 %v18395_v36  ;;  %v4907_v24 = vsel %vm3056_vm5, %v4873_v32, %v4889_v2 }
 0x795   :  { %v4926_v61 = vcombine.low %v4903_v40, %v4907_v24 }
 0x796   :  { %v4875_v34 = vpop.permute.xlu0 %4874 }
 0x797   :  { %v4893_v35 = vpop.permute.xlu1 %4892  ;;  %5350 = vmatpush1.bf16.msra.mxu0 %v12016_v1  ;;  %5079 = vmatpush1.bf16.msra.mxu1 %v12017_v45  ;;  %v4933_v8 = vrot.slane %v4926_v61, %v15168_v31  ;;  %v4904_v55 = vsel %vm3020_vm12, %v4900_v57, %v4875_v34  ;;  %v6138_v57 = vld [vmem:[#allocation3 + $0x58] sm:$0xf] }
 0x798   :  { %5351 = vmatprep.subr.bf16.mxu0 %v18395_v36  ;;  %5080 = vmatprep.subr.bf16.mxu1 %v18395_v36  ;;  %v4909_v53 = vsel %vm3056_vm5, %v15613_v56, %v4893_v35 }
 0x799   :  { %v4950_v37 = vcombine.low %v4925_v49, %v4933_v8  ;;  %v5556_v8 = vld [vmem:[#allocation3 + $0x31] sm:$0xf]  ;;  %6193 = vrot.lane.b32.xlu1 %v6138_v57, %s12381_s10 }
 0x79a   :  { %v4891_v30 = vpop.permute.xlu0 %4890 }
 0x79b   :  { %v5136_v52 = vpop.permute.xlu1 %5135  ;;  %5352 = vmatpush1.bf16.msra.mxu0 %v12018_v9  ;;  %5081 = vmatpush1.bf16.msra.mxu1 %v12019_v27  ;;  %v4908_v15 = vsel %vm3056_vm5, %v4875_v34, %v4891_v30  ;;  %v4958_v9 = vrot.slane %v4950_v37, %v15168_v31 }
 0x79c   :  { %5353 = vmatprep.subr.bf16.mxu0 %v18395_v36  ;;  %5082 = vmatprep.subr.bf16.mxu1 %v18395_v36  ;;  %v4934_v17 = vcombine.low %v4904_v55, %v4908_v15  ;;  %v5174_v42 = vsel %vm1926_vm15, %v15430_v58, %v5136_v52  ;;  %v15770_v15 = vld [vmem:[#allocation3 + $0x1] sm:$0xf] }
 0x79d   :  { %5584 = vrot.lane.b32.xlu0 %v15770_v15, %s18334_s28  ;;  %v5849_v55 = vld [vmem:[#allocation3 + $0x2] sm:$0xf] }
 0x79e   :  { %v5150_v63 = vpop.permute.xlu0 %5149 }
 0x79f   :  { %v5148_v59 = vpop.permute.xlu1 %5147  ;;  %5354 = vmatpush1.bf16.msra.mxu0 %v12020_v21  ;;  %5083 = vmatpush1.bf16.msra.mxu1 %v12021_v62  ;;  %v12032_v21 = vld [vmem:[%s18396_s4 + $0x168] sm:$0xff]  }
 0x7a0   :  { %5355 = vmatprep.subr.bf16.mxu0 %v18395_v36  ;;  %5084 = vmatprep.subr.bf16.mxu1 %v18395_v36  ;;  %v5178_v44 = vsel %vm3020_vm12, %v5174_v42, %v5148_v59 }
 0x7a1   :  { %5592 = vrot.lane.b32.xlu0 %v5556_v8, %s18334_s28 }
 0x7a2   :  { %v5166_v12 = vpop.permute.xlu0 %5165 }
 0x7a3   :  { %v15659_v28 = vpop.permute.xlu1 %5151  ;;  %5356 = vmatpush1.bf16.msra.mxu0 %v12022_v26  ;;  %5085 = vmatpush1.bf16.msra.mxu1 %v12023_v16  ;;  %v5183_v43 = vsel %vm3056_vm5, %v5150_v63, %v5166_v12 }
 0x7a4   :  { %5357 = vmatprep.subr.bf16.mxu0 %v18395_v36  ;;  %5086 = vmatprep.subr.bf16.mxu1 %v18395_v36 }
 0x7a5   :  { %5873 = vrot.lane.b32.xlu0 %v5849_v55, %s18334_s28 }
 0x7a7   :  { %v5164_v50 = vpop.permute.xlu1 %5163  ;;  %5358 = vmatpush1.bf16.msra.mxu0 %v12024_v4  ;;  %5087 = vmatpush1.bf16.msra.mxu1 %v12025_v10 }
 0x7a8   :  { %5359 = vmatprep.subr.bf16.mxu0 %v18395_v36  ;;  %5088 = vmatprep.subr.bf16.mxu1 %v18395_v36  ;;  %v5182_v33 = vsel %vm3056_vm5, %v5148_v59, %v5164_v50 }
 0x7a9   :  { %v5201_v58 = vcombine.low %v5178_v44, %v5182_v33 }
 0x7ab   :  { %v4861_v11 = vpop.permute.xlu1 %4860  ;;  %5360 = vmatpush1.bf16.msra.mxu0 %v12026_v51  ;;  %5089 = vmatpush1.bf16.msra.mxu1 %v12027_v18  ;;  %v5208_v34 = vrot.slane %v5201_v58, %v15168_v31 }
 0x7ac   :  { %v4901_v0 = vsel %vm1926_vm15, %v15476_v7, %v4861_v11  ;;  %5361 = vmatprep.subr.bf16.mxu0 %v18395_v36  ;;  %5090 = vmatprep.subr.bf16.mxu1 %v18395_v36  ;;  %v5173_v7 = vsel %vm1926_vm15, %v15389_v19, %v15599_v41  ;;  %v12031_v19 = vld [vmem:[%s18396_s4 + $0x110] sm:$0xff]   ;;  %v4941_v41 = vrot.slane %v4934_v17, %v15168_v31  ;;  %v15779_v11 = vld [vmem:[#allocation3 + $0x59] sm:$0xf] }
 0x7ad   :  { %v4905_v32 = vsel %vm3020_vm12, %v4901_v0, %v15613_v56  ;;  %v5177_v20 = vsel %vm3020_vm12, %v5173_v7, %v15615_v48  ;;  %v12030_v56 = vld [vmem:[%s18396_s4 + $0x160] sm:$0xff]   ;;  %v5175_v48 = vsel %vm1926_vm15, %v15444_v54, %v15607_v60  ;;  %v12033_v54 = vld [vmem:[%s18396_s4 + $0x118] sm:$0xff]  }
 0x7ae   :  { %v4942_v29 = vcombine.low %v4905_v32, %v4909_v53  ;;  %v5193_v1 = vcombine.low %v5177_v20, %v5181_v14  ;;  %v5179_v5 = vsel %vm3020_vm12, %v5175_v48, %v5150_v63  ;;  %v12035_v63 = vld [vmem:[%s18396_s4 + $0x178] sm:$0xff]  }
 0x7af   :  { %v5140_v23 = vpop.permute.xlu1 %5139  ;;  %5362 = vmatpush1.bf16.msra.mxu0 %v12028_v38  ;;  %5091 = vmatpush1.bf16.msra.mxu1 %v12029_v6  ;;  %v5209_v27 = vcombine.low %v5179_v5, %v5183_v43  ;;  %v5853_v38 = vld [vmem:[#allocation3 + $0x32] sm:$0xf] }
 0x7b0   :  { %v4949_v2 = vrot.slane %v4942_v29, %v15168_v31  ;;  %5363 = vmatprep.subr.bf16.mxu0 %v18395_v36  ;;  %5092 = vmatprep.subr.bf16.mxu1 %v18395_v36  ;;  %v5176_v45 = vsel %vm1926_vm15, %v15490_v22, %v5140_v23  ;;  %v5200_v59 = vrot.slane %v5193_v1, %v15168_v31 }
 0x7b1   :  { %v5180_v22 = vsel %vm3020_vm12, %v5176_v45, %v15659_v28  ;;  %v5216_v4 = vrot.slane %v5209_v27, %v15168_v31  ;;  %5881 = vrot.lane.b32.xlu0 %v5853_v38, %s18334_s28 }
 0x7b2   :  { %v4951_v35 = vcombine.low %v4941_v41, %v4949_v2  ;;  %v5225_v10 = vcombine.low %v5200_v59, %v5208_v34 }
 0x7b3   :  { %v5168_v52 = vpop.permute.xlu1 %5167  ;;  %5364 = vmatpush1.bf16.msra.mxu0 %v12030_v56  ;;  %5093 = vmatpush1.bf16.msra.mxu1 %v12031_v19 }
 0x7b4   :  { %v5184_v60 = vsel %vm3056_vm5, %v15659_v28, %v5168_v52  ;;  %5365 = vmatprep.subr.bf16.mxu0 %v18395_v36  ;;  %5094 = vmatprep.subr.bf16.mxu1 %v18395_v36  ;;  %v4965_v62 = vrot.slane %v4951_v35, %v15168_v31  ;;  %v12034_v28 = vld [vmem:[%s18396_s4 + $0x170] sm:$0xff]   ;;  %v5233_v25 = vrot.slane %v5225_v10, %v15168_v31 }
 0x7b5   :  { %v5217_v26 = vcombine.low %v5180_v22, %v5184_v60 }
 0x7b6   :  { %v4967_v16 = vcombine.high %v4958_v9, %v4965_v62  ;;  %v4966_v30 = vcombine.low %v4958_v9, %v4965_v62 }
 0x7b7   :  { %v5224_v24 = vrot.slane %v5217_v26, %v15168_v31  ;;  %5366 = vmatpush1.bf16.msra.mxu0 %v12032_v21  ;;  %5095 = vmatpush1.bf16.msra.mxu1 %v12033_v54 }
 0x7b8   :  { %v4971_v13 = vpack.c.bf16 %v4967_v16, %v4967_v16  ;;  %5367 = vmatprep.subr.bf16.mxu0 %v18395_v36  ;;  %v4970_v39 = vpack.c.bf16 %v4966_v30, %v4966_v30 }
 0x7b9   :  { %v5226_v40 = vcombine.low %v5216_v4, %v5224_v24 }
 0x7ba   :  { %10281 = vmatprep.mubr.msk.bf16.mxu1 %vm3232_vm0, %v4971_v13 }
 0x7bb   :  { %v5240_v61 = vrot.slane %v5226_v40, %v15168_v31  ;;  %5105 = vmatmul.mubr.bf16.vlgmr.msra.gmra.mrb[12].mxu1 %v4970_v39  ;;  %5368 = vmatpush1.bf16.msra.mxu0 %v12034_v28 }
 0x7bc   :  { %5369 = vmatprep.subr.bf16.mxu0 %v18395_v36  ;;  %v6142_v36 = vld [vmem:[#allocation3 + $0x29] sm:$0xf] }
 0x7bd   :  { %v5242_v50 = vcombine.high %v5233_v25, %v5240_v61  ;;  %v5241_v51 = vcombine.low %v5233_v25, %v5240_v61  ;;  %6217 = vrot.lane.b32.xlu1 %v6142_v36, %s12385_s21 }
 0x7bf   :  { %5370 = vmatpush1.bf16.msra.mxu0 %v12035_v63  ;;  %v5246_v18 = vpack.c.bf16 %v5242_v50, %v5242_v50  ;;  %v5245_v47 = vpack.c.bf16 %v5241_v51, %v5241_v51 }
 0x7c1   :  { %10318 = vmatprep.mubr.msk.bf16.mxu0 %vm3232_vm0, %v5246_v18  ;;  %6225 = vrot.lane.b32.xlu1 %v15779_v11, %s12385_s21  ;;  %vm18452_vm0 = vcmask 23552  }
 0x7c2   :  { %5380 = vmatmul.mubr.bf16.vlgmr.msra.gmra.mrb[28].mxu0 %v5245_v47  ;;  %vm18457_vm5 = vmmov %vm18452_vm0 }
 0x7c3   :  { %vm18460_vm1 = vmmov %vm18452_vm0 }
 0x7c4   :  { %vm18461_vm2 = vmmov %vm18452_vm0 }
 0x7c5   :  { %6451 = vrot.lane.b32.xlu1 %v6142_v36, %s12381_s10  ;;  %vm18462_vm4 = vmmov %vm18452_vm0 }
 0x7c6   :  { %vm18463_vm6 = vmmov %vm18452_vm0 }
 0x7c7   :  { %vm18464_vm9 = vmmov %vm18452_vm0 }
 0x7c8   :  { %vm18465_vm10 = vmmov %vm18452_vm0 }
 0x7c9   :  { %vm18466_vm14 = vmmov %vm18452_vm0 }
 0x7ca   :  { %vm18467_vm13 = vmmov %vm18452_vm0 }
 0x85d   :  { %v15784_v6 = vpop.f32.mrb[8].mxu1 }
 0x85e   :  { %v4545_v17 = vsel %vm1758_vm7, %v15784_v6, 0.0  ;;  %v4553_v33 = vmul.f32 %v15784_v6, %v15784_v6  ;;  %v4541_v0 = vpop.f32.mrb[9].mxu1 }
 0x85f   :  { %v4546_v49 = vrot.slane %v4545_v17, 4  ;;  %v4542_v53 = vpop.f32.mrb[10].mxu1 }
 0x860   :  { %v4554_v42 = vsel %vm1758_vm7, %v4553_v33, 0.0  ;;  %v4543_v12 = vpop.f32.mrb[11].mxu1 }
 0x861   :  { %v4547_v32 = vadd.f32 %v4546_v49, %v4545_v17  ;;  %v4555_v7 = vrot.slane %v4554_v42, 4 }
 0x863   :  { %v4556_v14 = vadd.f32 %v4555_v7, %v4554_v42  ;;  %v4548_v44 = vrot.slane %v4547_v32, 2 }
 0x865   :  { %v15792_v29 = vpop.f32.mrb[24].mxu0  ;;  %v4557_v23 = vrot.slane %v4556_v14, 2  ;;  %v4549_v2 = vadd.f32 %v4548_v44, %v4547_v32 }
 0x866   :  { %v4828_v20 = vsel %vm1758_vm7, %v15792_v29, 0.0  ;;  %v4836_v37 = vmul.f32 %v15792_v29, %v15792_v29  ;;  %v4824_v58 = vpop.f32.mrb[25].mxu0 }
 0x867   :  { %v4829_v56 = vrot.slane %v4828_v20, 4  ;;  %v4825_v19 = vpop.f32.mrb[26].mxu0  ;;  %v4558_v45 = vadd.f32 %v4557_v23, %v4556_v14  ;;  %v4550_v9 = vrot.slane %v4549_v2, 1 }
 0x868   :  { %v4837_v41 = vsel %vm1758_vm7, %v4836_v37, 0.0  ;;  %v4826_v43 = vpop.f32.mrb[27].mxu0 }
 0x869   :  { %v4830_v48 = vadd.f32 %v4829_v56, %v4828_v20  ;;  %v4838_v1 = vrot.slane %v4837_v41, 4  ;;  %v4559_v52 = vrot.slane %v4558_v45, 1  ;;  %v4551_v22 = vadd.f32 %v4550_v9, %v4549_v2 }
 0x86b   :  { %v4831_v5 = vrot.slane %v4830_v48, 2  ;;  %v4839_v35 = vadd.f32 %v4838_v1, %v4837_v41  ;;  %v4560_v59 = vadd.f32 %v4559_v52, %v4558_v45  ;;  %v5409_v52 = vld [vmem:[%s18397_s16] sm:$0x1] }
 0x86d   :  { %v4832_v27 = vadd.f32 %v4831_v5, %v4830_v48  ;;  %v4840_v34 = vrot.slane %v4839_v35, 2 }
 0x86f   :  { %v4833_v21 = vrot.slane %v4832_v27, 1  ;;  %v4841_v54 = vadd.f32 %v4840_v34, %v4839_v35 }
 0x871   :  { %v4834_v60 = vadd.f32 %v4833_v21, %v4832_v27  ;;  %v4842_v62 = vrot.slane %v4841_v54, 1 }
 0x873   :  { %v4835_v26 = vadd.f32 %v4834_v60, %v4551_v22  ;;  %v4843_v16 = vadd.f32 %v4842_v62, %v4841_v54  ;;  %v5413_v22 = vld [vmem:[%s18398_s8] sm:$0x1] }
 0x875   :  { %v4844_v30 = vadd.f32 %v4843_v16, %v4560_v59 }
 0x88e   :  { %v5106_v4 = vpop.f32.mrb[12].mxu1 }
 0x88f   :  { %v5112_v10 = vsel %vm1758_vm7, %v5106_v4, 0.0  ;;  %v5120_v24 = vmul.f32 %v5106_v4, %v5106_v4  ;;  %v5108_v28 = vpop.f32.mrb[13].mxu1 }
 0x890   :  { %v5113_v13 = vrot.slane %v5112_v10, 4  ;;  %v5109_v39 = vpop.f32.mrb[14].mxu1 }
 0x891   :  { %v5121_v40 = vsel %vm1758_vm7, %v5120_v24, 0.0  ;;  %v5110_v25 = vpop.f32.mrb[15].mxu1 }
 0x892   :  { %v5114_v61 = vadd.f32 %v5113_v13, %v5112_v10  ;;  %v5122_v63 = vrot.slane %v5121_v40, 4 }
 0x894   :  { %v5115_v50 = vrot.slane %v5114_v61, 2  ;;  %v5123_v51 = vadd.f32 %v5122_v63, %v5121_v40 }
 0x895   :  { %v5381_v18 = vpop.f32.mrb[28].mxu0 }
 0x896   :  { %v5116_v47 = vadd.f32 %v5115_v50, %v5114_v61  ;;  %v5124_v46 = vrot.slane %v5123_v51, 2  ;;  %v5387_v57 = vsel %vm1758_vm7, %v5381_v18, 0.0  ;;  %v5395_v8 = vmul.f32 %v5381_v18, %v5381_v18  ;;  %v5383_v36 = vpop.f32.mrb[29].mxu0 }
 0x897   :  { %v5388_v55 = vrot.slane %v5387_v57, 4  ;;  %v5384_v38 = vpop.f32.mrb[30].mxu0 }
 0x898   :  { %v5117_v17 = vrot.slane %v5116_v47, 1  ;;  %v5125_v33 = vadd.f32 %v5124_v46, %v5123_v51  ;;  %v5396_v0 = vsel %vm1758_vm7, %v5395_v8, 0.0  ;;  %v5385_v49 = vpop.f32.mrb[31].mxu0 }
 0x899   :  { %v5389_v53 = vadd.f32 %v5388_v55, %v5387_v57  ;;  %v5397_v42 = vrot.slane %v5396_v0, 4 }
 0x89a   :  { %v5118_v12 = vadd.f32 %v5117_v17, %v5116_v47  ;;  %v5126_v32 = vrot.slane %v5125_v33, 1 }
 0x89b   :  { %v5390_v7 = vrot.slane %v5389_v53, 2  ;;  %v5398_v14 = vadd.f32 %v5397_v42, %v5396_v0 }
 0x89c   :  { %v5119_v44 = vadd.f32 %v5118_v12, %v4835_v26  ;;  %v5127_v20 = vadd.f32 %v5126_v32, %v5125_v33 }
 0x89d   :  { %v5391_v37 = vadd.f32 %v5390_v7, %v5389_v53  ;;  %v5399_v58 = vrot.slane %v5398_v14, 2 }
 0x89e   :  { %v5128_v23 = vadd.f32 %v5127_v20, %v4844_v30 }
 0x89f   :  { %v5392_v56 = vrot.slane %v5391_v37, 1  ;;  %v5400_v19 = vadd.f32 %v5399_v58, %v5398_v14 }
 0x8a1   :  { %v5393_v41 = vadd.f32 %v5392_v56, %v5391_v37  ;;  %v5401_v43 = vrot.slane %v5400_v19, 1 }
 0x8a3   :  { %v5394_v2 = vadd.f32 %v5393_v41, %v5119_v44  ;;  %v5402_v48 = vadd.f32 %v5401_v43, %v5400_v19 }
 0x8a5   :  { %v5403_v1 = vadd.f32 %v5402_v48, %v5128_v23  ;;  %v5404_v45 = vmul.f32 0.03125, %v5394_v2 }
 0x8a7   :  { %v5405_v5 = vmul.f32 0.03125, %v5403_v1  ;;  %v5406_v35 = vmul.f32 %v5404_v45, %v5404_v45 }
 0x8a9   :  { %v5407_v9 = vsub.f32 %v5405_v5, %v5406_v35 }
 0x8ab   :  { %v5408_v27 = vmax.f32 %v5407_v9, 0.0 }
 0x8ad   :  { %v5410_v34 = vadd.f32 1e-05, %v5408_v27 }
 0x8af   :  { %12078 = vrsqrt.f32 %v5410_v34 }
 0x8b9   :  { %v12079_v21 = vpop.eup %12078 }
 0x8ba   :  { %v5412_v54 = vmul.f32 %v12079_v21, %v5409_v52 }
 0x8bc   :  { %v5414_v60 = vmul.f32 %v5412_v54, %v5404_v45  ;;  %v5420_v62 = vrot.slane %v5412_v54, %v18393_v3 }
 0x8be   :  { %v5415_v59 = vsub.f32 %v5413_v22, %v5414_v60  ;;  %v5422_v26 = vmul.f32 %v5420_v62, %v15784_v6  ;;  %v5457_v16 = vmul.f32 %v5420_v62, %v15792_v29  ;;  %v5486_v30 = vmul.f32 %v5420_v62, %v5106_v4 }
 0x8bf   :  { %v5515_v10 = vmul.f32 %v5420_v62, %v5381_v18 }
 0x8c0   :  { %v5427_v24 = vrot.slane %v5415_v59, %v18393_v3 }
 0x8c2   :  { %v5429_v28 = vadd.f32 %v5427_v24, %v5422_v26  ;;  %v5458_v13 = vadd.f32 %v5457_v16, %v5427_v24  ;;  %v5487_v39 = vadd.f32 %v5486_v30, %v5427_v24  ;;  %v5516_v40 = vadd.f32 %v5515_v10, %v5427_v24  ;;  %v15925_v30 = vpop.permute.xlu1 %6185 }
 0x8c4   :  { %v5430_v25 = vmax.f32 %v5429_v28, 0.0  ;;  %v5459_v61 = vmax.f32 %v5458_v13, 0.0  ;;  %v5488_v63 = vmax.f32 %v5487_v39, 0.0  ;;  %v5517_v50 = vmax.f32 %v5516_v40, 0.0  ;;  %v15934_v13 = vpop.permute.xlu0 %5584  ;;  %v12036_v40 = vld [vmem:[%s18404_s2] sm:$0xff]  }
 0x8c5   :  { %10672 = vmatprep.subr.bf16.mxu1 %v12036_v40 }
 0x8c6   :  { %v5432_v51 = vcombine.high %v5430_v25, %v5430_v25  ;;  %v5439_v47 = vrot.slane %v5430_v25, %v15168_v31  ;;  %v5461_v46 = vcombine.high %v5459_v61, %v5459_v61  ;;  %v5468_v6 = vrot.slane %v5459_v61, %v15168_v31  ;;  %v15932_v24 = vpop.permute.xlu1 %6193  ;;  %10673 = vmatpush3.bf16.msra.mxu1 %v12036_v40 }
 0x8c7   :  { %v5490_v57 = vcombine.high %v5488_v63, %v5488_v63  ;;  %v5497_v29 = vrot.slane %v5488_v63, %v15168_v31  ;;  %v5519_v4 = vcombine.high %v5517_v50, %v5517_v50  ;;  %v5526_v18 = vrot.slane %v5517_v50, %v15168_v31  ;;  %18403 = vst [vmem:[#allocation11_spill] sm:$0xff] %v15932_v24  ;;  %v12037_v63 = vld [vmem:[%s18404_s2 + $0x8] sm:$0xff]  }
 0x8c8   :  { %v5446_v8 = vrot.slane %v5432_v51, %v15168_v31  ;;  %v5447_v36 = vcombine.high %v5439_v47, %v5439_v47  ;;  %5453 = vst [vmem:[#allocation3 + $0x9] ss:$2 sm:$0x3] %v5439_v47  ;;  %v5475_v55 = vrot.slane %v5461_v46, %v15168_v31  ;;  %v5476_v38 = vcombine.high %v5468_v6, %v5468_v6  ;;  %v15948_v50 = vpop.permute.xlu0 %5592  ;;  %v12038_v47 = vld [vmem:[%s18404_s2 + $0x10] sm:$0xff]  }
 0x8c9   :  { %5482 = vst [vmem:[#allocation3 + $0xa] ss:$2 sm:$0x3] %v5468_v6  ;;  %v5504_v17 = vrot.slane %v5490_v57, %v15168_v31  ;;  %v5505_v33 = vcombine.high %v5497_v29, %v5497_v29  ;;  %v5533_v0 = vrot.slane %v5519_v4, %v15168_v31  ;;  %v5534_v49 = vcombine.high %v5526_v18, %v5526_v18  ;;  %v12039_v57 = vld [vmem:[%s18404_s2 + $0x18] sm:$0xff]  }
 0x8ca   :  { %5540 = vst [vmem:[#allocation3 + $0x12] ss:$2 sm:$0x3] %v5526_v18  ;;  %5511 = vst [vmem:[#allocation3 + $0x11] ss:$2 sm:$0x3] %v5497_v29  ;;  %v5448_v53 = vcombine.high %v5446_v8, %v5446_v8  ;;  %v5477_v42 = vcombine.high %v5475_v55, %v5475_v55  ;;  %v15942_v61 = vpop.permute.xlu1 %6217  ;;  %10674 = vmatprep.subr.bf16.mxu1 %v12037_v63 }
 0x8cb   :  { %5455 = vst [vmem:[#allocation3 + $0x39] ss:$2 sm:$0x3] %v5446_v8  ;;  %5484 = vst [vmem:[#allocation3 + $0x3a] ss:$2 sm:$0x3] %v5475_v55  ;;  %v5506_v12 = vcombine.high %v5504_v17, %v5504_v17  ;;  %v5535_v32 = vcombine.high %v5533_v0, %v5533_v0  ;;  %10675 = vmatpush3.bf16.msra.mxu1 %v12037_v63 }
 0x8cc   :  { %5454 = vst [vmem:[#allocation3 + $0x19] ss:$2 sm:$0x3] %v5447_v36  ;;  %5483 = vst [vmem:[#allocation3 + $0x1a] ss:$2 sm:$0x3] %v5476_v38  ;;  %10676 = vmatprep.subr.bf16.mxu1 %v12038_v47  ;;  %v15957_v6 = vpop.permute.xlu0 %5873 }
 0x8cd   :  { %5512 = vst [vmem:[#allocation3 + $0x21] ss:$2 sm:$0x3] %v5505_v33  ;;  %5541 = vst [vmem:[#allocation3 + $0x22] ss:$2 sm:$0x3] %v5534_v49 }
 0x8ce   :  { %5542 = vst [vmem:[#allocation3 + $0x42] ss:$2 sm:$0x3] %v5533_v0  ;;  %5513 = vst [vmem:[#allocation3 + $0x41] ss:$2 sm:$0x3] %v5504_v17  ;;  %v15955_v46 = vpop.permute.xlu1 %6225 }
 0x8cf   :  { %5456 = vst [vmem:[#allocation3 + $0x49] ss:$2 sm:$0x3] %v5448_v53  ;;  %5485 = vst [vmem:[#allocation3 + $0x4a] ss:$2 sm:$0x3] %v5477_v42  ;;  %10677 = vmatpush3.bf16.msra.mxu1 %v12038_v47 }
 0x8d0   :  { %5543 = vst [vmem:[#allocation3 + $0x52] ss:$2 sm:$0x3] %v5535_v32  ;;  %5514 = vst [vmem:[#allocation3 + $0x51] ss:$2 sm:$0x3] %v5506_v12  ;;  %10678 = vmatprep.subr.bf16.mxu1 %v12039_v57  ;;  %v15974_v36 = vpop.permute.xlu0 %5881 }
 0x8d1   :  { %v15821_v31 = vld [vmem:[#allocation3 + $0x9] sm:$0xf]  ;;  %v15823_v7 = vld [vmem:[#allocation3 + $0x11] sm:$0xf]  ;;  %18405 = vst [vmem:[#allocation15_spill] sm:$0xff] %v15955_v46  ;;  %v12040_v8 = vld [vmem:[%s18404_s2 + $0x20] sm:$0xff]  }
 0x8d2   :  { %5586 = vrot.lane.b32.xlu1 %v15821_v31, %s18334_s28  ;;  %5588 = vrot.lane.b32.xlu0 %v15823_v7, %s18334_s28  ;;  %v15829_v14 = vld [vmem:[#allocation3 + $0x10] sm:$0xf]  ;;  %v15831_v44 = vld [vmem:[#allocation3 + $0x8] sm:$0xf]  ;;  %v15864_v48 = vld [vmem:[#allocation3 + $0x39] sm:$0xf]  ;;  %v15968_v18 = vpop.permute.xlu1 %6451 }
 0x8d3   :  { %v15837_v20 = vld [vmem:[#allocation3 + $0x11] sm:$0xf]  ;;  %v15839_v37 = vld [vmem:[#allocation3 + $0x9] sm:$0xf]  ;;  %v15859_v43 = vld [vmem:[#allocation3 + $0x19] sm:$0xf]  ;;  %10679 = vmatpush3.bf16.msra.mxu1 %v12039_v57 }
 0x8d4   :  { %v5850_v58 = vld [vmem:[#allocation3 + $0xa] sm:$0xf]  ;;  %v5851_v23 = vld [vmem:[#allocation3 + $0x12] sm:$0xf]  ;;  %v15869_v1 = vld [vmem:[#allocation3 + $0x20] sm:$0xf]  ;;  %10680 = vmatprep.subr.bf16.mxu1 %v12040_v8 }
 0x8d5   :  { %v5858_v56 = vld [vmem:[#allocation3 + $0x12] sm:$0xf]  ;;  %v5857_v19 = vld [vmem:[#allocation3 + $0xa] sm:$0xf]  ;;  %v15874_v45 = vld [vmem:[#allocation3 + $0x40] sm:$0xf] }
 0x8d6   :  { %5618 = vrot.lane.b32.xlu1 %v15829_v14, %s12381_s10  ;;  %5616 = vrot.lane.b32.xlu0 %v15831_v44, %s12381_s10  ;;  %v6131_v41 = vld [vmem:[#allocation3 + $0x10] sm:$0xf]  ;;  %18399 = vst [vmem:[#allocation7_spill] sm:$0xff] %v15874_v45  ;;  %v15876_v5 = vld [vmem:[#allocation3 + $0x41] sm:$0xf]  ;;  %v12041_v33 = vld [vmem:[%s18404_s2 + $0x28] sm:$0xff]  }
 0x8d7   :  { %v6139_v2 = vld [vmem:[#allocation3 + $0x11] sm:$0xf]  ;;  %v15882_v35 = vld [vmem:[#allocation3 + $0x21] sm:$0xf]  ;;  %v15884_v9 = vld [vmem:[#allocation3 + $0x18] sm:$0xf]  ;;  %10681 = vmatpush3.bf16.msra.mxu1 %v12040_v8 }
 0x8d8   :  { %v15890_v27 = vld [vmem:[#allocation3 + $0x41] sm:$0xf]  ;;  %v15892_v34 = vld [vmem:[#allocation3 + $0x38] sm:$0xf]  ;;  %v15964_v29 = vld [vmem:[#allocation3 + $0x49] sm:$0xf]  ;;  %10682 = vmatprep.subr.bf16.mxu1 %v12041_v33 }
 0x8d9   :  { %18400 = vst [vmem:[#allocation8_spill] sm:$0xff] %v15890_v27  ;;  %18401 = vst [vmem:[#allocation9_spill] sm:$0xff] %v15892_v34  ;;  %v5852_v52 = vld [vmem:[#allocation3 + $0x1a] sm:$0xf]  ;;  %v5855_v60 = vld [vmem:[#allocation3 + $0x42] sm:$0xf] }
 0x8da   :  { %5650 = vrot.lane.b32.xlu1 %v15837_v20, %s12385_s21  ;;  %5648 = vrot.lane.b32.xlu0 %v15839_v37, %s12385_s21  ;;  %v15898_v21 = vld [vmem:[#allocation3 + $0x19] sm:$0xf]  ;;  %v5860_v62 = vld [vmem:[#allocation3 + $0x22] sm:$0xf]  ;;  %18406 = vst [vmem:[#allocation16_spill] sm:$0xff] %v15964_v29  ;;  %v15994_v0 = vld [vmem:[%s18404_s2 + $0x30] sm:$0xff]  }
 0x8db   :  { %v5854_v54 = vld [vmem:[#allocation3 + $0x3a] sm:$0xf]  ;;  %v5862_v59 = vld [vmem:[#allocation3 + $0x42] sm:$0xf]  ;;  %v15976_v55 = vld [vmem:[#allocation3 + $0x50] sm:$0xf]  ;;  %10683 = vmatpush3.bf16.msra.mxu1 %v12041_v33 }
 0x8dc   :  { %v15903_v22 = vld [vmem:[#allocation3 + $0x39] sm:$0xf]  ;;  %v6133_v39 = vld [vmem:[#allocation3 + $0x20] sm:$0xf]  ;;  %18407 = vst [vmem:[#allocation6_spill] sm:$0xff] %v15976_v55  ;;  %10688 = vmatprep.subr.bf16.mxu1 %v15994_v0 }
 0x8dd   :  { %18402 = vst [vmem:[#allocation10_spill] sm:$0xff] %v15903_v22  ;;  %v5859_v26 = vld [vmem:[#allocation3 + $0x1a] sm:$0xf]  ;;  %v6135_v25 = vld [vmem:[#allocation3 + $0x40] sm:$0xf] }
 0x8de   :  { %5875 = vrot.lane.b32.xlu1 %v5850_v58, %s18334_s28  ;;  %5877 = vrot.lane.b32.xlu0 %v5851_v23, %s18334_s28  ;;  %v5861_v16 = vld [vmem:[#allocation3 + $0x3a] sm:$0xf]  ;;  %v6141_v51 = vld [vmem:[#allocation3 + $0x21] sm:$0xf]  ;;  %v16000_v42 = vld [vmem:[#allocation3 + $0x51] sm:$0xf] }
 0x8df   :  { %v6132_v10 = vld [vmem:[#allocation3 + $0x18] sm:$0xf]  ;;  %v6143_v4 = vld [vmem:[#allocation3 + $0x41] sm:$0xf]  ;;  %18408 = vst [vmem:[#allocation5_spill] sm:$0xff] %v16000_v42 }
 0x8e0   :  { %v6140_v28 = vld [vmem:[#allocation3 + $0x19] sm:$0xf]  ;;  %v16003_v12 = vld [vmem:[#allocation3 + $0x48] sm:$0xf]  ;;  %v5864_v40 = vld [vmem:[#allocation3 + $0x52] sm:$0xf] }
 0x8e1   :  { %18409 = vst [vmem:[#allocation13_spill] sm:$0xff] %v16003_v12  ;;  %v6414_v58 = vld [vmem:[#allocation3 + $0x1a] sm:$0xf]  ;;  %v16013_v23 = vld [vmem:[#allocation3 + $0x49] sm:$0xf] }
 0x8e2   :  { %5899 = vrot.lane.b32.xlu1 %v15837_v20, %s12381_s10  ;;  %5897 = vrot.lane.b32.xlu0 %v15839_v37, %s12381_s10  ;;  %18410 = vst [vmem:[#allocation12_spill] sm:$0xff] %v16013_v23  ;;  %v6417_v63 = vld [vmem:[#allocation3 + $0x42] sm:$0xf] }
 0x8e6   :  { %5931 = vrot.lane.b32.xlu1 %v5858_v56, %s12385_s21  ;;  %5929 = vrot.lane.b32.xlu0 %v5857_v19, %s12385_s21 }
 0x8ea   :  { %6149 = vrot.lane.b32.xlu1 %v15837_v20, %s18334_s28  ;;  %6147 = vrot.lane.b32.xlu0 %v15839_v37, %s18334_s28 }
 0x8ee   :  { %6423 = vrot.lane.b32.xlu1 %v5858_v56, %s18334_s28  ;;  %6179 = vrot.lane.b32.xlu0 %v6131_v41, %s12381_s10  ;;  %v6416_v56 = vld [vmem:[#allocation3 + $0x2a] sm:$0xf] }
 0x8f2   :  { %5590 = vrot.lane.b32.xlu1 %v15859_v43, %s18334_s28  ;;  %6211 = vrot.lane.b32.xlu0 %v6139_v2, %s12385_s21 }
 0x8f6   :  { %5594 = vrot.lane.b32.xlu1 %v15864_v48, %s18334_s28  ;;  %6421 = vrot.lane.b32.xlu0 %v5857_v19, %s18334_s28 }
 0x8fa   :  { %5622 = vrot.lane.b32.xlu1 %v15869_v1, %s12381_s10  ;;  %6445 = vrot.lane.b32.xlu0 %v6139_v2, %s12381_s10  ;;  %v12046_v2 = vld [vmem:[%s18404_s2 + $0x60] sm:$0xff]  }
 0x8fb   :  { %10704 = vmatprep.subr.bf16.mxu0 %v12046_v2 }
 0x8fc   :  { %10705 = vmatpush3.bf16.msra.mxu0 %v12046_v2 }
 0x8fe   :  { %5626 = vrot.lane.b32.xlu1 %v15874_v45, %s12381_s10  ;;  %5596 = vrot.lane.b32.xlu0 %v15876_v5, %s18334_s28 }
 0x902   :  { %5654 = vrot.lane.b32.xlu1 %v15882_v35, %s12385_s21  ;;  %5620 = vrot.lane.b32.xlu0 %v15884_v9, %s12381_s10 }
 0x906   :  { %5658 = vrot.lane.b32.xlu1 %v15890_v27, %s12385_s21  ;;  %5624 = vrot.lane.b32.xlu0 %v15892_v34, %s12381_s10  ;;  %v5547_v34 = vld [vmem:[#allocation3 + $0x18] sm:$0xf] }
 0x90a   :  { %5879 = vrot.lane.b32.xlu1 %v5852_v52, %s18334_s28  ;;  %5652 = vrot.lane.b32.xlu0 %v15898_v21, %s12385_s21 }
 0x90e   :  { %5883 = vrot.lane.b32.xlu1 %v5854_v54, %s18334_s28  ;;  %5656 = vrot.lane.b32.xlu0 %v15903_v22, %s12385_s21 }
 0x912   :  { %5903 = vrot.lane.b32.xlu1 %v15882_v35, %s12381_s10  ;;  %5885 = vrot.lane.b32.xlu0 %v5855_v60, %s18334_s28  ;;  %v5856_v60 = vld [vmem:[#allocation3 + $0x4a] sm:$0xf] }
 0x916   :  { %5907 = vrot.lane.b32.xlu1 %v15890_v27, %s12381_s10  ;;  %5901 = vrot.lane.b32.xlu0 %v15898_v21, %s12381_s10 }
 0x91a   :  { %5935 = vrot.lane.b32.xlu1 %v5860_v62, %s12385_s21  ;;  %5905 = vrot.lane.b32.xlu0 %v15903_v22, %s12381_s10 }
 0x91e   :  { %5939 = vrot.lane.b32.xlu1 %v5862_v59, %s12385_s21  ;;  %5933 = vrot.lane.b32.xlu0 %v5859_v26, %s12385_s21 }
 0x922   :  { %6153 = vrot.lane.b32.xlu1 %v15882_v35, %s18334_s28  ;;  %5937 = vrot.lane.b32.xlu0 %v5861_v16, %s12385_s21 }
 0x926   :  { %6157 = vrot.lane.b32.xlu1 %v15890_v27, %s18334_s28  ;;  %6151 = vrot.lane.b32.xlu0 %v15898_v21, %s18334_s28 }
 0x92a   :  { %6181 = vrot.lane.b32.xlu1 %v6132_v10, %s12381_s10  ;;  %6155 = vrot.lane.b32.xlu0 %v15903_v22, %s18334_s28  ;;  %v6415_v10 = vld [vmem:[#allocation3 + $0x22] sm:$0xf]  ;;  %v6418_v22 = vld [vmem:[#allocation3 + $0x4a] sm:$0xf] }
 0x92e   :  { %6213 = vrot.lane.b32.xlu1 %v6140_v28, %s12385_s21  ;;  %6183 = vrot.lane.b32.xlu0 %v6133_v39, %s12381_s10 }
 0x932   :  { %6427 = vrot.lane.b32.xlu1 %v5860_v62, %s18334_s28  ;;  %6187 = vrot.lane.b32.xlu0 %v6135_v25, %s12381_s10  ;;  %v6413_v62 = vld [vmem:[#allocation3 + $0x12] sm:$0xf] }
 0x933   :  { %v12050_v25 = vld [vmem:[%s18404_s2 + $0x70] sm:$0xff]  }
 0x936   :  { %6431 = vrot.lane.b32.xlu1 %v5862_v59, %s18334_s28  ;;  %6215 = vrot.lane.b32.xlu0 %v6141_v51, %s12385_s21  ;;  %v12048_v59 = vld [vmem:[%s18404_s2 + $0x68] sm:$0xff]  }
 0x937   :  { %10706 = vmatprep.subr.bf16.mxu0 %v12048_v59 }
 0x938   :  { %10707 = vmatpush3.bf16.msra.mxu0 %v12048_v59  ;;  %v12055_v59 = vld [vmem:[%s18404_s2 + $0x88] sm:$0xff]  }
 0x939   :  { %10708 = vmatprep.subr.bf16.mxu0 %v12050_v25 }
 0x93a   :  { %6447 = vrot.lane.b32.xlu1 %v6140_v28, %s12381_s10  ;;  %6425 = vrot.lane.b32.xlu0 %v5859_v26, %s18334_s28 }
 0x93c   :  { %10709 = vmatpush3.bf16.msra.mxu0 %v12050_v25 }
 0x93e   :  { %5598 = vrot.lane.b32.xlu1 %v15964_v29, %s18334_s28  ;;  %6219 = vrot.lane.b32.xlu0 %v6143_v4, %s12385_s21 }
 0x942   :  { %5630 = vrot.lane.b32.xlu1 %v15976_v55, %s12381_s10  ;;  %6429 = vrot.lane.b32.xlu0 %v5861_v16, %s18334_s28 }
 0x944   :  { %v15981_v38 = vpop.permute.xlu1 %5586  ;;  %v15983_v17 = vpop.permute.xlu0 %5588 }
 0x946   :  { %6459 = vrot.lane.b32.xlu1 %v15779_v11, %s12381_s10  ;;  %6449 = vrot.lane.b32.xlu0 %v6141_v51, %s12381_s10  ;;  %v12051_v51 = vld [vmem:[%s18404_s2 + $0x78] sm:$0xff]  }
 0x947   :  { %10710 = vmatprep.subr.bf16.mxu0 %v12051_v51 }
 0x948   :  { %v15996_v49 = vpop.permute.xlu1 %5618  ;;  %v15998_v53 = vpop.permute.xlu0 %5616  ;;  %10711 = vmatpush3.bf16.msra.mxu0 %v12051_v51 }
 0x94a   :  { %5662 = vrot.lane.b32.xlu1 %v16000_v42, %s12385_s21  ;;  %5628 = vrot.lane.b32.xlu0 %v16003_v12, %s12381_s10  ;;  %v5546_v12 = vld [vmem:[#allocation3 + $0x10] sm:$0xf] }
 0x94b   :  { %v5674_v24 = vsel %vm1758_vm7, %v5546_v12, %v15983_v17  ;;  %v6419_v17 = vld [vmem:[#allocation3 + $0x52] sm:$0xf] }
 0x94c   :  { %v16009_v11 = vpop.permute.xlu1 %5650  ;;  %v16011_v32 = vpop.permute.xlu0 %5648 }
 0x94e   :  { %6479 = vrot.lane.b32.xlu1 %v6414_v58, %s12385_s21  ;;  %5660 = vrot.lane.b32.xlu0 %v16013_v23, %s12385_s21  ;;  %v6136_v58 = vld [vmem:[#allocation3 + $0x48] sm:$0xf] }
 0x950   :  { %v16018_v19 = vpop.permute.xlu1 %5875  ;;  %v16020_v41 = vpop.permute.xlu0 %5877 }
 0x952   :  { %6483 = vrot.lane.b32.xlu1 %v6416_v56, %s12385_s21  ;;  %6453 = vrot.lane.b32.xlu0 %v6143_v4, %s12381_s10  ;;  %v12053_v4 = vld [vmem:[%s18404_s2 + $0x80] sm:$0xff]   ;;  %v5863_v56 = vld [vmem:[#allocation3 + $0x4a] sm:$0xf] }
 0x953   :  { %10712 = vmatprep.subr.bf16.mxu0 %v12053_v4 }
 0x954   :  { %v16027_v52 = vpop.permute.xlu1 %5899  ;;  %v16029_v54 = vpop.permute.xlu0 %5897  ;;  %10713 = vmatpush3.bf16.msra.mxu0 %v12053_v4 }
 0x955   :  { %10714 = vmatprep.subr.bf16.mxu0 %v12055_v59 }
 0x956   :  { %5887 = vrot.lane.b32.xlu1 %v5856_v60, %s18334_s28  ;;  %6477 = vrot.lane.b32.xlu0 %v6413_v62, %s12385_s21  ;;  %v6144_v62 = vld [vmem:[#allocation3 + $0x49] sm:$0xf] }
 0x958   :  { %v16036_v26 = vpop.permute.xlu1 %5931  ;;  %v16038_v16 = vpop.permute.xlu0 %5929  ;;  %10715 = vmatpush3.bf16.msra.mxu0 %v12055_v59  ;;  %v5544_v59 = vld [vmem:[#allocation3] sm:$0xf] }
 0x959   :  { %v5672_v46 = vsel %vm1758_vm7, %v5544_v59, %v15934_v13 }
 0x95a   :  { %5911 = vrot.lane.b32.xlu1 %v16000_v42, %s12381_s10  ;;  %6481 = vrot.lane.b32.xlu0 %v6415_v10, %s12385_s21 }
 0x95c   :  { %v16043_v28 = vpop.permute.xlu1 %6149  ;;  %v16045_v39 = vpop.permute.xlu0 %6147 }
 0x95d   :  { %v6236_v45 = vsel %vm1758_vm7, %v15829_v14, %v16043_v28 }
 0x95e   :  { %5943 = vrot.lane.b32.xlu1 %v5864_v40, %s12385_s21  ;;  %6485 = vrot.lane.b32.xlu0 %v6417_v63, %s12385_s21  ;;  %v6137_v63 = vld [vmem:[#allocation3 + $0x50] sm:$0xf] }
 0x960   :  { %v16055_v47 = vpop.permute.xlu1 %6423  ;;  %v16057_v57 = vpop.permute.xlu0 %6179 }
 0x962   :  { %6161 = vrot.lane.b32.xlu1 %v16000_v42, %s18334_s28  ;;  %5909 = vrot.lane.b32.xlu0 %v16013_v23, %s12381_s10 }
 0x964   :  { %v5591_v8 = vpop.permute.xlu1 %5590  ;;  %v16066_v33 = vpop.permute.xlu0 %6211 }
 0x965   :  { %v5675_v59 = vsel %vm1758_vm7, %v5547_v34, %v5591_v8 }
 0x966   :  { %6189 = vrot.lane.b32.xlu1 %v6136_v58, %s12381_s10  ;;  %5941 = vrot.lane.b32.xlu0 %v5863_v56, %s12385_s21  ;;  %v6145_v58 = vld [vmem:[#allocation3 + $0x51] sm:$0xf] }
 0x968   :  { %v16070_v2 = vpop.permute.xlu1 %5594  ;;  %v16072_v60 = vpop.permute.xlu0 %6421 }
 0x96a   :  { %6221 = vrot.lane.b32.xlu1 %v6144_v62, %s12385_s21  ;;  %6159 = vrot.lane.b32.xlu0 %v16013_v23, %s18334_s28 }
 0x96c   :  { %v5623_v10 = vpop.permute.xlu1 %5622  ;;  %v16080_v25 = vpop.permute.xlu0 %6445 }
 0x96e   :  { %6435 = vrot.lane.b32.xlu1 %v5864_v40, %s18334_s28  ;;  %6191 = vrot.lane.b32.xlu0 %v6137_v63, %s12381_s10  ;;  %v6420_v40 = vld [vmem:[#allocation3 + $0x5a] sm:$0xf]  ;;  %v5545_v63 = vld [vmem:[#allocation3 + $0x8] sm:$0xf] }
 0x970   :  { %v16084_v51 = vpop.permute.xlu1 %5626  ;;  %v16086_v4 = vpop.permute.xlu0 %5596 }
 0x972   :  { %6455 = vrot.lane.b32.xlu1 %v6144_v62, %s12381_s10  ;;  %6223 = vrot.lane.b32.xlu0 %v6145_v58, %s12385_s21  ;;  %v5673_v62 = vsel %vm1758_vm7, %v5545_v63, %v15981_v38 }
 0x974   :  { %v5655_v3 = vpop.permute.xlu1 %5654  ;;  %v5621_v23 = vpop.permute.xlu0 %5620 }
 0x976   :  { %6487 = vrot.lane.b32.xlu1 %v6418_v22, %s12385_s21  ;;  %6433 = vrot.lane.b32.xlu0 %v5863_v56, %s18334_s28  ;;  %v5681_v22 = vsel %vm1926_vm15, %v5673_v62, %v15996_v49  ;;  %v5680_v56 = vsel %vm1926_vm15, %v5672_v46, %v15998_v53  ;;  %v5683_v49 = vsel %vm1926_vm15, %v5675_v59, %v5623_v10 }
 0x977   :  { %v5689_v13 = vsel %vm3002_vm8, %v5681_v22, %v16009_v11  ;;  %v5688_v38 = vsel %vm3002_vm8, %v5680_v56, %v16011_v32  ;;  %v5682_v46 = vsel %vm1926_vm15, %v5674_v24, %v5621_v23 }
 0x978   :  { %v16092_v42 = vpop.permute.xlu1 %5658  ;;  %v16094_v27 = vpop.permute.xlu0 %5624  ;;  %v5704_v12 = vcombine.low %v5688_v38, %v5689_v13 }
 0x97a   :  { %6491 = vrot.lane.b32.xlu1 %v6420_v40, %s12385_s21  ;;  %6457 = vrot.lane.b32.xlu0 %v6145_v58, %s12381_s10  ;;  %v5691_v58 = vsel %vm3002_vm8, %v5683_v49, %v5655_v3 }
 0x97c   :  { %v16113_v40 = vpop.permute.xlu1 %5879  ;;  %v5653_v53 = vpop.permute.xlu0 %5652 }
 0x97d   :  { %v5690_v63 = vsel %vm3002_vm8, %v5682_v46, %v5653_v53 }
 0x97e   :  { %v5705_v62 = vcombine.low %v5690_v63, %v5691_v58  ;;  %6489 = vrot.lane.b32.xlu0 %v6419_v17, %s12385_s21 }
 0x980   :  { %v16120_v11 = vpop.permute.xlu1 %5883  ;;  %v5712_v32 = vpack.c.bf16 %v5705_v62, %v5704_v12  ;;  %v16122_v34 = vpop.permute.xlu0 %5656 }
 0x982   :  { %10684 = vmatprep.mubr.msk.bf16.mxu1 %vm3020_vm12, %v5712_v32 }
 0x984   :  { %v16125_v8 = vpop.permute.xlu1 %5903  ;;  %v16127_v24 = vpop.permute.xlu0 %5885 }
 0x988   :  { %v16129_v23 = vpop.permute.xlu1 %5907  ;;  %v5902_v3 = vpop.permute.xlu0 %5901 }
 0x98c   :  { %v16131_v10 = vpop.permute.xlu1 %5935  ;;  %v16133_v22 = vpop.permute.xlu0 %5905 }
 0x990   :  { %v16135_v56 = vpop.permute.xlu1 %5939  ;;  %v5934_v13 = vpop.permute.xlu0 %5933 }
 0x994   :  { %v6154_v38 = vpop.permute.xlu1 %6153  ;;  %v16137_v59 = vpop.permute.xlu0 %5937 }
 0x995   :  { %v6238_v12 = vsel %vm1758_vm7, %v15869_v1, %v6154_v38 }
 0x998   :  { %v16139_v49 = vpop.permute.xlu1 %6157  ;;  %v6152_v46 = vpop.permute.xlu0 %6151 }
 0x999   :  { %18411 = vst [vmem:[#allocation17_spill] sm:$0xff] %v16139_v49  ;;  %v6246_v49 = vsel %vm1926_vm15, %v6238_v12, %v15925_v30  ;;  %v6237_v1 = vsel %vm1758_vm7, %v15884_v9, %v6152_v46  ;;  %v5953_v12 = vsel %vm1758_vm7, %v15770_v15, %v15957_v6  ;;  %v5549_v6 = vld [vmem:[#allocation3 + $0x38] sm:$0xf] }
 0x99a   :  { %v6254_v30 = vsel %vm3002_vm8, %v6246_v49, %v15942_v61  ;;  %v5548_v49 = vld [vmem:[#allocation3 + $0x30] sm:$0xf] }
 0x99c   :  { %v6182_v53 = vpop.permute.xlu1 %6181  ;;  %v16141_v58 = vpop.permute.xlu0 %6155 }
 0x99d   :  { %18412 = vst [vmem:[#allocation18_spill] sm:$0xff] %v16141_v58  ;;  %v6244_v55 = vsel %vm1926_vm15, %v6236_v45, %v6182_v53  ;;  %v6235_v58 = vsel %vm1758_vm7, %v15831_v44, %v16045_v39 }
 0x9a0   :  { %v6214_v63 = vpop.permute.xlu1 %6213  ;;  %v6184_v17 = vpop.permute.xlu0 %6183 }
 0x9a1   :  { %v6252_v38 = vsel %vm3002_vm8, %v6244_v55, %v6214_v63  ;;  %v6245_v14 = vsel %vm1926_vm15, %v6237_v1, %v6184_v17 }
 0x9a4   :  { %v16145_v62 = vpop.permute.xlu1 %6427  ;;  %v16147_v32 = vpop.permute.xlu0 %6187 }
 0x9a5   :  { %18413 = vst [vmem:[#allocation19_spill] sm:$0xff] %v16147_v32  ;;  %v6243_v32 = vsel %vm1926_vm15, %v6235_v58, %v16057_v57 }
 0x9a6   :  { %v6251_v45 = vsel %vm3002_vm8, %v6243_v32, %v16066_v33  ;;  %v5954_v32 = vsel %vm1758_vm7, %v15821_v31, %v16018_v19 }
 0x9a7   :  { %v6267_v39 = vcombine.low %v6251_v45, %v6252_v38  ;;  %v5955_v38 = vsel %vm1758_vm7, %v15823_v7, %v16020_v41  ;;  %v5677_v7 = vsel %vm1758_vm7, %v5549_v6, %v16070_v2  ;;  %v5550_v41 = vld [vmem:[#allocation3 + $0x40] sm:$0xf] }
 0x9a8   :  { %v16161_v29 = vpop.permute.xlu1 %6431  ;;  %v6216_v28 = vpop.permute.xlu0 %6215  ;;  %v5963_v19 = vsel %vm1926_vm15, %v5955_v38, %v5902_v3 }
 0x9a9   :  { %v6253_v44 = vsel %vm3002_vm8, %v6245_v14, %v6216_v28  ;;  %v5962_v14 = vsel %vm1926_vm15, %v5954_v32, %v16027_v52  ;;  %v5961_v28 = vsel %vm1926_vm15, %v5953_v12, %v16029_v54  ;;  %v5971_v54 = vsel %vm3002_vm8, %v5963_v19, %v5934_v13  ;;  %v12340_v19 = vld [vmem:[#allocation3 + $0x31] sm:$0xf] }
 0x9aa   :  { %v6268_v9 = vcombine.low %v6253_v44, %v6254_v30  ;;  %v5676_v30 = vsel %vm1758_vm7, %v5548_v49, %v15948_v50  ;;  %v5970_v15 = vsel %vm3002_vm8, %v5962_v14, %v16036_v26  ;;  %v5969_v31 = vsel %vm3002_vm8, %v5961_v28, %v16038_v16  ;;  %v5551_v26 = vld [vmem:[#allocation3 + $0x48] sm:$0xf]  ;;  %v12044_v14 = vld [vmem:[%s18404_s2 + $0x40] sm:$0xff]  }
 0x9ab   :  { %v5684_v52 = vsel %vm1926_vm15, %v5676_v30, %v16094_v27  ;;  %v5956_v50 = vsel %vm1758_vm7, %v15859_v43, %v16113_v40  ;;  %v5678_v16 = vsel %vm1758_vm7, %v5550_v41, %v16086_v4  ;;  %v5685_v27 = vsel %vm1926_vm15, %v5677_v7, %v16084_v51  ;;  %v12045_v30 = vld [vmem:[%s18404_s2 + $0x48] sm:$0xff]  }
 0x9ac   :  { %v16171_v46 = vpop.permute.xlu1 %6447  ;;  %v6275_v55 = vpack.c.bf16 %v6268_v9, %v6267_v39  ;;  %v16173_v53 = vpop.permute.xlu0 %6425  ;;  %v5692_v3 = vsel %vm3002_vm8, %v5684_v52, %v16122_v34  ;;  %v5964_v2 = vsel %vm1926_vm15, %v5956_v50, %v16125_v8  ;;  %v5693_v34 = vsel %vm3002_vm8, %v5685_v27, %v16092_v42 }
 0x9ad   :  { %v5972_v43 = vsel %vm3002_vm8, %v5964_v2, %v16131_v10  ;;  %v5985_v12 = vcombine.low %v5969_v31, %v5970_v15  ;;  %v12043_v10 = vld [vmem:[%s18404_s2 + $0x38] sm:$0xff]   ;;  %v12047_v31 = vld [vmem:[%s18404_s2 + $0x50] sm:$0xff]   ;;  %v5957_v7 = vsel %vm1758_vm7, %v12340_v19, %v15974_v36  ;;  %v6501_v41 = vsel %vm1758_vm7, %v15839_v37, %v16072_v60 }
 0x9ae   :  { %10716 = vmatprep.mubr.msk.bf16.mxu0 %vm3020_vm12, %v6275_v55  ;;  %v5986_v9 = vcombine.low %v5971_v54, %v5972_v43  ;;  %v6504_v52 = vsel %vm1758_vm7, %v15882_v35, %v16145_v62  ;;  %v6503_v50 = vsel %vm1758_vm7, %v15898_v21, %v16173_v53  ;;  %v6502_v36 = vsel %vm1758_vm7, %v15837_v20, %v16055_v47  ;;  %v18414_v53 = vld [vmem:[#allocation16_spill] sm:$0xff]  ;;  %v18422_v19 = vld [vmem:[#allocation19_spill] sm:$0xff] }
 0x9af   :  { %v6509_v37 = vsel %vm1926_vm15, %v6501_v41, %v16080_v25  ;;  %v5958_v35 = vsel %vm1758_vm7, %v15864_v48, %v16120_v11  ;;  %v5959_v60 = vsel %vm1758_vm7, %v15876_v5, %v16127_v24  ;;  %v5965_v20 = vsel %vm1926_vm15, %v5957_v7, %v16133_v22 }
 0x9b0   :  { %v5599_v57 = vpop.permute.xlu1 %5598  ;;  %v16176_v58 = vpop.permute.xlu0 %6219  ;;  %v5966_v62 = vsel %vm1926_vm15, %v5958_v35, %v16129_v23  ;;  %v5973_v48 = vsel %vm3002_vm8, %v5965_v20, %v16137_v59  ;;  %v6512_v11 = vsel %vm1926_vm15, %v6504_v52, %v15968_v18  ;;  %v12052_v59 = vld [vmem:[%s18404_s2 + $0x90] sm:$0xff]   ;;  %v6510_v18 = vsel %vm1926_vm15, %v6502_v36, %v16171_v46  ;;  %v12054_v46 = vld [vmem:[%s18404_s2 + $0x98] sm:$0xff]  }
 0x9b1   :  { %v5679_v44 = vsel %vm1758_vm7, %v5551_v26, %v5599_v57  ;;  %v5706_v57 = vcombine.low %v5692_v3, %v5693_v34  ;;  %v12049_v26 = vld [vmem:[%s18404_s2 + $0x58] sm:$0xff]   ;;  %v5974_v25 = vsel %vm3002_vm8, %v5966_v62, %v16135_v56 }
 0x9b2   :  { %v5987_v27 = vcombine.low %v5973_v48, %v5974_v25  ;;  %v12059_v25 = vld [vmem:[%s18404_s2 + $0xb8] sm:$0xff]  }
 0x9b3   :  { %v18424_v48 = vld [vmem:[#allocation8_spill] sm:$0xff] }
 0x9b4   :  { %v5631_v63 = vpop.permute.xlu1 %5630  ;;  %v16178_v17 = vpop.permute.xlu0 %6429 }
 0x9b5   :  { %v5687_v40 = vsel %vm1926_vm15, %v5679_v44, %v5631_v63  ;;  %v5993_v63 = vpack.c.bf16 %v5986_v9, %v5985_v12  ;;  %v12056_v12 = vld [vmem:[%s18404_s2 + $0xa0] sm:$0xff]  }
 0x9b8   :  { %v16180_v33 = vpop.permute.xlu1 %6459  ;;  %v16182_v61 = vpop.permute.xlu0 %6449 }
 0x9b9   :  { %v6511_v21 = vsel %vm1926_vm15, %v6503_v50, %v16182_v61  ;;  %v12057_v50 = vld [vmem:[%s18404_s2 + $0xa8] sm:$0xff]  }
 0x9bc   :  { %v5663_v1 = vpop.permute.xlu1 %5662  ;;  %v5629_v45 = vpop.permute.xlu0 %5628 }
 0x9bd   :  { %v5686_v4 = vsel %vm1926_vm15, %v5678_v16, %v5629_v45  ;;  %v5695_v8 = vsel %vm3002_vm8, %v5687_v40, %v5663_v1 }
 0x9c0   :  { %v16219_v39 = vpop.permute.xlu1 %6479  ;;  %v5661_v13 = vpop.permute.xlu0 %5660 }
 0x9c1   :  { %v5694_v55 = vsel %vm3002_vm8, %v5686_v4, %v5661_v13  ;;  %v6518_v43 = vsel %vm3002_vm8, %v6510_v18, %v16219_v39 }
 0x9c2   :  { %v5707_v49 = vcombine.low %v5694_v55, %v5695_v8  ;;  %v18415_v55 = vld [vmem:[#allocation6_spill] sm:$0xff] }
 0x9c4   :  { %v6484_v51 = vpop.permute.xlu1 %6483  ;;  %v5713_v32 = vpack.c.bf16 %v5707_v49, %v5706_v57  ;;  %v16231_v38 = vpop.permute.xlu0 %6453 }
 0x9c5   :  { %v6520_v23 = vsel %vm3002_vm8, %v6512_v11, %v6484_v51  ;;  %v18416_v51 = vld [vmem:[#allocation17_spill] sm:$0xff]  ;;  %v6506_v11 = vsel %vm1758_vm7, %v18424_v48, %v16161_v29 }
 0x9c6   :  { %10685 = vmatmul.mubr.msk.bf16.vlgmr.msra.gmra.mrb[16].mxu1 %vm3020_vm12, %v5713_v32  ;;  %v18417_v32 = vld [vmem:[#allocation7_spill] sm:$0xff] }
 0x9c7   :  { %10689 = vmatpush3.bf16.msra.mxu1 %v15994_v0  ;;  %10700 = vmatprep.mubr.msk.bf16.mxu1 %vm3020_vm12, %v5993_v63  ;;  %v18418_v63 = vld [vmem:[#allocation11_spill] sm:$0xff] }
 0x9c8   :  { %v5888_v42 = vpop.permute.xlu1 %5887  ;;  %v6478_v1 = vpop.permute.xlu0 %6477  ;;  %10690 = vmatprep.subr.bf16.mxu1 %v12043_v10 }
 0x9c9   :  { %v5960_v5 = vsel %vm1758_vm7, %v18414_v53, %v5888_v42  ;;  %v6517_v22 = vsel %vm3002_vm8, %v6509_v37, %v6478_v1  ;;  %v18425_v53 = vld [vmem:[#allocation5_spill] sm:$0xff] }
 0x9ca   :  { %v6533_v4 = vcombine.low %v6517_v22, %v6518_v43  ;;  %v18426_v22 = vld [vmem:[#allocation10_spill] sm:$0xff] }
 0x9cb   :  { %10691 = vmatpush3.bf16.msra.mxu1 %v12043_v10  ;;  %v6240_v10 = vsel %vm1758_vm7, %v18417_v32, %v18416_v51 }
 0x9cc   :  { %v5912_v28 = vpop.permute.xlu1 %5911  ;;  %v6482_v45 = vpop.permute.xlu0 %6481  ;;  %10692 = vmatprep.subr.bf16.mxu1 %v12044_v14 }
 0x9cd   :  { %v6519_v47 = vsel %vm3002_vm8, %v6511_v21, %v6482_v45  ;;  %v5968_v61 = vsel %vm1926_vm15, %v5960_v5, %v5912_v28  ;;  %v18420_v28 = vld [vmem:[#allocation9_spill] sm:$0xff] }
 0x9ce   :  { %v6534_v3 = vcombine.low %v6519_v47, %v6520_v23  ;;  %v12058_v47 = vld [vmem:[%s18404_s2 + $0xb0] sm:$0xff]  }
 0x9cf   :  { %10693 = vmatpush3.bf16.msra.mxu1 %v12044_v14  ;;  %v18419_v14 = vld [vmem:[#allocation18_spill] sm:$0xff] }
 0x9d0   :  { %v5944_v15 = vpop.permute.xlu1 %5943  ;;  %v16245_v0 = vpop.permute.xlu0 %6485  ;;  %10694 = vmatprep.subr.bf16.mxu1 %v12045_v30  ;;  %v6541_v8 = vpack.c.bf16 %v6534_v3, %v6533_v4  ;;  %v6239_v45 = vsel %vm1758_vm7, %v18420_v28, %v18419_v14 }
 0x9d1   :  { %v5976_v2 = vsel %vm3002_vm8, %v5968_v61, %v5944_v15  ;;  %v18421_v15 = vld [vmem:[#allocation13_spill] sm:$0xff]  ;;  %v6247_v7 = vsel %vm1926_vm15, %v6239_v45, %v18422_v19  ;;  %v6505_v61 = vsel %vm1758_vm7, %v18426_v22, %v16178_v17 }
 0x9d2   :  { %v6513_v18 = vsel %vm1926_vm15, %v6505_v61, %v16231_v38 }
 0x9d3   :  { %10695 = vmatpush3.bf16.msra.mxu1 %v12045_v30 }
 0x9d4   :  { %v6162_v6 = vpop.permute.xlu1 %6161  ;;  %v5910_v54 = vpop.permute.xlu0 %5909  ;;  %10696 = vmatprep.subr.bf16.mxu1 %v12047_v31 }
 0x9d5   :  { %v5967_v16 = vsel %vm1926_vm15, %v5959_v60, %v5910_v54  ;;  %v6242_v57 = vsel %vm1758_vm7, %v18415_v55, %v6162_v6  ;;  %v6255_v54 = vsel %vm3002_vm8, %v6247_v7, %v16176_v58 }
 0x9d6   :  { %v6250_v42 = vsel %vm1926_vm15, %v6242_v57, %v18418_v63 }
 0x9d7   :  { %10697 = vmatpush3.bf16.msra.mxu1 %v12047_v31 }
 0x9d8   :  { %v6190_v24 = vpop.permute.xlu1 %6189  ;;  %v5942_v56 = vpop.permute.xlu0 %5941  ;;  %10698 = vmatprep.subr.bf16.mxu1 %v12049_v26 }
 0x9d9   :  { %v5975_v44 = vsel %vm3002_vm8, %v5967_v16, %v5942_v56  ;;  %v6248_v1 = vsel %vm1926_vm15, %v6240_v10, %v6190_v24  ;;  %v18427_v56 = vld [vmem:[#allocation12_spill] sm:$0xff] }
 0x9da   :  { %v5988_v40 = vcombine.low %v5975_v44, %v5976_v2  ;;  %v6521_v44 = vsel %vm3002_vm8, %v6513_v18, %v16245_v0 }
 0x9db   :  { %10699 = vmatpush3.bf16.msra.mxu1 %v12049_v26  ;;  %v18423_v26 = vld [vmem:[#allocation15_spill] sm:$0xff] }
 0x9dc   :  { %v6222_v13 = vpop.permute.xlu1 %6221  ;;  %v5994_v34 = vpack.c.bf16 %v5988_v40, %v5987_v27  ;;  %v6160_v9 = vpop.permute.xlu0 %6159  ;;  %10720 = vmatprep.subr.bf16.mxu1 %v12052_v59  ;;  %v6258_v36 = vsel %vm3002_vm8, %v6250_v42, %v18423_v26 }
 0x9dd   :  { %v6256_v30 = vsel %vm3002_vm8, %v6248_v1, %v6222_v13  ;;  %v6241_v31 = vsel %vm1758_vm7, %v18421_v15, %v6160_v9 }
 0x9de   :  { %10701 = vmatmul.mubr.msk.bf16.vlgmr.msra.gmra.mrb[20].mxu1 %vm3020_vm12, %v5994_v34  ;;  %v6269_v35 = vcombine.low %v6255_v54, %v6256_v30 }
 0x9df   :  { %10721 = vmatpush3.bf16.msra.mxu1 %v12052_v59  ;;  %10732 = vmatprep.mubr.msk.bf16.mxu1 %vm3020_vm12, %v6541_v8 }
 0x9e0   :  { %v6436_v39 = vpop.permute.xlu1 %6435  ;;  %v6192_v49 = vpop.permute.xlu0 %6191  ;;  %10722 = vmatprep.subr.bf16.mxu1 %v12054_v46 }
 0x9e1   :  { %v6249_v41 = vsel %vm1926_vm15, %v6241_v31, %v6192_v49  ;;  %v6508_v5 = vsel %vm1758_vm7, %v18425_v53, %v6436_v39 }
 0x9e2   :  { %v6516_v29 = vsel %vm1926_vm15, %v6508_v5, %v16180_v33 }
 0x9e3   :  { %10723 = vmatpush3.bf16.msra.mxu1 %v12054_v46 }
 0x9e4   :  { %v6456_v6 = vpop.permute.xlu1 %6455  ;;  %v6224_v52 = vpop.permute.xlu0 %6223  ;;  %10724 = vmatprep.subr.bf16.mxu1 %v12056_v12 }
 0x9e5   :  { %v6257_v37 = vsel %vm3002_vm8, %v6249_v41, %v6224_v52  ;;  %v6514_v24 = vsel %vm1926_vm15, %v6506_v11, %v6456_v6 }
 0x9e6   :  { %v6270_v21 = vcombine.low %v6257_v37, %v6258_v36 }
 0x9e7   :  { %10725 = vmatpush3.bf16.msra.mxu1 %v12056_v12 }
 0x9e8   :  { %v6276_v60 = vpack.c.bf16 %v6270_v21, %v6269_v35  ;;  %v6488_v62 = vpop.permute.xlu1 %6487  ;;  %v6434_v20 = vpop.permute.xlu0 %6433  ;;  %10726 = vmatprep.subr.bf16.mxu1 %v12057_v50 }
 0x9e9   :  { %v6522_v16 = vsel %vm3002_vm8, %v6514_v24, %v6488_v62  ;;  %v6507_v59 = vsel %vm1758_vm7, %v18427_v56, %v6434_v20 }
 0x9ea   :  { %10717 = vmatmul.mubr.msk.bf16.vlgmr.msra.gmra.mrb[32].mxu0 %vm3020_vm12, %v6276_v60  ;;  %v6535_v43 = vcombine.low %v6521_v44, %v6522_v16 }
 0x9eb   :  { %10727 = vmatpush3.bf16.msra.mxu1 %v12057_v50 }
 0x9ec   :  { %v6458_v58 = vpop.permute.xlu0 %6457  ;;  %10728 = vmatprep.subr.bf16.mxu1 %v12058_v47  ;;  %v6492_v23 = vpop.permute.xlu1 %6491 }
 0x9ed   :  { %v6515_v3 = vsel %vm1926_vm15, %v6507_v59, %v6458_v58  ;;  %v6524_v17 = vsel %vm3002_vm8, %v6516_v29, %v6492_v23 }
 0x9ef   :  { %10729 = vmatpush3.bf16.msra.mxu1 %v12058_v47 }
 0x9f0   :  { %v6490_v2 = vpop.permute.xlu0 %6489  ;;  %10730 = vmatprep.subr.bf16.mxu1 %v12059_v25 }
 0x9f1   :  { %v6523_v27 = vsel %vm3002_vm8, %v6515_v3, %v6490_v2  ;;  %vm18458_vm8 = vmmov %vm18452_vm0 }
 0x9f2   :  { %v6536_v40 = vcombine.low %v6523_v27, %v6524_v17 }
 0x9f3   :  { %10731 = vmatpush3.bf16.msra.mxu1 %v12059_v25 }
 0x9f4   :  { %v6542_v4 = vpack.c.bf16 %v6536_v40, %v6535_v43 }
 0x9f6   :  { %10733 = vmatmul.mubr.msk.bf16.vlgmr.msra.gmra.mrb[24].mxu1 %vm3020_vm12, %v6542_v4  ;;  %vm18459_vm12 = vmmov %vm18452_vm0 }
 0xa99   :  { %v16365_v38 = vpop.f32.mrb[16].mxu1 }
 0xa9a   :  { %v16367_v33 = vpop.f32.mrb[17].mxu1  ;;  %v5833_v9 = vmul.f32 %v16365_v38, %v16365_v38  ;;  %v5820_v39 = vsel %vm63_vm3, %v16365_v38, 0.0 }
 0xa9b   :  { %v5831_v13 = vmul.f32 %v16367_v33, %v16367_v33  ;;  %v16371_v34 = vpop.f32.mrb[18].mxu1  ;;  %v5817_v46 = vsel %vm63_vm3, %v16367_v33, 0.0 }
 0xa9c   :  { %v16373_v0 = vpop.f32.mrb[19].mxu1  ;;  %v5834_v12 = vmul.f32 %v16371_v34, %v16371_v34  ;;  %v5838_v63 = vsel %vm63_vm3, %v5833_v9, 0.0  ;;  %v5822_v42 = vsel %vm63_vm3, %v16371_v34, 0.0 }
 0xa9d   :  { %v5818_v8 = vsel %vm63_vm3, %v16373_v0, 0.0  ;;  %v5832_v55 = vmul.f32 %v16373_v0, %v16373_v0  ;;  %v5835_v49 = vsel %vm63_vm3, %v5831_v13, 0.0 }
 0xa9e   :  { %v5819_v57 = vadd.f32 %v5818_v8, %v5817_v46  ;;  %v5840_v28 = vsel %vm63_vm3, %v5834_v12, 0.0 }
 0xa9f   :  { %v5836_v51 = vsel %vm63_vm3, %v5832_v55, 0.0 }
 0xaa0   :  { %v5821_v32 = vadd.f32 %v5820_v39, %v5819_v57  ;;  %v5837_v10 = vadd.f32 %v5836_v51, %v5835_v49 }
 0xaa2   :  { %v5823_v1 = vadd.f32 %v5822_v42, %v5821_v32  ;;  %v5839_v14 = vadd.f32 %v5838_v63, %v5837_v10 }
 0xaa4   :  { %v5841_v45 = vadd.f32 %v5840_v28, %v5839_v14  ;;  %v5824_v30 = vrot.slane %v5823_v1, 4 }
 0xaa6   :  { %v5842_v31 = vrot.slane %v5841_v45, 4  ;;  %v5825_v41 = vadd.f32 %v5824_v30, %v5823_v1 }
 0xaa8   :  { %v5843_v37 = vadd.f32 %v5842_v31, %v5841_v45  ;;  %v5826_v47 = vrot.slane %v5825_v41, 2 }
 0xaaa   :  { %v5844_v53 = vrot.slane %v5843_v37, 2  ;;  %v5827_v22 = vadd.f32 %v5826_v47, %v5825_v41 }
 0xaac   :  { %v5845_v59 = vadd.f32 %v5844_v53, %v5843_v37  ;;  %v5828_v17 = vrot.slane %v5827_v22, 1 }
 0xaae   :  { %v5846_v8 = vrot.slane %v5845_v59, 1  ;;  %v5829_v14 = vadd.f32 %v5828_v17, %v5827_v22 }
 0xab1   :  { %v16393_v15 = vpop.f32.mrb[20].mxu1 }
 0xab2   :  { %v16395_v6 = vpop.f32.mrb[21].mxu1  ;;  %v6115_v50 = vmul.f32 %v16393_v15, %v16393_v15  ;;  %v6102_v21 = vsel %vm63_vm3, %v16393_v15, 0.0 }
 0xab3   :  { %v6113_v19 = vmul.f32 %v16395_v6, %v16395_v6  ;;  %v16399_v7 = vpop.f32.mrb[22].mxu1  ;;  %v6099_v54 = vsel %vm63_vm3, %v16395_v6, 0.0 }
 0xab4   :  { %v16401_v52 = vpop.f32.mrb[23].mxu1  ;;  %v6116_v62 = vmul.f32 %v16399_v7, %v16399_v7  ;;  %v6120_v48 = vsel %vm63_vm3, %v6115_v50, 0.0  ;;  %v6104_v11 = vsel %vm63_vm3, %v16399_v7, 0.0  ;;  %v5847_v50 = vadd.f32 %v5846_v8, %v5845_v59 }
 0xab5   :  { %v6100_v26 = vsel %vm63_vm3, %v16401_v52, 0.0  ;;  %v6114_v36 = vmul.f32 %v16401_v52, %v16401_v52  ;;  %v6117_v60 = vsel %vm63_vm3, %v6113_v19, 0.0 }
 0xab6   :  { %v6101_v35 = vadd.f32 %v6100_v26, %v6099_v54  ;;  %v6122_v23 = vsel %vm63_vm3, %v6116_v62, 0.0 }
 0xab7   :  { %v6118_v20 = vsel %vm63_vm3, %v6114_v36, 0.0 }
 0xab8   :  { %v6103_v58 = vadd.f32 %v6102_v21, %v6101_v35  ;;  %v6119_v25 = vadd.f32 %v6118_v20, %v6117_v60 }
 0xaba   :  { %v6105_v5 = vadd.f32 %v6104_v11, %v6103_v58  ;;  %v6121_v24 = vadd.f32 %v6120_v48, %v6119_v25 }
 0xabc   :  { %v6106_v61 = vrot.slane %v6105_v5, 4  ;;  %v6123_v16 = vadd.f32 %v6122_v23, %v6121_v24 }
 0xabd   :  { %v16421_v56 = vpop.f32.mrb[32].mxu0 }
 0xabe   :  { %v6107_v18 = vadd.f32 %v6106_v61, %v6105_v5  ;;  %v6124_v29 = vrot.slane %v6123_v16, 4  ;;  %v16423_v3 = vpop.f32.mrb[33].mxu0  ;;  %v6397_v4 = vmul.f32 %v16421_v56, %v16421_v56  ;;  %v6384_v49 = vsel %vm63_vm3, %v16421_v56, 0.0 }
 0xabf   :  { %v6395_v2 = vmul.f32 %v16423_v3, %v16423_v3  ;;  %v16427_v44 = vpop.f32.mrb[34].mxu0  ;;  %v6381_v13 = vsel %vm63_vm3, %v16423_v3, 0.0 }
 0xac0   :  { %v6108_v27 = vrot.slane %v6107_v18, 2  ;;  %v6125_v43 = vadd.f32 %v6124_v29, %v6123_v16  ;;  %v16429_v40 = vpop.f32.mrb[35].mxu0  ;;  %v6398_v51 = vmul.f32 %v16427_v44, %v16427_v44  ;;  %v6402_v28 = vsel %vm63_vm3, %v6397_v4, 0.0 }
 0xac1   :  { %v6382_v9 = vsel %vm63_vm3, %v16429_v40, 0.0  ;;  %v6396_v46 = vmul.f32 %v16429_v40, %v16429_v40  ;;  %v6399_v12 = vsel %vm63_vm3, %v6395_v2, 0.0  ;;  %v6386_v45 = vsel %vm63_vm3, %v16427_v44, 0.0 }
 0xac2   :  { %v6109_v55 = vadd.f32 %v6108_v27, %v6107_v18  ;;  %v6126_v57 = vrot.slane %v6125_v43, 2  ;;  %v6383_v39 = vadd.f32 %v6382_v9, %v6381_v13  ;;  %v6404_v54 = vsel %vm63_vm3, %v6398_v51, 0.0 }
 0xac3   :  { %v6400_v32 = vsel %vm63_vm3, %v6396_v46, 0.0 }
 0xac4   :  { %v6110_v10 = vrot.slane %v6109_v55, 1  ;;  %v6127_v63 = vadd.f32 %v6126_v57, %v6125_v43  ;;  %v6385_v42 = vadd.f32 %v6384_v49, %v6383_v39  ;;  %v6401_v1 = vadd.f32 %v6400_v32, %v6399_v12 }
 0xac6   :  { %v6111_v30 = vadd.f32 %v6110_v10, %v6109_v55  ;;  %v6128_v31 = vrot.slane %v6127_v63, 1  ;;  %v6387_v19 = vadd.f32 %v6386_v45, %v6385_v42  ;;  %v6403_v41 = vadd.f32 %v6402_v28, %v6401_v1 }
 0xac8   :  { %v6112_v26 = vadd.f32 %v6111_v30, %v5829_v14  ;;  %v6129_v36 = vadd.f32 %v6128_v31, %v6127_v63  ;;  %v6388_v37 = vrot.slane %v6387_v19, 4  ;;  %v6405_v35 = vadd.f32 %v6404_v54, %v6403_v41 }
 0xac9   :  { %v16449_v21 = vpop.f32.mrb[24].mxu1 }
 0xaca   :  { %v6130_v60 = vadd.f32 %v6129_v36, %v5847_v50  ;;  %v6389_v62 = vadd.f32 %v6388_v37, %v6387_v19  ;;  %v6406_v20 = vrot.slane %v6405_v35, 4  ;;  %v16451_v47 = vpop.f32.mrb[25].mxu1  ;;  %v6663_v5 = vmul.f32 %v16449_v21, %v16449_v21 }
 0xacb   :  { %v6661_v58 = vmul.f32 %v16451_v47, %v16451_v47  ;;  %v16455_v25 = vpop.f32.mrb[26].mxu1  ;;  %v6647_v24 = vsel %vm63_vm3, %v16451_v47, 0.0  ;;  %v6650_v18 = vsel %vm63_vm3, %v16449_v21, 0.0 }
 0xacc   :  { %v6390_v48 = vrot.slane %v6389_v62, 2  ;;  %v6407_v11 = vadd.f32 %v6406_v20, %v6405_v35  ;;  %v6635_v53 = vpop.f32.mrb[27].mxu1  ;;  %v6664_v2 = vmul.f32 %v16455_v25, %v16455_v25  ;;  %v6668_v9 = vsel %vm63_vm3, %v6663_v5, 0.0 }
 0xacd   :  { %v6648_v23 = vsel %vm63_vm3, %v6635_v53, 0.0  ;;  %v6662_v22 = vmul.f32 %v6635_v53, %v6635_v53  ;;  %v6665_v29 = vsel %vm63_vm3, %v6661_v58, 0.0  ;;  %v6652_v46 = vsel %vm63_vm3, %v16455_v25, 0.0 }
 0xace   :  { %v6391_v61 = vadd.f32 %v6390_v48, %v6389_v62  ;;  %v6408_v16 = vrot.slane %v6407_v11, 2  ;;  %v6649_v59 = vadd.f32 %v6648_v23, %v6647_v24  ;;  %v6670_v49 = vsel %vm63_vm3, %v6664_v2, 0.0  ;;  %v6688_v24 = vld [vmem:[%s18429_s9] sm:$0x1]  ;;  %s18600_s9 = sld [smem:[#allocation44_spill]] }
 0xacf   :  { %v6666_v17 = vsel %vm63_vm3, %v6662_v22, 0.0  ;;  %v18430_v22 = vld [vmem:[#allocation14_spill] sm:$0xff] }
 0xad0   :  { %v6392_v27 = vrot.slane %v6391_v61, 1  ;;  %v6409_v43 = vadd.f32 %v6408_v16, %v6407_v11  ;;  %v6651_v4 = vadd.f32 %v6650_v18, %v6649_v59  ;;  %v6667_v13 = vadd.f32 %v6666_v17, %v6665_v29 }
 0xad2   :  { %v6393_v8 = vadd.f32 %v6392_v27, %v6391_v61  ;;  %v6410_v55 = vrot.slane %v6409_v43, 1  ;;  %v6653_v57 = vadd.f32 %v6652_v46, %v6651_v4  ;;  %v6669_v39 = vadd.f32 %v6668_v9, %v6667_v13 }
 0xad4   :  { %v6394_v12 = vadd.f32 %v6393_v8, %v6112_v26  ;;  %v6411_v51 = vadd.f32 %v6410_v55, %v6409_v43  ;;  %v6654_v32 = vrot.slane %v6653_v57, 4  ;;  %v6671_v10 = vadd.f32 %v6670_v49, %v6669_v39 }
 0xad6   :  { %v6412_v63 = vadd.f32 %v6411_v51, %v6130_v60  ;;  %v6655_v42 = vadd.f32 %v6654_v32, %v6653_v57  ;;  %v6672_v1 = vrot.slane %v6671_v10, 4  ;;  %v6684_v60 = vld [vmem:[%s18428_s20] sm:$0x1]  ;;  %s18599_s20 = sld [smem:[#allocation43_spill]] }
 0xad8   :  { %v6656_v14 = vrot.slane %v6655_v42, 2  ;;  %v6673_v28 = vadd.f32 %v6672_v1, %v6671_v10 }
 0xada   :  { %v6657_v45 = vadd.f32 %v6656_v14, %v6655_v42  ;;  %v6674_v30 = vrot.slane %v6673_v28, 2 }
 0xadc   :  { %v6658_v31 = vrot.slane %v6657_v45, 1  ;;  %v6675_v19 = vadd.f32 %v6674_v30, %v6673_v28 }
 0xade   :  { %v6659_v41 = vadd.f32 %v6658_v31, %v6657_v45  ;;  %v6676_v50 = vrot.slane %v6675_v19, 1 }
 0xae0   :  { %v6660_v54 = vadd.f32 %v6659_v41, %v6394_v12  ;;  %v6677_v36 = vadd.f32 %v6676_v50, %v6675_v19 }
 0xae2   :  { %v6678_v37 = vadd.f32 %v6677_v36, %v6412_v63  ;;  %v6679_v35 = vmul.f32 0.0078125, %v6660_v54 }
 0xae4   :  { %v6680_v62 = vmul.f32 0.0078125, %v6678_v37  ;;  %v6681_v26 = vmul.f32 %v6679_v35, %v6679_v35 }
 0xae6   :  { %v6682_v20 = vsub.f32 %v6680_v62, %v6681_v26 }
 0xae8   :  { %v6683_v58 = vmax.f32 %v6682_v20, 0.0 }
 0xaea   :  { %v6685_v48 = vadd.f32 1e-05, %v6683_v58 }
 0xaec   :  { %12080 = vrsqrt.f32 %v6685_v48 }
 0xaf6   :  { %v12081_v11 = vpop.eup %12080 }
 0xaf7   :  { %v6687_v5 = vmul.f32 %v12081_v11, %v6684_v60  ;;  %v16501_v11 = vld [vmem:[#allocation2 + $0x1] sm:$0xff] }
 0xaf9   :  { %v6689_v23 = vmul.f32 %v6687_v5, %v6679_v35  ;;  %v6695_v61 = vrot.slane %v6687_v5, %v18430_v22 }
 0xafb   :  { %v6690_v16 = vsub.f32 %v6688_v24, %v6689_v23  ;;  %v6800_v59 = vmul.f32 %v6695_v61, %v6635_v53  ;;  %v6698_v18 = vmul.f32 %v6695_v61, %v16373_v0  ;;  %v6736_v29 = vmul.f32 %v6695_v61, %v16401_v52 }
 0xafc   :  { %v6768_v2 = vmul.f32 %v6695_v61, %v16429_v40  ;;  %v6697_v17 = vmul.f32 %v6695_v61, %v16367_v33  ;;  %v6735_v27 = vmul.f32 %v6695_v61, %v16395_v6  ;;  %v6767_v43 = vmul.f32 %v6695_v61, %v16423_v3 }
 0xafd   :  { %v6705_v4 = vrot.slane %v6690_v16, %v18430_v22  ;;  %v6799_v13 = vmul.f32 %v6695_v61, %v16451_v47  ;;  %v6699_v9 = vmul.f32 %v16365_v38, %v6695_v61  ;;  %v6737_v53 = vmul.f32 %v16393_v15, %v6695_v61 }
 0xafe   :  { %v6769_v0 = vmul.f32 %v16421_v56, %v6695_v61  ;;  %v6801_v52 = vmul.f32 %v16449_v21, %v6695_v61  ;;  %v6700_v40 = vmul.f32 %v16371_v34, %v6695_v61  ;;  %v6738_v33 = vmul.f32 %v16399_v7, %v6695_v61 }
 0xaff   :  { %v6804_v46 = vadd.f32 %v6800_v59, %v6705_v4  ;;  %v6708_v6 = vadd.f32 %v6705_v4, %v6698_v18  ;;  %v6740_v8 = vadd.f32 %v6736_v29, %v6705_v4  ;;  %v6772_v3 = vadd.f32 %v6768_v2, %v6705_v4 }
 0xb00   :  { %v6707_v55 = vadd.f32 %v6705_v4, %v6697_v17  ;;  %v6739_v57 = vadd.f32 %v6735_v27, %v6705_v4  ;;  %v6771_v39 = vadd.f32 %v6767_v43, %v6705_v4  ;;  %v6803_v47 = vadd.f32 %v6799_v13, %v6705_v4 }
 0xb01   :  { %v6808_v49 = vmax.f32 %v6804_v46, 0.0  ;;  %v6712_v38 = vmax.f32 %v6708_v6, 0.0  ;;  %v16493_v12 = vmax.f32 %v6740_v8, 0.0  ;;  %v16495_v15 = vmax.f32 %v6772_v3, 0.0 }
 0xb02   :  { %v6711_v56 = vmax.f32 %v6707_v55, 0.0  ;;  %v6743_v21 = vmax.f32 %v6739_v57, 0.0  ;;  %v6775_v51 = vmax.f32 %v6771_v39, 0.0  ;;  %v6807_v34 = vmax.f32 %v6803_v47, 0.0 }
 0xb03   :  { %v6816_v32 = vcombine.high %v6808_v49, %v6808_v49  ;;  %6825 = vst [vmem:[#allocation2 + $0x62] ss:$2 sm:$0xf] %v6808_v49  ;;  %6729 = vst [vmem:[#allocation2 + $0x51] ss:$2 sm:$0xf] %v6712_v38  ;;  %v6709_v7 = vadd.f32 %v6705_v4, %v6699_v9  ;;  %v6741_v10 = vadd.f32 %v6737_v53, %v6705_v4 }
 0xb04   :  { %6761 = vst [vmem:[#allocation2 + $0x52] ss:$2 sm:$0xf] %v16493_v12  ;;  %6793 = vst [vmem:[#allocation2 + $0x61] ss:$2 sm:$0xf] %v16495_v15  ;;  %v6773_v63 = vadd.f32 %v6769_v0, %v6705_v4  ;;  %v6751_v42 = vcombine.high %v6743_v21, %v6743_v21  ;;  %v6719_v1 = vcombine.high %v6711_v56, %v6711_v56 }
 0xb05   :  { %6727 = vst [vmem:[#allocation2 + $0x11] ss:$2 sm:$0xf] %v6711_v56  ;;  %6759 = vst [vmem:[#allocation2 + $0x12] ss:$2 sm:$0xf] %v6743_v21  ;;  %v6805_v14 = vadd.f32 %v6801_v52, %v6705_v4  ;;  %v6710_v28 = vadd.f32 %v6705_v4, %v6700_v40  ;;  %v6742_v19 = vadd.f32 %v6738_v33, %v6705_v4 }
 0xb06   :  { %6791 = vst [vmem:[#allocation2 + $0x21] ss:$2 sm:$0xf] %v6775_v51  ;;  %6823 = vst [vmem:[#allocation2 + $0x22] ss:$2 sm:$0xf] %v6807_v34  ;;  %v6770_v54 = vmul.f32 %v16427_v44, %v6695_v61  ;;  %v6802_v36 = vmul.f32 %v16455_v25, %v6695_v61  ;;  %v6783_v26 = vcombine.high %v6775_v51, %v6775_v51 }
 0xb07   :  { %6826 = vst [vmem:[#allocation2 + $0x82] ss:$2 sm:$0xf] %v6816_v32  ;;  %v6713_v45 = vmax.f32 %v6709_v7, 0.0  ;;  %v6745_v30 = vmax.f32 %v6741_v10, 0.0  ;;  %v6777_v31 = vmax.f32 %v6773_v63, 0.0  ;;  %v6815_v48 = vcombine.high %v6807_v34, %v6807_v34 }
 0xb08   :  { %6728 = vst [vmem:[#allocation2 + $0x31] ss:$2 sm:$0xf] %v6719_v1  ;;  %6760 = vst [vmem:[#allocation2 + $0x32] ss:$2 sm:$0xf] %v6751_v42  ;;  %v6774_v20 = vadd.f32 %v6770_v54, %v6705_v4  ;;  %v6806_v58 = vadd.f32 %v6802_v36, %v6705_v4  ;;  %v6720_v60 = vcombine.high %v6712_v38, %v6712_v38 }
 0xb09   :  { %v6809_v41 = vmax.f32 %v6805_v14, 0.0  ;;  %v6714_v50 = vmax.f32 %v6710_v28, 0.0  ;;  %6731 = vst [vmem:[#allocation2 + $0xb1] ss:$2 sm:$0xf] %v6713_v45  ;;  %v6753_v37 = vcombine.high %v6745_v30, %v6745_v30  ;;  %v6721_v35 = vcombine.high %v6713_v45, %v6713_v45  ;;  %v16555_v38 = vld [vmem:[#allocation2 + $0xa1] sm:$0xff] }
 0xb0a   :  { %6763 = vst [vmem:[#allocation2 + $0xb2] ss:$2 sm:$0xf] %v6745_v30  ;;  %6795 = vst [vmem:[#allocation2 + $0xc1] ss:$2 sm:$0xf] %v6777_v31  ;;  %v6752_v44 = vcombine.high %v16493_v12, %v16493_v12  ;;  %v6784_v25 = vcombine.high %v16495_v15, %v16495_v15  ;;  %v6785_v5 = vcombine.high %v6777_v31, %v6777_v31 }
 0xb0b   :  { %v6746_v62 = vmax.f32 %v6742_v19, 0.0  ;;  %6827 = vst [vmem:[#allocation2 + $0xc2] ss:$2 sm:$0xf] %v6809_v41  ;;  %v6817_v24 = vcombine.high %v6809_v41, %v6809_v41  ;;  %v16507_v23 = vld [vmem:[#allocation2 + $0x51] sm:$0xff]  ;;  %v16509_v61 = vld [vmem:[#allocation2 + $0x61] sm:$0xff]  ;;  %v6722_v18 = vcombine.high %v6714_v50, %v6714_v50 }
 0xb0c   :  { %6733 = vst [vmem:[#allocation2 + $0xf1] ss:$2 sm:$0xf] %v6714_v50  ;;  %6732 = vst [vmem:[#allocation2 + $0xd1] ss:$2 sm:$0xf] %v6721_v35  ;;  %v11529_v2 = vpack.i.bf16 %v16509_v61, %v16507_v23 }
 0xb0d   :  { %6764 = vst [vmem:[#allocation2 + $0xd2] ss:$2 sm:$0xf] %v6753_v37  ;;  %6765 = vst [vmem:[#allocation2 + $0xf2] ss:$2 sm:$0xf] %v6746_v62  ;;  %v6754_v29 = vcombine.high %v6746_v62, %v6746_v62 }
 0xb0e   :  { %6792 = vst [vmem:[#allocation2 + $0x41] ss:$2 sm:$0xf] %v6783_v26  ;;  %v6778_v16 = vmax.f32 %v6774_v20, 0.0  ;;  %v6810_v59 = vmax.f32 %v6806_v58, 0.0  ;;  %v16513_v17 = vld [vmem:[#allocation2 + $0x11] sm:$0xff]  ;;  %11530 = vrot.lane.b32.xlu1 %v11529_v2, %s18342_s13 }
 0xb0f   :  { %6824 = vst [vmem:[#allocation2 + $0x42] ss:$2 sm:$0xf] %v6815_v48  ;;  %6730 = vst [vmem:[#allocation2 + $0x71] ss:$2 sm:$0xf] %v6720_v60  ;;  %v11469_v27 = vpack.i.bf16 %v16513_v17, %v16501_v11 }
 0xb10   :  { %6762 = vst [vmem:[#allocation2 + $0x72] ss:$2 sm:$0xf] %v6752_v44  ;;  %6794 = vst [vmem:[#allocation2 + $0x81] ss:$2 sm:$0xf] %v6784_v25  ;;  %v6786_v4 = vcombine.high %v6778_v16, %v6778_v16  ;;  %v6818_v13 = vcombine.high %v6810_v59, %v6810_v59 }
 0xb11   :  { %6796 = vst [vmem:[#allocation2 + $0xe1] ss:$2 sm:$0xf] %v6785_v5  ;;  %6828 = vst [vmem:[#allocation2 + $0xe2] ss:$2 sm:$0xf] %v6817_v24  ;;  %11470 = vrot.lane.b32.xlu0 %v11469_v27, %s18342_s13 }
 0xb12   :  { %v16517_v43 = vld [vmem:[#allocation2 + $0x21] sm:$0xff]  ;;  %6797 = vst [vmem:[#allocation2 + $0x101] ss:$2 sm:$0xf] %v6778_v16  ;;  %v16520_v9 = vld [vmem:[#allocation2 + $0x10] sm:$0xff] }
 0xb13   :  { %6829 = vst [vmem:[#allocation2 + $0x102] ss:$2 sm:$0xf] %v6810_v59  ;;  %6734 = vst [vmem:[#allocation2 + $0x111] ss:$2 sm:$0xf] %v6722_v18  ;;  %v11534_v0 = vpack.i.bf16 %v16517_v43, %v16513_v17 }
 0xb14   :  { %6766 = vst [vmem:[#allocation2 + $0x112] ss:$2 sm:$0xf] %v6754_v29  ;;  %v16522_v53 = vld [vmem:[#allocation2 + $0x20] sm:$0xff]  ;;  %v7396_v40 = vld [vmem:[#allocation2 + $0x12] sm:$0xff]  ;;  %v12061_v36 = vld [vmem:[%s18431_s19 + $0x8] sm:$0xff]  }
 0xb15   :  { %6798 = vst [vmem:[#allocation2 + $0x121] ss:$2 sm:$0xf] %v6786_v4  ;;  %6830 = vst [vmem:[#allocation2 + $0x122] ss:$2 sm:$0xf] %v6818_v13  ;;  %v11474_v52 = vpack.i.bf16 %v16522_v53, %v16520_v9  ;;  %11535 = vrot.lane.b32.xlu1 %v11534_v0, %s18334_s28 }
 0xb16   :  { %v16529_v33 = vld [vmem:[#allocation2 + $0x22] sm:$0xff]  ;;  %v16534_v6 = vld [vmem:[#allocation2 + $0xb1] sm:$0xff] }
 0xb17   :  { %11475 = vrot.lane.b32.xlu0 %v11474_v52, %s18334_s28  ;;  %v11539_v46 = vpack.i.bf16 %v16529_v33, %v7396_v40  ;;  %v16536_v8 = vld [vmem:[#allocation2 + $0xc1] sm:$0xff]  ;;  %v16539_v3 = vld [vmem:[#allocation2 + $0x50] sm:$0xff]  ;;  %v11494_v15 = vpack.i.bf16 %v16534_v6, %v16555_v38 }
 0xb18   :  { %v16541_v55 = vld [vmem:[#allocation2 + $0x60] sm:$0xff]  ;;  %v11544_v57 = vpack.i.bf16 %v16536_v8, %v16534_v6  ;;  %v16550_v47 = vld [vmem:[#allocation2 + $0x52] sm:$0xff] }
 0xb19   :  { %11540 = vrot.lane.b32.xlu1 %v11539_v46, %s18343_s12  ;;  %v11484_v39 = vpack.i.bf16 %v16541_v55, %v16539_v3  ;;  %v16552_v49 = vld [vmem:[#allocation2 + $0x62] sm:$0xff]  ;;  %v16562_v56 = vld [vmem:[#allocation2 + $0xf1] sm:$0xff] }
 0xb1a   :  { %v11554_v12 = vpack.i.bf16 %v16552_v49, %v16550_v47  ;;  %v16564_v21 = vld [vmem:[#allocation2 + $0x101] sm:$0xff]  ;;  %v16567_v51 = vld [vmem:[#allocation2 + $0xb0] sm:$0xff] }
 0xb1b   :  { %11480 = vrot.lane.b32.xlu0 %v11534_v0, %s18343_s12  ;;  %v16569_v34 = vld [vmem:[#allocation2 + $0xc0] sm:$0xff]  ;;  %v11564_v32 = vpack.i.bf16 %v16564_v21, %v16562_v56  ;;  %v7404_v10 = vld [vmem:[#allocation2 + $0xb2] sm:$0xff] }
 0xb1c   :  { %v11499_v7 = vpack.i.bf16 %v16569_v34, %v16567_v51  ;;  %v16578_v63 = vld [vmem:[#allocation2 + $0xc2] sm:$0xff]  ;;  %v16581_v42 = vld [vmem:[#allocation2 + $0xf0] sm:$0xff] }
 0xb1d   :  { %11545 = vrot.lane.b32.xlu1 %v11544_v57, %s18342_s13  ;;  %v16583_v1 = vld [vmem:[#allocation2 + $0x100] sm:$0xff]  ;;  %v11574_v14 = vpack.i.bf16 %v16578_v63, %v7404_v10  ;;  %v16593_v45 = vld [vmem:[#allocation2 + $0xf2] sm:$0xff] }
 0xb1e   :  { %v11509_v28 = vpack.i.bf16 %v16583_v1, %v16581_v42  ;;  %v16595_v30 = vld [vmem:[#allocation2 + $0x102] sm:$0xff]  ;;  %v16602_v41 = vld [vmem:[#allocation2 + $0x31] sm:$0xff] }
 0xb1f   :  { %11485 = vrot.lane.b32.xlu0 %v11484_v39, %s18334_s28  ;;  %v7380_v31 = vld [vmem:[#allocation2 + $0x2] sm:$0xff]  ;;  %v11589_v50 = vpack.i.bf16 %v16595_v30, %v16593_v45  ;;  %v16611_v35 = vld [vmem:[#allocation2 + $0x30] sm:$0xff]  ;;  %v16617_v26 = vpack.i.bf16 %v16602_v41, %v16517_v43 }
 0xb20   :  { %v12060_v19 = vld [vmem:[%s18431_s19] sm:$0xff]   ;;  %v11524_v37 = vpack.i.bf16 %v7396_v40, %v7380_v31  ;;  %v12062_v20 = vld [vmem:[%s18431_s19 + $0x10] sm:$0xff]   ;;  %v11684_v13 = vpack.i.bf16 %v16611_v35, %v16522_v53 }
 0xb21   :  { %11550 = vrot.lane.b32.xlu1 %v11529_v2, %s18334_s28  ;;  %v7388_v54 = vld [vmem:[#allocation2 + $0xa2] sm:$0xff]  ;;  %10736 = vmatprep.subr.bf16.mxu0 %v12060_v19  ;;  %v16633_v25 = vld [vmem:[#allocation2 + $0x71] sm:$0xff] }
 0xb22   :  { %10737 = vmatpush3.bf16.msra.mxu0 %v12060_v19  ;;  %v16613_v62 = vld [vmem:[#allocation2 + $0x40] sm:$0xff]  ;;  %v11559_v58 = vpack.i.bf16 %v7404_v10, %v7388_v54  ;;  %18432 = vst [vmem:[#allocation16_spill] sm:$0xff] %v16633_v25  ;;  %v16639_v5 = vpack.i.bf16 %v16633_v25, %v16509_v61  ;;  %v16641_v24 = vld [vmem:[#allocation2 + $0x70] sm:$0xff]  ;;  %v12065_v10 = vld [vmem:[%s18431_s19 + $0x28] sm:$0xff]  }
 0xb23   :  { %11490 = vrot.lane.b32.xlu0 %v11529_v2, %s18343_s12  ;;  %10738 = vmatprep.subr.bf16.mxu0 %v12061_v36  ;;  %v11614_v48 = vpack.i.bf16 %v16613_v62, %v16611_v35  ;;  %v16627_v60 = vld [vmem:[#allocation2 + $0x41] sm:$0xff]  ;;  %v16664_v4 = vld [vmem:[#allocation2 + $0xd1] sm:$0xff] }
 0xb24   :  { %v11619_v44 = vpack.i.bf16 %v16627_v60, %v16602_v41  ;;  %v16643_v16 = vld [vmem:[#allocation2 + $0x80] sm:$0xff]  ;;  %v16652_v18 = vpack.i.bf16 %v16507_v23, %v16627_v60  ;;  %18434 = vst [vmem:[#allocation17_spill] sm:$0xff] %v16664_v4  ;;  %v16671_v23 = vpack.i.bf16 %v16664_v4, %v16536_v8 }
 0xb25   :  { %11555 = vrot.lane.b32.xlu1 %v11554_v12, %s18343_s12  ;;  %18433 = vst [vmem:[#allocation6_spill] sm:$0xff] %v16643_v16  ;;  %v11634_v59 = vpack.i.bf16 %v16643_v16, %v16641_v24  ;;  %v16654_v29 = vld [vmem:[#allocation2 + $0x81] sm:$0xff] }
 0xb26   :  { %10739 = vmatpush3.bf16.msra.mxu0 %v12061_v36  ;;  %v6859_v61 = vld [vmem:[#allocation2 + $0xe1] sm:$0xff]  ;;  %v11639_v2 = vpack.i.bf16 %v16654_v29, %v16633_v25  ;;  %v11689_v36 = vpack.i.bf16 %v16539_v3, %v16613_v62 }
 0xb27   :  { %11495 = vrot.lane.b32.xlu0 %v11494_v15, %s18342_s13  ;;  %10740 = vmatprep.subr.bf16.mxu0 %v12062_v20  ;;  %v16662_v27 = vpack.i.bf16 %v16562_v56, %v6859_v61  ;;  %v16677_v52 = vld [vmem:[#allocation2 + $0xe0] sm:$0xff]  ;;  %v16688_v8 = vpack.i.bf16 %v6859_v61, %v16664_v4 }
 0xb28   :  { %v12064_v56 = vld [vmem:[%s18431_s19 + $0x20] sm:$0xff]   ;;  %v11769_v61 = vpack.i.bf16 %v16581_v42, %v16677_v52 }
 0xb29   :  { %11565 = vrot.lane.b32.xlu1 %v11564_v32, %s18342_s13 }
 0xb2a   :  { %10741 = vmatpush3.bf16.msra.mxu0 %v12062_v20  ;;  %v7387_v20 = vld [vmem:[#allocation2 + $0x72] sm:$0xff] }
 0xb2b   :  { %11500 = vrot.lane.b32.xlu0 %v11499_v7, %s18334_s28 }
 0xb2d   :  { %11570 = vrot.lane.b32.xlu1 %v11544_v57, %s18334_s28 }
 0xb2f   :  { %11505 = vrot.lane.b32.xlu0 %v11544_v57, %s18343_s12  ;;  %v12063_v57 = vld [vmem:[%s18431_s19 + $0x18] sm:$0xff]  }
 0xb30   :  { %10758 = vmatprep.subr.bf16.mxu1 %v12063_v57 }
 0xb31   :  { %11575 = vrot.lane.b32.xlu1 %v11574_v14, %s18343_s12  ;;  %10759 = vmatpush3.bf16.msra.mxu1 %v12063_v57 }
 0xb32   :  { %10760 = vmatprep.subr.bf16.mxu1 %v12064_v56 }
 0xb33   :  { %11510 = vrot.lane.b32.xlu0 %v11509_v28, %s18334_s28  ;;  %v7889_v28 = vld [vmem:[#allocation2 + $0x90] sm:$0xff] }
 0xb34   :  { %v11724_v19 = vpack.i.bf16 %v7889_v28, %v16643_v16 }
 0xb35   :  { %11580 = vrot.lane.b32.xlu1 %v11539_v46, %s18342_s13  ;;  %v7383_v46 = vld [vmem:[#allocation2 + $0x32] sm:$0xff]  ;;  %10761 = vmatpush3.bf16.msra.mxu1 %v12064_v56 }
 0xb36   :  { %v16694_v39 = vpack.i.bf16 %v7383_v46, %v16529_v33  ;;  %v16708_v33 = vld [vmem:[#allocation2 + $0x120] sm:$0xff]  ;;  %10762 = vmatprep.subr.bf16.mxu1 %v12065_v10  ;;  %v7391_v56 = vld [vmem:[#allocation2 + $0xd2] sm:$0xff] }
 0xb37   :  { %11515 = vrot.lane.b32.xlu0 %v11564_v32, %s18343_s12  ;;  %18435 = vst [vmem:[#allocation7_spill] sm:$0xff] %v16708_v33 }
 0xb39   :  { %11585 = vrot.lane.b32.xlu1 %v11564_v32, %s18334_s28  ;;  %v16706_v32 = vld [vmem:[#allocation2 + $0x110] sm:$0xff]  ;;  %10763 = vmatpush3.bf16.msra.mxu1 %v12065_v10 }
 0xb3a   :  { %v11669_v7 = vpack.i.bf16 %v16708_v33, %v16706_v32 }
 0xb3b   :  { %11520 = vrot.lane.b32.xlu0 %v11534_v0, %s18342_s13  ;;  %v16675_v0 = vld [vmem:[#allocation2 + $0xd0] sm:$0xff] }
 0xb3c   :  { %v11649_v40 = vpack.i.bf16 %v16677_v52, %v16675_v0 }
 0xb3d   :  { %11590 = vrot.lane.b32.xlu1 %v11589_v50, %s18343_s12 }
 0xb3f   :  { %11525 = vrot.lane.b32.xlu0 %v11524_v37, %s18342_s13 }
 0xb41   :  { %11610 = vrot.lane.b32.xlu1 %v16617_v26, %s18342_s13 }
 0xb43   :  { %11560 = vrot.lane.b32.xlu0 %v11559_v58, %s18342_s13  ;;  %v16749_v58 = vpack.i.bf16 %v7387_v20, %v16552_v49 }
 0xb45   :  { %11615 = vrot.lane.b32.xlu1 %v11614_v48, %s18334_s28  ;;  %v11714_v48 = vpack.i.bf16 %v16641_v24, %v16541_v55 }
 0xb47   :  { %11595 = vrot.lane.b32.xlu0 %v11554_v12, %s18342_s13  ;;  %v6862_v12 = vld [vmem:[#allocation2 + $0x111] sm:$0xff] }
 0xb48   :  { %v16701_v15 = vpack.i.bf16 %v6862_v12, %v16564_v21  ;;  %v16715_v21 = vld [vmem:[#allocation2 + $0x121] sm:$0xff] }
 0xb49   :  { %11620 = vrot.lane.b32.xlu1 %v11619_v44, %s18343_s12  ;;  %v16728_v31 = vpack.i.bf16 %v16715_v21, %v6862_v12 }
 0xb4b   :  { %11600 = vrot.lane.b32.xlu0 %v11574_v14, %s18342_s13  ;;  %v16723_v14 = vld [vmem:[%s18431_s19 + $0x30] sm:$0xff]  }
 0xb4c   :  { %10780 = vmatprep.subr.bf16.mxu0 %v16723_v14 }
 0xb4d   :  { %11630 = vrot.lane.b32.xlu1 %v16639_v5, %s18342_s13 }
 0xb4f   :  { %11605 = vrot.lane.b32.xlu0 %v11589_v50, %s18342_s13  ;;  %v7399_v50 = vld [vmem:[#allocation2 + $0x42] sm:$0xff] }
 0xb50   :  { %v16735_v54 = vpack.i.bf16 %v7399_v50, %v7383_v46  ;;  %v16743_v37 = vpack.i.bf16 %v16550_v47, %v7399_v50  ;;  %v7905_v47 = vld [vmem:[#allocation2 + $0x91] sm:$0xff] }
 0xb51   :  { %11635 = vrot.lane.b32.xlu1 %v11634_v59, %s18334_s28 }
 0xb53   :  { %11625 = vrot.lane.b32.xlu0 %v16652_v18, %s18342_s13 }
 0xb55   :  { %11640 = vrot.lane.b32.xlu1 %v11639_v2, %s18343_s12 }
 0xb57   :  { %11660 = vrot.lane.b32.xlu0 %v16662_v27, %s18342_s13 }
 0xb59   :  { %11645 = vrot.lane.b32.xlu1 %v16671_v23, %s18342_s13 }
 0xb5b   :  { %11685 = vrot.lane.b32.xlu0 %v11684_v13, %s18334_s28  ;;  %v16772_v13 = vld [vmem:[#allocation2 + $0x82] sm:$0xff] }
 0xb5d   :  { %11650 = vrot.lane.b32.xlu1 %v11649_v40, %s18334_s28 }
 0xb5f   :  { %11695 = vrot.lane.b32.xlu0 %v16617_v26, %s18343_s12 }
 0xb61   :  { %11655 = vrot.lane.b32.xlu1 %v16688_v8, %s18343_s12 }
 0xb63   :  { %11705 = vrot.lane.b32.xlu0 %v16694_v39, %s18342_s13 }
 0xb65   :  { %11665 = vrot.lane.b32.xlu1 %v16701_v15, %s18342_s13 }
 0xb67   :  { %11710 = vrot.lane.b32.xlu0 %v11639_v2, %s18342_s13 }
 0xb69   :  { %11670 = vrot.lane.b32.xlu1 %v11669_v7, %s18334_s28  ;;  %v6831_v7 = vld [vmem:[#allocation2] sm:$0xff] }
 0xb6b   :  { %11720 = vrot.lane.b32.xlu0 %v11619_v44, %s18334_s28 }
 0xb6d   :  { %11675 = vrot.lane.b32.xlu1 %v16728_v31, %s18343_s12 }
 0xb6f   :  { %11725 = vrot.lane.b32.xlu0 %v11724_v19, %s18334_s28 }
 0xb71   :  { %11680 = vrot.lane.b32.xlu1 %v11619_v44, %s18342_s13  ;;  %v16766_v44 = vpack.i.bf16 %v7905_v47, %v16654_v29  ;;  %v16780_v29 = vpack.i.bf16 %v16772_v13, %v7387_v20 }
 0xb73   :  { %11735 = vrot.lane.b32.xlu0 %v16735_v54, %s18343_s12 }
 0xb75   :  { %11690 = vrot.lane.b32.xlu1 %v11689_v36, %s18334_s28  ;;  %v16788_v36 = vpack.i.bf16 %v7391_v56, %v16578_v63 }
 0xb77   :  { %11745 = vrot.lane.b32.xlu0 %v16743_v37, %s18342_s13 }
 0xb79   :  { %11700 = vrot.lane.b32.xlu1 %v16652_v18, %s18343_s12 }
 0xb7b   :  { %11750 = vrot.lane.b32.xlu0 %v16749_v58, %s18342_s13 }
 0xb7d   :  { %11715 = vrot.lane.b32.xlu1 %v11714_v48, %s18334_s28 }
 0xb7f   :  { %11755 = vrot.lane.b32.xlu0 %v16688_v8, %s18342_s13 }
 0xb80   :  { %v16763_v49 = vpop.permute.xlu1 %11530 }
 0xb81   :  { %11730 = vrot.lane.b32.xlu1 %v16639_v5, %s18343_s12  ;;  %18436 = vst [vmem:[#allocation11_spill] sm:$0xff] %v16763_v49 }
 0xb83   :  { %11765 = vrot.lane.b32.xlu0 %v11639_v2, %s18334_s28  ;;  %v11471_v59 = vpop.permute.xlu0 %11470  ;;  %v11759_v2 = vpack.i.bf16 %v16675_v0, %v16569_v34 }
 0xb84   :  { %v11473_v57 = vunpack.i.h.bf16 %v11471_v59  ;;  %v11472_v12 = vunpack.i.l.bf16 %v11471_v59 }
 0xb85   :  { %11740 = vrot.lane.b32.xlu1 %v16766_v44, %s18343_s12 }
 0xb86   :  { %v7087_v20 = vsel %vm63_vm3, %v6831_v7, %v11472_v12  ;;  %v7088_v48 = vsel %vm63_vm3, %v16520_v9, %v11473_v57  ;;  %v16806_v57 = vld [vmem:[%s18431_s19 + $0x48] sm:$0xff]  }
 0xb87   :  { %11770 = vrot.lane.b32.xlu0 %v11769_v61, %s18334_s28  ;;  %v16775_v40 = vpop.permute.xlu1 %11535  ;;  %10824 = vmatprep.subr.bf16.mxu1 %v16806_v57 }
 0xb89   :  { %v11476_v46 = vpop.permute.xlu0 %11475  ;;  %11760 = vrot.lane.b32.xlu1 %v11759_v2, %s18334_s28 }
 0xb8a   :  { %v11478_v10 = vunpack.i.h.bf16 %v11476_v46  ;;  %v11477_v28 = vunpack.i.l.bf16 %v11476_v46 }
 0xb8b   :  { %11780 = vrot.lane.b32.xlu0 %v16780_v29, %s18343_s12  ;;  %v16785_v19 = vpop.permute.xlu1 %11540 }
 0xb8c   :  { %v7103_v61 = vsel %vm1758_vm7, %v7087_v20, %v11477_v28  ;;  %v7104_v2 = vsel %vm1758_vm7, %v7088_v48, %v11478_v10  ;;  %v11799_v28 = vpack.i.bf16 %v16706_v32, %v16583_v1  ;;  %v7897_v48 = vld [vmem:[#allocation2 + $0x130] sm:$0xff] }
 0xb8d   :  { %v11481_v50 = vpop.permute.xlu0 %11480  ;;  %11775 = vrot.lane.b32.xlu1 %v16671_v23, %s18343_s12 }
 0xb8e   :  { %v11483_v47 = vunpack.i.h.bf16 %v11481_v50  ;;  %v11482_v59 = vunpack.i.l.bf16 %v11481_v50 }
 0xb8f   :  { %11790 = vrot.lane.b32.xlu0 %v16788_v36, %s18342_s13  ;;  %v16801_v12 = vpop.permute.xlu1 %11545 }
 0xb90   :  { %v7119_v63 = vsel %vm1826_vm11, %v7103_v61, %v11482_v59  ;;  %v7120_v46 = vsel %vm1826_vm11, %v7104_v2, %v11483_v47  ;;  %18437 = vst [vmem:[#allocation18_spill] sm:$0xff] %v16801_v12  ;;  %v11809_v61 = vpack.i.bf16 %v7897_v48, %v16708_v33  ;;  %v7913_v2 = vld [vmem:[#allocation2 + $0x131] sm:$0xff] }
 0xb91   :  { %v7135_v7 = vpack.c.bf16 %v7120_v46, %v7119_v63  ;;  %v16808_v50 = vpop.permute.xlu0 %11485  ;;  %11785 = vrot.lane.b32.xlu1 %v16662_v27, %s18343_s12  ;;  %v7407_v63 = vld [vmem:[#allocation2 + $0xe2] sm:$0xff]  ;;  %v16836_v46 = vpack.i.bf16 %v7913_v2, %v16715_v21  ;;  %v7395_v21 = vld [vmem:[#allocation2 + $0x112] sm:$0xff] }
 0xb92   :  { %v16858_v22 = vpack.i.bf16 %v7395_v21, %v16595_v30  ;;  %v8391_v33 = vld [vmem:[#allocation2 + $0x92] sm:$0xff] }
 0xb93   :  { %10742 = vmatprep.mubr.msk.bf16.mxu0 %vm1926_vm15, %v7135_v7  ;;  %11795 = vrot.lane.b32.xlu0 %v16728_v31, %s18342_s13  ;;  %v16816_v10 = vpop.permute.xlu1 %11550 }
 0xb95   :  { %v16820_v20 = vpop.permute.xlu0 %11490  ;;  %11800 = vrot.lane.b32.xlu1 %v11799_v28, %s18334_s28 }
 0xb97   :  { %11805 = vrot.lane.b32.xlu0 %v16688_v8, %s18334_s28  ;;  %v16825_v47 = vpop.permute.xlu1 %11555  ;;  %v16840_v8 = vpack.i.bf16 %v7407_v63, %v7391_v56 }
 0xb99   :  { %v16827_v59 = vpop.permute.xlu0 %11495  ;;  %11815 = vrot.lane.b32.xlu1 %v16701_v15, %s18343_s12 }
 0xb9b   :  { %11810 = vrot.lane.b32.xlu0 %v11809_v61, %s18334_s28  ;;  %v16833_v1 = vpop.permute.xlu1 %11565  ;;  %v16849_v61 = vpack.i.bf16 %v16593_v45, %v7407_v63 }
 0xb9c   :  { %18438 = vst [vmem:[#allocation9_spill] sm:$0xff] %v16833_v1 }
 0xb9d   :  { %v16838_v7 = vpop.permute.xlu0 %11500  ;;  %11825 = vrot.lane.b32.xlu1 %v16836_v46, %s18343_s12 }
 0xb9f   :  { %11820 = vrot.lane.b32.xlu0 %v16840_v8, %s18343_s12  ;;  %v11571_v28 = vpop.permute.xlu1 %11570 }
 0xba0   :  { %v11572_v49 = vunpack.i.l.bf16 %v11571_v28 }
 0xba1   :  { %v16846_v48 = vpop.permute.xlu0 %11505  ;;  %11845 = vrot.lane.b32.xlu1 %v16617_v26, %s18334_s28 }
 0xba3   :  { %11830 = vrot.lane.b32.xlu0 %v16849_v61, %s18342_s13  ;;  %v11576_v56 = vpop.permute.xlu1 %11575 }
 0xba5   :  { %v16855_v2 = vpop.permute.xlu0 %11510  ;;  %11860 = vrot.lane.b32.xlu1 %v16694_v39, %s18343_s12 }
 0xba7   :  { %11835 = vrot.lane.b32.xlu0 %v16858_v22, %s18342_s13  ;;  %v16864_v45 = vpop.permute.xlu1 %11580 }
 0xba8   :  { %18439 = vst [vmem:[#allocation13_spill] sm:$0xff] %v16864_v45 }
 0xba9   :  { %v16866_v63 = vpop.permute.xlu0 %11515  ;;  %11870 = vrot.lane.b32.xlu1 %v16743_v37, %s18343_s12  ;;  %v11538_v37 = vunpack.i.h.bf16 %v16775_v40 }
 0xbab   :  { %11840 = vrot.lane.b32.xlu0 %v16735_v54, %s18342_s13  ;;  %v16872_v26 = vpop.permute.xlu1 %11585  ;;  %v16884_v54 = vld [vmem:[#allocation2 + $0x122] sm:$0xff] }
 0xbac   :  { %18440 = vst [vmem:[#allocation19_spill] sm:$0xff] %v16872_v26  ;;  %v11537_v26 = vunpack.i.l.bf16 %v16775_v40 }
 0xbad   :  { %v16874_v30 = vpop.permute.xlu0 %11520  ;;  %11875 = vrot.lane.b32.xlu1 %v16780_v29, %s18342_s13  ;;  %v11543_v29 = vunpack.i.h.bf16 %v16785_v19 }
 0xbaf   :  { %11850 = vrot.lane.b32.xlu0 %v16728_v31, %s18334_s28  ;;  %v16880_v39 = vpop.permute.xlu1 %11590  ;;  %v11894_v31 = vpack.i.bf16 %v8391_v33, %v16772_v13 }
 0xbb0   :  { %18441 = vst [vmem:[#allocation15_spill] sm:$0xff] %v16880_v39  ;;  %v11542_v39 = vunpack.i.l.bf16 %v16785_v19 }
 0xbb1   :  { %v11526_v4 = vpop.permute.xlu0 %11525  ;;  %11885 = vrot.lane.b32.xlu1 %v16766_v44, %s18334_s28 }
 0xbb2   :  { %v11528_v45 = vunpack.i.h.bf16 %v11526_v4  ;;  %v11527_v1 = vunpack.i.l.bf16 %v11526_v4 }
 0xbb3   :  { %11855 = vrot.lane.b32.xlu0 %v16652_v18, %s18334_s28  ;;  %v11611_v25 = vpop.permute.xlu1 %11610  ;;  %v16900_v18 = vpack.i.bf16 %v16884_v54, %v7395_v21 }
 0xbb4   :  { %v7589_v4 = vsel %vm63_vm3, %v16513_v17, %v11528_v45  ;;  %v7588_v44 = vsel %vm63_vm3, %v16501_v11, %v11527_v1  ;;  %v11573_v45 = vunpack.i.h.bf16 %v11571_v28  ;;  %v11578_v1 = vunpack.i.h.bf16 %v11576_v56 }
 0xbb5   :  { %v7605_v12 = vsel %vm1758_vm7, %v7589_v4, %v11538_v37  ;;  %v7604_v40 = vsel %vm1758_vm7, %v7588_v44, %v11537_v26  ;;  %v11561_v16 = vpop.permute.xlu0 %11560  ;;  %11895 = vrot.lane.b32.xlu1 %v11894_v31, %s18343_s12  ;;  %v11577_v26 = vunpack.i.l.bf16 %v11576_v56 }
 0xbb6   :  { %v11563_v33 = vunpack.i.h.bf16 %v11561_v16  ;;  %v11562_v13 = vunpack.i.l.bf16 %v11561_v16  ;;  %v7620_v19 = vsel %vm1826_vm11, %v7604_v40, %v11542_v39  ;;  %v7621_v17 = vsel %vm1826_vm11, %v7605_v12, %v11543_v29 }
 0xbb7   :  { %11865 = vrot.lane.b32.xlu0 %v16900_v18, %s18343_s12  ;;  %v7636_v11 = vpack.c.bf16 %v7621_v17, %v7620_v19  ;;  %v11616_v37 = vpop.permute.xlu1 %11615  ;;  %v11613_v12 = vunpack.i.h.bf16 %v11611_v25  ;;  %v11612_v29 = vunpack.i.l.bf16 %v11611_v25 }
 0xbb8   :  { %v7597_v21 = vsel %vm63_vm3, %v16534_v6, %v11563_v33  ;;  %v7596_v16 = vsel %vm63_vm3, %v16555_v38, %v11562_v13  ;;  %v11618_v4 = vunpack.i.h.bf16 %v11616_v37  ;;  %v11617_v44 = vunpack.i.l.bf16 %v11616_v37  ;;  %v6839_v37 = vld [vmem:[#allocation2 + $0xa0] sm:$0xff] }
 0xbb9   :  { %v7613_v31 = vsel %vm1758_vm7, %v7597_v21, %v11573_v45  ;;  %v7612_v39 = vsel %vm1758_vm7, %v7596_v16, %v11572_v49  ;;  %v16913_v28 = vpop.permute.xlu0 %11595  ;;  %10764 = vmatprep.mubr.msk.bf16.mxu1 %vm1926_vm15, %v7636_v11  ;;  %11900 = vrot.lane.b32.xlu1 %v16840_v8, %s18342_s13  ;;  %v7089_v56 = vsel %vm63_vm3, %v16522_v53, %v11612_v29  ;;  %v11498_v11 = vunpack.i.h.bf16 %v16827_v59  ;;  %v12067_v16 = vld [vmem:[%s18431_s19 + $0x38] sm:$0xff]  }
 0xbba   :  { %v16919_v6 = vsel %vm1826_vm11, %v7612_v39, %v11577_v26  ;;  %v16922_v38 = vsel %vm1826_vm11, %v7613_v31, %v11578_v1  ;;  %v7090_v40 = vsel %vm63_vm3, %v16611_v35, %v11613_v12  ;;  %v7105_v19 = vsel %vm1758_vm7, %v7089_v56, %v11617_v44 }
 0xbbb   :  { %11880 = vrot.lane.b32.xlu0 %v16639_v5, %s18334_s28  ;;  %v7640_v25 = vpack.c.bf16 %v16922_v38, %v16919_v6  ;;  %v11621_v49 = vpop.permute.xlu1 %11620  ;;  %v7106_v17 = vsel %vm1758_vm7, %v7090_v40, %v11618_v4  ;;  %v11497_v1 = vunpack.i.l.bf16 %v16827_v59  ;;  %v11502_v31 = vunpack.i.l.bf16 %v16838_v7 }
 0xbbc   :  { %v11623_v33 = vunpack.i.h.bf16 %v11621_v49  ;;  %v11622_v13 = vunpack.i.l.bf16 %v11621_v49  ;;  %v11507_v59 = vunpack.i.l.bf16 %v16846_v48  ;;  %v7096_v12 = vsel %vm63_vm3, %v16567_v51, %v11498_v11 }
 0xbbd   :  { %v16932_v8 = vpop.permute.xlu0 %11600  ;;  %11910 = vrot.lane.b32.xlu1 %v16662_v27, %s18334_s28  ;;  %v11503_v27 = vunpack.i.h.bf16 %v16838_v7  ;;  %v7095_v7 = vsel %vm63_vm3, %v6839_v37, %v11497_v1  ;;  %v11487_v49 = vunpack.i.l.bf16 %v16808_v50 }
 0xbbe   :  { %v7121_v5 = vsel %vm1826_vm11, %v7105_v19, %v11622_v13  ;;  %v7122_v45 = vsel %vm1826_vm11, %v7106_v17, %v11623_v33  ;;  %v11493_v19 = vunpack.i.h.bf16 %v16820_v20  ;;  %v11492_v17 = vunpack.i.l.bf16 %v16820_v20 }
 0xbbf   :  { %11890 = vrot.lane.b32.xlu0 %v16749_v58, %s18343_s12  ;;  %v7136_v26 = vpack.c.bf16 %v7122_v45, %v7121_v5  ;;  %v11631_v21 = vpop.permute.xlu1 %11630  ;;  %v11508_v58 = vunpack.i.h.bf16 %v16846_v48  ;;  %v11488_v48 = vunpack.i.h.bf16 %v16808_v50 }
 0xbc0   :  { %v11633_v29 = vunpack.i.h.bf16 %v11631_v21  ;;  %v11632_v4 = vunpack.i.l.bf16 %v11631_v21 }
 0xbc1   :  { %v16949_v39 = vpop.permute.xlu0 %11605  ;;  %11920 = vrot.lane.b32.xlu1 %v16849_v61, %s18343_s12  ;;  %10743 = vmatmul.mubr.msk.bf16.vlgmr.msra.gmra.mrb[36].mxu0 %vm1926_vm15, %v7136_v26  ;;  %v12068_v61 = vld [vmem:[%s18431_s19 + $0x40] sm:$0xff]  }
 0xbc2   :  { %10781 = vmatpush3.bf16.msra.mxu0 %v16723_v14  ;;  %v7112_v14 = vsel %vm1758_vm7, %v7096_v12, %v11503_v27  ;;  %v7094_v45 = vsel %vm63_vm3, %v16641_v24, %v11633_v29  ;;  %v7093_v11 = vsel %vm63_vm3, %v16541_v55, %v11632_v4  ;;  %v8399_v27 = vld [vmem:[#allocation2 + $0x132] sm:$0xff] }
 0xbc3   :  { %11905 = vrot.lane.b32.xlu0 %v16671_v23, %s18334_s28  ;;  %v11636_v44 = vpop.permute.xlu1 %11635  ;;  %10782 = vmatprep.subr.bf16.mxu0 %v12067_v16  ;;  %v7111_v23 = vsel %vm1758_vm7, %v7095_v7, %v11502_v31  ;;  %v7128_v50 = vsel %vm1826_vm11, %v7112_v14, %v11508_v58  ;;  %v11944_v14 = vpack.i.bf16 %v8399_v27, %v16884_v54 }
 0xbc4   :  { %v11638_v33 = vunpack.i.h.bf16 %v11636_v44  ;;  %v11637_v13 = vunpack.i.l.bf16 %v11636_v44  ;;  %v7127_v5 = vsel %vm1826_vm11, %v7111_v23, %v11507_v59 }
 0xbc5   :  { %v11626_v56 = vpop.permute.xlu0 %11625  ;;  %11925 = vrot.lane.b32.xlu1 %v16900_v18, %s18342_s13 }
 0xbc6   :  { %v11628_v51 = vunpack.i.h.bf16 %v11626_v56  ;;  %v11627_v40 = vunpack.i.l.bf16 %v11626_v56  ;;  %10783 = vmatpush3.bf16.msra.mxu0 %v12067_v16  ;;  %v7109_v31 = vsel %vm1758_vm7, %v7093_v11, %v11637_v13  ;;  %v7110_v58 = vsel %vm1758_vm7, %v7094_v45, %v11638_v33 }
 0xbc7   :  { %11915 = vrot.lane.b32.xlu0 %v16788_v36, %s18343_s12  ;;  %v11641_v1 = vpop.permute.xlu1 %11640  ;;  %10784 = vmatprep.subr.bf16.mxu0 %v12068_v61  ;;  %v11518_v45 = vunpack.i.h.bf16 %v16866_v63 }
 0xbc8   :  { %v7092_v18 = vsel %vm63_vm3, %v16539_v3, %v11628_v51  ;;  %v7091_v20 = vsel %vm63_vm3, %v16613_v62, %v11627_v40  ;;  %v11643_v16 = vunpack.i.h.bf16 %v11641_v1  ;;  %v11642_v37 = vunpack.i.l.bf16 %v11641_v1 }
 0xbc9   :  { %v7107_v26 = vsel %vm1758_vm7, %v7091_v20, %v11487_v49  ;;  %v7108_v21 = vsel %vm1758_vm7, %v7092_v18, %v11488_v48  ;;  %v11661_v36 = vpop.permute.xlu0 %11660  ;;  %11935 = vrot.lane.b32.xlu1 %v16836_v46, %s18334_s28  ;;  %v7139_v46 = vpack.c.bf16 %v7128_v50, %v7127_v5  ;;  %v11513_v51 = vunpack.i.h.bf16 %v16855_v2 }
 0xbca   :  { %v7123_v59 = vsel %vm1826_vm11, %v7107_v26, %v11492_v17  ;;  %v7124_v12 = vsel %vm1826_vm11, %v7108_v21, %v11493_v19  ;;  %v7125_v7 = vsel %vm1826_vm11, %v7109_v31, %v11642_v37  ;;  %v7126_v29 = vsel %vm1826_vm11, %v7110_v58, %v11643_v16  ;;  %10785 = vmatpush3.bf16.msra.mxu0 %v12068_v61 }
 0xbcb   :  { %11930 = vrot.lane.b32.xlu0 %v16701_v15, %s18334_s28  ;;  %v7137_v4 = vpack.c.bf16 %v7124_v12, %v7123_v59  ;;  %v11663_v44 = vunpack.i.h.bf16 %v11661_v36  ;;  %v11662_v48 = vunpack.i.l.bf16 %v11661_v36  ;;  %v7138_v49 = vpack.c.bf16 %v7126_v29, %v7125_v7  ;;  %v11646_v23 = vpop.permute.xlu1 %11645  ;;  %10802 = vmatprep.subr.bf16.mxu0 %v16806_v57 }
 0xbcc   :  { %v11512_v40 = vunpack.i.l.bf16 %v16855_v2  ;;  %v11648_v33 = vunpack.i.h.bf16 %v11646_v23  ;;  %v11647_v13 = vunpack.i.l.bf16 %v11646_v23  ;;  %v11523_v12 = vunpack.i.h.bf16 %v16874_v30 }
 0xbcd   :  { %v11686_v56 = vpop.permute.xlu0 %11685  ;;  %10746 = vmatprep.mubr.msk.bf16.mxu0 %vm1926_vm15, %v7137_v4  ;;  %11945 = vrot.lane.b32.xlu1 %v11944_v14, %s18343_s12  ;;  %v7100_v15 = vsel %vm63_vm3, %v16581_v42, %v11663_v44  ;;  %v7099_v54 = vsel %vm63_vm3, %v16677_v52, %v11662_v48  ;;  %v11517_v42 = vunpack.i.l.bf16 %v16866_v63  ;;  %v11522_v7 = vunpack.i.l.bf16 %v16874_v30 }
 0xbce   :  { %10747 = vmatmul.mubr.msk.bf16.gmra.mrb[40].mxu0 %vm1926_vm15, %v7138_v49  ;;  %v7116_v50 = vsel %vm1758_vm7, %v7100_v15, %v11513_v51  ;;  %v7098_v18 = vsel %vm63_vm3, %v16675_v0, %v11648_v33  ;;  %v7097_v2 = vsel %vm63_vm3, %v16569_v34, %v11647_v13  ;;  %v11688_v29 = vunpack.i.h.bf16 %v11686_v56  ;;  %v6845_v13 = vld [vmem:[#allocation2 + $0x100] sm:$0xff] }
 0xbcf   :  { %11940 = vrot.lane.b32.xlu0 %v16858_v22, %s18343_s12  ;;  %10750 = vmatprep.mubr.msk.bf16.mxu0 %vm1926_vm15, %v7139_v46  ;;  %v11651_v61 = vpop.permute.xlu1 %11650  ;;  %v7115_v22 = vsel %vm1758_vm7, %v7099_v54, %v11512_v40  ;;  %v7132_v37 = vsel %vm1826_vm11, %v7116_v50, %v11518_v45  ;;  %v11687_v4 = vunpack.i.l.bf16 %v11686_v56  ;;  %v8091_v15 = vsel %vm63_vm3, %v16522_v53, %v11523_v12 }
 0xbd0   :  { %v11653_v17 = vunpack.i.h.bf16 %v11651_v61  ;;  %v11652_v5 = vunpack.i.l.bf16 %v11651_v61  ;;  %v7131_v16 = vsel %vm1826_vm11, %v7115_v22, %v11517_v42  ;;  %v8090_v54 = vsel %vm63_vm3, %v16520_v9, %v11522_v7 }
 0xbd1   :  { %v11696_v19 = vpop.permute.xlu0 %11695  ;;  %v7141_v34 = vpack.c.bf16 %v7132_v37, %v7131_v16  ;;  %v8107_v51 = vsel %vm1758_vm7, %v8091_v15, %v11688_v29  ;;  %v8106_v56 = vsel %vm1758_vm7, %v8090_v54, %v11687_v4  ;;  %v11552_v15 = vunpack.i.l.bf16 %v16816_v10 }
 0xbd2   :  { %v7113_v21 = vsel %vm1758_vm7, %v7097_v2, %v11652_v5  ;;  %v7114_v36 = vsel %vm1758_vm7, %v7098_v18, %v11653_v17  ;;  %v11698_v44 = vunpack.i.h.bf16 %v11696_v19  ;;  %v11697_v48 = vunpack.i.l.bf16 %v11696_v19 }
 0xbd3   :  { %v11656_v11 = vpop.permute.xlu1 %11655  ;;  %v11558_v54 = vunpack.i.h.bf16 %v16825_v47 }
 0xbd4   :  { %v11658_v1 = vunpack.i.h.bf16 %v11656_v11  ;;  %v11657_v26 = vunpack.i.l.bf16 %v11656_v11  ;;  %v8122_v40 = vsel %vm1826_vm11, %v8106_v56, %v11697_v48  ;;  %v8123_v33 = vsel %vm1826_vm11, %v8107_v51, %v11698_v44 }
 0xbd5   :  { %v11706_v20 = vpop.permute.xlu0 %11705  ;;  %v8138_v16 = vpack.c.bf16 %v8123_v33, %v8122_v40  ;;  %v17070_v40 = vld [vmem:[#allocation2 + $0x51] sm:$0xff] }
 0xbd6   :  { %v7129_v63 = vsel %vm1826_vm11, %v7113_v21, %v11657_v26  ;;  %v7130_v27 = vsel %vm1826_vm11, %v7114_v36, %v11658_v1  ;;  %v11708_v50 = vunpack.i.h.bf16 %v11706_v20  ;;  %v11707_v45 = vunpack.i.l.bf16 %v11706_v20 }
 0xbd7   :  { %v7140_v31 = vpack.c.bf16 %v7130_v27, %v7129_v63  ;;  %v11666_v58 = vpop.permute.xlu1 %11665 }
 0xbd8   :  { %v11668_v23 = vunpack.i.h.bf16 %v11666_v58  ;;  %v11667_v14 = vunpack.i.l.bf16 %v11666_v58  ;;  %v7590_v63 = vsel %vm63_vm3, %v16517_v43, %v11707_v45  ;;  %v7591_v20 = vsel %vm63_vm3, %v16602_v41, %v11708_v50 }
 0xbd9   :  { %v17025_v59 = vpop.permute.xlu0 %11710  ;;  %10751 = vmatmul.mubr.msk.bf16.gmra.mrb[44].mxu0 %vm1926_vm15, %v7140_v31 }
 0xbda   :  { %10754 = vmatprep.mubr.msk.bf16.mxu0 %vm1926_vm15, %v7141_v34  ;;  %v7102_v17 = vsel %vm63_vm3, %v16706_v32, %v11668_v23  ;;  %v7101_v53 = vsel %vm63_vm3, %v6845_v13, %v11667_v14 }
 0xbdb   :  { %v11671_v49 = vpop.permute.xlu1 %11670 }
 0xbdc   :  { %v11673_v61 = vunpack.i.h.bf16 %v11671_v49  ;;  %v11672_v30 = vunpack.i.l.bf16 %v11671_v49 }
 0xbdd   :  { %v11721_v46 = vpop.permute.xlu0 %11720 }
 0xbde   :  { %v7117_v42 = vsel %vm1758_vm7, %v7101_v53, %v11672_v30  ;;  %v7118_v11 = vsel %vm1758_vm7, %v7102_v17, %v11673_v61  ;;  %v11723_v18 = vunpack.i.h.bf16 %v11721_v46  ;;  %v11722_v2 = vunpack.i.l.bf16 %v11721_v46  ;;  %v12070_v30 = vld [vmem:[%s18431_s19 + $0x50] sm:$0xff]  }
 0xbdf   :  { %v11676_v19 = vpop.permute.xlu1 %11675  ;;  %v11553_v46 = vunpack.i.h.bf16 %v16816_v10  ;;  %v11557_v61 = vunpack.i.l.bf16 %v16825_v47 }
 0xbe0   :  { %v11678_v9 = vunpack.i.h.bf16 %v11676_v19  ;;  %v11677_v22 = vunpack.i.l.bf16 %v11676_v19  ;;  %v7606_v58 = vsel %vm1758_vm7, %v7590_v63, %v11722_v2  ;;  %v7607_v34 = vsel %vm1758_vm7, %v7591_v20, %v11723_v18 }
 0xbe1   :  { %v17042_v5 = vpop.permute.xlu0 %11725  ;;  %v11713_v63 = vunpack.i.h.bf16 %v17025_v59  ;;  %v11712_v20 = vunpack.i.l.bf16 %v17025_v59 }
 0xbe2   :  { %v7133_v1 = vsel %vm1826_vm11, %v7117_v42, %v11677_v22  ;;  %v7134_v26 = vsel %vm1826_vm11, %v7118_v11, %v11678_v9  ;;  %v12071_v11 = vld [vmem:[%s18431_s19 + $0x58] sm:$0xff]   ;;  %s18602_s19 = sld [smem:[#allocation45_spill]] }
 0xbe3   :  { %v7142_v21 = vpack.c.bf16 %v7134_v26, %v7133_v1  ;;  %v11681_v36 = vpop.permute.xlu1 %11680  ;;  %v18442_v1 = vld [vmem:[#allocation11_spill] sm:$0xff] }
 0xbe4   :  { %v11683_v29 = vunpack.i.h.bf16 %v11681_v36  ;;  %v11682_v4 = vunpack.i.l.bf16 %v11681_v36  ;;  %v11533_v26 = vunpack.i.h.bf16 %v18442_v1 }
 0xbe5   :  { %v11736_v37 = vpop.permute.xlu0 %11735  ;;  %10755 = vmatmul.mubr.msk.bf16.gmra.mrb[48].mxu0 %vm1926_vm15, %v7142_v21  ;;  %v11532_v21 = vunpack.i.l.bf16 %v18442_v1  ;;  %v12344_v1 = vld [vmem:[#allocation2 + $0xb0] sm:$0xff] }
 0xbe6   :  { %v11738_v27 = vunpack.i.h.bf16 %v11736_v37  ;;  %v11737_v31 = vunpack.i.l.bf16 %v11736_v37  ;;  %10786 = vmatprep.mubr.msk.bf16.mxu0 %vm1926_vm15, %v8138_v16  ;;  %v8093_v51 = vsel %vm63_vm3, %v16613_v62, %v11683_v29  ;;  %v8092_v56 = vsel %vm63_vm3, %v16611_v35, %v11682_v4 }
 0xbe7   :  { %v11691_v43 = vpop.permute.xlu1 %11690  ;;  %v11728_v29 = vunpack.i.h.bf16 %v17042_v5 }
 0xbe8   :  { %v7622_v12 = vsel %vm1826_vm11, %v7606_v58, %v11737_v31  ;;  %v7623_v7 = vsel %vm1826_vm11, %v7607_v34, %v11738_v27  ;;  %v11693_v23 = vunpack.i.h.bf16 %v11691_v43  ;;  %v11692_v14 = vunpack.i.l.bf16 %v11691_v43 }
 0xbe9   :  { %v7637_v44 = vpack.c.bf16 %v7623_v7, %v7622_v12  ;;  %v11746_v48 = vpop.permute.xlu0 %11745  ;;  %v8095_v31 = vsel %vm63_vm3, %v16541_v55, %v11533_v26  ;;  %v8094_v58 = vsel %vm63_vm3, %v16539_v3, %v11532_v21  ;;  %v18443_v55 = vld [vmem:[#allocation6_spill] sm:$0xff]  ;;  %v8096_v3 = vsel %vm63_vm3, %v16641_v24, %v11712_v20 }
 0xbea   :  { %v11748_v41 = vunpack.i.h.bf16 %v11746_v48  ;;  %v11747_v49 = vunpack.i.l.bf16 %v11746_v48  ;;  %v8108_v35 = vsel %vm1758_vm7, %v8092_v56, %v11692_v14  ;;  %v8109_v9 = vsel %vm1758_vm7, %v8093_v51, %v11693_v23 }
 0xbeb   :  { %10765 = vmatmul.mubr.msk.bf16.vlgmr.msra.gmra.mrb[28].mxu1 %vm1926_vm15, %v7637_v44  ;;  %v11701_v33 = vpop.permute.xlu1 %11700  ;;  %v8097_v48 = vsel %vm63_vm3, %v18443_v55, %v11713_v63 }
 0xbec   :  { %v7593_v10 = vsel %vm63_vm3, %v17070_v40, %v11748_v41  ;;  %v7592_v47 = vsel %vm63_vm3, %v16627_v60, %v11747_v49  ;;  %10827 = vmatpush3.bf16.msra.mxu1 %v16806_v57  ;;  %v11703_v62 = vunpack.i.h.bf16 %v11701_v33  ;;  %v11702_v53 = vunpack.i.l.bf16 %v11701_v33 }
 0xbed   :  { %v7609_v13 = vsel %vm1758_vm7, %v7593_v10, %v11553_v46  ;;  %v7608_v19 = vsel %vm1758_vm7, %v7592_v47, %v11552_v15  ;;  %v17079_v17 = vpop.permute.xlu0 %11750  ;;  %10825 = vmatprep.subr.bf16.mxu1 %v12070_v30 }
 0xbee   :  { %v7624_v22 = vsel %vm1826_vm11, %v7608_v19, %v11557_v61  ;;  %v7625_v60 = vsel %vm1826_vm11, %v7609_v13, %v11558_v54  ;;  %v8124_v50 = vsel %vm1826_vm11, %v8108_v35, %v11702_v53  ;;  %v8125_v45 = vsel %vm1826_vm11, %v8109_v9, %v11703_v62  ;;  %v18444_v54 = vld [vmem:[#allocation18_spill] sm:$0xff] }
 0xbef   :  { %v7638_v42 = vpack.c.bf16 %v7625_v60, %v7624_v22  ;;  %v8139_v18 = vpack.c.bf16 %v8125_v45, %v8124_v50  ;;  %v11716_v2 = vpop.permute.xlu1 %11715  ;;  %v11752_v23 = vunpack.i.l.bf16 %v17079_v17  ;;  %v11548_v61 = vunpack.i.h.bf16 %v18444_v54  ;;  %v17124_v53 = vld [vmem:[#allocation2 + $0x61] sm:$0xff] }
 0xbf0   :  { %10828 = vmatpush3.bf16.msra.mxu1 %v12070_v30  ;;  %v11718_v16 = vunpack.i.h.bf16 %v11716_v2  ;;  %v11717_v37 = vunpack.i.l.bf16 %v11716_v2  ;;  %v11547_v33 = vunpack.i.l.bf16 %v18444_v54 }
 0xbf1   :  { %v17092_v36 = vpop.permute.xlu0 %11755  ;;  %10768 = vmatprep.mubr.msk.bf16.mxu1 %vm1926_vm15, %v7638_v42  ;;  %10826 = vmatprep.subr.bf16.mxu1 %v12071_v11  ;;  %v7594_v35 = vsel %vm63_vm3, %v17124_v53, %v11752_v23  ;;  %v12343_v42 = vld [vmem:[#allocation2 + $0xc0] sm:$0xff] }
 0xbf2   :  { %10787 = vmatmul.mubr.msk.bf16.vlgmr.msra.gmra.mrb[52].mxu0 %vm1926_vm15, %v8139_v18  ;;  %v8111_v4 = vsel %vm1758_vm7, %v8095_v31, %v11718_v16  ;;  %v8110_v59 = vsel %vm1758_vm7, %v8094_v58, %v11717_v37  ;;  %v8098_v26 = vsel %vm63_vm3, %v12344_v1, %v11547_v33  ;;  %v11758_v21 = vunpack.i.h.bf16 %v17092_v36  ;;  %v18446_v23 = vld [vmem:[#allocation9_spill] sm:$0xff] }
 0xbf3   :  { %10803 = vmatpush3.bf16.msra.mxu0 %v16806_v57  ;;  %v11731_v27 = vpop.permute.xlu1 %11730  ;;  %v11727_v57 = vunpack.i.l.bf16 %v17042_v5  ;;  %v11753_v5 = vunpack.i.h.bf16 %v17079_v17  ;;  %v18445_v17 = vld [vmem:[#allocation16_spill] sm:$0xff]  ;;  %v11757_v20 = vunpack.i.l.bf16 %v17092_v36  ;;  %v11568_v6 = vunpack.i.h.bf16 %v18446_v23 }
 0xbf4   :  { %10804 = vmatprep.subr.bf16.mxu0 %v12070_v30  ;;  %10829 = vmatpush3.bf16.msra.mxu1 %v12071_v11  ;;  %v11733_v12 = vunpack.i.h.bf16 %v11731_v27  ;;  %v11732_v7 = vunpack.i.l.bf16 %v11731_v27 }
 0xbf5   :  { %v11766_v34 = vpop.permute.xlu0 %11765  ;;  %v8112_v51 = vsel %vm1758_vm7, %v8096_v3, %v11727_v57  ;;  %v7595_v62 = vsel %vm63_vm3, %v18445_v17, %v11753_v5  ;;  %v8100_v55 = vsel %vm63_vm3, %v16675_v0, %v11757_v20 }
 0xbf6   :  { %v8126_v43 = vsel %vm1826_vm11, %v8110_v59, %v11732_v7  ;;  %v8127_v44 = vsel %vm1826_vm11, %v8111_v4, %v11733_v12  ;;  %v11768_v56 = vunpack.i.h.bf16 %v11766_v34  ;;  %v11767_v24 = vunpack.i.l.bf16 %v11766_v34 }
 0xbf7   :  { %10805 = vmatpush3.bf16.msra.mxu0 %v12070_v30  ;;  %v8140_v41 = vpack.c.bf16 %v8127_v44, %v8126_v43  ;;  %v11741_v49 = vpop.permute.xlu1 %11740  ;;  %v8113_v30 = vsel %vm1758_vm7, %v8097_v48, %v11728_v29  ;;  %v8101_v44 = vsel %vm63_vm3, %v16677_v52, %v11758_v21  ;;  %v11567_v52 = vunpack.i.l.bf16 %v18446_v23 }
 0xbf8   :  { %10806 = vmatprep.subr.bf16.mxu0 %v12071_v11  ;;  %v11743_v46 = vunpack.i.h.bf16 %v11741_v49  ;;  %v11742_v15 = vunpack.i.l.bf16 %v11741_v49  ;;  %v7610_v18 = vsel %vm1758_vm7, %v7594_v35, %v11767_v24  ;;  %v7611_v2 = vsel %vm1758_vm7, %v7595_v62, %v11768_v56  ;;  %v18447_v24 = vld [vmem:[#allocation13_spill] sm:$0xff] }
 0xbf9   :  { %v11771_v14 = vpop.permute.xlu0 %11770  ;;  %10790 = vmatprep.mubr.msk.bf16.mxu0 %vm1926_vm15, %v8140_v41  ;;  %v11582_v1 = vunpack.i.l.bf16 %v18447_v24 }
 0xbfa   :  { %v8129_v10 = vsel %vm1826_vm11, %v8113_v30, %v11743_v46  ;;  %v8128_v47 = vsel %vm1826_vm11, %v8112_v51, %v11742_v15  ;;  %v11773_v12 = vunpack.i.h.bf16 %v11771_v14  ;;  %v11772_v7 = vunpack.i.l.bf16 %v11771_v14  ;;  %v12346_v51 = vld [vmem:[#allocation2 + $0xf0] sm:$0xff] }
 0xbfb   :  { %10807 = vmatpush3.bf16.msra.mxu0 %v12071_v11  ;;  %v8141_v13 = vpack.c.bf16 %v8129_v10, %v8128_v47  ;;  %v11761_v19 = vpop.permute.xlu1 %11760  ;;  %v8099_v11 = vsel %vm63_vm3, %v12343_v42, %v11548_v61  ;;  %v12345_v61 = vld [vmem:[#allocation2 + $0x100] sm:$0xff]  ;;  %v8102_v56 = vsel %vm63_vm3, %v12346_v51, %v11567_v52  ;;  %v11583_v10 = vunpack.i.h.bf16 %v18447_v24  ;;  %v17193_v24 = vld [vmem:[#allocation2 + $0xf1] sm:$0xff] }
 0xbfc   :  { %v11763_v50 = vunpack.i.h.bf16 %v11761_v19  ;;  %v11762_v45 = vunpack.i.l.bf16 %v11761_v19  ;;  %v8116_v49 = vsel %vm1758_vm7, %v8100_v55, %v11772_v7  ;;  %v8117_v5 = vsel %vm1758_vm7, %v8101_v44, %v11773_v12  ;;  %v12348_v52 = vld [vmem:[#allocation2 + $0x21] sm:$0xff] }
 0xbfd   :  { %v11781_v9 = vpop.permute.xlu0 %11780  ;;  %10791 = vmatmul.mubr.msk.bf16.gmra.mrb[56].mxu0 %vm1926_vm15, %v8141_v13  ;;  %v8103_v30 = vsel %vm63_vm3, %v12345_v61, %v11568_v6 }
 0xbfe   :  { %v11783_v22 = vunpack.i.h.bf16 %v11781_v9  ;;  %v11782_v60 = vunpack.i.l.bf16 %v11781_v9  ;;  %v8115_v29 = vsel %vm1758_vm7, %v8099_v11, %v11763_v50  ;;  %v8114_v57 = vsel %vm1758_vm7, %v8098_v26, %v11762_v45  ;;  %v18448_v26 = vld [vmem:[#allocation17_spill] sm:$0xff] }
 0xbff   :  { %v11776_v63 = vpop.permute.xlu1 %11775 }
 0xc00   :  { %v7626_v16 = vsel %vm1826_vm11, %v7610_v18, %v11782_v60  ;;  %v7627_v37 = vsel %vm1826_vm11, %v7611_v2, %v11783_v22  ;;  %v11778_v58 = vunpack.i.h.bf16 %v11776_v63  ;;  %v11777_v34 = vunpack.i.l.bf16 %v11776_v63 }
 0xc01   :  { %v7639_v27 = vpack.c.bf16 %v7627_v37, %v7626_v16  ;;  %v11791_v31 = vpop.permute.xlu0 %11790  ;;  %v17168_v16 = vld [vmem:[#allocation2 + $0xc1] sm:$0xff] }
 0xc02   :  { %v8130_v4 = vsel %vm1826_vm11, %v8114_v57, %v11777_v34  ;;  %v8131_v59 = vsel %vm1826_vm11, %v8115_v29, %v11778_v58  ;;  %v11793_v47 = vunpack.i.h.bf16 %v11791_v31  ;;  %v11792_v33 = vunpack.i.l.bf16 %v11791_v31 }
 0xc03   :  { %10769 = vmatmul.mubr.msk.bf16.gmra.mrb[32].mxu1 %vm1926_vm15, %v7639_v27  ;;  %v8142_v43 = vpack.c.bf16 %v8131_v59, %v8130_v4  ;;  %v11786_v36 = vpop.permute.xlu1 %11785  ;;  %v18449_v27 = vld [vmem:[#allocation7_spill] sm:$0xff] }
 0xc04   :  { %10772 = vmatprep.mubr.msk.bf16.mxu1 %vm1926_vm15, %v7640_v25  ;;  %v11788_v3 = vunpack.i.h.bf16 %v11786_v36  ;;  %v11787_v41 = vunpack.i.l.bf16 %v11786_v36  ;;  %v7599_v21 = vsel %vm63_vm3, %v18448_v26, %v11793_v47  ;;  %v7598_v37 = vsel %vm63_vm3, %v17168_v16, %v11792_v33  ;;  %v17197_v33 = vld [vmem:[#allocation2 + $0xe1] sm:$0xff] }
 0xc05   :  { %v11796_v48 = vpop.permute.xlu0 %11795  ;;  %10794 = vmatprep.mubr.msk.bf16.mxu0 %vm1926_vm15, %v8142_v43 }
 0xc06   :  { %v8133_v38 = vsel %vm1826_vm11, %v8117_v5, %v11788_v3  ;;  %v8132_v25 = vsel %vm1826_vm11, %v8116_v49, %v11787_v41  ;;  %v11798_v19 = vunpack.i.h.bf16 %v11796_v48  ;;  %v11797_v17 = vunpack.i.l.bf16 %v11796_v48 }
 0xc07   :  { %v8143_v14 = vpack.c.bf16 %v8133_v38, %v8132_v25  ;;  %v11801_v46 = vpop.permute.xlu1 %11800 }
 0xc08   :  { %v11803_v15 = vunpack.i.h.bf16 %v11801_v46  ;;  %v11802_v54 = vunpack.i.l.bf16 %v11801_v46  ;;  %v8105_v31 = vsel %vm63_vm3, %v18449_v27, %v11798_v19  ;;  %v8104_v58 = vsel %vm63_vm3, %v16706_v32, %v11797_v17  ;;  %v12349_v46 = vld [vmem:[#allocation2 + $0x11] sm:$0xff] }
 0xc09   :  { %v11806_v0 = vpop.permute.xlu0 %11805  ;;  %10795 = vmatmul.mubr.msk.bf16.gmra.mrb[60].mxu0 %vm1926_vm15, %v8143_v14  ;;  %v8561_v14 = vsel %vm63_vm3, %v12348_v52, %v11583_v10 }
 0xc0a   :  { %v8119_v22 = vsel %vm1758_vm7, %v8103_v30, %v11803_v15  ;;  %v8118_v60 = vsel %vm1758_vm7, %v8102_v56, %v11802_v54  ;;  %v11808_v42 = vunpack.i.h.bf16 %v11806_v0  ;;  %v11807_v11 = vunpack.i.l.bf16 %v11806_v0  ;;  %v18450_v15 = vld [vmem:[#allocation19_spill] sm:$0xff] }
 0xc0b   :  { %v11816_v13 = vpop.permute.xlu1 %11815  ;;  %v8560_v0 = vsel %vm63_vm3, %v12349_v46, %v11582_v1  ;;  %v11588_v54 = vunpack.i.h.bf16 %v18450_v15  ;;  %v11587_v61 = vunpack.i.l.bf16 %v18450_v15  ;;  %v18451_v30 = vld [vmem:[#allocation15_spill] sm:$0xff] }
 0xc0c   :  { %v11818_v35 = vunpack.i.h.bf16 %v11816_v13  ;;  %v11817_v9 = vunpack.i.l.bf16 %v11816_v13  ;;  %v7614_v43 = vsel %vm1758_vm7, %v7598_v37, %v11807_v11  ;;  %v7615_v36 = vsel %vm1758_vm7, %v7599_v21, %v11808_v42 }
 0xc0d   :  { %v11811_v62 = vpop.permute.xlu0 %11810  ;;  %v11593_v51 = vunpack.i.h.bf16 %v18451_v30  ;;  %v11592_v56 = vunpack.i.l.bf16 %v18451_v30 }
 0xc0e   :  { %v11813_v50 = vunpack.i.h.bf16 %v11811_v62  ;;  %v11812_v45 = vunpack.i.l.bf16 %v11811_v62  ;;  %v8134_v18 = vsel %vm1826_vm11, %v8118_v60, %v11817_v9  ;;  %v8135_v2 = vsel %vm1826_vm11, %v8119_v22, %v11818_v35 }
 0xc0f   :  { %v8144_v63 = vpack.c.bf16 %v8135_v2, %v8134_v18  ;;  %v11826_v20 = vpop.permute.xlu1 %11825 }
 0xc10   :  { %v11828_v12 = vunpack.i.h.bf16 %v11826_v20  ;;  %v11827_v7 = vunpack.i.l.bf16 %v11826_v20  ;;  %v8120_v29 = vsel %vm1758_vm7, %v8104_v58, %v11812_v45  ;;  %v8121_v57 = vsel %vm1758_vm7, %v8105_v31, %v11813_v50 }
 0xc11   :  { %v11821_v34 = vpop.permute.xlu0 %11820  ;;  %10798 = vmatprep.mubr.msk.bf16.mxu0 %vm1926_vm15, %v8144_v63 }
 0xc12   :  { %v11823_v4 = vunpack.i.h.bf16 %v11821_v34  ;;  %v11822_v59 = vunpack.i.l.bf16 %v11821_v34  ;;  %v8137_v44 = vsel %vm1826_vm11, %v8121_v57, %v11828_v12  ;;  %v8136_v55 = vsel %vm1826_vm11, %v8120_v29, %v11827_v7 }
 0xc13   :  { %v8145_v3 = vpack.c.bf16 %v8137_v44, %v8136_v55  ;;  %v11846_v41 = vpop.permute.xlu1 %11845 }
 0xc14   :  { %v7630_v32 = vsel %vm1826_vm11, %v7614_v43, %v11822_v59  ;;  %v7631_v48 = vsel %vm1826_vm11, %v7615_v36, %v11823_v4  ;;  %v11848_v38 = vunpack.i.h.bf16 %v11846_v41  ;;  %v11847_v25 = vunpack.i.l.bf16 %v11846_v41  ;;  %v12352_v4 = vld [vmem:[#allocation2 + $0x41] sm:$0xff]  ;;  %v12353_v43 = vld [vmem:[#allocation2 + $0x31] sm:$0xff] }
 0xc15   :  { %v7641_v49 = vpack.c.bf16 %v7631_v48, %v7630_v32  ;;  %v11831_v5 = vpop.permute.xlu0 %11830  ;;  %10799 = vmatmul.mubr.msk.bf16.gmra.mrb[64].mxu0 %vm1926_vm15, %v8145_v3  ;;  %v17215_v41 = vld [vmem:[#allocation2 + $0x111] sm:$0xff] }
 0xc16   :  { %v11833_v23 = vunpack.i.h.bf16 %v11831_v5  ;;  %v11832_v6 = vunpack.i.l.bf16 %v11831_v5  ;;  %v8577_v22 = vsel %vm1758_vm7, %v8561_v14, %v11848_v38  ;;  %v8576_v60 = vsel %vm1758_vm7, %v8560_v0, %v11847_v25  ;;  %v17221_v38 = vld [vmem:[#allocation2 + $0x101] sm:$0xff] }
 0xc17   :  { %10773 = vmatmul.mubr.msk.bf16.gmra.mrb[36].mxu1 %vm1926_vm15, %v7641_v49  ;;  %v11861_v13 = vpop.permute.xlu1 %11860 }
 0xc18   :  { %v7601_v47 = vsel %vm63_vm3, %v17193_v24, %v11833_v23  ;;  %v7600_v10 = vsel %vm63_vm3, %v17197_v33, %v11832_v6  ;;  %v11863_v35 = vunpack.i.h.bf16 %v11861_v13  ;;  %v11862_v9 = vunpack.i.l.bf16 %v11861_v13 }
 0xc19   :  { %v7617_v19 = vsel %vm1758_vm7, %v7601_v47, %v11588_v54  ;;  %v7616_v17 = vsel %vm1758_vm7, %v7600_v10, %v11587_v61  ;;  %v11836_v62 = vpop.permute.xlu0 %11835  ;;  %v11598_v54 = vunpack.i.h.bf16 %v16913_v28 }
 0xc1a   :  { %v7632_v50 = vsel %vm1826_vm11, %v7616_v17, %v11592_v56  ;;  %v7633_v45 = vsel %vm1826_vm11, %v7617_v19, %v11593_v51  ;;  %v8592_v42 = vsel %vm1826_vm11, %v8576_v60, %v11862_v9  ;;  %v8593_v11 = vsel %vm1826_vm11, %v8577_v22, %v11863_v35 }
 0xc1b   :  { %v7642_v18 = vpack.c.bf16 %v7633_v45, %v7632_v50  ;;  %v8608_v2 = vpack.c.bf16 %v8593_v11, %v8592_v42  ;;  %v11871_v1 = vpop.permute.xlu1 %11870  ;;  %v11838_v31 = vunpack.i.h.bf16 %v11836_v62  ;;  %v11837_v58 = vunpack.i.l.bf16 %v11836_v62 }
 0xc1c   :  { %v11873_v12 = vunpack.i.h.bf16 %v11871_v1  ;;  %v11872_v7 = vunpack.i.l.bf16 %v11871_v1  ;;  %v11597_v56 = vunpack.i.l.bf16 %v16913_v28  ;;  %v8565_v45 = vsel %vm63_vm3, %v17124_v53, %v11598_v54  ;;  %v12356_v28 = vld [vmem:[#allocation2 + $0x81] sm:$0xff] }
 0xc1d   :  { %v11841_v26 = vpop.permute.xlu0 %11840  ;;  %10776 = vmatprep.mubr.msk.bf16.mxu1 %vm1926_vm15, %v7642_v18  ;;  %10808 = vmatprep.mubr.msk.bf16.mxu0 %vm1926_vm15, %v8608_v2  ;;  %v7603_v49 = vsel %vm63_vm3, %v17215_v41, %v11838_v31  ;;  %v7602_v25 = vsel %vm63_vm3, %v17221_v38, %v11837_v58  ;;  %v12357_v18 = vld [vmem:[#allocation2 + $0x71] sm:$0xff]  ;;  %v11603_v31 = vunpack.i.h.bf16 %v16932_v8 }
 0xc1e   :  { %v11843_v63 = vunpack.i.h.bf16 %v11841_v26  ;;  %v11842_v20 = vunpack.i.l.bf16 %v11841_v26  ;;  %v8564_v42 = vsel %vm63_vm3, %v17070_v40, %v11597_v56  ;;  %v11607_v56 = vunpack.i.l.bf16 %v16949_v39 }
 0xc1f   :  { %v11876_v21 = vpop.permute.xlu1 %11875 }
 0xc20   :  { %v8563_v59 = vsel %vm63_vm3, %v12352_v4, %v11843_v63  ;;  %v8562_v36 = vsel %vm63_vm3, %v12353_v43, %v11842_v20  ;;  %v11878_v47 = vunpack.i.h.bf16 %v11876_v21  ;;  %v11877_v10 = vunpack.i.l.bf16 %v11876_v21 }
 0xc21   :  { %v11851_v37 = vpop.permute.xlu0 %11850 }
 0xc22   :  { %v11853_v44 = vunpack.i.h.bf16 %v11851_v37  ;;  %v11852_v55 = vunpack.i.l.bf16 %v11851_v37  ;;  %v8567_v11 = vsel %vm63_vm3, %v12356_v28, %v11878_v47  ;;  %v8566_v2 = vsel %vm63_vm3, %v12357_v18, %v11877_v10 }
 0xc23   :  { %v11886_v27 = vpop.permute.xlu1 %11885 }
 0xc24   :  { %v7618_v0 = vsel %vm1758_vm7, %v7602_v25, %v11852_v55  ;;  %v7619_v15 = vsel %vm1758_vm7, %v7603_v49, %v11853_v44  ;;  %v11888_v17 = vunpack.i.h.bf16 %v11886_v27  ;;  %v11887_v62 = vunpack.i.l.bf16 %v11886_v27  ;;  %v12359_v25 = vld [vmem:[#allocation2 + $0xd1] sm:$0xff] }
 0xc25   :  { %v11856_v34 = vpop.permute.xlu0 %11855 }
 0xc26   :  { %v11858_v29 = vunpack.i.h.bf16 %v11856_v34  ;;  %v11857_v57 = vunpack.i.l.bf16 %v11856_v34  ;;  %v8582_v26 = vsel %vm1758_vm7, %v8566_v2, %v11887_v62  ;;  %v8583_v21 = vsel %vm1758_vm7, %v8567_v11, %v11888_v17  ;;  %v12360_v11 = vld [vmem:[#allocation2 + $0x121] sm:$0xff] }
 0xc27   :  { %v11896_v3 = vpop.permute.xlu1 %11895 }
 0xc28   :  { %v8578_v32 = vsel %vm1758_vm7, %v8562_v36, %v11857_v57  ;;  %v8579_v48 = vsel %vm1758_vm7, %v8563_v59, %v11858_v29  ;;  %v11898_v35 = vunpack.i.h.bf16 %v11896_v3  ;;  %v11897_v9 = vunpack.i.l.bf16 %v11896_v3 }
 0xc29   :  { %v8594_v5 = vsel %vm1826_vm11, %v8578_v32, %v11872_v7  ;;  %v8595_v23 = vsel %vm1826_vm11, %v8579_v48, %v11873_v12  ;;  %v11866_v6 = vpop.permute.xlu0 %11865  ;;  %v11602_v7 = vunpack.i.l.bf16 %v16932_v8  ;;  %v12358_v8 = vld [vmem:[#allocation2 + $0xb1] sm:$0xff] }
 0xc2a   :  { %v8609_v52 = vpack.c.bf16 %v8595_v23, %v8594_v5  ;;  %v11868_v14 = vunpack.i.h.bf16 %v11866_v6  ;;  %v11867_v46 = vunpack.i.l.bf16 %v11866_v6  ;;  %v8598_v20 = vsel %vm1826_vm11, %v8582_v26, %v11897_v9 }
 0xc2b   :  { %v11901_v51 = vpop.permute.xlu1 %11900  ;;  %v8599_v53 = vsel %vm1826_vm11, %v8583_v21, %v11898_v35  ;;  %v8569_v5 = vsel %vm63_vm3, %v17168_v16, %v11603_v31  ;;  %v8568_v23 = vsel %vm63_vm3, %v12358_v8, %v11602_v7 }
 0xc2c   :  { %v7634_v61 = vsel %vm1826_vm11, %v7618_v0, %v11867_v46  ;;  %v7635_v30 = vsel %vm1826_vm11, %v7619_v15, %v11868_v14  ;;  %10809 = vmatmul.mubr.msk.bf16.vlgmr.msra.gmra.mrb[68].mxu0 %vm1926_vm15, %v8609_v52  ;;  %v11903_v29 = vunpack.i.h.bf16 %v11901_v51  ;;  %v11902_v57 = vunpack.i.l.bf16 %v11901_v51 }
 0xc2d   :  { %v7643_v13 = vpack.c.bf16 %v7635_v30, %v7634_v61  ;;  %v11881_v19 = vpop.permute.xlu0 %11880  ;;  %v8611_v43 = vpack.c.bf16 %v8599_v53, %v8598_v20 }
 0xc2e   :  { %v11883_v22 = vunpack.i.h.bf16 %v11881_v19  ;;  %v11882_v60 = vunpack.i.l.bf16 %v11881_v19  ;;  %v8571_v6 = vsel %vm63_vm3, %v17197_v33, %v11903_v29  ;;  %v8570_v52 = vsel %vm63_vm3, %v12359_v25, %v11902_v57 }
 0xc2f   :  { %10777 = vmatmul.mubr.msk.bf16.gmra.mrb[40].mxu1 %vm1926_vm15, %v7643_v13  ;;  %v11911_v50 = vpop.permute.xlu1 %11910  ;;  %v11608_v33 = vunpack.i.h.bf16 %v16949_v39  ;;  %v8572_v39 = vsel %vm63_vm3, %v17193_v24, %v11607_v56 }
 0xc30   :  { %v8581_v27 = vsel %vm1758_vm7, %v8565_v45, %v11883_v22  ;;  %v8580_v40 = vsel %vm1758_vm7, %v8564_v42, %v11882_v60  ;;  %v11913_v36 = vunpack.i.h.bf16 %v11911_v50  ;;  %v11912_v44 = vunpack.i.l.bf16 %v11911_v50 }
 0xc31   :  { %v11891_v1 = vpop.permute.xlu0 %11890  ;;  %v8573_v42 = vsel %vm63_vm3, %v17221_v38, %v11608_v33 }
 0xc32   :  { %v11893_v37 = vunpack.i.h.bf16 %v11891_v1  ;;  %v11892_v63 = vunpack.i.l.bf16 %v11891_v1  ;;  %v8586_v46 = vsel %vm1758_vm7, %v8570_v52, %v11912_v44  ;;  %v8587_v0 = vsel %vm1758_vm7, %v8571_v6, %v11913_v36 }
 0xc33   :  { %v11921_v12 = vpop.permute.xlu1 %11920 }
 0xc34   :  { %v8596_v58 = vsel %vm1826_vm11, %v8580_v40, %v11892_v63  ;;  %v8597_v34 = vsel %vm1826_vm11, %v8581_v27, %v11893_v37  ;;  %v11923_v48 = vunpack.i.h.bf16 %v11921_v12  ;;  %v11922_v3 = vunpack.i.l.bf16 %v11921_v12 }
 0xc35   :  { %v8610_v4 = vpack.c.bf16 %v8597_v34, %v8596_v58  ;;  %v11906_v59 = vpop.permute.xlu0 %11905 }
 0xc36   :  { %v11908_v55 = vunpack.i.h.bf16 %v11906_v59  ;;  %v11907_v32 = vunpack.i.l.bf16 %v11906_v59  ;;  %v8602_v30 = vsel %vm1826_vm11, %v8586_v46, %v11922_v3  ;;  %v8603_v51 = vsel %vm1826_vm11, %v8587_v0, %v11923_v48 }
 0xc37   :  { %10812 = vmatprep.mubr.msk.bf16.mxu1 %vm1926_vm15, %v8610_v4  ;;  %v11926_v49 = vpop.permute.xlu1 %11925  ;;  %v8613_v9 = vpack.c.bf16 %v8603_v51, %v8602_v30 }
 0xc38   :  { %10813 = vmatmul.mubr.msk.bf16.vlgmr.msra.gmra.mrb[44].mxu1 %vm1926_vm15, %v8611_v43  ;;  %v8585_v61 = vsel %vm1758_vm7, %v8569_v5, %v11908_v55  ;;  %v8584_v16 = vsel %vm1758_vm7, %v8568_v23, %v11907_v32  ;;  %v11928_v17 = vunpack.i.h.bf16 %v11926_v49  ;;  %v11927_v62 = vunpack.i.l.bf16 %v11926_v49 }
 0xc39   :  { %v11916_v14 = vpop.permute.xlu0 %11915 }
 0xc3a   :  { %v11918_v15 = vunpack.i.h.bf16 %v11916_v14  ;;  %v11917_v54 = vunpack.i.l.bf16 %v11916_v14  ;;  %v8575_v18 = vsel %vm63_vm3, %v12360_v11, %v11928_v17  ;;  %v8574_v2 = vsel %vm63_vm3, %v17215_v41, %v11927_v62  ;;  %vm18453_vm3 = vmmov %vm18452_vm0 }
 0xc3b   :  { %v11936_v13 = vpop.permute.xlu1 %11935 }
 0xc3c   :  { %v8600_v47 = vsel %vm1826_vm11, %v8584_v16, %v11917_v54  ;;  %v8601_v10 = vsel %vm1826_vm11, %v8585_v61, %v11918_v15  ;;  %v11938_v22 = vunpack.i.h.bf16 %v11936_v13  ;;  %v11937_v60 = vunpack.i.l.bf16 %v11936_v13 }
 0xc3d   :  { %v8612_v19 = vpack.c.bf16 %v8601_v10, %v8600_v47  ;;  %v11931_v35 = vpop.permute.xlu0 %11930 }
 0xc3e   :  { %v11933_v50 = vunpack.i.h.bf16 %v11931_v35  ;;  %v11932_v45 = vunpack.i.l.bf16 %v11931_v35  ;;  %v8590_v37 = vsel %vm1758_vm7, %v8574_v2, %v11937_v60  ;;  %v8591_v63 = vsel %vm1758_vm7, %v8575_v18, %v11938_v22 }
 0xc3f   :  { %10816 = vmatprep.mubr.msk.bf16.mxu1 %vm1926_vm15, %v8612_v19  ;;  %v11946_v28 = vpop.permute.xlu1 %11945 }
 0xc40   :  { %10817 = vmatmul.mubr.msk.bf16.gmra.mrb[48].mxu1 %vm1926_vm15, %v8613_v9  ;;  %v11948_v26 = vunpack.i.h.bf16 %v11946_v28  ;;  %v11947_v21 = vunpack.i.l.bf16 %v11946_v28  ;;  %v8589_v24 = vsel %vm1758_vm7, %v8573_v42, %v11933_v50  ;;  %v8588_v53 = vsel %vm1758_vm7, %v8572_v39, %v11932_v45  ;;  %vm18454_vm7 = vmmov %vm18452_vm0 }
 0xc41   :  { %v11941_v1 = vpop.permute.xlu0 %11940 }
 0xc42   :  { %v11943_v38 = vunpack.i.h.bf16 %v11941_v1  ;;  %v11942_v20 = vunpack.i.l.bf16 %v11941_v1  ;;  %v8606_v27 = vsel %vm1826_vm11, %v8590_v37, %v11947_v21  ;;  %v8607_v40 = vsel %vm1826_vm11, %v8591_v63, %v11948_v26 }
 0xc43   :  { %v8615_v58 = vpack.c.bf16 %v8607_v40, %v8606_v27 }
 0xc44   :  { %v8604_v31 = vsel %vm1826_vm11, %v8588_v53, %v11942_v20  ;;  %v8605_v41 = vsel %vm1826_vm11, %v8589_v24, %v11943_v38  ;;  %vm18455_vm11 = vmmov %vm18452_vm0 }
 0xc45   :  { %v8614_v34 = vpack.c.bf16 %v8605_v41, %v8604_v31 }
 0xc47   :  { %10820 = vmatprep.mubr.msk.bf16.mxu1 %vm1926_vm15, %v8614_v34 }
 0xc48   :  { %10821 = vmatmul.mubr.msk.bf16.gmra.mrb[52].mxu1 %vm1926_vm15, %v8615_v58  ;;  %vm18456_vm15 = vmmov %vm18452_vm0 }
 0xc94   :  { %v17286_v12 = vpop.f32.mrb[36].mxu0 }
 0xc95   :  { %v17288_v7 = vpop.f32.mrb[37].mxu0  ;;  %v7328_v59 = vmul.f32 %v17286_v12, %v17286_v12  ;;  %v7291_v32 = vsel %vm18454_vm7, %v17286_v12, 0.0  ;;  %vm18469_vm7 = vmmov %vm18452_vm0 }
 0xc96   :  { %v7326_v29 = vmul.f32 %v17288_v7, %v17288_v7  ;;  %v17292_v57 = vpop.f32.mrb[38].mxu0  ;;  %v7288_v43 = vsel %vm18452_vm0, %v17288_v7, 0.0 }
 0xc97   :  { %v17294_v4 = vpop.f32.mrb[39].mxu0  ;;  %v7329_v3 = vmul.f32 %v17292_v57, %v17292_v57  ;;  %v7345_v23 = vsel %vm18457_vm5, %v7328_v59, 0.0  ;;  %v7293_v6 = vsel %vm18458_vm8, %v17292_v57, 0.0  ;;  %vm18472_vm5 = vmmov %vm18452_vm0 }
 0xc98   :  { %v7289_v36 = vsel %vm18453_vm3, %v17294_v4, 0.0  ;;  %v7327_v44 = vmul.f32 %v17294_v4, %v17294_v4  ;;  %v7342_v48 = vsel %vm18455_vm11, %v7326_v29, 0.0  ;;  %vm18468_vm3 = vmmov %vm18452_vm0 }
 0xc99   :  { %v7290_v55 = vadd.f32 %v7289_v36, %v7288_v43  ;;  %v7347_v14 = vsel %vm18459_vm12, %v7329_v3, 0.0  ;;  %vm18470_vm11 = vmmov %vm18452_vm0 }
 0xc9a   :  { %v7343_v49 = vsel %vm18456_vm15, %v7327_v44, 0.0  ;;  %vm18471_vm15 = vmmov %vm18452_vm0 }
 0xc9b   :  { %v7292_v5 = vadd.f32 %v7291_v32, %v7290_v55  ;;  %v7344_v8 = vadd.f32 %v7343_v49, %v7342_v48  ;;  %vm18473_vm8 = vmmov %vm18452_vm0 }
 0xc9c   :  { %vm18474_vm12 = vmmov %vm18452_vm0 }
 0xc9d   :  { %v7346_v25 = vadd.f32 %v7345_v23, %v7344_v8  ;;  %v7294_v52 = vadd.f32 %v7293_v6, %v7292_v5 }
 0xc9f   :  { %v7348_v46 = vadd.f32 %v7347_v14, %v7346_v25 }
 0xca1   :  { %v17314_v0 = vpop.f32.mrb[40].mxu0 }
 0xca2   :  { %v17316_v15 = vpop.f32.mrb[41].mxu0  ;;  %v7332_v33 = vmul.f32 %v17314_v0, %v17314_v0  ;;  %v7299_v17 = vsel %vm18463_vm6, %v17314_v0, 0.0  ;;  %vm18478_vm6 = vmmov %vm18452_vm0 }
 0xca3   :  { %v7295_v54 = vsel %vm18460_vm1, %v17316_v15, 0.0  ;;  %v7330_v61 = vmul.f32 %v17316_v15, %v17316_v15  ;;  %v17322_v16 = vpop.f32.mrb[42].mxu0  ;;  %vm18475_vm1 = vmmov %vm18452_vm0 }
 0xca4   :  { %v7296_v30 = vadd.f32 %v7295_v54, %v7294_v52  ;;  %v17324_v51 = vpop.f32.mrb[43].mxu0  ;;  %v7333_v62 = vmul.f32 %v17322_v16, %v17322_v16  ;;  %v7353_v60 = vsel %vm18465_vm10, %v7332_v33, 0.0  ;;  %v7301_v50 = vsel %vm18466_vm14, %v17322_v16, 0.0  ;;  %vm18480_vm10 = vmmov %vm18452_vm0 }
 0xca5   :  { %v7349_v56 = vsel %vm18461_vm2, %v7330_v61, 0.0  ;;  %v7297_v47 = vsel %vm18462_vm4, %v17324_v51, 0.0  ;;  %v7331_v10 = vmul.f32 %v17324_v51, %v17324_v51  ;;  %vm18476_vm2 = vmmov %vm18452_vm0 }
 0xca6   :  { %v7350_v13 = vadd.f32 %v7349_v56, %v7348_v46  ;;  %v7298_v19 = vadd.f32 %v7297_v47, %v7296_v30  ;;  %v7355_v39 = vsel %vm18467_vm13, %v7333_v62, 0.0  ;;  %vm18477_vm4 = vmmov %vm18452_vm0 }
 0xca7   :  { %v7351_v35 = vsel %vm18464_vm9, %v7331_v10, 0.0  ;;  %vm18479_vm9 = vmmov %vm18452_vm0 }
 0xca8   :  { %v7300_v9 = vadd.f32 %v7299_v17, %v7298_v19  ;;  %v7352_v22 = vadd.f32 %v7351_v35, %v7350_v13  ;;  %vm18481_vm14 = vmmov %vm18452_vm0 }
 0xca9   :  { %vm18482_vm13 = vmmov %vm18452_vm0 }
 0xcaa   :  { %v7354_v45 = vadd.f32 %v7353_v60, %v7352_v22  ;;  %v7302_v42 = vadd.f32 %v7301_v50, %v7300_v9 }
 0xcac   :  { %v7356_v28 = vadd.f32 %v7355_v39, %v7354_v45  ;;  %v17342_v11 = vpop.f32.mrb[44].mxu0 }
 0xcad   :  { %v17344_v18 = vpop.f32.mrb[45].mxu0  ;;  %v7336_v63 = vmul.f32 %v17342_v11, %v17342_v11  ;;  %v7307_v40 = vsel %vm18470_vm11, %v17342_v11, 0.0  ;;  %vm18485_vm11 = vmmov %vm18452_vm0 }
 0xcae   :  { %v7303_v2 = vsel %vm18452_vm0, %v17344_v18, 0.0  ;;  %v7334_v1 = vmul.f32 %v17344_v18, %v17344_v18  ;;  %v17350_v26 = vpop.f32.mrb[46].mxu0 }
 0xcaf   :  { %v7304_v21 = vadd.f32 %v7303_v2, %v7302_v42  ;;  %v17352_v37 = vpop.f32.mrb[47].mxu0  ;;  %v7337_v31 = vmul.f32 %v17350_v26, %v17350_v26  ;;  %v7361_v29 = vsel %vm18472_vm5, %v7336_v63, 0.0  ;;  %v7309_v59 = vsel %vm18473_vm8, %v17350_v26, 0.0  ;;  %vm18488_vm5 = vmmov %vm18452_vm0 }
 0xcb0   :  { %v7357_v38 = vsel %vm18468_vm3, %v7334_v1, 0.0  ;;  %v7305_v20 = vsel %vm18469_vm7, %v17352_v37, 0.0  ;;  %v7335_v24 = vmul.f32 %v17352_v37, %v17352_v37  ;;  %vm18483_vm3 = vmmov %vm18452_vm0 }
 0xcb1   :  { %v7358_v53 = vadd.f32 %v7357_v38, %v7356_v28  ;;  %v7306_v27 = vadd.f32 %v7305_v20, %v7304_v21  ;;  %v7363_v44 = vsel %vm18474_vm12, %v7337_v31, 0.0  ;;  %vm18484_vm7 = vmmov %vm18452_vm0 }
 0xcb2   :  { %v7359_v41 = vsel %vm18471_vm15, %v7335_v24, 0.0  ;;  %vm18486_vm15 = vmmov %vm18452_vm0 }
 0xcb3   :  { %v7308_v58 = vadd.f32 %v7307_v40, %v7306_v27  ;;  %v7360_v34 = vadd.f32 %v7359_v41, %v7358_v53  ;;  %vm18489_vm8 = vmmov %vm18452_vm0 }
 0xcb4   :  { %vm18492_vm12 = vmmov %vm18452_vm0 }
 0xcb5   :  { %v7362_v43 = vadd.f32 %v7361_v29, %v7360_v34  ;;  %v7310_v36 = vadd.f32 %v7309_v59, %v7308_v58 }
 0xcb7   :  { %v7364_v55 = vadd.f32 %v7363_v44, %v7362_v43 }
 0xcb8   :  { %v17370_v32 = vpop.f32.mrb[48].mxu0 }
 0xcb9   :  { %v17372_v48 = vpop.f32.mrb[49].mxu0  ;;  %v7340_v6 = vmul.f32 %v17370_v32, %v17370_v32  ;;  %v7315_v30 = vsel %vm18478_vm6, %v17370_v32, 0.0  ;;  %vm18496_vm6 = vmmov %vm18452_vm0 }
 0xcba   :  { %v7311_v3 = vsel %vm18475_vm1, %v17372_v48, 0.0  ;;  %v7338_v49 = vmul.f32 %v17372_v48, %v17372_v48  ;;  %v17378_v5 = vpop.f32.mrb[50].mxu0  ;;  %vm18493_vm1 = vmmov %vm18452_vm0 }
 0xcbb   :  { %v7312_v8 = vadd.f32 %v7311_v3, %v7310_v36  ;;  %v17380_v23 = vpop.f32.mrb[51].mxu0  ;;  %v7341_v33 = vmul.f32 %v17378_v5, %v17378_v5  ;;  %v7369_v17 = vsel %vm18480_vm10, %v7340_v6, 0.0  ;;  %v7317_v62 = vsel %vm18481_vm14, %v17378_v5, 0.0  ;;  %vm18498_vm10 = vmmov %vm18452_vm0 }
 0xcbc   :  { %v7365_v25 = vsel %vm18476_vm2, %v7338_v49, 0.0  ;;  %v7313_v52 = vsel %vm18477_vm4, %v17380_v23, 0.0  ;;  %v7339_v14 = vmul.f32 %v17380_v23, %v17380_v23  ;;  %vm18494_vm2 = vmmov %vm18452_vm0 }
 0xcbd   :  { %v7366_v46 = vadd.f32 %v7365_v25, %v7364_v55  ;;  %v7314_v54 = vadd.f32 %v7313_v52, %v7312_v8  ;;  %v7371_v42 = vsel %vm18483_vm3, %v7341_v33, 0.0  ;;  %vm18495_vm4 = vmmov %vm18452_vm0 }
 0xcbe   :  { %v17389_v61 = vpop.f32.mrb[28].mxu1  ;;  %v7367_v56 = vsel %vm18479_vm9, %v7339_v14, 0.0  ;;  %vm18497_vm9 = vmmov %vm18452_vm0 }
 0xcbf   :  { %v17396_v47 = vpop.f32.mrb[29].mxu1  ;;  %v7316_v10 = vadd.f32 %v7315_v30, %v7314_v54  ;;  %v7368_v13 = vadd.f32 %v7367_v56, %v7366_v46  ;;  %v7830_v39 = vmul.f32 %v17389_v61, %v17389_v61  ;;  %v7793_v21 = vsel %vm18484_vm7, %v17389_v61, 0.0  ;;  %vm18499_vm14 = vmmov %vm18452_vm0 }
 0xcc0   :  { %v17398_v19 = vpop.f32.mrb[30].mxu1  ;;  %v7828_v35 = vmul.f32 %v17396_v47, %v17396_v47  ;;  %v7790_v50 = vsel %vm18482_vm13, %v17396_v47, 0.0  ;;  %vm18500_vm13 = vmmov %vm18452_vm0 }
 0xcc1   :  { %v17405_v9 = vpop.f32.mrb[31].mxu1  ;;  %v17407_v22 = vadd.f32 %v7317_v62, %v7316_v10  ;;  %v7370_v60 = vadd.f32 %v7369_v17, %v7368_v13  ;;  %v7795_v53 = vsel %vm18488_vm5, %v17398_v19, 0.0  ;;  %v7831_v27 = vmul.f32 %v17398_v19, %v17398_v19  ;;  %vm18505_vm3 = vmmov %vm18452_vm0 }
 0xcc2   :  { %v7791_v45 = vsel %vm18452_vm0, %v17405_v9, 0.0  ;;  %v7829_v2 = vmul.f32 %v17405_v9, %v17405_v9  ;;  %v7844_v63 = vsel %vm18485_vm11, %v7828_v35, 0.0  ;;  %v7847_v41 = vsel %vm18489_vm8, %v7830_v39, 0.0  ;;  %vm18506_vm7 = vmmov %vm18452_vm0 }
 0xcc3   :  { %v7792_v28 = vadd.f32 %v7791_v45, %v7790_v50  ;;  %v17418_v1 = vadd.f32 %v7371_v42, %v7370_v60  ;;  %v7849_v55 = vsel %vm18494_vm2, %v7831_v27, 0.0  ;;  %vm18507_vm11 = vmmov %vm18452_vm0 }
 0xcc4   :  { %v7845_v20 = vsel %vm18486_vm15, %v7829_v2, 0.0  ;;  %vm18508_vm15 = vmmov %vm18452_vm0 }
 0xcc5   :  { %v7794_v38 = vadd.f32 %v7793_v21, %v7792_v28  ;;  %v17424_v24 = vpop.f32.mrb[52].mxu0  ;;  %v7846_v40 = vadd.f32 %v7845_v20, %v7844_v63  ;;  %vm18509_vm5 = vmmov %vm18452_vm0 }
 0xcc6   :  { %18487 = vst [vmem:[#allocation8_spill] sm:$0xff] %v17424_v24  ;;  %v17430_v31 = vpop.f32.mrb[53].mxu0  ;;  %v8332_v3 = vmul.f32 %v17424_v24, %v17424_v24  ;;  %v8295_v6 = vsel %vm18495_vm4, %v17424_v24, 0.0  ;;  %vm18510_vm8 = vmmov %vm18452_vm0 }
 0xcc7   :  { %v17433_v58 = vpop.f32.mrb[54].mxu0  ;;  %v7796_v34 = vadd.f32 %v7795_v53, %v7794_v38  ;;  %v7848_v29 = vadd.f32 %v7847_v41, %v7846_v40  ;;  %v8330_v59 = vmul.f32 %v17430_v31, %v17430_v31  ;;  %v8292_v36 = vsel %vm18492_vm12, %v17430_v31, 0.0  ;;  %vm18511_vm12 = vmmov %vm18452_vm0 }
 0xcc8   :  { %18490 = vst [vmem:[#allocation5_spill] sm:$0xff] %v17433_v58  ;;  %v17437_v43 = vpop.f32.mrb[55].mxu0  ;;  %v8333_v14 = vmul.f32 %v17433_v58, %v17433_v58  ;;  %v8297_v30 = vsel %vm18498_vm10, %v17433_v58, 0.0  ;;  %v8349_v56 = vsel %vm18499_vm14, %v8332_v3, 0.0  ;;  %vm18513_vm2 = vmmov %vm18452_vm0 }
 0xcc9   :  { %18491 = vst [vmem:[#allocation10_spill] sm:$0xff] %v17437_v43  ;;  %v8293_v44 = vsel %vm18493_vm1, %v17437_v43, 0.0  ;;  %v8331_v8 = vmul.f32 %v17437_v43, %v17437_v43  ;;  %v7850_v25 = vadd.f32 %v7849_v55, %v7848_v29  ;;  %v8346_v52 = vsel %vm18496_vm6, %v8330_v59, 0.0  ;;  %vm18512_vm1 = vmmov %vm18452_vm0 }
 0xcca   :  { %v8294_v49 = vadd.f32 %v8293_v44, %v8292_v36  ;;  %v8351_v17 = vsel %vm18500_vm13, %v8333_v14, 0.0  ;;  %vm18514_vm4 = vmmov %vm18452_vm0 }
 0xccb   :  { %v8347_v54 = vsel %vm18497_vm9, %v8331_v8, 0.0  ;;  %vm18515_vm6 = vmmov %vm18452_vm0 }
 0xccc   :  { %v8296_v46 = vadd.f32 %v8295_v6, %v8294_v49  ;;  %v8348_v33 = vadd.f32 %v8347_v54, %v8346_v52  ;;  %vm18516_vm9 = vmmov %vm18452_vm0 }
 0xccd   :  { %vm18518_vm10 = vmmov %vm18452_vm0 }
 0xcce   :  { %v8298_v10 = vadd.f32 %v8297_v30, %v8296_v46  ;;  %v8350_v13 = vadd.f32 %v8349_v56, %v8348_v33  ;;  %vm18519_vm14 = vmmov %vm18452_vm0 }
 0xccf   :  { %vm18521_vm13 = vmmov %vm18452_vm0 }
 0xcd0   :  { %v17458_v62 = vpop.f32.mrb[56].mxu0  ;;  %v8352_v35 = vadd.f32 %v8351_v17, %v8350_v13 }
 0xcd1   :  { %18501 = vst [vmem:[#allocation12_spill] sm:$0xff] %v17458_v62  ;;  %v17460_v60 = vpop.f32.mrb[57].mxu0  ;;  %v8336_v2 = vmul.f32 %v17458_v62, %v17458_v62  ;;  %v8303_v40 = vsel %vm18507_vm11, %v17458_v62, 0.0  ;;  %vm18526_vm11 = vmmov %vm18452_vm0 }
 0xcd2   :  { %18502 = vst [vmem:[#allocation11_spill] sm:$0xff] %v17460_v60  ;;  %v8299_v50 = vsel %vm18452_vm0, %v17460_v60, 0.0  ;;  %v8334_v45 = vmul.f32 %v17460_v60, %v17460_v60  ;;  %v17466_v42 = vpop.f32.mrb[58].mxu0 }
 0xcd3   :  { %18503 = vst [vmem:[#allocation6_spill] sm:$0xff] %v17466_v42  ;;  %v8300_v39 = vadd.f32 %v8299_v50, %v8298_v10  ;;  %v17468_v28 = vpop.f32.mrb[59].mxu0  ;;  %v8337_v41 = vmul.f32 %v17466_v42, %v17466_v42  ;;  %v8357_v8 = vsel %vm18510_vm8, %v8336_v2, 0.0  ;;  %v8305_v6 = vsel %vm18511_vm12, %v17466_v42, 0.0  ;;  %vm18529_vm8 = vmmov %vm18452_vm0 }
 0xcd4   :  { %18504 = vst [vmem:[#allocation18_spill] sm:$0xff] %v17468_v28  ;;  %v8353_v21 = vsel %vm18505_vm3, %v8334_v45, 0.0  ;;  %v8301_v63 = vsel %vm18506_vm7, %v17468_v28, 0.0  ;;  %v8335_v38 = vmul.f32 %v17468_v28, %v17468_v28  ;;  %vm18524_vm3 = vmmov %vm18452_vm0 }
 0xcd5   :  { %v8354_v20 = vadd.f32 %v8353_v21, %v8352_v35  ;;  %v8302_v53 = vadd.f32 %v8301_v63, %v8300_v39  ;;  %v8359_v10 = vsel %vm18514_vm4, %v8337_v41, 0.0  ;;  %vm18525_vm7 = vmmov %vm18452_vm0 }
 0xcd6   :  { %v17477_v27 = vpop.f32.mrb[32].mxu1  ;;  %v8355_v29 = vsel %vm18508_vm15, %v8335_v38, 0.0  ;;  %vm18527_vm15 = vmmov %vm18452_vm0 }
 0xcd7   :  { %v17484_v59 = vpop.f32.mrb[33].mxu1  ;;  %v8304_v36 = vadd.f32 %v8303_v40, %v8302_v53  ;;  %v8356_v44 = vadd.f32 %v8355_v29, %v8354_v20  ;;  %v7834_v52 = vmul.f32 %v17477_v27, %v17477_v27  ;;  %v7801_v50 = vsel %vm18515_vm6, %v17477_v27, 0.0  ;;  %vm18530_vm12 = vmmov %vm18452_vm0 }
 0xcd8   :  { %v7797_v55 = vsel %vm18509_vm5, %v17484_v59, 0.0  ;;  %v7832_v3 = vmul.f32 %v17484_v59, %v17484_v59  ;;  %v17490_v49 = vpop.f32.mrb[34].mxu1  ;;  %vm18528_vm5 = vmmov %vm18452_vm0 }
 0xcd9   :  { %v7798_v14 = vadd.f32 %v7797_v55, %v7796_v34  ;;  %v17497_v46 = vpop.f32.mrb[35].mxu1  ;;  %v8358_v54 = vadd.f32 %v8357_v8, %v8356_v44  ;;  %v8306_v35 = vadd.f32 %v8305_v6, %v8304_v36  ;;  %v7835_v34 = vmul.f32 %v17490_v49, %v17490_v49  ;;  %vm18537_vm4 = vmmov %vm18452_vm0 }
 0xcda   :  { %v7851_v30 = vsel %vm18512_vm1, %v7832_v3, 0.0  ;;  %v7799_v33 = vsel %vm18513_vm2, %v17497_v46, 0.0  ;;  %v7833_v56 = vmul.f32 %v17497_v46, %v17497_v46  ;;  %v7855_v38 = vsel %vm18518_vm10, %v7834_v52, 0.0  ;;  %vm18533_vm1 = vmmov %vm18452_vm0 }
 0xcdb   :  { %v7852_v13 = vadd.f32 %v7851_v30, %v7850_v25  ;;  %v7800_v17 = vadd.f32 %v7799_v33, %v7798_v14  ;;  %v8360_v39 = vadd.f32 %v8359_v10, %v8358_v54  ;;  %v7803_v25 = vsel %vm18519_vm14, %v17490_v49, 0.0  ;;  %vm18535_vm2 = vmmov %vm18452_vm0 }
 0xcdc   :  { %v7853_v45 = vsel %vm18516_vm9, %v7833_v56, 0.0  ;;  %v17510_v63 = vpop.f32.mrb[60].mxu0  ;;  %v7857_v44 = vsel %vm18452_vm0, %v7835_v34, 0.0  ;;  %vm18538_vm6 = vmmov %vm18452_vm0 }
 0xcdd   :  { %v7802_v2 = vadd.f32 %v7801_v50, %v7800_v17  ;;  %v7854_v21 = vadd.f32 %v7853_v45, %v7852_v13  ;;  %18517 = vst [vmem:[#allocation16_spill] sm:$0xff] %v17510_v63  ;;  %v17515_v20 = vpop.f32.mrb[61].mxu0  ;;  %v8340_v55 = vmul.f32 %v17510_v63, %v17510_v63  ;;  %v8311_v56 = vsel %vm18526_vm11, %v17510_v63, 0.0  ;;  %vm18539_vm9 = vmmov %vm18452_vm0 }
 0xcde   :  { %18520 = vst [vmem:[#allocation9_spill] sm:$0xff] %v17515_v20  ;;  %v8307_v40 = vsel %vm18521_vm13, %v17515_v20, 0.0  ;;  %v8338_v41 = vmul.f32 %v17515_v20, %v17515_v20  ;;  %v17521_v29 = vpop.f32.mrb[62].mxu0  ;;  %vm18540_vm10 = vmmov %vm18452_vm0 }
 0xcdf   :  { %v7856_v53 = vadd.f32 %v7855_v38, %v7854_v21  ;;  %18522 = vst [vmem:[#allocation13_spill] sm:$0xff] %v17521_v29  ;;  %v7804_v36 = vadd.f32 %v7803_v25, %v7802_v2  ;;  %v8308_v3 = vadd.f32 %v8307_v40, %v8306_v35  ;;  %v17526_v8 = vpop.f32.mrb[63].mxu0  ;;  %v8341_v10 = vmul.f32 %v17521_v29, %v17521_v29  ;;  %vm18541_vm14 = vmmov %vm18452_vm0 }
 0xce0   :  { %18523 = vst [vmem:[#allocation17_spill] sm:$0xff] %v17526_v8  ;;  %v8361_v6 = vsel %vm18524_vm3, %v8338_v41, 0.0  ;;  %v8309_v52 = vsel %vm18525_vm7, %v17526_v8, 0.0  ;;  %v8339_v14 = vmul.f32 %v17526_v8, %v17526_v8  ;;  %v8365_v50 = vsel %vm18528_vm5, %v8340_v55, 0.0  ;;  %vm18542_vm13 = vmmov %vm18452_vm0 }
 0xce1   :  { %v7858_v54 = vadd.f32 %v7857_v44, %v7856_v53  ;;  %v8362_v30 = vadd.f32 %v8361_v6, %v8360_v39  ;;  %v8310_v33 = vadd.f32 %v8309_v52, %v8308_v3  ;;  %v8313_v34 = vsel %vm18529_vm8, %v17521_v29, 0.0  ;;  %vm18543_vm3 = vmmov %vm18452_vm0 }
 0xce2   :  { %v8363_v13 = vsel %vm18527_vm15, %v8339_v14, 0.0  ;;  %v8367_v39 = vsel %vm18530_vm12, %v8341_v10, 0.0  ;;  %vm18544_vm7 = vmmov %vm18452_vm0 }
 0xce3   :  { %v8312_v17 = vadd.f32 %v8311_v56, %v8310_v33  ;;  %v8364_v35 = vadd.f32 %v8363_v13, %v8362_v30  ;;  %vm18545_vm11 = vmmov %vm18452_vm0 }
 0xce4   :  { %vm18546_vm15 = vmmov %vm18452_vm0 }
 0xce5   :  { %v8366_v45 = vadd.f32 %v8365_v50, %v8364_v35  ;;  %v8314_v2 = vadd.f32 %v8313_v34, %v8312_v17  ;;  %vm18547_vm5 = vmmov %vm18452_vm0 }
 0xce6   :  { %vm18548_vm8 = vmmov %vm18452_vm0 }
 0xce7   :  { %v8368_v21 = vadd.f32 %v8367_v39, %v8366_v45  ;;  %vm18549_vm12 = vmmov %vm18452_vm0 }
 0xce8   :  { %v17542_v38 = vpop.f32.mrb[64].mxu0 }
 0xce9   :  { %18531 = vst [vmem:[#allocation7_spill] sm:$0xff] %v17542_v38  ;;  %v17546_v53 = vpop.f32.mrb[65].mxu0  ;;  %v8319_v13 = vsel %vm18538_vm6, %v17542_v38, 0.0  ;;  %vm18557_vm6 = vmmov %vm18452_vm0 }
 0xcea   :  { %v17544_v25 = vpop.f32.mrb[36].mxu1  ;;  %18532 = vst [vmem:[#allocation19_spill] sm:$0xff] %v17546_v53  ;;  %v8315_v41 = vsel %vm18533_vm1, %v17546_v53, 0.0  ;;  %v8342_v44 = vmul.f32 %v17546_v53, %v17546_v53  ;;  %v17554_v55 = vpop.f32.mrb[66].mxu0  ;;  %vm18554_vm1 = vmmov %vm18452_vm0 }
 0xceb   :  { %v17548_v40 = vpop.f32.mrb[37].mxu1  ;;  %18534 = vst [vmem:[#allocation15_spill] sm:$0xff] %v17554_v55  ;;  %v8316_v52 = vadd.f32 %v8315_v41, %v8314_v2  ;;  %v17562_v30 = vpop.f32.mrb[67].mxu0  ;;  %v7838_v50 = vmul.f32 %v17544_v25, %v17544_v25  ;;  %v8344_v2 = vmul.f32 %v17542_v38, %v17542_v38 }
 0xcec   :  { %v7805_v3 = vsel %vm18535_vm2, %v17548_v40, 0.0  ;;  %v7836_v6 = vmul.f32 %v17548_v40, %v17548_v40  ;;  %v17560_v14 = vpop.f32.mrb[38].mxu1  ;;  %18536 = vst [vmem:[#allocation20_spill] sm:$0xff] %v17562_v30  ;;  %v8369_v56 = vsel %vm18537_vm4, %v8342_v44, 0.0  ;;  %v8317_v41 = vsel %vm18541_vm14, %v17562_v30, 0.0  ;;  %vm18555_vm2 = vmmov %vm18452_vm0 }
 0xced   :  { %v7806_v33 = vadd.f32 %v7805_v3, %v7804_v36  ;;  %v17565_v10 = vpop.f32.mrb[39].mxu1  ;;  %v8370_v35 = vadd.f32 %v8369_v56, %v8368_v21  ;;  %v8343_v21 = vmul.f32 %v17562_v30, %v17562_v30  ;;  %v7809_v44 = vsel %vm18542_vm13, %v17544_v25, 0.0  ;;  %vm18556_vm4 = vmmov %vm18452_vm0 }
 0xcee   :  { %v7859_v17 = vsel %vm18539_vm9, %v7836_v6, 0.0  ;;  %v7807_v45 = vsel %vm18540_vm10, %v17565_v10, 0.0  ;;  %v7837_v36 = vmul.f32 %v17565_v10, %v17565_v10  ;;  %v8318_v6 = vadd.f32 %v8317_v41, %v8316_v52  ;;  %vm18558_vm9 = vmmov %vm18452_vm0 }
 0xcef   :  { %v7860_v34 = vadd.f32 %v7859_v17, %v7858_v54  ;;  %v7808_v39 = vadd.f32 %v7807_v45, %v7806_v33  ;;  %v7839_v54 = vmul.f32 %v17560_v14, %v17560_v14  ;;  %v8345_v56 = vmul.f32 %v17554_v55, %v17554_v55  ;;  %vm18559_vm10 = vmmov %vm18452_vm0 }
 0xcf0   :  { %v7861_v3 = vsel %vm18452_vm0, %v7837_v36, 0.0  ;;  %v8371_v45 = vsel %vm18543_vm3, %v8343_v21, 0.0  ;;  %v7863_v38 = vsel %vm18544_vm7, %v7838_v50, 0.0  ;;  %v7811_v30 = vsel %vm18545_vm11, %v17560_v14, 0.0  ;;  %vm18560_vm14 = vmmov %vm18452_vm0 }
 0xcf1   :  { %v7810_v17 = vadd.f32 %v7809_v44, %v7808_v39  ;;  %v7862_v33 = vadd.f32 %v7861_v3, %v7860_v34  ;;  %v8320_v53 = vadd.f32 %v8319_v13, %v8318_v6  ;;  %v8372_v29 = vadd.f32 %v8371_v45, %v8370_v35  ;;  %vm18561_vm13 = vmmov %vm18452_vm0 }
 0xcf2   :  { %v8373_v63 = vsel %vm18546_vm15, %v8344_v2, 0.0  ;;  %v8321_v36 = vsel %vm18547_vm5, %v17554_v55, 0.0  ;;  %v7865_v8 = vsel %vm18548_vm8, %v7839_v54, 0.0  ;;  %v7319_v21 = vrot.slane %v17407_v22, 4  ;;  %vm18562_vm3 = vmmov %vm18452_vm0 }
 0xcf3   :  { %v7864_v52 = vadd.f32 %v7863_v38, %v7862_v33  ;;  %v7812_v41 = vadd.f32 %v7811_v30, %v7810_v17  ;;  %v8322_v39 = vadd.f32 %v8321_v36, %v8320_v53  ;;  %v8374_v34 = vadd.f32 %v8373_v63, %v8372_v29  ;;  %vm18563_vm7 = vmmov %vm18452_vm0 }
 0xcf4   :  { %v8375_v50 = vsel %vm18549_vm12, %v8345_v56, 0.0  ;;  %v7320_v13 = vadd.f32 %v7319_v21, %v17407_v22  ;;  %v7373_v2 = vrot.slane %v17418_v1, 4  ;;  %vm18564_vm11 = vmmov %vm18452_vm0 }
 0xcf5   :  { %v7866_v44 = vadd.f32 %v7865_v8, %v7864_v52  ;;  %v8376_v3 = vadd.f32 %v8375_v50, %v8374_v34  ;;  %v8323_v35 = vrot.slane %v8322_v39, 4  ;;  %vm18565_vm15 = vmmov %vm18452_vm0 }
 0xcf6   :  { %v7321_v6 = vrot.slane %v7320_v13, 2  ;;  %v17612_v8 = vadd.f32 %v7373_v2, %v17418_v1  ;;  %vm18566_vm5 = vmmov %vm18452_vm0 }
 0xcf7   :  { %v8324_v45 = vadd.f32 %v8323_v35, %v8322_v39  ;;  %v8377_v17 = vrot.slane %v8376_v3, 4  ;;  %vm18568_vm8 = vmmov %vm18452_vm0 }
 0xcf8   :  { %v17609_v29 = vadd.f32 %v7321_v6, %v7320_v13  ;;  %vm18570_vm12 = vmmov %vm18452_vm0 }
 0xcf9   :  { %v8325_v56 = vrot.slane %v8324_v45, 2  ;;  %v8378_v28 = vadd.f32 %v8377_v17, %v8376_v3 }
 0xcfa   :  { %v7323_v3 = vrot.slane %v17609_v29, 1 }
 0xcff   :  { %v17601_v55 = vpop.f32.mrb[68].mxu0 }
 0xd00   :  { %18550 = vst [vmem:[#allocation21_spill] sm:$0xff] %v17601_v55  ;;  %v8802_v38 = vmul.f32 %v17601_v55, %v17601_v55  ;;  %v17605_v53 = vpop.f32.mrb[69].mxu0  ;;  %v8765_v33 = vsel %vm18554_vm1, %v17601_v55, 0.0  ;;  %vm18572_vm1 = vmmov %vm18452_vm0 }
 0xd01   :  { %18551 = vst [vmem:[#allocation22_spill] sm:$0xff] %v17605_v53  ;;  %v17607_v63 = vpop.f32.mrb[70].mxu0  ;;  %v8800_v22 = vmul.f32 %v17605_v53, %v17605_v53  ;;  %v8762_v36 = vsel %vm18555_vm2, %v17605_v53, 0.0  ;;  %vm18574_vm2 = vmmov %vm18452_vm0 }
 0xd02   :  { %18552 = vst [vmem:[#allocation23_spill] sm:$0xff] %v17607_v63  ;;  %v17616_v30 = vpop.f32.mrb[40].mxu1  ;;  %v17618_v54 = vpop.f32.mrb[71].mxu0  ;;  %v8819_v1 = vsel %vm18556_vm4, %v8802_v38, 0.0  ;;  %v8767_v13 = vsel %vm18559_vm10, %v17607_v63, 0.0  ;;  %vm18575_vm4 = vmmov %vm18452_vm0 }
 0xd03   :  { %18553 = vst [vmem:[#allocation24_spill] sm:$0xff] %v17618_v54  ;;  %v17624_v52 = vpop.f32.mrb[41].mxu1  ;;  %v8763_v39 = vsel %vm18557_vm6, %v17618_v54, 0.0  ;;  %v8801_v34 = vmul.f32 %v17618_v54, %v17618_v54  ;;  %v8816_v55 = vsel %vm18560_vm14, %v8800_v22, 0.0  ;;  %v8803_v54 = vmul.f32 %v17607_v63, %v17607_v63  ;;  %vm18576_vm6 = vmmov %vm18452_vm0 }
 0xd04   :  { %v7813_v21 = vsel %vm18558_vm9, %v17624_v52, 0.0  ;;  %v17633_v50 = vpop.f32.mrb[42].mxu1  ;;  %v8764_v35 = vadd.f32 %v8763_v39, %v8762_v36  ;;  %v7840_v2 = vmul.f32 %v17624_v52, %v17624_v52  ;;  %v7817_v39 = vsel %vm18563_vm7, %v17616_v30, 0.0  ;;  %vm18577_vm9 = vmmov %vm18452_vm0 }
 0xd05   :  { %v7814_v6 = vadd.f32 %v7813_v21, %v7812_v41  ;;  %v17639_v38 = vpop.f32.mrb[43].mxu1  ;;  %v8817_v53 = vsel %vm18561_vm13, %v8801_v34, 0.0  ;;  %v7842_v21 = vmul.f32 %v17616_v30, %v17616_v30  ;;  %vm18578_vm10 = vmmov %vm18452_vm0 }
 0xd06   :  { %v7815_v20 = vsel %vm18452_vm0, %v17639_v38, 0.0  ;;  %v8766_v42 = vadd.f32 %v8765_v33, %v8764_v35  ;;  %v8818_v62 = vadd.f32 %v8817_v53, %v8816_v55  ;;  %v7867_v36 = vsel %vm18562_vm3, %v7840_v2, 0.0  ;;  %vm18579_vm14 = vmmov %vm18452_vm0 }
 0xd07   :  { %v7816_v41 = vadd.f32 %v7815_v20, %v7814_v6  ;;  %v7868_v22 = vadd.f32 %v7867_v36, %v7866_v44  ;;  %v7841_v63 = vmul.f32 %v17639_v38, %v17639_v38  ;;  %v8821_v33 = vsel %vm18564_vm11, %v8803_v54, 0.0  ;;  %vm18581_vm13 = vmmov %vm18452_vm0 }
 0xd08   :  { %v8820_v34 = vadd.f32 %v8819_v1, %v8818_v62  ;;  %v8768_v58 = vadd.f32 %v8767_v13, %v8766_v42  ;;  %v7819_v55 = vsel %vm18565_vm15, %v17633_v50, 0.0  ;;  %v7843_v20 = vmul.f32 %v17633_v50, %v17633_v50  ;;  %vm18583_vm3 = vmmov %vm18452_vm0 }
 0xd09   :  { %v7818_v60 = vadd.f32 %v7817_v39, %v7816_v41  ;;  %v7869_v53 = vsel %vm18566_vm5, %v7841_v63, 0.0  ;;  %v7375_v62 = vrot.slane %v17612_v8, 2  ;;  %v7871_v42 = vsel %vm18568_vm8, %v7842_v21, 0.0  ;;  %vm18584_vm7 = vmmov %vm18452_vm0 }
 0xd0a   :  { %v7870_v6 = vadd.f32 %v7869_v53, %v7868_v22  ;;  %v8822_v2 = vadd.f32 %v8821_v33, %v8820_v34  ;;  %v8326_v36 = vadd.f32 %v8325_v56, %v8324_v45  ;;  %v8379_v41 = vrot.slane %v8378_v28, 2  ;;  %vm18585_vm11 = vmmov %vm18452_vm0 }
 0xd0b   :  { %v7820_v35 = vadd.f32 %v7819_v55, %v7818_v60  ;;  %v17660_v44 = vpop.f32.mrb[44].mxu1  ;;  %v7873_v39 = vsel %vm18572_vm1, %v7843_v20, 0.0  ;;  %v7376_v56 = vadd.f32 %v7375_v62, %v17612_v8  ;;  %v7324_v8 = vadd.f32 %v7323_v3, %v17609_v29  ;;  %vm18586_vm15 = vmmov %vm18452_vm0 }
 0xd0c   :  { %18567 = vst [vmem:[#allocation25_spill] sm:$0xff] %v17660_v44  ;;  %v17665_v54 = vpop.f32.mrb[45].mxu1  ;;  %v7872_v1 = vadd.f32 %v7871_v42, %v7870_v6  ;;  %v8806_v6 = vmul.f32 %v17660_v44, %v17660_v44  ;;  %v8327_v62 = vrot.slane %v8326_v36, 1  ;;  %vm18587_vm5 = vmmov %vm18452_vm0 }
 0xd0d   :  { %18569 = vst [vmem:[#allocation26_spill] sm:$0xff] %v17665_v54  ;;  %v7821_v17 = vrot.slane %v7820_v35, 4  ;;  %v8769_v13 = vsel %vm18570_vm12, %v17665_v54, 0.0  ;;  %v8804_v60 = vmul.f32 %v17665_v54, %v17665_v54  ;;  %v17671_v63 = vpop.f32.mrb[46].mxu1  ;;  %vm18588_vm8 = vmmov %vm18452_vm0 }
 0xd0e   :  { %18571 = vst [vmem:[#allocation27_spill] sm:$0xff] %v17671_v63  ;;  %v8770_v22 = vadd.f32 %v8769_v13, %v8768_v58  ;;  %v17674_v34 = vpop.f32.mrb[47].mxu1  ;;  %v7874_v33 = vadd.f32 %v7873_v39, %v7872_v1  ;;  %v8807_v1 = vmul.f32 %v17671_v63, %v17671_v63  ;;  %vm18589_vm12 = vmmov %vm18452_vm0 }
 0xd0f   :  { %18573 = vst [vmem:[#allocation28_spill] sm:$0xff] %v17674_v34  ;;  %v7822_v21 = vadd.f32 %v7821_v17, %v7820_v35  ;;  %v8823_v55 = vsel %vm18574_vm2, %v8804_v60, 0.0  ;;  %v8771_v53 = vsel %vm18575_vm4, %v17674_v34, 0.0  ;;  %v8805_v45 = vmul.f32 %v17674_v34, %v17674_v34  ;;  %vm18591_vm1 = vmmov %vm18452_vm0 }
 0xd10   :  { %v8824_v42 = vadd.f32 %v8823_v55, %v8822_v2  ;;  %v8772_v54 = vadd.f32 %v8771_v53, %v8770_v22  ;;  %v7875_v20 = vrot.slane %v7874_v33, 4  ;;  %v8773_v35 = vsel %vm18576_vm6, %v17660_v44, 0.0  ;;  %vm18592_vm2 = vmmov %vm18452_vm0 }
 0xd11   :  { %v7823_v58 = vrot.slane %v7822_v21, 2  ;;  %v8380_v17 = vadd.f32 %v8379_v41, %v8378_v28  ;;  %v8825_v60 = vsel %vm18577_vm9, %v8805_v45, 0.0  ;;  %v8775_v22 = vsel %vm18578_vm10, %v17671_v63, 0.0  ;;  %vm18593_vm4 = vmmov %vm18452_vm0 }
 0xd12   :  { %v8774_v13 = vadd.f32 %v8773_v35, %v8772_v54  ;;  %v7876_v2 = vadd.f32 %v7875_v20, %v7874_v33  ;;  %v8826_v55 = vadd.f32 %v8825_v60, %v8824_v42  ;;  %v8827_v44 = vsel %vm18579_vm14, %v8806_v6, 0.0  ;;  %vm18594_vm6 = vmmov %vm18452_vm0 }
 0xd13   :  { %v7824_v39 = vadd.f32 %v7823_v58, %v7822_v21  ;;  %v17691_v53 = vpop.f32.mrb[48].mxu1  ;;  %v7377_v45 = vrot.slane %v7376_v56, 1  ;;  %v8829_v42 = vsel %vm18452_vm0, %v8807_v1, 0.0  ;;  %v8381_v6 = vrot.slane %v8380_v17, 1  ;;  %vm18595_vm9 = vmmov %vm18452_vm0 }
 0xd14   :  { %v17695_v28 = vpop.f32.mrb[49].mxu1  ;;  %v8776_v41 = vadd.f32 %v8775_v22, %v8774_v13  ;;  %v7877_v54 = vrot.slane %v7876_v2, 2  ;;  %v8828_v35 = vadd.f32 %v8827_v44, %v8826_v55  ;;  %v8810_v44 = vmul.f32 %v17691_v53, %v17691_v53  ;;  %vm18596_vm10 = vmmov %vm18452_vm0 }
 0xd15   :  { %18580 = vst [vmem:[#allocation29_spill] sm:$0xff] %v17695_v28  ;;  %v7825_v34 = vrot.slane %v7824_v39, 1  ;;  %v8777_v21 = vsel %vm18581_vm13, %v17695_v28, 0.0  ;;  %v17699_v33 = vpop.f32.mrb[50].mxu1  ;;  %v8808_v29 = vmul.f32 %v17695_v28, %v17695_v28  ;;  %v7378_v24 = vadd.f32 %v7377_v45, %v7376_v56  ;;  %vm18597_vm14 = vmmov %vm18452_vm0 }
 0xd16   :  { %v8778_v58 = vadd.f32 %v8777_v21, %v8776_v41  ;;  %v17704_v3 = vpop.f32.mrb[51].mxu1  ;;  %v7878_v13 = vadd.f32 %v7877_v54, %v7876_v2  ;;  %v8830_v60 = vadd.f32 %v8829_v42, %v8828_v35  ;;  %v8328_v41 = vadd.f32 %v8327_v62, %v8326_v36  ;;  %vm18598_vm13 = vmmov %vm18452_vm0 }
 0xd17   :  { %18582 = vst [vmem:[#allocation30_spill] sm:$0xff] %v17704_v3  ;;  %v7826_v20 = vadd.f32 %v7825_v34, %v7824_v39  ;;  %v8831_v22 = vsel %vm18583_vm3, %v8808_v29, 0.0  ;;  %v8779_v55 = vsel %vm18584_vm7, %v17704_v3, 0.0  ;;  %v8809_v1 = vmul.f32 %v17704_v3, %v17704_v3 }
 0xd18   :  { %v7879_v28 = vrot.slane %v7878_v13, 1  ;;  %v8832_v63 = vadd.f32 %v8831_v22, %v8830_v60  ;;  %v8811_v34 = vmul.f32 %v17699_v33, %v17699_v33  ;;  %v8780_v39 = vadd.f32 %v8779_v55, %v8778_v58 }
 0xd19   :  { %v7827_v21 = vadd.f32 %v7826_v20, %v7324_v8  ;;  %v8833_v2 = vsel %vm18585_vm11, %v8809_v1, 0.0  ;;  %v8781_v35 = vsel %vm18586_vm15, %v17691_v53, 0.0  ;;  %v8382_v3 = vadd.f32 %v8381_v6, %v8380_v17 }
 0xd1a   :  { %v7880_v54 = vadd.f32 %v7879_v28, %v7878_v13  ;;  %v8834_v42 = vadd.f32 %v8833_v2, %v8832_v63  ;;  %v8835_v36 = vsel %vm18587_vm5, %v8810_v44, 0.0  ;;  %v8783_v56 = vsel %vm18588_vm8, %v17699_v33, 0.0 }
 0xd1b   :  { %v17718_v29 = vpop.f32.mrb[52].mxu1  ;;  %v8329_v43 = vadd.f32 %v8328_v41, %v7827_v21  ;;  %v8782_v8 = vadd.f32 %v8781_v35, %v8780_v39  ;;  %v8837_v17 = vsel %vm18591_vm1, %v8811_v34, 0.0 }
 0xd1c   :  { %v17723_v62 = vpop.f32.mrb[53].mxu1  ;;  %v7881_v45 = vadd.f32 %v7880_v54, %v7378_v24  ;;  %v8836_v58 = vadd.f32 %v8835_v36, %v8834_v42  ;;  %v8814_v55 = vmul.f32 %v17718_v29, %v17718_v29 }
 0xd1d   :  { %v8785_v28 = vsel %vm18589_vm12, %v17723_v62, 0.0  ;;  %v8812_v63 = vmul.f32 %v17723_v62, %v17723_v62  ;;  %v17729_v20 = vpop.f32.mrb[54].mxu1  ;;  %v8784_v6 = vadd.f32 %v8783_v56, %v8782_v8 }
 0xd1e   :  { %18590 = vst [vmem:[#allocation31_spill] sm:$0xff] %v17729_v20  ;;  %v17732_v13 = vpop.f32.mrb[55].mxu1  ;;  %v8838_v60 = vadd.f32 %v8837_v17, %v8836_v58  ;;  %v8383_v22 = vadd.f32 %v8382_v3, %v7881_v45  ;;  %v8815_v34 = vmul.f32 %v17729_v20, %v17729_v20  ;;  %v8789_v3 = vsel %vm18595_vm9, %v17718_v29, 0.0 }
 0xd1f   :  { %v8839_v44 = vsel %vm18592_vm2, %v8812_v63, 0.0  ;;  %v8787_v24 = vsel %vm18593_vm4, %v17732_v13, 0.0  ;;  %v8786_v1 = vadd.f32 %v8785_v28, %v8784_v6  ;;  %v8813_v41 = vmul.f32 %v17732_v13, %v17732_v13 }
 0xd20   :  { %v8840_v21 = vadd.f32 %v8839_v44, %v8838_v60  ;;  %v8843_v35 = vsel %vm18596_vm10, %v8814_v55, 0.0  ;;  %v8791_v36 = vsel %vm18597_vm14, %v17729_v20, 0.0  ;;  %v8845_v8 = vsel %vm18598_vm13, %v8815_v34, 0.0 }
 0xd21   :  { %v8788_v39 = vadd.f32 %v8787_v24, %v8786_v1  ;;  %v8841_v2 = vsel %vm18594_vm6, %v8813_v41, 0.0 }
 0xd22   :  { %v8842_v54 = vadd.f32 %v8841_v2, %v8840_v21 }
 0xd23   :  { %v8790_v42 = vadd.f32 %v8789_v3, %v8788_v39 }
 0xd24   :  { %v8844_v56 = vadd.f32 %v8843_v35, %v8842_v54 }
 0xd25   :  { %v8792_v45 = vadd.f32 %v8791_v36, %v8790_v42 }
 0xd26   :  { %v8846_v58 = vadd.f32 %v8845_v8, %v8844_v56  ;;  %v8859_v56 = vld [vmem:[%s18599_s20] sm:$0x1] }
 0xd27   :  { %v8793_v28 = vrot.slane %v8792_v45, 4 }
 0xd28   :  { %v8847_v63 = vrot.slane %v8846_v58, 4 }
 0xd29   :  { %v8794_v17 = vadd.f32 %v8793_v28, %v8792_v45 }
 0xd2a   :  { %v8848_v6 = vadd.f32 %v8847_v63, %v8846_v58  ;;  %v8863_v58 = vld [vmem:[%s18600_s9] sm:$0x1] }
 0xd2b   :  { %v8795_v60 = vrot.slane %v8794_v17, 2 }
 0xd2c   :  { %v8849_v44 = vrot.slane %v8848_v6, 2 }
 0xd2d   :  { %v8796_v24 = vadd.f32 %v8795_v60, %v8794_v17 }
 0xd2e   :  { %v8850_v1 = vadd.f32 %v8849_v44, %v8848_v6 }
 0xd2f   :  { %v8797_v41 = vrot.slane %v8796_v24, 1 }
 0xd30   :  { %v8851_v21 = vrot.slane %v8850_v1, 1 }
 0xd31   :  { %v8798_v55 = vadd.f32 %v8797_v41, %v8796_v24 }
 0xd32   :  { %v8852_v39 = vadd.f32 %v8851_v21, %v8850_v1 }
 0xd33   :  { %v8799_v2 = vadd.f32 %v8798_v55, %v8329_v43 }
 0xd34   :  { %v8853_v3 = vadd.f32 %v8852_v39, %v8383_v22  ;;  %v18601_v22 = vld [vmem:[#allocation14_spill] sm:$0xff] }
 0xd35   :  { %v8854_v20 = vmul.f32 0.001953125, %v8799_v2 }
 0xd36   :  { %v8855_v54 = vmul.f32 0.001953125, %v8853_v3 }
 0xd37   :  { %v8856_v35 = vmul.f32 %v8854_v20, %v8854_v20 }
 0xd39   :  { %v8857_v34 = vsub.f32 %v8855_v54, %v8856_v35 }
 0xd3b   :  { %v8858_v42 = vmax.f32 %v8857_v34, 0.0 }
 0xd3d   :  { %v8860_v36 = vadd.f32 1e-05, %v8858_v42 }
 0xd3f   :  { %12082 = vrsqrt.f32 %v8860_v36 }
 0xd49   :  { %v12083_v8 = vpop.eup %12082 }
 0xd4a   :  { %v8862_v45 = vmul.f32 %v12083_v8, %v8859_v56 }
 0xd4c   :  { %v8864_v28 = vmul.f32 %v8862_v45, %v8854_v20  ;;  %v17757_v63 = vrot.slane %v8862_v45, %v18601_v22 }
 0xd4e   :  { %v8865_v43 = vsub.f32 %v8863_v58, %v8864_v28  ;;  %v8872_v17 = vmul.f32 %v17757_v63, %v17288_v7  ;;  %v8873_v6 = vmul.f32 %v17757_v63, %v17294_v4  ;;  %v8874_v60 = vmul.f32 %v17286_v12, %v17757_v63 }
 0xd4f   :  { %v8875_v24 = vmul.f32 %v17292_v57, %v17757_v63  ;;  %v8876_v20 = vmul.f32 %v17757_v63, %v17316_v15  ;;  %v8877_v4 = vmul.f32 %v17757_v63, %v17324_v51  ;;  %v8878_v12 = vmul.f32 %v17314_v0, %v17757_v63 }
 0xd50   :  { %v17766_v44 = vrot.slane %v8865_v43, %v18601_v22  ;;  %v8879_v57 = vmul.f32 %v17322_v16, %v17757_v63  ;;  %v8880_v15 = vmul.f32 %v17757_v63, %v17344_v18  ;;  %v8881_v51 = vmul.f32 %v17757_v63, %v17352_v37 }
 0xd51   :  { %v8882_v35 = vmul.f32 %v17342_v11, %v17757_v63  ;;  %v8883_v34 = vmul.f32 %v17350_v26, %v17757_v63  ;;  %v8884_v18 = vmul.f32 %v17757_v63, %v17372_v48  ;;  %v8885_v36 = vmul.f32 %v17757_v63, %v17380_v23 }
 0xd52   :  { %v8894_v1 = vadd.f32 %v17766_v44, %v8872_v17  ;;  %v8895_v41 = vadd.f32 %v17766_v44, %v8873_v6  ;;  %v8896_v7 = vadd.f32 %v17766_v44, %v8874_v60  ;;  %v8897_v21 = vadd.f32 %v17766_v44, %v8875_v24 }
 0xd53   :  { %v8898_v55 = vadd.f32 %v17766_v44, %v8876_v20  ;;  %v8899_v39 = vadd.f32 %v17766_v44, %v8877_v4  ;;  %v8900_v2 = vadd.f32 %v17766_v44, %v8878_v12  ;;  %v8901_v16 = vadd.f32 %v17766_v44, %v8879_v57 }
 0xd54   :  { %v8910_v3 = vsub.f32 0.0, %v8894_v1  ;;  %v8911_v54 = vsub.f32 0.0, %v8895_v41  ;;  %v8912_v0 = vsub.f32 0.0, %v8896_v7  ;;  %v8913_v42 = vsub.f32 0.0, %v8897_v21 }
 0xd55   :  { %v8902_v37 = vadd.f32 %v17766_v44, %v8880_v15  ;;  %v8914_v56 = vsub.f32 0.0, %v8898_v55  ;;  %v8886_v8 = vmul.f32 %v17370_v32, %v17757_v63  ;;  %v8903_v11 = vadd.f32 %v17766_v44, %v8881_v51 }
 0xd56   :  { %v8915_v45 = vsub.f32 0.0, %v8899_v39  ;;  %v8916_v58 = vsub.f32 0.0, %v8900_v2  ;;  %v8904_v26 = vadd.f32 %v17766_v44, %v8882_v35  ;;  %v8926_v28 = vmul.f32 1.442695, %v8910_v3 }
 0xd57   :  { %v8928_v43 = vmul.f32 1.442695, %v8911_v54  ;;  %v8930_v22 = vmul.f32 1.442695, %v8912_v0  ;;  %v8887_v48 = vmul.f32 %v17378_v5, %v17757_v63  ;;  %v8905_v23 = vadd.f32 %v17766_v44, %v8883_v34 }
 0xd58   :  { %v8917_v17 = vsub.f32 0.0, %v8901_v16  ;;  %v8932_v6 = vmul.f32 1.442695, %v8913_v42  ;;  %v8906_v60 = vadd.f32 %v17766_v44, %v8884_v18  ;;  %v8918_v24 = vsub.f32 0.0, %v8902_v37 }
 0xd59   :  { %12084 = vpow2.f32 %v8926_v28  ;;  %v8934_v32 = vmul.f32 1.442695, %v8914_v56  ;;  %v8907_v20 = vadd.f32 %v17766_v44, %v8885_v36  ;;  %v8919_v1 = vsub.f32 0.0, %v8903_v11 }
 0xd5a   :  { %12086 = vpow2.f32 %v8928_v43  ;;  %v8936_v41 = vmul.f32 1.442695, %v8915_v45  ;;  %v8908_v7 = vadd.f32 %v17766_v44, %v8886_v8  ;;  %v8920_v4 = vsub.f32 0.0, %v8904_v26 }
 0xd5b   :  { %12088 = vpow2.f32 %v8930_v22  ;;  %v8938_v12 = vmul.f32 1.442695, %v8916_v58  ;;  %v8909_v5 = vadd.f32 %v17766_v44, %v8887_v48  ;;  %v8921_v21 = vsub.f32 0.0, %v8905_v23 }
 0xd5c   :  { %12090 = vpow2.f32 %v8932_v6  ;;  %v8940_v55 = vmul.f32 1.442695, %v8917_v17  ;;  %v8922_v57 = vsub.f32 0.0, %v8906_v60  ;;  %v8942_v15 = vmul.f32 1.442695, %v8918_v24 }
 0xd5d   :  { %12092 = vpow2.f32 %v8934_v32  ;;  %v8923_v39 = vsub.f32 0.0, %v8907_v20  ;;  %v8944_v2 = vmul.f32 1.442695, %v8919_v1  ;;  %v8924_v51 = vsub.f32 0.0, %v8908_v7 }
 0xd5e   :  { %12094 = vpow2.f32 %v8936_v41  ;;  %v8946_v3 = vmul.f32 1.442695, %v8920_v4  ;;  %v8925_v54 = vsub.f32 0.0, %v8909_v5  ;;  %v8948_v0 = vmul.f32 1.442695, %v8921_v21 }
 0xd5f   :  { %12096 = vpow2.f32 %v8938_v12  ;;  %v8950_v35 = vmul.f32 1.442695, %v8922_v57  ;;  %v8952_v34 = vmul.f32 1.442695, %v8923_v39  ;;  %v8954_v42 = vmul.f32 1.442695, %v8924_v51 }
 0xd60   :  { %12098 = vpow2.f32 %v8940_v55  ;;  %v8956_v36 = vmul.f32 1.442695, %v8925_v54  ;;  %v9037_v26 = vmul.f32 %v17757_v63, %v17396_v47  ;;  %v9038_v28 = vmul.f32 %v17757_v63, %v17405_v9 }
 0xd61   :  { %12100 = vpow2.f32 %v8942_v15  ;;  %v9039_v48 = vmul.f32 %v17389_v61, %v17757_v63  ;;  %v9040_v23 = vmul.f32 %v17398_v19, %v17757_v63  ;;  %v9041_v60 = vmul.f32 %v17757_v63, %v17484_v59 }
 0xd62   :  { %12102 = vpow2.f32 %v8944_v2  ;;  %v9042_v47 = vmul.f32 %v17757_v63, %v17497_v46  ;;  %v9043_v32 = vmul.f32 %v17477_v27, %v17757_v63  ;;  %v9044_v61 = vmul.f32 %v17490_v49, %v17757_v63 }
 0xd63   :  { %v12085_v16 = vpop.eup %12084  ;;  %12104 = vpow2.f32 %v8946_v3  ;;  %v9045_v1 = vmul.f32 %v17757_v63, %v17548_v40  ;;  %v9046_v59 = vmul.f32 %v17757_v63, %v17565_v10  ;;  %v9047_v7 = vmul.f32 %v17544_v25, %v17757_v63 }
 0xd64   :  { %v12087_v18 = vpop.eup %12086  ;;  %12106 = vpow2.f32 %v8948_v0  ;;  %v8958_v56 = vadd.f32 1.0, %v12085_v16  ;;  %v17834_v27 = vmul.f32 %v17560_v14, %v17757_v63  ;;  %v17838_v12 = vmul.f32 %v17757_v63, %v17624_v52 }
 0xd65   :  { %v12089_v37 = vpop.eup %12088  ;;  %12108 = vpow2.f32 %v8950_v35  ;;  %v8959_v11 = vadd.f32 1.0, %v12087_v18  ;;  %v9053_v40 = vadd.f32 %v9037_v26, %v17766_v44  ;;  %v17843_v21 = vmul.f32 %v17757_v63, %v17639_v38 }
 0xd66   :  { %v12091_v8 = vpop.eup %12090  ;;  %12110 = vpow2.f32 %v8952_v34  ;;  %v8960_v58 = vadd.f32 1.0, %v12089_v37  ;;  %v9054_v25 = vadd.f32 %v9038_v28, %v17766_v44  ;;  %v17848_v57 = vmul.f32 %v17616_v30, %v17757_v63 }
 0xd67   :  { %v12093_v45 = vpop.eup %12092  ;;  %12112 = vpow2.f32 %v8954_v42  ;;  %v8961_v22 = vadd.f32 1.0, %v12091_v8  ;;  %v9055_v52 = vadd.f32 %v9039_v48, %v17766_v44  ;;  %v17853_v2 = vmul.f32 %v17633_v50, %v17757_v63 }
 0xd68   :  { %v12095_v43 = vpop.eup %12094  ;;  %12114 = vpow2.f32 %v8956_v36  ;;  %v8962_v6 = vadd.f32 1.0, %v12093_v45  ;;  %v9056_v38 = vadd.f32 %v9040_v23, %v17766_v44  ;;  %v9057_v54 = vadd.f32 %v9041_v60, %v17766_v44 }
 0xd69   :  { %v12097_v17 = vpop.eup %12096  ;;  %12116 = vrcp.f32 %v8958_v56  ;;  %v8963_v9 = vadd.f32 1.0, %v12095_v43  ;;  %v9069_v0 = vsub.f32 0.0, %v9053_v40  ;;  %v9058_v34 = vadd.f32 %v9042_v47, %v17766_v44 }
 0xd6a   :  { %v12099_v24 = vpop.eup %12098  ;;  %12118 = vrcp.f32 %v8959_v11  ;;  %v8964_v19 = vadd.f32 1.0, %v12097_v17  ;;  %v9070_v16 = vsub.f32 0.0, %v9054_v25  ;;  %v9059_v50 = vadd.f32 %v9043_v32, %v17766_v44 }
 0xd6b   :  { %v12101_v20 = vpop.eup %12100  ;;  %12120 = vrcp.f32 %v8960_v58  ;;  %v8965_v46 = vadd.f32 1.0, %v12099_v24  ;;  %v9071_v36 = vsub.f32 0.0, %v9055_v52  ;;  %v9060_v8 = vadd.f32 %v9044_v61, %v17766_v44 }
 0xd6c   :  { %v12103_v41 = vpop.eup %12102  ;;  %12122 = vrcp.f32 %v8961_v22  ;;  %v8966_v4 = vadd.f32 1.0, %v12101_v20  ;;  %v9072_v11 = vsub.f32 0.0, %v9056_v38  ;;  %v9061_v58 = vadd.f32 %v9045_v1, %v17766_v44 }
 0xd6d   :  { %v12105_v49 = vpop.eup %12104  ;;  %12124 = vrcp.f32 %v8962_v6  ;;  %v8967_v5 = vadd.f32 1.0, %v12103_v41  ;;  %v9073_v26 = vsub.f32 0.0, %v9057_v54  ;;  %v9085_v28 = vmul.f32 1.442695, %v9069_v0 }
 0xd6e   :  { %v12107_v10 = vpop.eup %12106  ;;  %12126 = vrcp.f32 %v8963_v9  ;;  %v8968_v55 = vadd.f32 1.0, %v12105_v49  ;;  %v9062_v22 = vadd.f32 %v9046_v59, %v17766_v44  ;;  %v9074_v48 = vsub.f32 0.0, %v9058_v34 }
 0xd6f   :  { %v12109_v14 = vpop.eup %12108  ;;  %12128 = vrcp.f32 %v8964_v19  ;;  %v8969_v39 = vadd.f32 1.0, %v12107_v10  ;;  %v9087_v23 = vmul.f32 1.442695, %v9070_v16  ;;  %v9063_v6 = vadd.f32 %v9047_v7, %v17766_v44 }
 0xd70   :  { %v12111_v15 = vpop.eup %12110  ;;  %12130 = vrcp.f32 %v8965_v46  ;;  %v8970_v3 = vadd.f32 1.0, %v12109_v14  ;;  %v9075_v60 = vsub.f32 0.0, %v9059_v50  ;;  %v9089_v47 = vmul.f32 1.442695, %v9071_v36 }
 0xd71   :  { %v12113_v51 = vpop.eup %12112  ;;  %12132 = vrcp.f32 %v8966_v4  ;;  %v8971_v30 = vadd.f32 1.0, %v12111_v15  ;;  %v9064_v9 = vadd.f32 %v17834_v27, %v17766_v44  ;;  %v9076_v32 = vsub.f32 0.0, %v9060_v8 }
 0xd72   :  { %v12115_v35 = vpop.eup %12114  ;;  %12134 = vrcp.f32 %v8967_v5  ;;  %v8972_v18 = vadd.f32 1.0, %v12113_v51  ;;  %v9091_v61 = vmul.f32 1.442695, %v9072_v11  ;;  %v9065_v19 = vadd.f32 %v17838_v12, %v17766_v44 }
 0xd73   :  { %v12117_v42 = vpop.eup %12116  ;;  %12136 = vrcp.f32 %v8968_v55  ;;  %v8973_v56 = vadd.f32 1.0, %v12115_v35  ;;  %v9077_v1 = vsub.f32 0.0, %v9061_v58  ;;  %v9093_v59 = vmul.f32 1.442695, %v9073_v26 }
 0xd74   :  { %v12119_v37 = vpop.eup %12118  ;;  %12138 = vrcp.f32 %v8969_v39  ;;  %9006 = vst [vmem:[%s18602_s19] ss:$2 sm:$0xff] %v12117_v42  ;;  %v9066_v46 = vadd.f32 %v17843_v21, %v17766_v44  ;;  %v9078_v7 = vsub.f32 0.0, %v9062_v22  ;;  %v9095_v27 = vmul.f32 1.442695, %v9074_v48 }
 0xd75   :  { %v12121_v45 = vpop.eup %12120  ;;  %12140 = vrcp.f32 %v8970_v3  ;;  %10449 = vst [vmem:[%s18602_s19 + $0x20] ss:$2 sm:$0xff] %v12119_v37  ;;  %v9067_v4 = vadd.f32 %v17848_v57, %v17766_v44  ;;  %v9079_v12 = vsub.f32 0.0, %v9063_v6  ;;  %v9097_v40 = vmul.f32 1.442695, %v9075_v60  ;;  %v18605_v6 = vld [vmem:[#allocation5_spill] sm:$0xff] }
 0xd76   :  { %v12123_v43 = vpop.eup %12122  ;;  %12142 = vrcp.f32 %v8971_v30  ;;  %10450 = vst [vmem:[%s18602_s19 + $0x40] ss:$2 sm:$0xff] %v12121_v45  ;;  %v9068_v5 = vadd.f32 %v17853_v2, %v17766_v44  ;;  %v9080_v21 = vsub.f32 0.0, %v9064_v9  ;;  %v9099_v25 = vmul.f32 1.442695, %v9076_v32  ;;  %v18606_v9 = vld [vmem:[#allocation11_spill] sm:$0xff] }
 0xd77   :  { %v12125_v17 = vpop.eup %12124  ;;  %12144 = vrcp.f32 %v8972_v18  ;;  %10451 = vst [vmem:[%s18602_s19 + $0x60] ss:$2 sm:$0xff] %v12123_v43  ;;  %v9081_v55 = vsub.f32 0.0, %v9065_v19  ;;  %v9101_v57 = vmul.f32 1.442695, %v9077_v1  ;;  %v9082_v15 = vsub.f32 0.0, %v9066_v46 }
 0xd78   :  { %v12127_v24 = vpop.eup %12126  ;;  %12146 = vrcp.f32 %v8973_v56  ;;  %10452 = vst [vmem:[%s18602_s19 + $0x80] ss:$2 sm:$0xff] %v12125_v17  ;;  %v9103_v39 = vmul.f32 1.442695, %v9078_v7  ;;  %v9083_v38 = vsub.f32 0.0, %v9067_v4  ;;  %v9084_v54 = vsub.f32 0.0, %v9068_v5 }
 0xd79   :  { %v12129_v20 = vpop.eup %12128  ;;  %10453 = vst [vmem:[%s18602_s19 + $0xa0] ss:$2 sm:$0xff] %v12127_v24  ;;  %12148 = vpow2.f32 %v9085_v28  ;;  %v9105_v51 = vmul.f32 1.442695, %v9079_v12  ;;  %v9107_v0 = vmul.f32 1.442695, %v9080_v21  ;;  %v9197_v26 = vmul.f32 %v17757_v63, %v17430_v31 }
 0xd7a   :  { %v12131_v41 = vpop.eup %12130  ;;  %10454 = vst [vmem:[%s18602_s19 + $0xc0] ss:$2 sm:$0xff] %v12129_v20  ;;  %12150 = vpow2.f32 %v9087_v23  ;;  %v9109_v30 = vmul.f32 1.442695, %v9081_v55  ;;  %v9111_v16 = vmul.f32 1.442695, %v9082_v15  ;;  %v9200_v60 = vmul.f32 %v18605_v6, %v17757_v63 }
 0xd7b   :  { %v12133_v49 = vpop.eup %12132  ;;  %10455 = vst [vmem:[%s18602_s19 + $0xe0] ss:$2 sm:$0xff] %v12131_v41  ;;  %12152 = vpow2.f32 %v9089_v47  ;;  %v9113_v18 = vmul.f32 1.442695, %v9083_v38  ;;  %v9115_v36 = vmul.f32 1.442695, %v9084_v54  ;;  %v9201_v32 = vmul.f32 %v17757_v63, %v18606_v9 }
 0xd7c   :  { %v12135_v10 = vpop.eup %12134  ;;  %10456 = vst [vmem:[%s18602_s19 + $0x100] ss:$2 sm:$0xff] %v12133_v49  ;;  %12154 = vpow2.f32 %v9091_v61  ;;  %v18603_v28 = vld [vmem:[#allocation10_spill] sm:$0xff]  ;;  %v18604_v23 = vld [vmem:[#allocation8_spill] sm:$0xff]  ;;  %v18610_v49 = vld [vmem:[#allocation9_spill] sm:$0xff] }
 0xd7d   :  { %v12137_v14 = vpop.eup %12136  ;;  %10457 = vst [vmem:[%s18602_s19 + $0x120] ss:$2 sm:$0xff] %v12135_v10  ;;  %12156 = vpow2.f32 %v9093_v59  ;;  %v9198_v43 = vmul.f32 %v17757_v63, %v18603_v28  ;;  %v9199_v17 = vmul.f32 %v18604_v23, %v17757_v63  ;;  %v18607_v61 = vld [vmem:[#allocation18_spill] sm:$0xff]  ;;  %v18608_v1 = vld [vmem:[#allocation12_spill] sm:$0xff]  ;;  %v9205_v4 = vmul.f32 %v17757_v63, %v18610_v49  ;;  %v18611_v12 = vld [vmem:[#allocation17_spill] sm:$0xff] }
 0xd7e   :  { %v12139_v52 = vpop.eup %12138  ;;  %10458 = vst [vmem:[%s18602_s19 + $0x140] ss:$2 sm:$0xff] %v12137_v14  ;;  %12158 = vpow2.f32 %v9095_v27  ;;  %v9202_v31 = vmul.f32 %v17757_v63, %v18607_v61  ;;  %v9203_v59 = vmul.f32 %v18608_v1, %v17757_v63  ;;  %v18609_v41 = vld [vmem:[#allocation6_spill] sm:$0xff]  ;;  %v18612_v21 = vld [vmem:[#allocation16_spill] sm:$0xff]  ;;  %v18613_v14 = vld [vmem:[#allocation13_spill] sm:$0xff] }
 0xd7f   :  { %v12141_v2 = vpop.eup %12140  ;;  %10459 = vst [vmem:[%s18602_s19 + $0x160] ss:$2 sm:$0xff] %v12139_v52  ;;  %12160 = vpow2.f32 %v9097_v40  ;;  %v9204_v46 = vmul.f32 %v18609_v41, %v17757_v63  ;;  %v9206_v40 = vmul.f32 %v17757_v63, %v18611_v12  ;;  %v17945_v55 = vmul.f32 %v18613_v14, %v17757_v63  ;;  %v18614_v15 = vld [vmem:[#allocation19_spill] sm:$0xff] }
 0xd80   :  { %v12143_v3 = vpop.eup %12142  ;;  %10460 = vst [vmem:[%s18602_s19 + $0x180] ss:$2 sm:$0xff] %v12141_v2  ;;  %12162 = vpow2.f32 %v9099_v25  ;;  %v9207_v25 = vmul.f32 %v18612_v21, %v17757_v63  ;;  %v9213_v2 = vadd.f32 %v9197_v26, %v17766_v44  ;;  %v9221_v61 = vadd.f32 %v9205_v4, %v17766_v44 }
 0xd81   :  { %v12145_v35 = vpop.eup %12144  ;;  %10461 = vst [vmem:[%s18602_s19 + $0x1a0] ss:$2 sm:$0xff] %v12143_v3  ;;  %12164 = vpow2.f32 %v9101_v57  ;;  %v18615_v3 = vld [vmem:[#allocation20_spill] sm:$0xff]  ;;  %v9222_v1 = vadd.f32 %v9206_v40, %v17766_v44  ;;  %v9224_v12 = vadd.f32 %v17945_v55, %v17766_v44 }
 0xd82   :  { %v12147_v34 = vpop.eup %12146  ;;  %10462 = vst [vmem:[%s18602_s19 + $0x1c0] ss:$2 sm:$0xff] %v12145_v35  ;;  %12166 = vpow2.f32 %v9103_v39  ;;  %v17949_v39 = vmul.f32 %v17757_v63, %v18614_v15  ;;  %v17954_v54 = vmul.f32 %v17757_v63, %v18615_v3 }
 0xd83   :  { %v12149_v42 = vpop.eup %12148  ;;  %10463 = vst [vmem:[%s18602_s19 + $0x1e0] ss:$2 sm:$0xff] %v12147_v34  ;;  %12168 = vpow2.f32 %v9105_v51  ;;  %v18616_v34 = vld [vmem:[#allocation7_spill] sm:$0xff] }
 0xd84   :  { %v12151_v50 = vpop.eup %12150  ;;  %12170 = vpow2.f32 %v9107_v0  ;;  %v9117_v56 = vadd.f32 1.0, %v12149_v42  ;;  %v9214_v0 = vadd.f32 %v9198_v43, %v17766_v44  ;;  %v9215_v42 = vadd.f32 %v9199_v17, %v17766_v44 }
 0xd85   :  { %v12153_v37 = vpop.eup %12152  ;;  %12172 = vpow2.f32 %v9109_v30  ;;  %v9118_v11 = vadd.f32 1.0, %v12151_v50  ;;  %v9218_v43 = vadd.f32 %v9202_v31, %v17766_v44  ;;  %v9219_v17 = vadd.f32 %v9203_v59, %v17766_v44 }
 0xd86   :  { %v12155_v8 = vpop.eup %12154  ;;  %12174 = vpow2.f32 %v9111_v16  ;;  %v9119_v58 = vadd.f32 1.0, %v12153_v37  ;;  %v17959_v16 = vmul.f32 %v18616_v34, %v17757_v63  ;;  %v9231_v6 = vsub.f32 0.0, %v9215_v42 }
 0xd87   :  { %v12157_v45 = vpop.eup %12156  ;;  %12176 = vpow2.f32 %v9113_v18  ;;  %v9120_v48 = vadd.f32 1.0, %v12155_v8  ;;  %v9234_v59 = vsub.f32 0.0, %v9218_v43  ;;  %v9225_v21 = vadd.f32 %v17949_v39, %v17766_v44 }
 0xd88   :  { %v12159_v22 = vpop.eup %12158  ;;  %12178 = vpow2.f32 %v9115_v36  ;;  %v9121_v24 = vadd.f32 1.0, %v12157_v45  ;;  %v18617_v36 = vld [vmem:[#allocation15_spill] sm:$0xff]  ;;  %v9217_v45 = vadd.f32 %v9201_v32, %v17766_v44  ;;  %v9249_v49 = vmul.f32 1.442695, %v9231_v6 }
 0xd89   :  { %v12161_v47 = vpop.eup %12160  ;;  %12180 = vrcp.f32 %v9117_v56  ;;  %v9122_v19 = vadd.f32 1.0, %v12159_v22  ;;  %v17964_v37 = vmul.f32 %v18617_v36, %v17757_v63  ;;  %v9216_v56 = vadd.f32 %v9200_v60, %v17766_v44 }
 0xd8a   :  { %v12163_v20 = vpop.eup %12162  ;;  %12182 = vrcp.f32 %v9118_v11  ;;  %v9123_v27 = vadd.f32 1.0, %v12161_v47  ;;  %v9230_v22 = vsub.f32 0.0, %v9214_v0  ;;  %v9233_v31 = vsub.f32 0.0, %v9217_v45 }
 0xd8b   :  { %v12165_v7 = vpop.eup %12164  ;;  %12184 = vrcp.f32 %v9119_v58  ;;  %v9124_v5 = vadd.f32 1.0, %v12163_v20  ;;  %v9229_v58 = vsub.f32 0.0, %v9213_v2  ;;  %v9232_v9 = vsub.f32 0.0, %v9216_v56 }
 0xd8c   :  { %v12167_v10 = vpop.eup %12166  ;;  %12186 = vrcp.f32 %v9120_v48  ;;  %v9125_v52 = vadd.f32 1.0, %v12165_v7  ;;  %v9247_v41 = vmul.f32 1.442695, %v9230_v22  ;;  %v9223_v7 = vadd.f32 %v9207_v25, %v17766_v44 }
 0xd8d   :  { %v12169_v57 = vpop.eup %12168  ;;  %12188 = vrcp.f32 %v9121_v24  ;;  %v9126_v51 = vadd.f32 1.0, %v12167_v10  ;;  %v9220_v24 = vadd.f32 %v9204_v46, %v17766_v44  ;;  %v9245_v20 = vmul.f32 1.442695, %v9229_v58 }
 0xd8e   :  { %v12171_v38 = vpop.eup %12170  ;;  %12190 = vrcp.f32 %v9122_v19  ;;  %v9127_v30 = vadd.f32 1.0, %v12169_v57  ;;  %v9251_v10 = vmul.f32 1.442695, %v9232_v9  ;;  %v9237_v25 = vsub.f32 0.0, %v9221_v61  ;;  %v18618_v61 = vld [vmem:[#allocation22_spill] sm:$0xff] }
 0xd8f   :  { %v12173_v35 = vpop.eup %12172  ;;  %12192 = vrcp.f32 %v9123_v27  ;;  %v9128_v50 = vadd.f32 1.0, %v12171_v38  ;;  %v9235_v27 = vsub.f32 0.0, %v9219_v17  ;;  %v9236_v40 = vsub.f32 0.0, %v9220_v24 }
 0xd90   :  { %v12175_v18 = vpop.eup %12174  ;;  %12194 = vrcp.f32 %v9124_v5  ;;  %v9129_v11 = vadd.f32 1.0, %v12173_v35  ;;  %v9253_v14 = vmul.f32 1.442695, %v9233_v31  ;;  %v9226_v55 = vadd.f32 %v17954_v54, %v17766_v44 }
 0xd91   :  { %v12177_v8 = vpop.eup %12176  ;;  %12196 = vrcp.f32 %v9125_v52  ;;  %v9130_v28 = vadd.f32 1.0, %v12175_v18  ;;  %v9238_v52 = vsub.f32 0.0, %v9222_v1  ;;  %v9255_v15 = vmul.f32 1.442695, %v9234_v59 }
 0xd92   :  { %v12179_v26 = vpop.eup %12178  ;;  %12198 = vrcp.f32 %v9126_v51  ;;  %v9131_v23 = vadd.f32 1.0, %v12177_v8  ;;  %v9227_v39 = vadd.f32 %v17959_v16, %v17766_v44  ;;  %v9239_v38 = vsub.f32 0.0, %v9223_v7  ;;  %v18621_v7 = vld [vmem:[#allocation23_spill] sm:$0xff] }
 0xd93   :  { %v12181_v48 = vpop.eup %12180  ;;  %12200 = vrcp.f32 %v9127_v30  ;;  %v9132_v60 = vadd.f32 1.0, %v12179_v26  ;;  %v9257_v51 = vmul.f32 1.442695, %v9235_v27  ;;  %v9228_v54 = vadd.f32 %v17964_v37, %v17766_v44 }
 0xd94   :  { %v12183_v47 = vpop.eup %12182  ;;  %12202 = vrcp.f32 %v9128_v50  ;;  %10464 = vst [vmem:[%s18602_s19 + $0x1] ss:$2 sm:$0xff] %v12181_v48  ;;  %v9240_v0 = vsub.f32 0.0, %v9224_v12  ;;  %v9259_v35 = vmul.f32 1.442695, %v9236_v40  ;;  %v9241_v34 = vsub.f32 0.0, %v9225_v21 }
 0xd95   :  { %v12185_v32 = vpop.eup %12184  ;;  %12204 = vrcp.f32 %v9129_v11  ;;  %10465 = vst [vmem:[%s18602_s19 + $0x21] ss:$2 sm:$0xff] %v12183_v47  ;;  %v9261_v16 = vmul.f32 1.442695, %v9237_v25  ;;  %v9242_v18 = vsub.f32 0.0, %v9226_v55  ;;  %v9243_v37 = vsub.f32 0.0, %v9227_v39 }
 0xd96   :  { %v12187_v19 = vpop.eup %12186  ;;  %12206 = vrcp.f32 %v9130_v28  ;;  %10466 = vst [vmem:[%s18602_s19 + $0x41] ss:$2 sm:$0xff] %v12185_v32  ;;  %v9263_v50 = vmul.f32 1.442695, %v9238_v52  ;;  %v9265_v56 = vmul.f32 1.442695, %v9239_v38  ;;  %v9357_v31 = vmul.f32 %v17757_v63, %v18618_v61 }
 0xd97   :  { %v12189_v46 = vpop.eup %12188  ;;  %12208 = vrcp.f32 %v9131_v23  ;;  %10467 = vst [vmem:[%s18602_s19 + $0x61] ss:$2 sm:$0xff] %v12187_v19  ;;  %v9244_v11 = vsub.f32 0.0, %v9228_v54  ;;  %v9267_v45 = vmul.f32 1.442695, %v9240_v0  ;;  %v9360_v27 = vmul.f32 %v18621_v7, %v17757_v63  ;;  %v18622_v12 = vld [vmem:[#allocation26_spill] sm:$0xff] }
 0xd98   :  { %v12191_v4 = vpop.eup %12190  ;;  %12210 = vrcp.f32 %v9132_v60  ;;  %10468 = vst [vmem:[%s18602_s19 + $0x81] ss:$2 sm:$0xff] %v12189_v46  ;;  %v9269_v26 = vmul.f32 1.442695, %v9241_v34  ;;  %v9271_v43 = vmul.f32 1.442695, %v9242_v18  ;;  %v9361_v40 = vmul.f32 %v17757_v63, %v18622_v12 }
 0xd99   :  { %v12193_v5 = vpop.eup %12192  ;;  %10469 = vst [vmem:[%s18602_s19 + $0xa1] ss:$2 sm:$0xff] %v12191_v4  ;;  %12212 = vpow2.f32 %v9245_v20  ;;  %v9273_v48 = vmul.f32 1.442695, %v9243_v37  ;;  %v9275_v17 = vmul.f32 1.442695, %v9244_v11  ;;  %v9373_v18 = vadd.f32 %v9357_v31, %v17766_v44 }
 0xd9a   :  { %v12195_v57 = vpop.eup %12194  ;;  %10470 = vst [vmem:[%s18602_s19 + $0xc1] ss:$2 sm:$0xff] %v12193_v5  ;;  %12214 = vpow2.f32 %v9247_v41  ;;  %v18619_v20 = vld [vmem:[#allocation24_spill] sm:$0xff]  ;;  %v18620_v41 = vld [vmem:[#allocation21_spill] sm:$0xff]  ;;  %v18625_v55 = vld [vmem:[#allocation27_spill] sm:$0xff]  ;;  %v18065_v37 = vmul.f32 %v17757_v63, %v17732_v13  ;;  %v9376_v13 = vadd.f32 %v9360_v27, %v17766_v44 }
 0xd9b   :  { %v12197_v2 = vpop.eup %12196  ;;  %10471 = vst [vmem:[%s18602_s19 + $0xe1] ss:$2 sm:$0xff] %v12195_v57  ;;  %12216 = vpow2.f32 %v9249_v49  ;;  %v9358_v19 = vmul.f32 %v17757_v63, %v18619_v20  ;;  %v9359_v46 = vmul.f32 %v18620_v41, %v17757_v63  ;;  %v9364_v52 = vmul.f32 %v18625_v55, %v17757_v63  ;;  %v18626_v39 = vld [vmem:[#allocation29_spill] sm:$0xff] }
 0xd9c   :  { %v12199_v3 = vpop.eup %12198  ;;  %10472 = vst [vmem:[%s18602_s19 + $0x101] ss:$2 sm:$0xff] %v12197_v2  ;;  %12218 = vpow2.f32 %v9251_v10  ;;  %v18623_v10 = vld [vmem:[#allocation28_spill] sm:$0xff]  ;;  %v9365_v38 = vmul.f32 %v17757_v63, %v18626_v39  ;;  %v9392_v31 = vsub.f32 0.0, %v9376_v13 }
 0xd9d   :  { %v12201_v30 = vpop.eup %12200  ;;  %10473 = vst [vmem:[%s18602_s19 + $0x121] ss:$2 sm:$0xff] %v12199_v3  ;;  %12220 = vpow2.f32 %v9253_v14  ;;  %v9362_v5 = vmul.f32 %v17757_v63, %v18623_v10  ;;  %v18624_v14 = vld [vmem:[#allocation25_spill] sm:$0xff]  ;;  %v9380_v61 = vadd.f32 %v9364_v52, %v17766_v44 }
 0xd9e   :  { %v12203_v42 = vpop.eup %12202  ;;  %10474 = vst [vmem:[%s18602_s19 + $0x141] ss:$2 sm:$0xff] %v12201_v30  ;;  %12222 = vpow2.f32 %v9255_v15  ;;  %v9363_v57 = vmul.f32 %v18624_v14, %v17757_v63  ;;  %v18056_v30 = vmul.f32 %v17699_v33, %v17757_v63 }
 0xd9f   :  { %v12205_v36 = vpop.eup %12204  ;;  %10475 = vst [vmem:[%s18602_s19 + $0x161] ss:$2 sm:$0xff] %v12203_v42  ;;  %12224 = vpow2.f32 %v9257_v51  ;;  %v18627_v51 = vld [vmem:[#allocation30_spill] sm:$0xff]  ;;  %v18060_v42 = vmul.f32 %v17757_v63, %v17723_v62  ;;  %v9375_v62 = vadd.f32 %v9359_v46, %v17766_v44 }
 0xda0   :  { %v12207_v8 = vpop.eup %12206  ;;  %10476 = vst [vmem:[%s18602_s19 + $0x181] ss:$2 sm:$0xff] %v12205_v36  ;;  %12226 = vpow2.f32 %v9259_v35  ;;  %v9366_v3 = vmul.f32 %v17757_v63, %v18627_v51  ;;  %v9367_v35 = vmul.f32 %v17691_v53, %v17757_v63  ;;  %v9374_v53 = vadd.f32 %v9358_v19, %v17766_v44 }
 0xda1   :  { %v12209_v58 = vpop.eup %12208  ;;  %10477 = vst [vmem:[%s18602_s19 + $0x1a1] ss:$2 sm:$0xff] %v12207_v8  ;;  %12228 = vpow2.f32 %v9261_v16  ;;  %v18070_v8 = vmul.f32 %v17718_v29, %v17757_v63  ;;  %v9381_v19 = vadd.f32 %v9365_v38, %v17766_v44 }
 0xda2   :  { %v12211_v28 = vpop.eup %12210  ;;  %10478 = vst [vmem:[%s18602_s19 + $0x1c1] ss:$2 sm:$0xff] %v12209_v58  ;;  %12230 = vpow2.f32 %v9263_v50  ;;  %v18628_v58 = vld [vmem:[#allocation31_spill] sm:$0xff]  ;;  %v9382_v46 = vadd.f32 %v9366_v3, %v17766_v44 }
 0xda3   :  { %v12213_v22 = vpop.eup %12212  ;;  %10479 = vst [vmem:[%s18602_s19 + $0x1e1] ss:$2 sm:$0xff] %v12211_v28  ;;  %12232 = vpow2.f32 %v9265_v56  ;;  %v9397_v55 = vsub.f32 0.0, %v9381_v19  ;;  %v9387_v3 = vadd.f32 %v18070_v8, %v17766_v44 }
 0xda4   :  { %v12215_v23 = vpop.eup %12214  ;;  %12234 = vpow2.f32 %v9267_v45  ;;  %v9277_v47 = vadd.f32 1.0, %v12213_v22  ;;  %v9377_v22 = vadd.f32 %v9361_v40, %v17766_v44  ;;  %v9398_v39 = vsub.f32 0.0, %v9382_v46 }
 0xda5   :  { %v12217_v6 = vpop.eup %12216  ;;  %12236 = vpow2.f32 %v9269_v26  ;;  %v9278_v24 = vadd.f32 1.0, %v12215_v23  ;;  %v18075_v26 = vmul.f32 %v18628_v58, %v17757_v63  ;;  %v9379_v63 = vadd.f32 %v9363_v57, %v17766_v44 }
 0xda6   :  { %v12219_v60 = vpop.eup %12218  ;;  %12238 = vpow2.f32 %v9271_v43  ;;  %v9279_v32 = vadd.f32 1.0, %v12217_v6  ;;  %v9390_v6 = vsub.f32 0.0, %v9374_v53  ;;  %v9385_v57 = vadd.f32 %v18060_v42, %v17766_v44 }
 0xda7   :  { %v12221_v9 = vpop.eup %12220  ;;  %12240 = vpow2.f32 %v9273_v48  ;;  %v9280_v59 = vadd.f32 1.0, %v12219_v60  ;;  %v9389_v48 = vsub.f32 0.0, %v9373_v18  ;;  %v9395_v12 = vsub.f32 0.0, %v9379_v63 }
 0xda8   :  { %v12223_v1 = vpop.eup %12222  ;;  %12242 = vpow2.f32 %v9275_v17  ;;  %v9281_v4 = vadd.f32 1.0, %v12221_v9  ;;  %v9378_v17 = vadd.f32 %v9362_v5, %v17766_v44  ;;  %v9407_v27 = vmul.f32 1.442695, %v9390_v6 }
 0xda9   :  { %v12225_v49 = vpop.eup %12224  ;;  %12244 = vrcp.f32 %v9277_v47  ;;  %v9282_v25 = vadd.f32 1.0, %v12223_v1  ;;  %v9393_v1 = vsub.f32 0.0, %v9377_v22  ;;  %v9384_v5 = vadd.f32 %v18056_v30, %v17766_v44 }
 0xdaa   :  { %v12227_v21 = vpop.eup %12226  ;;  %12246 = vrcp.f32 %v9278_v24  ;;  %v9283_v2 = vadd.f32 1.0, %v12225_v49  ;;  %v9391_v24 = vsub.f32 0.0, %v9375_v62  ;;  %v9394_v7 = vsub.f32 0.0, %v9378_v17 }
 0xdab   :  { %v12229_v15 = vpop.eup %12228  ;;  %12248 = vrcp.f32 %v9279_v32  ;;  %v9284_v0 = vadd.f32 1.0, %v12227_v21  ;;  %v9396_v21 = vsub.f32 0.0, %v9380_v61  ;;  %v9413_v52 = vmul.f32 1.442695, %v9393_v1 }
 0xdac   :  { %v12231_v54 = vpop.eup %12230  ;;  %12250 = vrcp.f32 %v9280_v59  ;;  %v9285_v16 = vadd.f32 1.0, %v12229_v15  ;;  %v9405_v59 = vmul.f32 1.442695, %v9389_v48  ;;  %v9409_v40 = vmul.f32 1.442695, %v9391_v24 }
 0xdad   :  { %v12233_v34 = vpop.eup %12232  ;;  %12252 = vrcp.f32 %v9281_v4  ;;  %v9286_v36 = vadd.f32 1.0, %v12231_v54  ;;  %v9383_v4 = vadd.f32 %v9367_v35, %v17766_v44  ;;  %v9415_v38 = vmul.f32 1.442695, %v9394_v7 }
 0xdae   :  { %v12235_v50 = vpop.eup %12234  ;;  %12254 = vrcp.f32 %v9282_v25  ;;  %v9287_v56 = vadd.f32 1.0, %v12233_v34  ;;  %v9411_v25 = vmul.f32 1.442695, %v9392_v31  ;;  %v9388_v30 = vadd.f32 %v18075_v26, %v17766_v44 }
 0xdaf   :  { %v12237_v33 = vpop.eup %12236  ;;  %12256 = vrcp.f32 %v9283_v2  ;;  %v9288_v45 = vadd.f32 1.0, %v12235_v50  ;;  %v9386_v2 = vadd.f32 %v18065_v37, %v17766_v44  ;;  %v9399_v54 = vsub.f32 0.0, %v9383_v4 }
 0xdb0   :  { %v12239_v11 = vpop.eup %12238  ;;  %12258 = vrcp.f32 %v9284_v0  ;;  %v9289_v43 = vadd.f32 1.0, %v12237_v33  ;;  %v9417_v0 = vmul.f32 1.442695, %v9395_v12  ;;  %v9400_v34 = vsub.f32 0.0, %v9384_v5 }
 0xdb1   :  { %v12241_v28 = vpop.eup %12240  ;;  %12260 = vrcp.f32 %v9285_v16  ;;  %v9290_v29 = vadd.f32 1.0, %v12239_v11  ;;  %v9419_v16 = vmul.f32 1.442695, %v9396_v21  ;;  %v9401_v18 = vsub.f32 0.0, %v9385_v57 }
 0xdb2   :  { %v12243_v23 = vpop.eup %12242  ;;  %12262 = vrcp.f32 %v9286_v36  ;;  %v9291_v60 = vadd.f32 1.0, %v12241_v28  ;;  %v9421_v50 = vmul.f32 1.442695, %v9397_v55  ;;  %v9402_v37 = vsub.f32 0.0, %v9386_v2 }
 0xdb3   :  { %v12245_v47 = vpop.eup %12244  ;;  %12264 = vrcp.f32 %v9287_v56  ;;  %v9292_v32 = vadd.f32 1.0, %v12243_v23  ;;  %v9423_v53 = vmul.f32 1.442695, %v9398_v39  ;;  %v9403_v33 = vsub.f32 0.0, %v9387_v3 }
 0xdb4   :  { %v12247_v9 = vpop.eup %12246  ;;  %12266 = vrcp.f32 %v9288_v45  ;;  %10480 = vst [vmem:[%s18602_s19 + $0x10] ss:$2 sm:$0xff] %v12245_v47  ;;  %v9425_v56 = vmul.f32 1.442695, %v9399_v54  ;;  %v9404_v62 = vsub.f32 0.0, %v9388_v30 }
 0xdb5   :  { %v12249_v20 = vpop.eup %12248  ;;  %12268 = vrcp.f32 %v9289_v43  ;;  %10481 = vst [vmem:[%s18602_s19 + $0x30] ss:$2 sm:$0xff] %v12247_v9  ;;  %v9427_v11 = vmul.f32 1.442695, %v9400_v34  ;;  %v9429_v58 = vmul.f32 1.442695, %v9401_v18 }
 0xdb6   :  { %v12251_v41 = vpop.eup %12250  ;;  %12270 = vrcp.f32 %v9290_v29  ;;  %10482 = vst [vmem:[%s18602_s19 + $0x50] ss:$2 sm:$0xff] %v12249_v20  ;;  %v9431_v13 = vmul.f32 1.442695, %v9402_v37  ;;  %v9433_v43 = vmul.f32 1.442695, %v9403_v33 }
 0xdb7   :  { %v12253_v49 = vpop.eup %12252  ;;  %12272 = vrcp.f32 %v9291_v60  ;;  %10483 = vst [vmem:[%s18602_s19 + $0x70] ss:$2 sm:$0xff] %v12251_v41  ;;  %v9435_v48 = vmul.f32 1.442695, %v9404_v62 }
 0xdb8   :  { %v12255_v10 = vpop.eup %12254  ;;  %12274 = vrcp.f32 %v9292_v32  ;;  %10484 = vst [vmem:[%s18602_s19 + $0x90] ss:$2 sm:$0xff] %v12253_v49 }
 0xdb9   :  { %v12257_v14 = vpop.eup %12256  ;;  %10485 = vst [vmem:[%s18602_s19 + $0xb0] ss:$2 sm:$0xff] %v12255_v10  ;;  %12276 = vpow2.f32 %v9405_v59 }
 0xdba   :  { %v12259_v15 = vpop.eup %12258  ;;  %10486 = vst [vmem:[%s18602_s19 + $0xd0] ss:$2 sm:$0xff] %v12257_v14  ;;  %12278 = vpow2.f32 %v9407_v27 }
 0xdbb   :  { %v12261_v51 = vpop.eup %12260  ;;  %10487 = vst [vmem:[%s18602_s19 + $0xf0] ss:$2 sm:$0xff] %v12259_v15  ;;  %12280 = vpow2.f32 %v9409_v40 }
 0xdbc   :  { %v12263_v35 = vpop.eup %12262  ;;  %10488 = vst [vmem:[%s18602_s19 + $0x110] ss:$2 sm:$0xff] %v12261_v51  ;;  %12282 = vpow2.f32 %v9411_v25 }
 0xdbd   :  { %v12265_v42 = vpop.eup %12264  ;;  %10489 = vst [vmem:[%s18602_s19 + $0x130] ss:$2 sm:$0xff] %v12263_v35  ;;  %12284 = vpow2.f32 %v9413_v52 }
 0xdbe   :  { %v12267_v36 = vpop.eup %12266  ;;  %10490 = vst [vmem:[%s18602_s19 + $0x150] ss:$2 sm:$0xff] %v12265_v42  ;;  %12286 = vpow2.f32 %v9415_v38 }
 0xdbf   :  { %v12269_v44 = vpop.eup %12268  ;;  %10491 = vst [vmem:[%s18602_s19 + $0x170] ss:$2 sm:$0xff] %v12267_v36  ;;  %12288 = vpow2.f32 %v9417_v0 }
 0xdc0   :  { %v12271_v8 = vpop.eup %12270  ;;  %10492 = vst [vmem:[%s18602_s19 + $0x190] ss:$2 sm:$0xff] %v12269_v44  ;;  %12290 = vpow2.f32 %v9419_v16 }
 0xdc1   :  { %v12273_v45 = vpop.eup %12272  ;;  %10493 = vst [vmem:[%s18602_s19 + $0x1b0] ss:$2 sm:$0xff] %v12271_v8  ;;  %12292 = vpow2.f32 %v9421_v50 }
 0xdc2   :  { %v12275_v26 = vpop.eup %12274  ;;  %10494 = vst [vmem:[%s18602_s19 + $0x1d0] ss:$2 sm:$0xff] %v12273_v45  ;;  %12294 = vpow2.f32 %v9423_v53 }
 0xdc3   :  { %v12277_v28 = vpop.eup %12276  ;;  %10495 = vst [vmem:[%s18602_s19 + $0x1f0] ss:$2 sm:$0xff] %v12275_v26  ;;  %12296 = vpow2.f32 %v9425_v56 }
 0xdc4   :  { %v12279_v22 = vpop.eup %12278  ;;  %12298 = vpow2.f32 %v9427_v11  ;;  %v9437_v29 = vadd.f32 1.0, %v12277_v28 }
 0xdc5   :  { %v12281_v23 = vpop.eup %12280  ;;  %12300 = vpow2.f32 %v9429_v58  ;;  %v9438_v6 = vadd.f32 1.0, %v12279_v22 }
 0xdc6   :  { %v12283_v17 = vpop.eup %12282  ;;  %12302 = vpow2.f32 %v9431_v13  ;;  %v9439_v60 = vadd.f32 1.0, %v12281_v23 }
 0xdc7   :  { %v12285_v47 = vpop.eup %12284  ;;  %12304 = vpow2.f32 %v9433_v43  ;;  %v9440_v24 = vadd.f32 1.0, %v12283_v17 }
 0xdc8   :  { %v12287_v63 = vpop.eup %12286  ;;  %12306 = vpow2.f32 %v9435_v48  ;;  %v9441_v32 = vadd.f32 1.0, %v12285_v47 }
 0xdc9   :  { %v12289_v9 = vpop.eup %12288  ;;  %12308 = vrcp.f32 %v9437_v29  ;;  %v9442_v31 = vadd.f32 1.0, %v12287_v63 }
 0xdca   :  { %v12291_v61 = vpop.eup %12290  ;;  %12310 = vrcp.f32 %v9438_v6  ;;  %v9443_v19 = vadd.f32 1.0, %v12289_v9 }
 0xdcb   :  { %v12293_v20 = vpop.eup %12292  ;;  %12312 = vrcp.f32 %v9439_v60  ;;  %v9444_v59 = vadd.f32 1.0, %v12291_v61 }
 0xdcc   :  { %v12295_v1 = vpop.eup %12294  ;;  %12314 = vrcp.f32 %v9440_v24  ;;  %v9445_v46 = vadd.f32 1.0, %v12293_v20 }
 0xdcd   :  { %v12297_v41 = vpop.eup %12296  ;;  %12316 = vrcp.f32 %v9441_v32  ;;  %v9446_v27 = vadd.f32 1.0, %v12295_v1 }
 0xdce   :  { %v12299_v7 = vpop.eup %12298  ;;  %12318 = vrcp.f32 %v9442_v31  ;;  %v9447_v4 = vadd.f32 1.0, %v12297_v41 }
 0xdcf   :  { %v12301_v49 = vpop.eup %12300  ;;  %12320 = vrcp.f32 %v9443_v19  ;;  %v9448_v40 = vadd.f32 1.0, %v12299_v7 }
 0xdd0   :  { %v12303_v12 = vpop.eup %12302  ;;  %12322 = vrcp.f32 %v9444_v59  ;;  %v9449_v5 = vadd.f32 1.0, %v12301_v49 }
 0xdd1   :  { %v12305_v10 = vpop.eup %12304  ;;  %12324 = vrcp.f32 %v9445_v46  ;;  %v9450_v25 = vadd.f32 1.0, %v12303_v12 }
 0xdd2   :  { %v12307_v21 = vpop.eup %12306  ;;  %12326 = vrcp.f32 %v9446_v27  ;;  %v9451_v57 = vadd.f32 1.0, %v12305_v10 }
 0xdd3   :  { %v12309_v14 = vpop.eup %12308  ;;  %12328 = vrcp.f32 %v9447_v4  ;;  %v9452_v52 = vadd.f32 1.0, %v12307_v21 }
 0xdd4   :  { %v12311_v55 = vpop.eup %12310  ;;  %12330 = vrcp.f32 %v9448_v40  ;;  %10496 = vst [vmem:[%s18602_s19 + $0x11] ss:$2 sm:$0xff] %v12309_v14 }
 0xdd5   :  { %v12313_v15 = vpop.eup %12312  ;;  %12332 = vrcp.f32 %v9449_v5  ;;  %10497 = vst [vmem:[%s18602_s19 + $0x31] ss:$2 sm:$0xff] %v12311_v55 }
 0xdd6   :  { %v12315_v2 = vpop.eup %12314  ;;  %12334 = vrcp.f32 %v9450_v25  ;;  %10498 = vst [vmem:[%s18602_s19 + $0x51] ss:$2 sm:$0xff] %v12313_v15 }
 0xdd7   :  { %v12317_v39 = vpop.eup %12316  ;;  %12336 = vrcp.f32 %v9451_v57  ;;  %10499 = vst [vmem:[%s18602_s19 + $0x71] ss:$2 sm:$0xff] %v12315_v2 }
 0xdd8   :  { %v12319_v38 = vpop.eup %12318  ;;  %12338 = vrcp.f32 %v9452_v52  ;;  %10500 = vst [vmem:[%s18602_s19 + $0x91] ss:$2 sm:$0xff] %v12317_v39 }
 0xdd9   :  { %v12321_v51 = vpop.eup %12320  ;;  %10501 = vst [vmem:[%s18602_s19 + $0xb1] ss:$2 sm:$0xff] %v12319_v38 }
 0xdda   :  { %v12323_v3 = vpop.eup %12322  ;;  %10502 = vst [vmem:[%s18602_s19 + $0xd1] ss:$2 sm:$0xff] %v12321_v51 }
 0xddb   :  { %v12325_v54 = vpop.eup %12324  ;;  %10503 = vst [vmem:[%s18602_s19 + $0xf1] ss:$2 sm:$0xff] %v12323_v3 }
 0xddc   :  { %v12327_v0 = vpop.eup %12326  ;;  %10504 = vst [vmem:[%s18602_s19 + $0x111] ss:$2 sm:$0xff] %v12325_v54 }
 0xddd   :  { %v12329_v35 = vpop.eup %12328  ;;  %10505 = vst [vmem:[%s18602_s19 + $0x131] ss:$2 sm:$0xff] %v12327_v0 }
 0xdde   :  { %v12331_v30 = vpop.eup %12330  ;;  %10506 = vst [vmem:[%s18602_s19 + $0x151] ss:$2 sm:$0xff] %v12329_v35 }
 0xddf   :  { %v12333_v34 = vpop.eup %12332  ;;  %10507 = vst [vmem:[%s18602_s19 + $0x171] ss:$2 sm:$0xff] %v12331_v30 }
 0xde0   :  { %v12335_v16 = vpop.eup %12334  ;;  %10508 = vst [vmem:[%s18602_s19 + $0x191] ss:$2 sm:$0xff] %v12333_v34 }
 0xde1   :  { %v12337_v42 = vpop.eup %12336  ;;  %10509 = vst [vmem:[%s18602_s19 + $0x1b1] ss:$2 sm:$0xff] %v12335_v16 }
 0xde2   :  { %v12339_v18 = vpop.eup %12338  ;;  %10510 = vst [vmem:[%s18602_s19 + $0x1d1] ss:$2 sm:$0xff] %v12337_v42 }
 0xde3   :  { %10511 = vst [vmem:[%s18602_s19 + $0x1f1] ss:$2 sm:$0xff] %v12339_v18 }

</bundles_post_ra>
